<compile_context>
chip_gen: v6e
topology: v6e:2x2x1
jax: 0.10.0
libtpu: 0.0.40
codegen_flags: <defaults>
</compile_context>

<pallas_src>
import functools

import numpy as np
import jax
import jax.numpy as jnp
from jax import lax
from jax.experimental import pallas as pl
from jax.experimental.pallas import tpu as pltpu

# ----------------------------- configuration --------------------------------
VOCAB = 16        # vocab_dim
DIM = 32          # model dim
ATTEN_DIM = 8     # per-head attention dim
HEAD = 8          # MultiHeadAttention default
HIDE_DIM = 2048   # FeedForward default hide_dim
PAD_IDX = 0
POS_LEN = 100     # Transformer default (PE table is POS_LEN + 50 long)
RECYCLE = 1
LN_EPS = 1e-5
NEG_INF = -1e30   # large finite negative instead of -inf (no NaN on masked rows)

_MHA_KEYS = ("wq", "bq", "wk", "bk", "wv", "bv", "wo", "bo", "ln_g", "ln_b")


# --------------------------- in-kernel building blocks -----------------------
def _layer_norm(y, g, b):
    mean = jnp.mean(y, axis=-1, keepdims=True)
    var = jnp.mean((y - mean) ** 2, axis=-1, keepdims=True)
    return (y - mean) * lax.rsqrt(var + LN_EPS) * g + b


def _embed_block(emb, pe, g, b):
    # LayerNorm( emb * sqrt(D) + PE[:L] )
    return _layer_norm(emb * (DIM ** 0.5) + pe, g, b)


def _mha_block(x_q, x_kv, valid2, wq, bq, wk, bk, wv, bv, wo, bo, g, be):
    """Fused multi-head attention + residual + LayerNorm for one batch element.

    x_q:(Lq,D) f32, x_kv:(Lk,D) f32, valid2:(Lq,Lk) bool.
    Head axis is a dot_general batch dim throughout (no sub-128-lane slicing);
    weights are pre-reshaped per-head (H,D,d)/(H,d,D) bf16 at init time.
    """
    Lq = x_q.shape[0]
    Lk = x_kv.shape[0]
    xq = jnp.broadcast_to(x_q.astype(jnp.bfloat16), (HEAD, Lq, DIM))
    xk = jnp.broadcast_to(x_kv.astype(jnp.bfloat16), (HEAD, Lk, DIM))

    # 1/sqrt(atten_dim) is already folded into wq / bq.
    q = jnp.einsum('hld,hdk->hlk', xq, wq, preferred_element_type=jnp.float32) + bq
    k = jnp.einsum('hld,hdk->hlk', xk, wk, preferred_element_type=jnp.float32) + bk
    v = jnp.einsum('hld,hdk->hlk', xk, wv, preferred_element_type=jnp.float32) + bv

    s = jnp.einsum('hqd,hkd->hqk', q.astype(jnp.bfloat16), k.astype(jnp.bfloat16),
                   preferred_element_type=jnp.float32)          # (H, Lq, Lk)
    s = jnp.where(valid2[None, :, :], s, NEG_INF)
    s = s - jnp.max(s, axis=-1, keepdims=True)
    p = jnp.exp(s)
    p = p * pl.reciprocal(jnp.sum(p, axis=-1, keepdims=True), approx=True)

    o = jnp.einsum('hqk,hkd->hqd', p.astype(jnp.bfloat16), v.astype(jnp.bfloat16),
                   preferred_element_type=jnp.float32)          # (H, Lq, d)
    # Reference regroup 'm n l d -> m l (d n)' is baked into wo's (H, d, D) layout.
    y = jnp.einsum('hqd,hdk->hqk', o.astype(jnp.bfloat16), wo,
                   preferred_element_type=jnp.float32)          # (H, Lq, D)
    y = jnp.sum(y, axis=0) + bo + x_q                           # bias + residual
    return _layer_norm(y, g, be)


def _ffn_block(x, w1, b1, w2, b2, g, be):
    h = jnp.dot(x.astype(jnp.bfloat16), w1, preferred_element_type=jnp.float32) + b1
    h = jnp.maximum(h, 0.0)
    y = jnp.dot(h.astype(jnp.bfloat16), w2, preferred_element_type=jnp.float32) + b2
    return _layer_norm(y + x, g, be)


# ------------------------------ fused layer kernels --------------------------
def _encoder_layer_kernel(x_ref, pe_ref, eg_ref, eb_ref, kval_ref,
                          wq_ref, bq_ref, wk_ref, bk_ref, wv_ref, bv_ref,
                          wo_ref, bo_ref, ag_ref, ab_ref,
                          w1_ref, b1_ref, w2_ref, b2_ref, fg_ref, fb_ref,
                          o_ref, *, do_embed):
    x = x_ref[0]                                                 # (L, D)
    if do_embed:
        x = _embed_block(x, pe_ref[0], eg_ref[...], eb_ref[...])
    L = x.shape[0]
    valid2 = jnp.broadcast_to(kval_ref[0] != 0, (L, L))          # padding mask
    x = _mha_block(x, x, valid2,
                   wq_ref[...], bq_ref[...], wk_ref[...], bk_ref[...],
                   wv_ref[...], bv_ref[...], wo_ref[...], bo_ref[...],
                   ag_ref[...], ab_ref[...])
    o_ref[0] = _ffn_block(x, w1_ref[...], b1_ref[...], w2_ref[...], b2_ref[...],
                          fg_ref[...], fb_ref[...])


def _decoder_layer_kernel(y_ref, pe_ref, eg_ref, eb_ref, enc_ref, sval_ref, cval_ref,
                          q1_ref, qb1_ref, k1_ref, kb1_ref, v1_ref, vb1_ref,
                          o1_ref, ob1_ref, g1_ref, n1_ref,
                          q2_ref, qb2_ref, k2_ref, kb2_ref, v2_ref, vb2_ref,
                          o2_ref, ob2_ref, g2_ref, n2_ref,
                          w1_ref, b1_ref, w2_ref, b2_ref, fg_ref, fb_ref,
                          fcw_ref, fcb_ref,
                          out_ref, *, do_embed, do_final):
    y = y_ref[0]                                                 # (Lq, D)
    if do_embed:
        y = _embed_block(y, pe_ref[0], eg_ref[...], eb_ref[...])
    Lq = y.shape[0]
    enc = enc_ref[0]                                             # (Lk, D)
    Lk = enc.shape[0]

    # masked self attention: padding-valid row & causal mask built in-kernel
    svalid = jnp.broadcast_to(sval_ref[0] != 0, (Lq, Lq))
    row = lax.broadcasted_iota(jnp.int32, (Lq, Lq), 0)
    col = lax.broadcasted_iota(jnp.int32, (Lq, Lq), 1)
    svalid = svalid & (row >= col)
    y = _mha_block(y, y, svalid,
                   q1_ref[...], qb1_ref[...], k1_ref[...], kb1_ref[...],
                   v1_ref[...], vb1_ref[...], o1_ref[...], ob1_ref[...],
                   g1_ref[...], n1_ref[...])

    # cross attention against the encoder output
    cvalid = jnp.broadcast_to(cval_ref[0] != 0, (Lq, Lk))
    y = _mha_block(y, enc, cvalid,
                   q2_ref[...], qb2_ref[...], k2_ref[...], kb2_ref[...],
                   v2_ref[...], vb2_ref[...], o2_ref[...], ob2_ref[...],
                   g2_ref[...], n2_ref[...])

    y = _ffn_block(y, w1_ref[...], b1_ref[...], w2_ref[...], b2_ref[...],
                   fg_ref[...], fb_ref[...])

    if do_final:   # fused tied output projection (logits)
        out_ref[0] = (jnp.dot(y.astype(jnp.bfloat16), fcw_ref[...],
                              preferred_element_type=jnp.float32) + fcb_ref[...])
    else:
        out_ref[0] = y


# ------------------------------ pallas_call wrappers --------------------------
def _const_spec(arr):
    nd = arr.ndim
    return pl.BlockSpec(arr.shape, lambda b, _n=nd: (0,) * _n)


def _batch_spec(shape):
    nd = len(shape)
    return pl.BlockSpec((1,) + tuple(shape[1:]),
                        lambda b, _n=nd - 1: (b,) + (0,) * _n)


def encoder_layer(params, layer, x, kvalid, *, do_embed):
    B, L, D = x.shape
    m, f = layer["mha"], layer["ff"]
    consts = [m[k] for k in _MHA_KEYS] + \
             [f["w1"], f["b1"], f["w2"], f["b2"], f["ln_g"], f["ln_b"]]
    kern = functools.partial(_encoder_layer_kernel, do_embed=do_embed)
    return pl.pallas_call(
        kern,
        out_shape=jax.ShapeDtypeStruct((B, L, D), jnp.float32),
        grid=(B,),
        in_specs=[_batch_spec(x.shape),
                  pl.BlockSpec((1, L, D), lambda b: (0, 0, 0)),     # PE[:, :L]
                  _const_spec(params["norm_g"]), _const_spec(params["norm_b"]),
                  _batch_spec(kvalid.shape)]
                 + [_const_spec(a) for a in consts],
        out_specs=_batch_spec((B, L, D)),
        compiler_params=pltpu.CompilerParams(dimension_semantics=("parallel",)),
    )(x, params["PE"], params["norm_g"], params["norm_b"], kvalid, *consts)


def decoder_layer(params, layer, y, enc, svalid, cvalid, *, do_embed, do_final):
    B, Lq, D = y.shape
    m1, m2, f = layer["mha1"], layer["mha2"], layer["ff"]
    consts = [m1[k] for k in _MHA_KEYS] + [m2[k] for k in _MHA_KEYS] + \
             [f["w1"], f["b1"], f["w2"], f["b2"], f["ln_g"], f["ln_b"],
              params["fc_wt"], params["fc_b"]]
    out_dim = VOCAB if do_final else D
    kern = functools.partial(_decoder_layer_kernel,
                             do_embed=do_embed, do_final=do_final)
    return pl.pallas_call(
        kern,
        out_shape=jax.ShapeDtypeStruct((B, Lq, out_dim), jnp.float32),
        grid=(B,),
        in_specs=[_batch_spec(y.shape),
                  pl.BlockSpec((1, Lq, D), lambda b: (0, 0, 0)),    # PE[:, :Lq]
                  _const_spec(params["norm_g"]), _const_spec(params["norm_b"]),
                  _batch_spec(enc.shape),
                  _batch_spec(svalid.shape), _batch_spec(cvalid.shape)]
                 + [_const_spec(a) for a in consts],
        out_specs=_batch_spec((B, Lq, out_dim)),
        compiler_params=pltpu.CompilerParams(dimension_semantics=("parallel",)),
    )(y, params["PE"], params["norm_g"], params["norm_b"], enc,
      svalid, cvalid, *consts)


# ------------------------------ model forward --------------------------------
def transformer_forward(params, inputs, outputs):
    # tiny (B,1,L) int32 padding-valid rows; causal mask built inside the kernel
    kvalid_in = (inputs != PAD_IDX).astype(jnp.int32)[:, None, :]
    kvalid_out = (outputs != PAD_IDX).astype(jnp.int32)[:, None, :]

    # TODO(synk): embedding-table gather stays in plain-JAX glue (tiny lookup).
    enc = jnp.take(params["emb_w"], inputs, axis=0)            # (B, Lin, D)
    for li, layer in enumerate(params["encoder"]):
        enc = encoder_layer(params, layer, enc, kvalid_in, do_embed=(li == 0))

    dec = jnp.take(params["emb_w"], outputs, axis=0)           # (B, Lout, D)
    n_dec = len(params["decoder"])
    for li, layer in enumerate(params["decoder"]):
        dec = decoder_layer(params, layer, dec, enc, kvalid_out, kvalid_in,
                            do_embed=(li == 0), do_final=(li == n_dec - 1))
    return dec                                                 # (B, Lout, VOCAB)


# ------------------------------ parameter init -------------------------------
def init_linear(key, din, dout):
    k1, k2 = jax.random.split(key)
    bound = 1.0 / (din ** 0.5)
    w = jax.random.uniform(k1, (din, dout), jnp.float32, -bound, bound)  # transposed
    b = jax.random.uniform(k2, (dout,), jnp.float32, -bound, bound)
    return w, b


def init_mha(key):
    ks = jax.random.split(key, 4)
    wq, bq = init_linear(ks[0], DIM, HEAD * ATTEN_DIM)
    wk, bk = init_linear(ks[1], DIM, HEAD * ATTEN_DIM)
    wv, bv = init_linear(ks[2], DIM, HEAD * ATTEN_DIM)
    wo, bo = init_linear(ks[3], HEAD * ATTEN_DIM, DIM)
    scale = ATTEN_DIM ** (-0.5)

    def per_head_w(w):   # (D, H*d) with col = n*d + dd  ->  (H, D, d)
        return jnp.transpose(w.reshape(DIM, HEAD, ATTEN_DIM), (1, 0, 2))

    def per_head_b(b):   # (H*d,) -> (H, 1, d)
        return b.reshape(HEAD, 1, ATTEN_DIM)

    # Reference regroups 'm n l d -> m l (d n)' before fc: fc input row = d*H + n.
    # Pre-reshape wo so the kernel does  sum_h sum_d o[h,q,d] * wo3[h,d,:].
    wo3 = jnp.transpose(wo.reshape(ATTEN_DIM, HEAD, DIM), (1, 0, 2))  # (H, d, D)

    return dict(
        wq=(per_head_w(wq) * scale).astype(jnp.bfloat16),   # scale folded in
        bq=per_head_b(bq) * scale,
        wk=per_head_w(wk).astype(jnp.bfloat16), bk=per_head_b(bk),
        wv=per_head_w(wv).astype(jnp.bfloat16), bv=per_head_b(bv),
        wo=wo3.astype(jnp.bfloat16), bo=bo.reshape(1, DIM),
        ln_g=jnp.ones((1, DIM), jnp.float32),
        ln_b=jnp.zeros((1, DIM), jnp.float32),
    )


def init_ff(key):
    k1, k2 = jax.random.split(key)
    w1, b1 = init_linear(k1, DIM, HIDE_DIM)
    w2, b2 = init_linear(k2, HIDE_DIM, DIM)
    return dict(w1=w1.astype(jnp.bfloat16), b1=b1.reshape(1, -1),
                w2=w2.astype(jnp.bfloat16), b2=b2.reshape(1, -1),
                ln_g=jnp.ones((1, DIM), jnp.float32),
                ln_b=jnp.zeros((1, DIM), jnp.float32))


def make_positional_encoding(dim, pos_len):
    pos = np.arange(pos_len, dtype=np.float64)[:, None]
    i = np.arange(dim)[None, :]
    angle = pos / (10000.0 ** ((i // 2) / dim))
    pe = np.empty((pos_len, dim), np.float64)
    pe[:, 0::2] = np.sin(angle[:, 0::2])
    pe[:, 1::2] = np.cos(angle[:, 1::2])
    return jnp.asarray(pe[None], dtype=jnp.float32)  # (1, pos_len, dim)


def init_params(key):
    keys = jax.random.split(key, 8)
    emb_w = jax.random.normal(keys[0], (VOCAB, DIM), jnp.float32)
    emb_w = emb_w.at[PAD_IDX].set(0.0)               # padding_idx row zeroed
    fc_b = jax.random.uniform(keys[1], (VOCAB,), jnp.float32,
                              -1.0 / DIM ** 0.5, 1.0 / DIM ** 0.5)
    encoder = []
    decoder = []
    for r in range(RECYCLE):
        ek = jax.random.split(keys[2 + r % 3], 2)
        encoder.append(dict(mha=init_mha(ek[0]), ff=init_ff(ek[1])))
        dk = jax.random.split(keys[5 + r % 3], 3)
        decoder.append(dict(mha1=init_mha(dk[0]), mha2=init_mha(dk[1]),
                            ff=init_ff(dk[2])))
    return dict(
        emb_w=emb_w,
        fc_wt=jnp.asarray(emb_w.T).astype(jnp.bfloat16),   # tied weight, bf16 for MXU
        fc_b=fc_b.reshape(1, -1),
        PE=make_positional_encoding(DIM, POS_LEN + 50),
        norm_g=jnp.ones((1, DIM), jnp.float32),
        norm_b=jnp.zeros((1, DIM), jnp.float32),
        encoder=encoder,
        decoder=decoder,
    )


# ---------------------------------- main -------------------------------------
if __name__ == "__main__":
    key = jax.random.PRNGKey(0)
    kp, ki, ko = jax.random.split(key, 3)

    params = init_params(kp)

    B, L_IN, L_OUT = 2, 8, 8
    # token ids in [1, VOCAB) so no fully-padded rows
    inputs = jax.random.randint(ki, (B, L_IN), 1, VOCAB, dtype=jnp.int32)
    outputs = jax.random.randint(ko, (B, L_OUT), 1, VOCAB, dtype=jnp.int32)

    forward = jax.jit(transformer_forward)
    logits = forward(params, inputs, outputs)
    logits = jax.block_until_ready(logits)

    assert logits.shape == (B, L_OUT, VOCAB), logits.shape
    assert bool(jnp.all(jnp.isfinite(logits)))
    # TODO(synk): dropout layers are treated as inference-mode identity;
    # the beam-search `translate` method is not part of forward() and is omitted.
    print("KERNEL_OK")
</pallas_src>

<mosaic_0001>
module attributes {stable_mosaic.version = 11 : i64} {
  func.func @_encoder_layer_kernel(%arg0: i32, %arg1: memref<1x8x32xf32, #tpu.memory_space<vmem>>, %arg2: memref<1x8x32xf32, #tpu.memory_space<vmem>>, %arg3: memref<1x32xf32, #tpu.memory_space<vmem>>, %arg4: memref<1x32xf32, #tpu.memory_space<vmem>>, %arg5: memref<1x1x8xi32, #tpu.memory_space<vmem>>, %arg6: memref<8x32x8xbf16, #tpu.memory_space<vmem>>, %arg7: memref<8x1x8xf32, #tpu.memory_space<vmem>>, %arg8: memref<8x32x8xbf16, #tpu.memory_space<vmem>>, %arg9: memref<8x1x8xf32, #tpu.memory_space<vmem>>, %arg10: memref<8x32x8xbf16, #tpu.memory_space<vmem>>, %arg11: memref<8x1x8xf32, #tpu.memory_space<vmem>>, %arg12: memref<8x8x32xbf16, #tpu.memory_space<vmem>>, %arg13: memref<1x32xf32, #tpu.memory_space<vmem>>, %arg14: memref<1x32xf32, #tpu.memory_space<vmem>>, %arg15: memref<1x32xf32, #tpu.memory_space<vmem>>, %arg16: memref<32x2048xbf16, #tpu.memory_space<vmem>>, %arg17: memref<1x2048xf32, #tpu.memory_space<vmem>>, %arg18: memref<2048x32xbf16, #tpu.memory_space<vmem>>, %arg19: memref<1x32xf32, #tpu.memory_space<vmem>>, %arg20: memref<1x32xf32, #tpu.memory_space<vmem>>, %arg21: memref<1x32xf32, #tpu.memory_space<vmem>>, %arg22: memref<1x8x32xf32, #tpu.memory_space<vmem>>) attributes {dimension_semantics = [#tpu.dimension_semantics<parallel>], iteration_bounds = array<i64: 2>, scalar_prefetch = 0 : i64, scratch_operands = 0 : i64, tpu.core_type = #tpu.core_type<tc>, window_params = [{transform_indices = @transform_0, window_bounds = array<i64: 1, 8, 32>}, {transform_indices = @transform_1, window_bounds = array<i64: 1, 8, 32>}, {pipeline_mode = #tpu.pipeline_mode<synchronous>, transform_indices = @transform_2, window_bounds = array<i64: 1, 32>}, {pipeline_mode = #tpu.pipeline_mode<synchronous>, transform_indices = @transform_3, window_bounds = array<i64: 1, 32>}, {transform_indices = @transform_4, window_bounds = array<i64: 1, 1, 8>}, {pipeline_mode = #tpu.pipeline_mode<synchronous>, transform_indices = @transform_5, window_bounds = array<i64: 8, 32, 8>}, {pipeline_mode = #tpu.pipeline_mode<synchronous>, transform_indices = @transform_6, window_bounds = array<i64: 8, 1, 8>}, {pipeline_mode = #tpu.pipeline_mode<synchronous>, transform_indices = @transform_7, window_bounds = array<i64: 8, 32, 8>}, {pipeline_mode = #tpu.pipeline_mode<synchronous>, transform_indices = @transform_8, window_bounds = array<i64: 8, 1, 8>}, {pipeline_mode = #tpu.pipeline_mode<synchronous>, transform_indices = @transform_9, window_bounds = array<i64: 8, 32, 8>}, {pipeline_mode = #tpu.pipeline_mode<synchronous>, transform_indices = @transform_10, window_bounds = array<i64: 8, 1, 8>}, {pipeline_mode = #tpu.pipeline_mode<synchronous>, transform_indices = @transform_11, window_bounds = array<i64: 8, 8, 32>}, {pipeline_mode = #tpu.pipeline_mode<synchronous>, transform_indices = @transform_12, window_bounds = array<i64: 1, 32>}, {pipeline_mode = #tpu.pipeline_mode<synchronous>, transform_indices = @transform_13, window_bounds = array<i64: 1, 32>}, {pipeline_mode = #tpu.pipeline_mode<synchronous>, transform_indices = @transform_14, window_bounds = array<i64: 1, 32>}, {pipeline_mode = #tpu.pipeline_mode<synchronous>, transform_indices = @transform_15, window_bounds = array<i64: 32, 2048>}, {pipeline_mode = #tpu.pipeline_mode<synchronous>, transform_indices = @transform_16, window_bounds = array<i64: 1, 2048>}, {pipeline_mode = #tpu.pipeline_mode<synchronous>, transform_indices = @transform_17, window_bounds = array<i64: 2048, 32>}, {pipeline_mode = #tpu.pipeline_mode<synchronous>, transform_indices = @transform_18, window_bounds = array<i64: 1, 32>}, {pipeline_mode = #tpu.pipeline_mode<synchronous>, transform_indices = @transform_19, window_bounds = array<i64: 1, 32>}, {pipeline_mode = #tpu.pipeline_mode<synchronous>, transform_indices = @transform_20, window_bounds = array<i64: 1, 32>}, {transform_indices = @transform_21, window_bounds = array<i64: 1, 8, 32>}]} {
    %c0 = arith.constant 0 : index
    %c0_0 = arith.constant 0 : index
    %c0_1 = arith.constant 0 : index
    %0 = vector.load %arg1[%c0, %c0_0, %c0_1] : memref<1x8x32xf32, #tpu.memory_space<vmem>>, vector<1x8x32xf32>
    %1 = vector.shape_cast %0 : vector<1x8x32xf32> to vector<8x32xf32>
    %c0_2 = arith.constant 0 : index
    %c0_3 = arith.constant 0 : index
    %c0_4 = arith.constant 0 : index
    %2 = vector.load %arg2[%c0_2, %c0_3, %c0_4] : memref<1x8x32xf32, #tpu.memory_space<vmem>>, vector<1x8x32xf32>
    %3 = vector.shape_cast %2 : vector<1x8x32xf32> to vector<8x32xf32>
    %c0_5 = arith.constant 0 : index
    %c0_6 = arith.constant 0 : index
    %4 = vector.load %arg3[%c0_5, %c0_6] : memref<1x32xf32, #tpu.memory_space<vmem>>, vector<1x32xf32>
    %c0_7 = arith.constant 0 : index
    %c0_8 = arith.constant 0 : index
    %5 = vector.load %arg4[%c0_7, %c0_8] : memref<1x32xf32, #tpu.memory_space<vmem>>, vector<1x32xf32>
    %cst = arith.constant 5.65685415 : f32
    %6 = vector.broadcast %cst : f32 to vector<8x32xf32>
    %7 = arith.mulf %1, %6 : vector<8x32xf32>
    %8 = arith.addf %7, %3 : vector<8x32xf32>
    %cst_9 = arith.constant dense<0.000000e+00> : vector<8xf32>
    %9 = vector.multi_reduction <add>, %8, %cst_9 [1] : vector<8x32xf32> to vector<8xf32>
    %10 = vector.shape_cast %9 : vector<8xf32> to vector<8x1xf32>
    %cst_10 = arith.constant 3.200000e+01 : f32
    %11 = vector.broadcast %cst_10 : f32 to vector<8x1xf32>
    %12 = arith.divf %10, %11 : vector<8x1xf32>
    %13 = vector.broadcast %12 : vector<8x1xf32> to vector<8x32xf32>
    %14 = arith.subf %8, %13 : vector<8x32xf32>
    %15 = arith.mulf %14, %14 : vector<8x32xf32>
    %cst_11 = arith.constant dense<0.000000e+00> : vector<8xf32>
    %16 = vector.multi_reduction <add>, %15, %cst_11 [1] : vector<8x32xf32> to vector<8xf32>
    %17 = vector.shape_cast %16 : vector<8xf32> to vector<8x1xf32>
    %cst_12 = arith.constant 3.200000e+01 : f32
    %18 = vector.broadcast %cst_12 : f32 to vector<8x1xf32>
    %19 = arith.divf %17, %18 : vector<8x1xf32>
    %20 = vector.broadcast %12 : vector<8x1xf32> to vector<8x32xf32>
    %21 = arith.subf %8, %20 : vector<8x32xf32>
    %cst_13 = arith.constant 9.99999974E-6 : f32
    %22 = vector.broadcast %cst_13 : f32 to vector<8x1xf32>
    %23 = arith.addf %19, %22 : vector<8x1xf32>
    %24 = math.rsqrt %23 : vector<8x1xf32>
    %25 = vector.broadcast %24 : vector<8x1xf32> to vector<8x32xf32>
    %26 = arith.mulf %21, %25 : vector<8x32xf32>
    %27 = vector.broadcast %4 : vector<1x32xf32> to vector<8x32xf32>
    %28 = arith.mulf %26, %27 : vector<8x32xf32>
    %29 = vector.broadcast %5 : vector<1x32xf32> to vector<8x32xf32>
    %30 = arith.addf %28, %29 : vector<8x32xf32>
    %c0_14 = arith.constant 0 : index
    %c0_15 = arith.constant 0 : index
    %c0_16 = arith.constant 0 : index
    %31 = vector.load %arg5[%c0_14, %c0_15, %c0_16] : memref<1x1x8xi32, #tpu.memory_space<vmem>>, vector<1x1x8xi32>
    %32 = vector.shape_cast %31 : vector<1x1x8xi32> to vector<1x8xi32>
    %c0_i32 = arith.constant 0 : i32
    %33 = vector.broadcast %c0_i32 : i32 to vector<1x8xi32>
    %34 = arith.cmpi ne, %32, %33 : vector<1x8xi32>
    %35 = vector.shape_cast %34 : vector<1x8xi1> to vector<1x8xi1>
    %36 = vector.broadcast %35 : vector<1x8xi1> to vector<8x8xi1>
    %c0_17 = arith.constant 0 : index
    %c0_18 = arith.constant 0 : index
    %c0_19 = arith.constant 0 : index
    %37 = vector.load %arg6[%c0_17, %c0_18, %c0_19] : memref<8x32x8xbf16, #tpu.memory_space<vmem>>, vector<8x32x8xbf16>
    %c0_20 = arith.constant 0 : index
    %c0_21 = arith.constant 0 : index
    %c0_22 = arith.constant 0 : index
    %38 = vector.load %arg7[%c0_20, %c0_21, %c0_22] : memref<8x1x8xf32, #tpu.memory_space<vmem>>, vector<8x1x8xf32>
    %c0_23 = arith.constant 0 : index
    %c0_24 = arith.constant 0 : index
    %c0_25 = arith.constant 0 : index
    %39 = vector.load %arg8[%c0_23, %c0_24, %c0_25] : memref<8x32x8xbf16, #tpu.memory_space<vmem>>, vector<8x32x8xbf16>
    %c0_26 = arith.constant 0 : index
    %c0_27 = arith.constant 0 : index
    %c0_28 = arith.constant 0 : index
    %40 = vector.load %arg9[%c0_26, %c0_27, %c0_28] : memref<8x1x8xf32, #tpu.memory_space<vmem>>, vector<8x1x8xf32>
    %c0_29 = arith.constant 0 : index
    %c0_30 = arith.constant 0 : index
    %c0_31 = arith.constant 0 : index
    %41 = vector.load %arg10[%c0_29, %c0_30, %c0_31] : memref<8x32x8xbf16, #tpu.memory_space<vmem>>, vector<8x32x8xbf16>
    %c0_32 = arith.constant 0 : index
    %c0_33 = arith.constant 0 : index
    %c0_34 = arith.constant 0 : index
    %42 = vector.load %arg11[%c0_32, %c0_33, %c0_34] : memref<8x1x8xf32, #tpu.memory_space<vmem>>, vector<8x1x8xf32>
    %c0_35 = arith.constant 0 : index
    %c0_36 = arith.constant 0 : index
    %c0_37 = arith.constant 0 : index
    %43 = vector.load %arg12[%c0_35, %c0_36, %c0_37] : memref<8x8x32xbf16, #tpu.memory_space<vmem>>, vector<8x8x32xbf16>
    %c0_38 = arith.constant 0 : index
    %c0_39 = arith.constant 0 : index
    %44 = vector.load %arg13[%c0_38, %c0_39] : memref<1x32xf32, #tpu.memory_space<vmem>>, vector<1x32xf32>
    %c0_40 = arith.constant 0 : index
    %c0_41 = arith.constant 0 : index
    %45 = vector.load %arg14[%c0_40, %c0_41] : memref<1x32xf32, #tpu.memory_space<vmem>>, vector<1x32xf32>
    %c0_42 = arith.constant 0 : index
    %c0_43 = arith.constant 0 : index
    %46 = vector.load %arg15[%c0_42, %c0_43] : memref<1x32xf32, #tpu.memory_space<vmem>>, vector<1x32xf32>
    %47 = arith.truncf %30 : vector<8x32xf32> to vector<8x32xbf16>
    %48 = vector.shape_cast %47 : vector<8x32xbf16> to vector<1x8x32xbf16>
    %49 = vector.broadcast %48 : vector<1x8x32xbf16> to vector<8x8x32xbf16>
    %50 = arith.truncf %30 : vector<8x32xf32> to vector<8x32xbf16>
    %51 = vector.shape_cast %50 : vector<8x32xbf16> to vector<1x8x32xbf16>
    %52 = vector.broadcast %51 : vector<1x8x32xbf16> to vector<8x8x32xbf16>
    "tpu.trace_start"() <{level = 10 : i32, message = "hld,hdk->hlk"}> : () -> ()
    %cst_44 = arith.constant dense<0.000000e+00> : vector<8x8x8xf32>
    %53 = tpu.matmul %49, %37, %cst_44 {dimension_numbers = #tpu.dot_dimension_numbers<[2], [1], [1], [2], [0, 0, 0, 1, 1, 2], [0], [0]>} : vector<8x8x32xbf16>, vector<8x32x8xbf16>, vector<8x8x8xf32> -> vector<8x8x8xf32>
    "tpu.trace_stop"() : () -> ()
    %54 = vector.broadcast %38 : vector<8x1x8xf32> to vector<8x8x8xf32>
    %55 = arith.addf %53, %54 : vector<8x8x8xf32>
    "tpu.trace_start"() <{level = 10 : i32, message = "hld,hdk->hlk"}> : () -> ()
    %cst_45 = arith.constant dense<0.000000e+00> : vector<8x8x8xf32>
    %56 = tpu.matmul %52, %39, %cst_45 {dimension_numbers = #tpu.dot_dimension_numbers<[2], [1], [1], [2], [0, 0, 0, 1, 1, 2], [0], [0]>} : vector<8x8x32xbf16>, vector<8x32x8xbf16>, vector<8x8x8xf32> -> vector<8x8x8xf32>
    "tpu.trace_stop"() : () -> ()
    %57 = vector.broadcast %40 : vector<8x1x8xf32> to vector<8x8x8xf32>
    %58 = arith.addf %56, %57 : vector<8x8x8xf32>
    "tpu.trace_start"() <{level = 10 : i32, message = "hld,hdk->hlk"}> : () -> ()
    %cst_46 = arith.constant dense<0.000000e+00> : vector<8x8x8xf32>
    %59 = tpu.matmul %52, %41, %cst_46 {dimension_numbers = #tpu.dot_dimension_numbers<[2], [1], [1], [2], [0, 0, 0, 1, 1, 2], [0], [0]>} : vector<8x8x32xbf16>, vector<8x32x8xbf16>, vector<8x8x8xf32> -> vector<8x8x8xf32>
    "tpu.trace_stop"() : () -> ()
    %60 = vector.broadcast %42 : vector<8x1x8xf32> to vector<8x8x8xf32>
    %61 = arith.addf %59, %60 : vector<8x8x8xf32>
    %62 = arith.truncf %55 : vector<8x8x8xf32> to vector<8x8x8xbf16>
    %63 = arith.truncf %58 : vector<8x8x8xf32> to vector<8x8x8xbf16>
    "tpu.trace_start"() <{level = 10 : i32, message = "hqd,hkd->hqk"}> : () -> ()
    %cst_47 = arith.constant dense<0.000000e+00> : vector<8x8x8xf32>
    %64 = tpu.matmul %62, %63, %cst_47 {dimension_numbers = #tpu.dot_dimension_numbers<[2], [2], [1], [1], [0, 0, 0, 1, 1, 1], [0], [0]>} : vector<8x8x8xbf16>, vector<8x8x8xbf16>, vector<8x8x8xf32> -> vector<8x8x8xf32>
    "tpu.trace_stop"() : () -> ()
    %65 = vector.shape_cast %36 : vector<8x8xi1> to vector<1x8x8xi1>
    %cst_48 = arith.constant -1.000000e+30 : f32
    %66 = vector.shape_cast %65 : vector<1x8x8xi1> to vector<1x8x8xi1>
    %67 = vector.broadcast %66 : vector<1x8x8xi1> to vector<8x8x8xi1>
    %68 = vector.broadcast %cst_48 : f32 to vector<8x8x8xf32>
    %69 = arith.select %67, %64, %68 : vector<8x8x8xi1>, vector<8x8x8xf32>
    %cst_49 = arith.constant dense<0xFF800000> : vector<8x8xf32>
    %70 = vector.multi_reduction <maximumf>, %69, %cst_49 [2] : vector<8x8x8xf32> to vector<8x8xf32>
    %71 = vector.shape_cast %70 : vector<8x8xf32> to vector<8x8x1xf32>
    %72 = vector.broadcast %71 : vector<8x8x1xf32> to vector<8x8x8xf32>
    %73 = arith.subf %69, %72 : vector<8x8x8xf32>
    %74 = math.exp %73 : vector<8x8x8xf32>
    %cst_50 = arith.constant dense<0.000000e+00> : vector<8x8xf32>
    %75 = vector.multi_reduction <add>, %74, %cst_50 [2] : vector<8x8x8xf32> to vector<8x8xf32>
    %76 = vector.shape_cast %75 : vector<8x8xf32> to vector<8x8x1xf32>
    %77 = tpu.reciprocal %76 {approx = true} : vector<8x8x1xf32> -> vector<8x8x1xf32>
    %78 = vector.broadcast %77 : vector<8x8x1xf32> to vector<8x8x8xf32>
    %79 = arith.mulf %74, %78 : vector<8x8x8xf32>
    %80 = arith.truncf %79 : vector<8x8x8xf32> to vector<8x8x8xbf16>
    %81 = arith.truncf %61 : vector<8x8x8xf32> to vector<8x8x8xbf16>
    "tpu.trace_start"() <{level = 10 : i32, message = "hqk,hkd->hqd"}> : () -> ()
    %cst_51 = arith.constant dense<0.000000e+00> : vector<8x8x8xf32>
    %82 = tpu.matmul %80, %81, %cst_51 {dimension_numbers = #tpu.dot_dimension_numbers<[2], [1], [1], [2], [0, 0, 0, 1, 1, 2], [0], [0]>} : vector<8x8x8xbf16>, vector<8x8x8xbf16>, vector<8x8x8xf32> -> vector<8x8x8xf32>
    "tpu.trace_stop"() : () -> ()
    %83 = arith.truncf %82 : vector<8x8x8xf32> to vector<8x8x8xbf16>
    "tpu.trace_start"() <{level = 10 : i32, message = "hqd,hdk->hqk"}> : () -> ()
    %cst_52 = arith.constant dense<0.000000e+00> : vector<8x8x32xf32>
    %84 = tpu.matmul %83, %43, %cst_52 {dimension_numbers = #tpu.dot_dimension_numbers<[2], [1], [1], [2], [0, 0, 0, 1, 1, 2], [0], [0]>} : vector<8x8x8xbf16>, vector<8x8x32xbf16>, vector<8x8x32xf32> -> vector<8x8x32xf32>
    "tpu.trace_stop"() : () -> ()
    %cst_53 = arith.constant dense<0.000000e+00> : vector<8x32xf32>
    %85 = vector.multi_reduction <add>, %84, %cst_53 [0] : vector<8x8x32xf32> to vector<8x32xf32>
    %86 = vector.broadcast %44 : vector<1x32xf32> to vector<8x32xf32>
    %87 = arith.addf %85, %86 : vector<8x32xf32>
    %88 = arith.addf %87, %30 : vector<8x32xf32>
    %cst_54 = arith.constant dense<0.000000e+00> : vector<8xf32>
    %89 = vector.multi_reduction <add>, %88, %cst_54 [1] : vector<8x32xf32> to vector<8xf32>
    %90 = vector.shape_cast %89 : vector<8xf32> to vector<8x1xf32>
    %cst_55 = arith.constant 3.200000e+01 : f32
    %91 = vector.broadcast %cst_55 : f32 to vector<8x1xf32>
    %92 = arith.divf %90, %91 : vector<8x1xf32>
    %93 = vector.broadcast %92 : vector<8x1xf32> to vector<8x32xf32>
    %94 = arith.subf %88, %93 : vector<8x32xf32>
    %95 = arith.mulf %94, %94 : vector<8x32xf32>
    %cst_56 = arith.constant dense<0.000000e+00> : vector<8xf32>
    %96 = vector.multi_reduction <add>, %95, %cst_56 [1] : vector<8x32xf32> to vector<8xf32>
    %97 = vector.shape_cast %96 : vector<8xf32> to vector<8x1xf32>
    %cst_57 = arith.constant 3.200000e+01 : f32
    %98 = vector.broadcast %cst_57 : f32 to vector<8x1xf32>
    %99 = arith.divf %97, %98 : vector<8x1xf32>
    %100 = vector.broadcast %92 : vector<8x1xf32> to vector<8x32xf32>
    %101 = arith.subf %88, %100 : vector<8x32xf32>
    %cst_58 = arith.constant 9.99999974E-6 : f32
    %102 = vector.broadcast %cst_58 : f32 to vector<8x1xf32>
    %103 = arith.addf %99, %102 : vector<8x1xf32>
    %104 = math.rsqrt %103 : vector<8x1xf32>
    %105 = vector.broadcast %104 : vector<8x1xf32> to vector<8x32xf32>
    %106 = arith.mulf %101, %105 : vector<8x32xf32>
    %107 = vector.broadcast %45 : vector<1x32xf32> to vector<8x32xf32>
    %108 = arith.mulf %106, %107 : vector<8x32xf32>
    %109 = vector.broadcast %46 : vector<1x32xf32> to vector<8x32xf32>
    %110 = arith.addf %108, %109 : vector<8x32xf32>
    %c0_59 = arith.constant 0 : index
    %c0_60 = arith.constant 0 : index
    %111 = vector.load %arg16[%c0_59, %c0_60] : memref<32x2048xbf16, #tpu.memory_space<vmem>>, vector<32x2048xbf16>
    %c0_61 = arith.constant 0 : index
    %c0_62 = arith.constant 0 : index
    %112 = vector.load %arg17[%c0_61, %c0_62] : memref<1x2048xf32, #tpu.memory_space<vmem>>, vector<1x2048xf32>
    %c0_63 = arith.constant 0 : index
    %c0_64 = arith.constant 0 : index
    %113 = vector.load %arg18[%c0_63, %c0_64] : memref<2048x32xbf16, #tpu.memory_space<vmem>>, vector<2048x32xbf16>
    %c0_65 = arith.constant 0 : index
    %c0_66 = arith.constant 0 : index
    %114 = vector.load %arg19[%c0_65, %c0_66] : memref<1x32xf32, #tpu.memory_space<vmem>>, vector<1x32xf32>
    %c0_67 = arith.constant 0 : index
    %c0_68 = arith.constant 0 : index
    %115 = vector.load %arg20[%c0_67, %c0_68] : memref<1x32xf32, #tpu.memory_space<vmem>>, vector<1x32xf32>
    %c0_69 = arith.constant 0 : index
    %c0_70 = arith.constant 0 : index
    %116 = vector.load %arg21[%c0_69, %c0_70] : memref<1x32xf32, #tpu.memory_space<vmem>>, vector<1x32xf32>
    %117 = arith.truncf %110 : vector<8x32xf32> to vector<8x32xbf16>
    %cst_71 = arith.constant dense<0.000000e+00> : vector<8x2048xf32>
    %118 = tpu.matmul %117, %111, %cst_71 {dimension_numbers = #tpu.dot_dimension_numbers<[1], [0], [0], [1], [0, 0, 1, 1], [], []>} : vector<8x32xbf16>, vector<32x2048xbf16>, vector<8x2048xf32> -> vector<8x2048xf32>
    %119 = vector.broadcast %112 : vector<1x2048xf32> to vector<8x2048xf32>
    %120 = arith.addf %118, %119 : vector<8x2048xf32>
    %cst_72 = arith.constant 0.000000e+00 : f32
    %121 = vector.broadcast %cst_72 : f32 to vector<8x2048xf32>
    %122 = arith.maximumf %120, %121 : vector<8x2048xf32>
    %123 = arith.truncf %122 : vector<8x2048xf32> to vector<8x2048xbf16>
    %cst_73 = arith.constant dense<0.000000e+00> : vector<8x32xf32>
    %124 = tpu.matmul %123, %113, %cst_73 {dimension_numbers = #tpu.dot_dimension_numbers<[1], [0], [0], [1], [0, 0, 1, 1], [], []>} : vector<8x2048xbf16>, vector<2048x32xbf16>, vector<8x32xf32> -> vector<8x32xf32>
    %125 = vector.broadcast %114 : vector<1x32xf32> to vector<8x32xf32>
    %126 = arith.addf %124, %125 : vector<8x32xf32>
    %127 = arith.addf %126, %110 : vector<8x32xf32>
    %cst_74 = arith.constant dense<0.000000e+00> : vector<8xf32>
    %128 = vector.multi_reduction <add>, %127, %cst_74 [1] : vector<8x32xf32> to vector<8xf32>
    %129 = vector.shape_cast %128 : vector<8xf32> to vector<8x1xf32>
    %cst_75 = arith.constant 3.200000e+01 : f32
    %130 = vector.broadcast %cst_75 : f32 to vector<8x1xf32>
    %131 = arith.divf %129, %130 : vector<8x1xf32>
    %132 = vector.broadcast %131 : vector<8x1xf32> to vector<8x32xf32>
    %133 = arith.subf %127, %132 : vector<8x32xf32>
    %134 = arith.mulf %133, %133 : vector<8x32xf32>
    %cst_76 = arith.constant dense<0.000000e+00> : vector<8xf32>
    %135 = vector.multi_reduction <add>, %134, %cst_76 [1] : vector<8x32xf32> to vector<8xf32>
    %136 = vector.shape_cast %135 : vector<8xf32> to vector<8x1xf32>
    %cst_77 = arith.constant 3.200000e+01 : f32
    %137 = vector.broadcast %cst_77 : f32 to vector<8x1xf32>
    %138 = arith.divf %136, %137 : vector<8x1xf32>
    %139 = vector.broadcast %131 : vector<8x1xf32> to vector<8x32xf32>
    %140 = arith.subf %127, %139 : vector<8x32xf32>
    %cst_78 = arith.constant 9.99999974E-6 : f32
    %141 = vector.broadcast %cst_78 : f32 to vector<8x1xf32>
    %142 = arith.addf %138, %141 : vector<8x1xf32>
    %143 = math.rsqrt %142 : vector<8x1xf32>
    %144 = vector.broadcast %143 : vector<8x1xf32> to vector<8x32xf32>
    %145 = arith.mulf %140, %144 : vector<8x32xf32>
    %146 = vector.broadcast %115 : vector<1x32xf32> to vector<8x32xf32>
    %147 = arith.mulf %145, %146 : vector<8x32xf32>
    %148 = vector.broadcast %116 : vector<1x32xf32> to vector<8x32xf32>
    %149 = arith.addf %147, %148 : vector<8x32xf32>
    %c0_79 = arith.constant 0 : index
    %c0_80 = arith.constant 0 : index
    %c0_81 = arith.constant 0 : index
    %150 = vector.load %arg22[%c0_79, %c0_80, %c0_81] : memref<1x8x32xf32, #tpu.memory_space<vmem>>, vector<1x8x32xf32>
    %151 = vector.shape_cast %150 : vector<1x8x32xf32> to vector<8x32xf32>
    %152 = vector.shape_cast %149 : vector<8x32xf32> to vector<1x8x32xf32>
    tpu.vector_store %arg22[%c0_79, %c0_80, %c0_81], %152 {strides = array<i32>} : memref<1x8x32xf32, #tpu.memory_space<vmem>>, vector<1x8x32xf32>,
    return
  }
  func.func @transform_0(%arg0: i32) -> (i32, i32, i32) {
    %c0_i32 = arith.constant 0 : i32
    %c0_i32_0 = arith.constant 0 : i32
    %c0_i32_1 = arith.constant 0 : i32
    return %arg0, %c0_i32, %c0_i32_0 : i32, i32, i32
  }
  func.func @transform_1(%arg0: i32) -> (i32, i32, i32) {
    %c0_i32 = arith.constant 0 : i32
    %c0_i32_0 = arith.constant 0 : i32
    %c0_i32_1 = arith.constant 0 : i32
    %c0_i32_2 = arith.constant 0 : i32
    return %c0_i32, %c0_i32_0, %c0_i32_1 : i32, i32, i32
  }
  func.func @transform_2(%arg0: i32) -> (i32, i32) {
    %c0_i32 = arith.constant 0 : i32
    %c0_i32_0 = arith.constant 0 : i32
    %c0_i32_1 = arith.constant 0 : i32
    return %c0_i32, %c0_i32_0 : i32, i32
  }
  func.func @transform_3(%arg0: i32) -> (i32, i32) {
    %c0_i32 = arith.constant 0 : i32
    %c0_i32_0 = arith.constant 0 : i32
    %c0_i32_1 = arith.constant 0 : i32
    return %c0_i32, %c0_i32_0 : i32, i32
  }
  func.func @transform_4(%arg0: i32) -> (i32, i32, i32) {
    %c0_i32 = arith.constant 0 : i32
    %c0_i32_0 = arith.constant 0 : i32
    %c0_i32_1 = arith.constant 0 : i32
    return %arg0, %c0_i32, %c0_i32_0 : i32, i32, i32
  }
  func.func @transform_5(%arg0: i32) -> (i32, i32, i32) {
    %c0_i32 = arith.constant 0 : i32
    %c0_i32_0 = arith.constant 0 : i32
    %c0_i32_1 = arith.constant 0 : i32
    %c0_i32_2 = arith.constant 0 : i32
    return %c0_i32, %c0_i32_0, %c0_i32_1 : i32, i32, i32
  }
  func.func @transform_6(%arg0: i32) -> (i32, i32, i32) {
    %c0_i32 = arith.constant 0 : i32
    %c0_i32_0 = arith.constant 0 : i32
    %c0_i32_1 = arith.constant 0 : i32
    %c0_i32_2 = arith.constant 0 : i32
    return %c0_i32, %c0_i32_0, %c0_i32_1 : i32, i32, i32
  }
  func.func @transform_7(%arg0: i32) -> (i32, i32, i32) {
    %c0_i32 = arith.constant 0 : i32
    %c0_i32_0 = arith.constant 0 : i32
    %c0_i32_1 = arith.constant 0 : i32
    %c0_i32_2 = arith.constant 0 : i32
    return %c0_i32, %c0_i32_0, %c0_i32_1 : i32, i32, i32
  }
  func.func @transform_8(%arg0: i32) -> (i32, i32, i32) {
    %c0_i32 = arith.constant 0 : i32
    %c0_i32_0 = arith.constant 0 : i32
    %c0_i32_1 = arith.constant 0 : i32
    %c0_i32_2 = arith.constant 0 : i32
    return %c0_i32, %c0_i32_0, %c0_i32_1 : i32, i32, i32
  }
  func.func @transform_9(%arg0: i32) -> (i32, i32, i32) {
    %c0_i32 = arith.constant 0 : i32
    %c0_i32_0 = arith.constant 0 : i32
    %c0_i32_1 = arith.constant 0 : i32
    %c0_i32_2 = arith.constant 0 : i32
    return %c0_i32, %c0_i32_0, %c0_i32_1 : i32, i32, i32
  }
  func.func @transform_10(%arg0: i32) -> (i32, i32, i32) {
    %c0_i32 = arith.constant 0 : i32
    %c0_i32_0 = arith.constant 0 : i32
    %c0_i32_1 = arith.constant 0 : i32
    %c0_i32_2 = arith.constant 0 : i32
    return %c0_i32, %c0_i32_0, %c0_i32_1 : i32, i32, i32
  }
  func.func @transform_11(%arg0: i32) -> (i32, i32, i32) {
    %c0_i32 = arith.constant 0 : i32
    %c0_i32_0 = arith.constant 0 : i32
    %c0_i32_1 = arith.constant 0 : i32
    %c0_i32_2 = arith.constant 0 : i32
    return %c0_i32, %c0_i32_0, %c0_i32_1 : i32, i32, i32
  }
  func.func @transform_12(%arg0: i32) -> (i32, i32) {
    %c0_i32 = arith.constant 0 : i32
    %c0_i32_0 = arith.constant 0 : i32
    %c0_i32_1 = arith.constant 0 : i32
    return %c0_i32, %c0_i32_0 : i32, i32
  }
  func.func @transform_13(%arg0: i32) -> (i32, i32) {
    %c0_i32 = arith.constant 0 : i32
    %c0_i32_0 = arith.constant 0 : i32
    %c0_i32_1 = arith.constant 0 : i32
    return %c0_i32, %c0_i32_0 : i32, i32
  }
  func.func @transform_14(%arg0: i32) -> (i32, i32) {
    %c0_i32 = arith.constant 0 : i32
    %c0_i32_0 = arith.constant 0 : i32
    %c0_i32_1 = arith.constant 0 : i32
    return %c0_i32, %c0_i32_0 : i32, i32
  }
  func.func @transform_15(%arg0: i32) -> (i32, i32) {
    %c0_i32 = arith.constant 0 : i32
    %c0_i32_0 = arith.constant 0 : i32
    %c0_i32_1 = arith.constant 0 : i32
    return %c0_i32, %c0_i32_0 : i32, i32
  }
  func.func @transform_16(%arg0: i32) -> (i32, i32) {
    %c0_i32 = arith.constant 0 : i32
    %c0_i32_0 = arith.constant 0 : i32
    %c0_i32_1 = arith.constant 0 : i32
    return %c0_i32, %c0_i32_0 : i32, i32
  }
  func.func @transform_17(%arg0: i32) -> (i32, i32) {
    %c0_i32 = arith.constant 0 : i32
    %c0_i32_0 = arith.constant 0 : i32
    %c0_i32_1 = arith.constant 0 : i32
    return %c0_i32, %c0_i32_0 : i32, i32
  }
  func.func @transform_18(%arg0: i32) -> (i32, i32) {
    %c0_i32 = arith.constant 0 : i32
    %c0_i32_0 = arith.constant 0 : i32
    %c0_i32_1 = arith.constant 0 : i32
    return %c0_i32, %c0_i32_0 : i32, i32
  }
  func.func @transform_19(%arg0: i32) -> (i32, i32) {
    %c0_i32 = arith.constant 0 : i32
    %c0_i32_0 = arith.constant 0 : i32
    %c0_i32_1 = arith.constant 0 : i32
    return %c0_i32, %c0_i32_0 : i32, i32
  }
  func.func @transform_20(%arg0: i32) -> (i32, i32) {
    %c0_i32 = arith.constant 0 : i32
    %c0_i32_0 = arith.constant 0 : i32
    %c0_i32_1 = arith.constant 0 : i32
    return %c0_i32, %c0_i32_0 : i32, i32
  }
  func.func @transform_21(%arg0: i32) -> (i32, i32, i32) {
    %c0_i32 = arith.constant 0 : i32
    %c0_i32_0 = arith.constant 0 : i32
    %c0_i32_1 = arith.constant 0 : i32
    return %arg0, %c0_i32, %c0_i32_0 : i32, i32, i32
  }
}

module attributes {stable_mosaic.version = 11 : i64} {
  func.func @_decoder_layer_kernel(%arg0: i32, %arg1: memref<1x8x32xf32, #tpu.memory_space<vmem>>, %arg2: memref<1x8x32xf32, #tpu.memory_space<vmem>>, %arg3: memref<1x32xf32, #tpu.memory_space<vmem>>, %arg4: memref<1x32xf32, #tpu.memory_space<vmem>>, %arg5: memref<1x8x32xf32, #tpu.memory_space<vmem>>, %arg6: memref<1x1x8xi32, #tpu.memory_space<vmem>>, %arg7: memref<1x1x8xi32, #tpu.memory_space<vmem>>, %arg8: memref<8x32x8xbf16, #tpu.memory_space<vmem>>, %arg9: memref<8x1x8xf32, #tpu.memory_space<vmem>>, %arg10: memref<8x32x8xbf16, #tpu.memory_space<vmem>>, %arg11: memref<8x1x8xf32, #tpu.memory_space<vmem>>, %arg12: memref<8x32x8xbf16, #tpu.memory_space<vmem>>, %arg13: memref<8x1x8xf32, #tpu.memory_space<vmem>>, %arg14: memref<8x8x32xbf16, #tpu.memory_space<vmem>>, %arg15: memref<1x32xf32, #tpu.memory_space<vmem>>, %arg16: memref<1x32xf32, #tpu.memory_space<vmem>>, %arg17: memref<1x32xf32, #tpu.memory_space<vmem>>, %arg18: memref<8x32x8xbf16, #tpu.memory_space<vmem>>, %arg19: memref<8x1x8xf32, #tpu.memory_space<vmem>>, %arg20: memref<8x32x8xbf16, #tpu.memory_space<vmem>>, %arg21: memref<8x1x8xf32, #tpu.memory_space<vmem>>, %arg22: memref<8x32x8xbf16, #tpu.memory_space<vmem>>, %arg23: memref<8x1x8xf32, #tpu.memory_space<vmem>>, %arg24: memref<8x8x32xbf16, #tpu.memory_space<vmem>>, %arg25: memref<1x32xf32, #tpu.memory_space<vmem>>, %arg26: memref<1x32xf32, #tpu.memory_space<vmem>>, %arg27: memref<1x32xf32, #tpu.memory_space<vmem>>, %arg28: memref<32x2048xbf16, #tpu.memory_space<vmem>>, %arg29: memref<1x2048xf32, #tpu.memory_space<vmem>>, %arg30: memref<2048x32xbf16, #tpu.memory_space<vmem>>, %arg31: memref<1x32xf32, #tpu.memory_space<vmem>>, %arg32: memref<1x32xf32, #tpu.memory_space<vmem>>, %arg33: memref<1x32xf32, #tpu.memory_space<vmem>>, %arg34: memref<32x16xbf16, #tpu.memory_space<vmem>>, %arg35: memref<1x16xf32, #tpu.memory_space<vmem>>, %arg36: memref<1x8x16xf32, #tpu.memory_space<vmem>>) attributes {dimension_semantics = [#tpu.dimension_semantics<parallel>], iteration_bounds = array<i64: 2>, scalar_prefetch = 0 : i64, scratch_operands = 0 : i64, tpu.core_type = #tpu.core_type<tc>, window_params = [{transform_indices = @transform_0, window_bounds = array<i64: 1, 8, 32>}, {transform_indices = @transform_1, window_bounds = array<i64: 1, 8, 32>}, {pipeline_mode = #tpu.pipeline_mode<synchronous>, transform_indices = @transform_2, window_bounds = array<i64: 1, 32>}, {pipeline_mode = #tpu.pipeline_mode<synchronous>, transform_indices = @transform_3, window_bounds = array<i64: 1, 32>}, {transform_indices = @transform_4, window_bounds = array<i64: 1, 8, 32>}, {transform_indices = @transform_5, window_bounds = array<i64: 1, 1, 8>}, {transform_indices = @transform_6, window_bounds = array<i64: 1, 1, 8>}, {pipeline_mode = #tpu.pipeline_mode<synchronous>, transform_indices = @transform_7, window_bounds = array<i64: 8, 32, 8>}, {pipeline_mode = #tpu.pipeline_mode<synchronous>, transform_indices = @transform_8, window_bounds = array<i64: 8, 1, 8>}, {pipeline_mode = #tpu.pipeline_mode<synchronous>, transform_indices = @transform_9, window_bounds = array<i64: 8, 32, 8>}, {pipeline_mode = #tpu.pipeline_mode<synchronous>, transform_indices = @transform_10, window_bounds = array<i64: 8, 1, 8>}, {pipeline_mode = #tpu.pipeline_mode<synchronous>, transform_indices = @transform_11, window_bounds = array<i64: 8, 32, 8>}, {pipeline_mode = #tpu.pipeline_mode<synchronous>, transform_indices = @transform_12, window_bounds = array<i64: 8, 1, 8>}, {pipeline_mode = #tpu.pipeline_mode<synchronous>, transform_indices = @transform_13, window_bounds = array<i64: 8, 8, 32>}, {pipeline_mode = #tpu.pipeline_mode<synchronous>, transform_indices = @transform_14, window_bounds = array<i64: 1, 32>}, {pipeline_mode = #tpu.pipeline_mode<synchronous>, transform_indices = @transform_15, window_bounds = array<i64: 1, 32>}, {pipeline_mode = #tpu.pipeline_mode<synchronous>, transform_indices = @transform_16, window_bounds = array<i64: 1, 32>}, {pipeline_mode = #tpu.pipeline_mode<synchronous>, transform_indices = @transform_17, window_bounds = array<i64: 8, 32, 8>}, {pipeline_mode = #tpu.pipeline_mode<synchronous>, transform_indices = @transform_18, window_bounds = array<i64: 8, 1, 8>}, {pipeline_mode = #tpu.pipeline_mode<synchronous>, transform_indices = @transform_19, window_bounds = array<i64: 8, 32, 8>}, {pipeline_mode = #tpu.pipeline_mode<synchronous>, transform_indices = @transform_20, window_bounds = array<i64: 8, 1, 8>}, {pipeline_mode = #tpu.pipeline_mode<synchronous>, transform_indices = @transform_21, window_bounds = array<i64: 8, 32, 8>}, {pipeline_mode = #tpu.pipeline_mode<synchronous>, transform_indices = @transform_22, window_bounds = array<i64: 8, 1, 8>}, {pipeline_mode = #tpu.pipeline_mode<synchronous>, transform_indices = @transform_23, window_bounds = array<i64: 8, 8, 32>}, {pipeline_mode = #tpu.pipeline_mode<synchronous>, transform_indices = @transform_24, window_bounds = array<i64: 1, 32>}, {pipeline_mode = #tpu.pipeline_mode<synchronous>, transform_indices = @transform_25, window_bounds = array<i64: 1, 32>}, {pipeline_mode = #tpu.pipeline_mode<synchronous>, transform_indices = @transform_26, window_bounds = array<i64: 1, 32>}, {pipeline_mode = #tpu.pipeline_mode<synchronous>, transform_indices = @transform_27, window_bounds = array<i64: 32, 2048>}, {pipeline_mode = #tpu.pipeline_mode<synchronous>, transform_indices = @transform_28, window_bounds = array<i64: 1, 2048>}, {pipeline_mode = #tpu.pipeline_mode<synchronous>, transform_indices = @transform_29, window_bounds = array<i64: 2048, 32>}, {pipeline_mode = #tpu.pipeline_mode<synchronous>, transform_indices = @transform_30, window_bounds = array<i64: 1, 32>}, {pipeline_mode = #tpu.pipeline_mode<synchronous>, transform_indices = @transform_31, window_bounds = array<i64: 1, 32>}, {pipeline_mode = #tpu.pipeline_mode<synchronous>, transform_indices = @transform_32, window_bounds = array<i64: 1, 32>}, {pipeline_mode = #tpu.pipeline_mode<synchronous>, transform_indices = @transform_33, window_bounds = array<i64: 32, 16>}, {pipeline_mode = #tpu.pipeline_mode<synchronous>, transform_indices = @transform_34, window_bounds = array<i64: 1, 16>}, {transform_indices = @transform_35, window_bounds = array<i64: 1, 8, 16>}]} {
    %c0 = arith.constant 0 : index
    %c0_0 = arith.constant 0 : index
    %c0_1 = arith.constant 0 : index
    %0 = vector.load %arg1[%c0, %c0_0, %c0_1] : memref<1x8x32xf32, #tpu.memory_space<vmem>>, vector<1x8x32xf32>
    %1 = vector.shape_cast %0 : vector<1x8x32xf32> to vector<8x32xf32>
    %c0_2 = arith.constant 0 : index
    %c0_3 = arith.constant 0 : index
    %c0_4 = arith.constant 0 : index
    %2 = vector.load %arg2[%c0_2, %c0_3, %c0_4] : memref<1x8x32xf32, #tpu.memory_space<vmem>>, vector<1x8x32xf32>
    %3 = vector.shape_cast %2 : vector<1x8x32xf32> to vector<8x32xf32>
    %c0_5 = arith.constant 0 : index
    %c0_6 = arith.constant 0 : index
    %4 = vector.load %arg3[%c0_5, %c0_6] : memref<1x32xf32, #tpu.memory_space<vmem>>, vector<1x32xf32>
    %c0_7 = arith.constant 0 : index
    %c0_8 = arith.constant 0 : index
    %5 = vector.load %arg4[%c0_7, %c0_8] : memref<1x32xf32, #tpu.memory_space<vmem>>, vector<1x32xf32>
    %cst = arith.constant 5.65685415 : f32
    %6 = vector.broadcast %cst : f32 to vector<8x32xf32>
    %7 = arith.mulf %1, %6 : vector<8x32xf32>
    %8 = arith.addf %7, %3 : vector<8x32xf32>
    %cst_9 = arith.constant dense<0.000000e+00> : vector<8xf32>
    %9 = vector.multi_reduction <add>, %8, %cst_9 [1] : vector<8x32xf32> to vector<8xf32>
    %10 = vector.shape_cast %9 : vector<8xf32> to vector<8x1xf32>
    %cst_10 = arith.constant 3.200000e+01 : f32
    %11 = vector.broadcast %cst_10 : f32 to vector<8x1xf32>
    %12 = arith.divf %10, %11 : vector<8x1xf32>
    %13 = vector.broadcast %12 : vector<8x1xf32> to vector<8x32xf32>
    %14 = arith.subf %8, %13 : vector<8x32xf32>
    %15 = arith.mulf %14, %14 : vector<8x32xf32>
    %cst_11 = arith.constant dense<0.000000e+00> : vector<8xf32>
    %16 = vector.multi_reduction <add>, %15, %cst_11 [1] : vector<8x32xf32> to vector<8xf32>
    %17 = vector.shape_cast %16 : vector<8xf32> to vector<8x1xf32>
    %cst_12 = arith.constant 3.200000e+01 : f32
    %18 = vector.broadcast %cst_12 : f32 to vector<8x1xf32>
    %19 = arith.divf %17, %18 : vector<8x1xf32>
    %20 = vector.broadcast %12 : vector<8x1xf32> to vector<8x32xf32>
    %21 = arith.subf %8, %20 : vector<8x32xf32>
    %cst_13 = arith.constant 9.99999974E-6 : f32
    %22 = vector.broadcast %cst_13 : f32 to vector<8x1xf32>
    %23 = arith.addf %19, %22 : vector<8x1xf32>
    %24 = math.rsqrt %23 : vector<8x1xf32>
    %25 = vector.broadcast %24 : vector<8x1xf32> to vector<8x32xf32>
    %26 = arith.mulf %21, %25 : vector<8x32xf32>
    %27 = vector.broadcast %4 : vector<1x32xf32> to vector<8x32xf32>
    %28 = arith.mulf %26, %27 : vector<8x32xf32>
    %29 = vector.broadcast %5 : vector<1x32xf32> to vector<8x32xf32>
    %30 = arith.addf %28, %29 : vector<8x32xf32>
    %c0_14 = arith.constant 0 : index
    %c0_15 = arith.constant 0 : index
    %c0_16 = arith.constant 0 : index
    %31 = vector.load %arg5[%c0_14, %c0_15, %c0_16] : memref<1x8x32xf32, #tpu.memory_space<vmem>>, vector<1x8x32xf32>
    %32 = vector.shape_cast %31 : vector<1x8x32xf32> to vector<8x32xf32>
    %c0_17 = arith.constant 0 : index
    %c0_18 = arith.constant 0 : index
    %c0_19 = arith.constant 0 : index
    %33 = vector.load %arg6[%c0_17, %c0_18, %c0_19] : memref<1x1x8xi32, #tpu.memory_space<vmem>>, vector<1x1x8xi32>
    %34 = vector.shape_cast %33 : vector<1x1x8xi32> to vector<1x8xi32>
    %c0_i32 = arith.constant 0 : i32
    %35 = vector.broadcast %c0_i32 : i32 to vector<1x8xi32>
    %36 = arith.cmpi ne, %34, %35 : vector<1x8xi32>
    %37 = vector.shape_cast %36 : vector<1x8xi1> to vector<1x8xi1>
    %38 = vector.broadcast %37 : vector<1x8xi1> to vector<8x8xi1>
    %39 = tpu.iota {dimensions = array<i32: 0>} : vector<8x8xi32>
    %40 = tpu.iota {dimensions = array<i32: 1>} : vector<8x8xi32>
    %41 = arith.cmpi sge, %39, %40 : vector<8x8xi32>
    %42 = arith.andi %38, %41 : vector<8x8xi1>
    %c0_20 = arith.constant 0 : index
    %c0_21 = arith.constant 0 : index
    %c0_22 = arith.constant 0 : index
    %43 = vector.load %arg8[%c0_20, %c0_21, %c0_22] : memref<8x32x8xbf16, #tpu.memory_space<vmem>>, vector<8x32x8xbf16>
    %c0_23 = arith.constant 0 : index
    %c0_24 = arith.constant 0 : index
    %c0_25 = arith.constant 0 : index
    %44 = vector.load %arg9[%c0_23, %c0_24, %c0_25] : memref<8x1x8xf32, #tpu.memory_space<vmem>>, vector<8x1x8xf32>
    %c0_26 = arith.constant 0 : index
    %c0_27 = arith.constant 0 : index
    %c0_28 = arith.constant 0 : index
    %45 = vector.load %arg10[%c0_26, %c0_27, %c0_28] : memref<8x32x8xbf16, #tpu.memory_space<vmem>>, vector<8x32x8xbf16>
    %c0_29 = arith.constant 0 : index
    %c0_30 = arith.constant 0 : index
    %c0_31 = arith.constant 0 : index
    %46 = vector.load %arg11[%c0_29, %c0_30, %c0_31] : memref<8x1x8xf32, #tpu.memory_space<vmem>>, vector<8x1x8xf32>
    %c0_32 = arith.constant 0 : index
    %c0_33 = arith.constant 0 : index
    %c0_34 = arith.constant 0 : index
    %47 = vector.load %arg12[%c0_32, %c0_33, %c0_34] : memref<8x32x8xbf16, #tpu.memory_space<vmem>>, vector<8x32x8xbf16>
    %c0_35 = arith.constant 0 : index
    %c0_36 = arith.constant 0 : index
    %c0_37 = arith.constant 0 : index
    %48 = vector.load %arg13[%c0_35, %c0_36, %c0_37] : memref<8x1x8xf32, #tpu.memory_space<vmem>>, vector<8x1x8xf32>
    %c0_38 = arith.constant 0 : index
    %c0_39 = arith.constant 0 : index
    %c0_40 = arith.constant 0 : index
    %49 = vector.load %arg14[%c0_38, %c0_39, %c0_40] : memref<8x8x32xbf16, #tpu.memory_space<vmem>>, vector<8x8x32xbf16>
    %c0_41 = arith.constant 0 : index
    %c0_42 = arith.constant 0 : index
    %50 = vector.load %arg15[%c0_41, %c0_42] : memref<1x32xf32, #tpu.memory_space<vmem>>, vector<1x32xf32>
    %c0_43 = arith.constant 0 : index
    %c0_44 = arith.constant 0 : index
    %51 = vector.load %arg16[%c0_43, %c0_44] : memref<1x32xf32, #tpu.memory_space<vmem>>, vector<1x32xf32>
    %c0_45 = arith.constant 0 : index
    %c0_46 = arith.constant 0 : index
    %52 = vector.load %arg17[%c0_45, %c0_46] : memref<1x32xf32, #tpu.memory_space<vmem>>, vector<1x32xf32>
    %53 = arith.truncf %30 : vector<8x32xf32> to vector<8x32xbf16>
    %54 = vector.shape_cast %53 : vector<8x32xbf16> to vector<1x8x32xbf16>
    %55 = vector.broadcast %54 : vector<1x8x32xbf16> to vector<8x8x32xbf16>
    %56 = arith.truncf %30 : vector<8x32xf32> to vector<8x32xbf16>
    %57 = vector.shape_cast %56 : vector<8x32xbf16> to vector<1x8x32xbf16>
    %58 = vector.broadcast %57 : vector<1x8x32xbf16> to vector<8x8x32xbf16>
    "tpu.trace_start"() <{level = 10 : i32, message = "hld,hdk->hlk"}> : () -> ()
    %cst_47 = arith.constant dense<0.000000e+00> : vector<8x8x8xf32>
    %59 = tpu.matmul %55, %43, %cst_47 {dimension_numbers = #tpu.dot_dimension_numbers<[2], [1], [1], [2], [0, 0, 0, 1, 1, 2], [0], [0]>} : vector<8x8x32xbf16>, vector<8x32x8xbf16>, vector<8x8x8xf32> -> vector<8x8x8xf32>
    "tpu.trace_stop"() : () -> ()
    %60 = vector.broadcast %44 : vector<8x1x8xf32> to vector<8x8x8xf32>
    %61 = arith.addf %59, %60 : vector<8x8x8xf32>
    "tpu.trace_start"() <{level = 10 : i32, message = "hld,hdk->hlk"}> : () -> ()
    %cst_48 = arith.constant dense<0.000000e+00> : vector<8x8x8xf32>
    %62 = tpu.matmul %58, %45, %cst_48 {dimension_numbers = #tpu.dot_dimension_numbers<[2], [1], [1], [2], [0, 0, 0, 1, 1, 2], [0], [0]>} : vector<8x8x32xbf16>, vector<8x32x8xbf16>, vector<8x8x8xf32> -> vector<8x8x8xf32>
    "tpu.trace_stop"() : () -> ()
    %63 = vector.broadcast %46 : vector<8x1x8xf32> to vector<8x8x8xf32>
    %64 = arith.addf %62, %63 : vector<8x8x8xf32>
    "tpu.trace_start"() <{level = 10 : i32, message = "hld,hdk->hlk"}> : () -> ()
    %cst_49 = arith.constant dense<0.000000e+00> : vector<8x8x8xf32>
    %65 = tpu.matmul %58, %47, %cst_49 {dimension_numbers = #tpu.dot_dimension_numbers<[2], [1], [1], [2], [0, 0, 0, 1, 1, 2], [0], [0]>} : vector<8x8x32xbf16>, vector<8x32x8xbf16>, vector<8x8x8xf32> -> vector<8x8x8xf32>
    "tpu.trace_stop"() : () -> ()
    %66 = vector.broadcast %48 : vector<8x1x8xf32> to vector<8x8x8xf32>
    %67 = arith.addf %65, %66 : vector<8x8x8xf32>
    %68 = arith.truncf %61 : vector<8x8x8xf32> to vector<8x8x8xbf16>
    %69 = arith.truncf %64 : vector<8x8x8xf32> to vector<8x8x8xbf16>
    "tpu.trace_start"() <{level = 10 : i32, message = "hqd,hkd->hqk"}> : () -> ()
    %cst_50 = arith.constant dense<0.000000e+00> : vector<8x8x8xf32>
    %70 = tpu.matmul %68, %69, %cst_50 {dimension_numbers = #tpu.dot_dimension_numbers<[2], [2], [1], [1], [0, 0, 0, 1, 1, 1], [0], [0]>} : vector<8x8x8xbf16>, vector<8x8x8xbf16>, vector<8x8x8xf32> -> vector<8x8x8xf32>
    "tpu.trace_stop"() : () -> ()
    %71 = vector.shape_cast %42 : vector<8x8xi1> to vector<1x8x8xi1>
    %cst_51 = arith.constant -1.000000e+30 : f32
    %72 = vector.shape_cast %71 : vector<1x8x8xi1> to vector<1x8x8xi1>
    %73 = vector.broadcast %72 : vector<1x8x8xi1> to vector<8x8x8xi1>
    %74 = vector.broadcast %cst_51 : f32 to vector<8x8x8xf32>
    %75 = arith.select %73, %70, %74 : vector<8x8x8xi1>, vector<8x8x8xf32>
    %cst_52 = arith.constant dense<0xFF800000> : vector<8x8xf32>
    %76 = vector.multi_reduction <maximumf>, %75, %cst_52 [2] : vector<8x8x8xf32> to vector<8x8xf32>
    %77 = vector.shape_cast %76 : vector<8x8xf32> to vector<8x8x1xf32>
    %78 = vector.broadcast %77 : vector<8x8x1xf32> to vector<8x8x8xf32>
    %79 = arith.subf %75, %78 : vector<8x8x8xf32>
    %80 = math.exp %79 : vector<8x8x8xf32>
    %cst_53 = arith.constant dense<0.000000e+00> : vector<8x8xf32>
    %81 = vector.multi_reduction <add>, %80, %cst_53 [2] : vector<8x8x8xf32> to vector<8x8xf32>
    %82 = vector.shape_cast %81 : vector<8x8xf32> to vector<8x8x1xf32>
    %83 = tpu.reciprocal %82 {approx = true} : vector<8x8x1xf32> -> vector<8x8x1xf32>
    %84 = vector.broadcast %83 : vector<8x8x1xf32> to vector<8x8x8xf32>
    %85 = arith.mulf %80, %84 : vector<8x8x8xf32>
    %86 = arith.truncf %85 : vector<8x8x8xf32> to vector<8x8x8xbf16>
    %87 = arith.truncf %67 : vector<8x8x8xf32> to vector<8x8x8xbf16>
    "tpu.trace_start"() <{level = 10 : i32, message = "hqk,hkd->hqd"}> : () -> ()
    %cst_54 = arith.constant dense<0.000000e+00> : vector<8x8x8xf32>
    %88 = tpu.matmul %86, %87, %cst_54 {dimension_numbers = #tpu.dot_dimension_numbers<[2], [1], [1], [2], [0, 0, 0, 1, 1, 2], [0], [0]>} : vector<8x8x8xbf16>, vector<8x8x8xbf16>, vector<8x8x8xf32> -> vector<8x8x8xf32>
    "tpu.trace_stop"() : () -> ()
    %89 = arith.truncf %88 : vector<8x8x8xf32> to vector<8x8x8xbf16>
    "tpu.trace_start"() <{level = 10 : i32, message = "hqd,hdk->hqk"}> : () -> ()
    %cst_55 = arith.constant dense<0.000000e+00> : vector<8x8x32xf32>
    %90 = tpu.matmul %89, %49, %cst_55 {dimension_numbers = #tpu.dot_dimension_numbers<[2], [1], [1], [2], [0, 0, 0, 1, 1, 2], [0], [0]>} : vector<8x8x8xbf16>, vector<8x8x32xbf16>, vector<8x8x32xf32> -> vector<8x8x32xf32>
    "tpu.trace_stop"() : () -> ()
    %cst_56 = arith.constant dense<0.000000e+00> : vector<8x32xf32>
    %91 = vector.multi_reduction <add>, %90, %cst_56 [0] : vector<8x8x32xf32> to vector<8x32xf32>
    %92 = vector.broadcast %50 : vector<1x32xf32> to vector<8x32xf32>
    %93 = arith.addf %91, %92 : vector<8x32xf32>
    %94 = arith.addf %93, %30 : vector<8x32xf32>
    %cst_57 = arith.constant dense<0.000000e+00> : vector<8xf32>
    %95 = vector.multi_reduction <add>, %94, %cst_57 [1] : vector<8x32xf32> to vector<8xf32>
    %96 = vector.shape_cast %95 : vector<8xf32> to vector<8x1xf32>
    %cst_58 = arith.constant 3.200000e+01 : f32
    %97 = vector.broadcast %cst_58 : f32 to vector<8x1xf32>
    %98 = arith.divf %96, %97 : vector<8x1xf32>
    %99 = vector.broadcast %98 : vector<8x1xf32> to vector<8x32xf32>
    %100 = arith.subf %94, %99 : vector<8x32xf32>
    %101 = arith.mulf %100, %100 : vector<8x32xf32>
    %cst_59 = arith.constant dense<0.000000e+00> : vector<8xf32>
    %102 = vector.multi_reduction <add>, %101, %cst_59 [1] : vector<8x32xf32> to vector<8xf32>
    %103 = vector.shape_cast %102 : vector<8xf32> to vector<8x1xf32>
    %cst_60 = arith.constant 3.200000e+01 : f32
    %104 = vector.broadcast %cst_60 : f32 to vector<8x1xf32>
    %105 = arith.divf %103, %104 : vector<8x1xf32>
    %106 = vector.broadcast %98 : vector<8x1xf32> to vector<8x32xf32>
    %107 = arith.subf %94, %106 : vector<8x32xf32>
    %cst_61 = arith.constant 9.99999974E-6 : f32
    %108 = vector.broadcast %cst_61 : f32 to vector<8x1xf32>
    %109 = arith.addf %105, %108 : vector<8x1xf32>
    %110 = math.rsqrt %109 : vector<8x1xf32>
    %111 = vector.broadcast %110 : vector<8x1xf32> to vector<8x32xf32>
    %112 = arith.mulf %107, %111 : vector<8x32xf32>
    %113 = vector.broadcast %51 : vector<1x32xf32> to vector<8x32xf32>
    %114 = arith.mulf %112, %113 : vector<8x32xf32>
    %115 = vector.broadcast %52 : vector<1x32xf32> to vector<8x32xf32>
    %116 = arith.addf %114, %115 : vector<8x32xf32>
    %c0_62 = arith.constant 0 : index
    %c0_63 = arith.constant 0 : index
    %c0_64 = arith.constant 0 : index
    %117 = vector.load %arg7[%c0_62, %c0_63, %c0_64] : memref<1x1x8xi32, #tpu.memory_space<vmem>>, vector<1x1x8xi32>
    %118 = vector.shape_cast %117 : vector<1x1x8xi32> to vector<1x8xi32>
    %c0_i32_65 = arith.constant 0 : i32
    %119 = vector.broadcast %c0_i32_65 : i32 to vector<1x8xi32>
    %120 = arith.cmpi ne, %118, %119 : vector<1x8xi32>
    %121 = vector.shape_cast %120 : vector<1x8xi1> to vector<1x8xi1>
    %122 = vector.broadcast %121 : vector<1x8xi1> to vector<8x8xi1>
    %c0_66 = arith.constant 0 : index
    %c0_67 = arith.constant 0 : index
    %c0_68 = arith.constant 0 : index
    %123 = vector.load %arg18[%c0_66, %c0_67, %c0_68] : memref<8x32x8xbf16, #tpu.memory_space<vmem>>, vector<8x32x8xbf16>
    %c0_69 = arith.constant 0 : index
    %c0_70 = arith.constant 0 : index
    %c0_71 = arith.constant 0 : index
    %124 = vector.load %arg19[%c0_69, %c0_70, %c0_71] : memref<8x1x8xf32, #tpu.memory_space<vmem>>, vector<8x1x8xf32>
    %c0_72 = arith.constant 0 : index
    %c0_73 = arith.constant 0 : index
    %c0_74 = arith.constant 0 : index
    %125 = vector.load %arg20[%c0_72, %c0_73, %c0_74] : memref<8x32x8xbf16, #tpu.memory_space<vmem>>, vector<8x32x8xbf16>
    %c0_75 = arith.constant 0 : index
    %c0_76 = arith.constant 0 : index
    %c0_77 = arith.constant 0 : index
    %126 = vector.load %arg21[%c0_75, %c0_76, %c0_77] : memref<8x1x8xf32, #tpu.memory_space<vmem>>, vector<8x1x8xf32>
    %c0_78 = arith.constant 0 : index
    %c0_79 = arith.constant 0 : index
    %c0_80 = arith.constant 0 : index
    %127 = vector.load %arg22[%c0_78, %c0_79, %c0_80] : memref<8x32x8xbf16, #tpu.memory_space<vmem>>, vector<8x32x8xbf16>
    %c0_81 = arith.constant 0 : index
    %c0_82 = arith.constant 0 : index
    %c0_83 = arith.constant 0 : index
    %128 = vector.load %arg23[%c0_81, %c0_82, %c0_83] : memref<8x1x8xf32, #tpu.memory_space<vmem>>, vector<8x1x8xf32>
    %c0_84 = arith.constant 0 : index
    %c0_85 = arith.constant 0 : index
    %c0_86 = arith.constant 0 : index
    %129 = vector.load %arg24[%c0_84, %c0_85, %c0_86] : memref<8x8x32xbf16, #tpu.memory_space<vmem>>, vector<8x8x32xbf16>
    %c0_87 = arith.constant 0 : index
    %c0_88 = arith.constant 0 : index
    %130 = vector.load %arg25[%c0_87, %c0_88] : memref<1x32xf32, #tpu.memory_space<vmem>>, vector<1x32xf32>
    %c0_89 = arith.constant 0 : index
    %c0_90 = arith.constant 0 : index
    %131 = vector.load %arg26[%c0_89, %c0_90] : memref<1x32xf32, #tpu.memory_space<vmem>>, vector<1x32xf32>
    %c0_91 = arith.constant 0 : index
    %c0_92 = arith.constant 0 : index
    %132 = vector.load %arg27[%c0_91, %c0_92] : memref<1x32xf32, #tpu.memory_space<vmem>>, vector<1x32xf32>
    %133 = arith.truncf %116 : vector<8x32xf32> to vector<8x32xbf16>
    %134 = vector.shape_cast %133 : vector<8x32xbf16> to vector<1x8x32xbf16>
    %135 = vector.broadcast %134 : vector<1x8x32xbf16> to vector<8x8x32xbf16>
    %136 = arith.truncf %32 : vector<8x32xf32> to vector<8x32xbf16>
    %137 = vector.shape_cast %136 : vector<8x32xbf16> to vector<1x8x32xbf16>
    %138 = vector.broadcast %137 : vector<1x8x32xbf16> to vector<8x8x32xbf16>
    "tpu.trace_start"() <{level = 10 : i32, message = "hld,hdk->hlk"}> : () -> ()
    %cst_93 = arith.constant dense<0.000000e+00> : vector<8x8x8xf32>
    %139 = tpu.matmul %135, %123, %cst_93 {dimension_numbers = #tpu.dot_dimension_numbers<[2], [1], [1], [2], [0, 0, 0, 1, 1, 2], [0], [0]>} : vector<8x8x32xbf16>, vector<8x32x8xbf16>, vector<8x8x8xf32> -> vector<8x8x8xf32>
    "tpu.trace_stop"() : () -> ()
    %140 = vector.broadcast %124 : vector<8x1x8xf32> to vector<8x8x8xf32>
    %141 = arith.addf %139, %140 : vector<8x8x8xf32>
    "tpu.trace_start"() <{level = 10 : i32, message = "hld,hdk->hlk"}> : () -> ()
    %cst_94 = arith.constant dense<0.000000e+00> : vector<8x8x8xf32>
    %142 = tpu.matmul %138, %125, %cst_94 {dimension_numbers = #tpu.dot_dimension_numbers<[2], [1], [1], [2], [0, 0, 0, 1, 1, 2], [0], [0]>} : vector<8x8x32xbf16>, vector<8x32x8xbf16>, vector<8x8x8xf32> -> vector<8x8x8xf32>
    "tpu.trace_stop"() : () -> ()
    %143 = vector.broadcast %126 : vector<8x1x8xf32> to vector<8x8x8xf32>
    %144 = arith.addf %142, %143 : vector<8x8x8xf32>
    "tpu.trace_start"() <{level = 10 : i32, message = "hld,hdk->hlk"}> : () -> ()
    %cst_95 = arith.constant dense<0.000000e+00> : vector<8x8x8xf32>
    %145 = tpu.matmul %138, %127, %cst_95 {dimension_numbers = #tpu.dot_dimension_numbers<[2], [1], [1], [2], [0, 0, 0, 1, 1, 2], [0], [0]>} : vector<8x8x32xbf16>, vector<8x32x8xbf16>, vector<8x8x8xf32> -> vector<8x8x8xf32>
    "tpu.trace_stop"() : () -> ()
    %146 = vector.broadcast %128 : vector<8x1x8xf32> to vector<8x8x8xf32>
    %147 = arith.addf %145, %146 : vector<8x8x8xf32>
    %148 = arith.truncf %141 : vector<8x8x8xf32> to vector<8x8x8xbf16>
    %149 = arith.truncf %144 : vector<8x8x8xf32> to vector<8x8x8xbf16>
    "tpu.trace_start"() <{level = 10 : i32, message = "hqd,hkd->hqk"}> : () -> ()
    %cst_96 = arith.constant dense<0.000000e+00> : vector<8x8x8xf32>
    %150 = tpu.matmul %148, %149, %cst_96 {dimension_numbers = #tpu.dot_dimension_numbers<[2], [2], [1], [1], [0, 0, 0, 1, 1, 1], [0], [0]>} : vector<8x8x8xbf16>, vector<8x8x8xbf16>, vector<8x8x8xf32> -> vector<8x8x8xf32>
    "tpu.trace_stop"() : () -> ()
    %151 = vector.shape_cast %122 : vector<8x8xi1> to vector<1x8x8xi1>
    %cst_97 = arith.constant -1.000000e+30 : f32
    %152 = vector.shape_cast %151 : vector<1x8x8xi1> to vector<1x8x8xi1>
    %153 = vector.broadcast %152 : vector<1x8x8xi1> to vector<8x8x8xi1>
    %154 = vector.broadcast %cst_97 : f32 to vector<8x8x8xf32>
    %155 = arith.select %153, %150, %154 : vector<8x8x8xi1>, vector<8x8x8xf32>
    %cst_98 = arith.constant dense<0xFF800000> : vector<8x8xf32>
    %156 = vector.multi_reduction <maximumf>, %155, %cst_98 [2] : vector<8x8x8xf32> to vector<8x8xf32>
    %157 = vector.shape_cast %156 : vector<8x8xf32> to vector<8x8x1xf32>
    %158 = vector.broadcast %157 : vector<8x8x1xf32> to vector<8x8x8xf32>
    %159 = arith.subf %155, %158 : vector<8x8x8xf32>
    %160 = math.exp %159 : vector<8x8x8xf32>
    %cst_99 = arith.constant dense<0.000000e+00> : vector<8x8xf32>
    %161 = vector.multi_reduction <add>, %160, %cst_99 [2] : vector<8x8x8xf32> to vector<8x8xf32>
    %162 = vector.shape_cast %161 : vector<8x8xf32> to vector<8x8x1xf32>
    %163 = tpu.reciprocal %162 {approx = true} : vector<8x8x1xf32> -> vector<8x8x1xf32>
    %164 = vector.broadcast %163 : vector<8x8x1xf32> to vector<8x8x8xf32>
    %165 = arith.mulf %160, %164 : vector<8x8x8xf32>
    %166 = arith.truncf %165 : vector<8x8x8xf32> to vector<8x8x8xbf16>
    %167 = arith.truncf %147 : vector<8x8x8xf32> to vector<8x8x8xbf16>
    "tpu.trace_start"() <{level = 10 : i32, message = "hqk,hkd->hqd"}> : () -> ()
    %cst_100 = arith.constant dense<0.000000e+00> : vector<8x8x8xf32>
    %168 = tpu.matmul %166, %167, %cst_100 {dimension_numbers = #tpu.dot_dimension_numbers<[2], [1], [1], [2], [0, 0, 0, 1, 1, 2], [0], [0]>} : vector<8x8x8xbf16>, vector<8x8x8xbf16>, vector<8x8x8xf32> -> vector<8x8x8xf32>
    "tpu.trace_stop"() : () -> ()
    %169 = arith.truncf %168 : vector<8x8x8xf32> to vector<8x8x8xbf16>
    "tpu.trace_start"() <{level = 10 : i32, message = "hqd,hdk->hqk"}> : () -> ()
    %cst_101 = arith.constant dense<0.000000e+00> : vector<8x8x32xf32>
    %170 = tpu.matmul %169, %129, %cst_101 {dimension_numbers = #tpu.dot_dimension_numbers<[2], [1], [1], [2], [0, 0, 0, 1, 1, 2], [0], [0]>} : vector<8x8x8xbf16>, vector<8x8x32xbf16>, vector<8x8x32xf32> -> vector<8x8x32xf32>
    "tpu.trace_stop"() : () -> ()
    %cst_102 = arith.constant dense<0.000000e+00> : vector<8x32xf32>
    %171 = vector.multi_reduction <add>, %170, %cst_102 [0] : vector<8x8x32xf32> to vector<8x32xf32>
    %172 = vector.broadcast %130 : vector<1x32xf32> to vector<8x32xf32>
    %173 = arith.addf %171, %172 : vector<8x32xf32>
    %174 = arith.addf %173, %116 : vector<8x32xf32>
    %cst_103 = arith.constant dense<0.000000e+00> : vector<8xf32>
    %175 = vector.multi_reduction <add>, %174, %cst_103 [1] : vector<8x32xf32> to vector<8xf32>
    %176 = vector.shape_cast %175 : vector<8xf32> to vector<8x1xf32>
    %cst_104 = arith.constant 3.200000e+01 : f32
    %177 = vector.broadcast %cst_104 : f32 to vector<8x1xf32>
    %178 = arith.divf %176, %177 : vector<8x1xf32>
    %179 = vector.broadcast %178 : vector<8x1xf32> to vector<8x32xf32>
    %180 = arith.subf %174, %179 : vector<8x32xf32>
    %181 = arith.mulf %180, %180 : vector<8x32xf32>
    %cst_105 = arith.constant dense<0.000000e+00> : vector<8xf32>
    %182 = vector.multi_reduction <add>, %181, %cst_105 [1] : vector<8x32xf32> to vector<8xf32>
    %183 = vector.shape_cast %182 : vector<8xf32> to vector<8x1xf32>
    %cst_106 = arith.constant 3.200000e+01 : f32
    %184 = vector.broadcast %cst_106 : f32 to vector<8x1xf32>
    %185 = arith.divf %183, %184 : vector<8x1xf32>
    %186 = vector.broadcast %178 : vector<8x1xf32> to vector<8x32xf32>
    %187 = arith.subf %174, %186 : vector<8x32xf32>
    %cst_107 = arith.constant 9.99999974E-6 : f32
    %188 = vector.broadcast %cst_107 : f32 to vector<8x1xf32>
    %189 = arith.addf %185, %188 : vector<8x1xf32>
    %190 = math.rsqrt %189 : vector<8x1xf32>
    %191 = vector.broadcast %190 : vector<8x1xf32> to vector<8x32xf32>
    %192 = arith.mulf %187, %191 : vector<8x32xf32>
    %193 = vector.broadcast %131 : vector<1x32xf32> to vector<8x32xf32>
    %194 = arith.mulf %192, %193 : vector<8x32xf32>
    %195 = vector.broadcast %132 : vector<1x32xf32> to vector<8x32xf32>
    %196 = arith.addf %194, %195 : vector<8x32xf32>
    %c0_108 = arith.constant 0 : index
    %c0_109 = arith.constant 0 : index
    %197 = vector.load %arg28[%c0_108, %c0_109] : memref<32x2048xbf16, #tpu.memory_space<vmem>>, vector<32x2048xbf16>
    %c0_110 = arith.constant 0 : index
    %c0_111 = arith.constant 0 : index
    %198 = vector.load %arg29[%c0_110, %c0_111] : memref<1x2048xf32, #tpu.memory_space<vmem>>, vector<1x2048xf32>
    %c0_112 = arith.constant 0 : index
    %c0_113 = arith.constant 0 : index
    %199 = vector.load %arg30[%c0_112, %c0_113] : memref<2048x32xbf16, #tpu.memory_space<vmem>>, vector<2048x32xbf16>
    %c0_114 = arith.constant 0 : index
    %c0_115 = arith.constant 0 : index
    %200 = vector.load %arg31[%c0_114, %c0_115] : memref<1x32xf32, #tpu.memory_space<vmem>>, vector<1x32xf32>
    %c0_116 = arith.constant 0 : index
    %c0_117 = arith.constant 0 : index
    %201 = vector.load %arg32[%c0_116, %c0_117] : memref<1x32xf32, #tpu.memory_space<vmem>>, vector<1x32xf32>
    %c0_118 = arith.constant 0 : index
    %c0_119 = arith.constant 0 : index
    %202 = vector.load %arg33[%c0_118, %c0_119] : memref<1x32xf32, #tpu.memory_space<vmem>>, vector<1x32xf32>
    %203 = arith.truncf %196 : vector<8x32xf32> to vector<8x32xbf16>
    %cst_120 = arith.constant dense<0.000000e+00> : vector<8x2048xf32>
    %204 = tpu.matmul %203, %197, %cst_120 {dimension_numbers = #tpu.dot_dimension_numbers<[1], [0], [0], [1], [0, 0, 1, 1], [], []>} : vector<8x32xbf16>, vector<32x2048xbf16>, vector<8x2048xf32> -> vector<8x2048xf32>
    %205 = vector.broadcast %198 : vector<1x2048xf32> to vector<8x2048xf32>
    %206 = arith.addf %204, %205 : vector<8x2048xf32>
    %cst_121 = arith.constant 0.000000e+00 : f32
    %207 = vector.broadcast %cst_121 : f32 to vector<8x2048xf32>
    %208 = arith.maximumf %206, %207 : vector<8x2048xf32>
    %209 = arith.truncf %208 : vector<8x2048xf32> to vector<8x2048xbf16>
    %cst_122 = arith.constant dense<0.000000e+00> : vector<8x32xf32>
    %210 = tpu.matmul %209, %199, %cst_122 {dimension_numbers = #tpu.dot_dimension_numbers<[1], [0], [0], [1], [0, 0, 1, 1], [], []>} : vector<8x2048xbf16>, vector<2048x32xbf16>, vector<8x32xf32> -> vector<8x32xf32>
    %211 = vector.broadcast %200 : vector<1x32xf32> to vector<8x32xf32>
    %212 = arith.addf %210, %211 : vector<8x32xf32>
    %213 = arith.addf %212, %196 : vector<8x32xf32>
    %cst_123 = arith.constant dense<0.000000e+00> : vector<8xf32>
    %214 = vector.multi_reduction <add>, %213, %cst_123 [1] : vector<8x32xf32> to vector<8xf32>
    %215 = vector.shape_cast %214 : vector<8xf32> to vector<8x1xf32>
    %cst_124 = arith.constant 3.200000e+01 : f32
    %216 = vector.broadcast %cst_124 : f32 to vector<8x1xf32>
    %217 = arith.divf %215, %216 : vector<8x1xf32>
    %218 = vector.broadcast %217 : vector<8x1xf32> to vector<8x32xf32>
    %219 = arith.subf %213, %218 : vector<8x32xf32>
    %220 = arith.mulf %219, %219 : vector<8x32xf32>
    %cst_125 = arith.constant dense<0.000000e+00> : vector<8xf32>
    %221 = vector.multi_reduction <add>, %220, %cst_125 [1] : vector<8x32xf32> to vector<8xf32>
    %222 = vector.shape_cast %221 : vector<8xf32> to vector<8x1xf32>
    %cst_126 = arith.constant 3.200000e+01 : f32
    %223 = vector.broadcast %cst_126 : f32 to vector<8x1xf32>
    %224 = arith.divf %222, %223 : vector<8x1xf32>
    %225 = vector.broadcast %217 : vector<8x1xf32> to vector<8x32xf32>
    %226 = arith.subf %213, %225 : vector<8x32xf32>
    %cst_127 = arith.constant 9.99999974E-6 : f32
    %227 = vector.broadcast %cst_127 : f32 to vector<8x1xf32>
    %228 = arith.addf %224, %227 : vector<8x1xf32>
    %229 = math.rsqrt %228 : vector<8x1xf32>
    %230 = vector.broadcast %229 : vector<8x1xf32> to vector<8x32xf32>
    %231 = arith.mulf %226, %230 : vector<8x32xf32>
    %232 = vector.broadcast %201 : vector<1x32xf32> to vector<8x32xf32>
    %233 = arith.mulf %231, %232 : vector<8x32xf32>
    %234 = vector.broadcast %202 : vector<1x32xf32> to vector<8x32xf32>
    %235 = arith.addf %233, %234 : vector<8x32xf32>
    %236 = arith.truncf %235 : vector<8x32xf32> to vector<8x32xbf16>
    %c0_128 = arith.constant 0 : index
    %c0_129 = arith.constant 0 : index
    %237 = vector.load %arg34[%c0_128, %c0_129] : memref<32x16xbf16, #tpu.memory_space<vmem>>, vector<32x16xbf16>
    %cst_130 = arith.constant dense<0.000000e+00> : vector<8x16xf32>
    %238 = tpu.matmul %236, %237, %cst_130 {dimension_numbers = #tpu.dot_dimension_numbers<[1], [0], [0], [1], [0, 0, 1, 1], [], []>} : vector<8x32xbf16>, vector<32x16xbf16>, vector<8x16xf32> -> vector<8x16xf32>
    %c0_131 = arith.constant 0 : index
    %c0_132 = arith.constant 0 : index
    %239 = vector.load %arg35[%c0_131, %c0_132] : memref<1x16xf32, #tpu.memory_space<vmem>>, vector<1x16xf32>
    %240 = vector.broadcast %239 : vector<1x16xf32> to vector<8x16xf32>
    %241 = arith.addf %238, %240 : vector<8x16xf32>
    %c0_133 = arith.constant 0 : index
    %c0_134 = arith.constant 0 : index
    %c0_135 = arith.constant 0 : index
    %242 = vector.load %arg36[%c0_133, %c0_134, %c0_135] : memref<1x8x16xf32, #tpu.memory_space<vmem>>, vector<1x8x16xf32>
    %243 = vector.shape_cast %242 : vector<1x8x16xf32> to vector<8x16xf32>
    %244 = vector.shape_cast %241 : vector<8x16xf32> to vector<1x8x16xf32>
    tpu.vector_store %arg36[%c0_133, %c0_134, %c0_135], %244 {strides = array<i32>} : memref<1x8x16xf32, #tpu.memory_space<vmem>>, vector<1x8x16xf32>,
    return
  }
  func.func @transform_0(%arg0: i32) -> (i32, i32, i32) {
    %c0_i32 = arith.constant 0 : i32
    %c0_i32_0 = arith.constant 0 : i32
    %c0_i32_1 = arith.constant 0 : i32
    return %arg0, %c0_i32, %c0_i32_0 : i32, i32, i32
  }
  func.func @transform_1(%arg0: i32) -> (i32, i32, i32) {
    %c0_i32 = arith.constant 0 : i32
    %c0_i32_0 = arith.constant 0 : i32
    %c0_i32_1 = arith.constant 0 : i32
    %c0_i32_2 = arith.constant 0 : i32
    return %c0_i32, %c0_i32_0, %c0_i32_1 : i32, i32, i32
  }
  func.func @transform_2(%arg0: i32) -> (i32, i32) {
    %c0_i32 = arith.constant 0 : i32
    %c0_i32_0 = arith.constant 0 : i32
    %c0_i32_1 = arith.constant 0 : i32
    return %c0_i32, %c0_i32_0 : i32, i32
  }
  func.func @transform_3(%arg0: i32) -> (i32, i32) {
    %c0_i32 = arith.constant 0 : i32
    %c0_i32_0 = arith.constant 0 : i32
    %c0_i32_1 = arith.constant 0 : i32
    return %c0_i32, %c0_i32_0 : i32, i32
  }
  func.func @transform_4(%arg0: i32) -> (i32, i32, i32) {
    %c0_i32 = arith.constant 0 : i32
    %c0_i32_0 = arith.constant 0 : i32
    %c0_i32_1 = arith.constant 0 : i32
    return %arg0, %c0_i32, %c0_i32_0 : i32, i32, i32
  }
  func.func @transform_5(%arg0: i32) -> (i32, i32, i32) {
    %c0_i32 = arith.constant 0 : i32
    %c0_i32_0 = arith.constant 0 : i32
    %c0_i32_1 = arith.constant 0 : i32
    return %arg0, %c0_i32, %c0_i32_0 : i32, i32, i32
  }
  func.func @transform_6(%arg0: i32) -> (i32, i32, i32) {
    %c0_i32 = arith.constant 0 : i32
    %c0_i32_0 = arith.constant 0 : i32
    %c0_i32_1 = arith.constant 0 : i32
    return %arg0, %c0_i32, %c0_i32_0 : i32, i32, i32
  }
  func.func @transform_7(%arg0: i32) -> (i32, i32, i32) {
    %c0_i32 = arith.constant 0 : i32
    %c0_i32_0 = arith.constant 0 : i32
    %c0_i32_1 = arith.constant 0 : i32
    %c0_i32_2 = arith.constant 0 : i32
    return %c0_i32, %c0_i32_0, %c0_i32_1 : i32, i32, i32
  }
  func.func @transform_8(%arg0: i32) -> (i32, i32, i32) {
    %c0_i32 = arith.constant 0 : i32
    %c0_i32_0 = arith.constant 0 : i32
    %c0_i32_1 = arith.constant 0 : i32
    %c0_i32_2 = arith.constant 0 : i32
    return %c0_i32, %c0_i32_0, %c0_i32_1 : i32, i32, i32
  }
  func.func @transform_9(%arg0: i32) -> (i32, i32, i32) {
    %c0_i32 = arith.constant 0 : i32
    %c0_i32_0 = arith.constant 0 : i32
    %c0_i32_1 = arith.constant 0 : i32
    %c0_i32_2 = arith.constant 0 : i32
    return %c0_i32, %c0_i32_0, %c0_i32_1 : i32, i32, i32
  }
  func.func @transform_10(%arg0: i32) -> (i32, i32, i32) {
    %c0_i32 = arith.constant 0 : i32
    %c0_i32_0 = arith.constant 0 : i32
    %c0_i32_1 = arith.constant 0 : i32
    %c0_i32_2 = arith.constant 0 : i32
    return %c0_i32, %c0_i32_0, %c0_i32_1 : i32, i32, i32
  }
  func.func @transform_11(%arg0: i32) -> (i32, i32, i32) {
    %c0_i32 = arith.constant 0 : i32
    %c0_i32_0 = arith.constant 0 : i32
    %c0_i32_1 = arith.constant 0 : i32
    %c0_i32_2 = arith.constant 0 : i32
    return %c0_i32, %c0_i32_0, %c0_i32_1 : i32, i32, i32
  }
  func.func @transform_12(%arg0: i32) -> (i32, i32, i32) {
    %c0_i32 = arith.constant 0 : i32
    %c0_i32_0 = arith.constant 0 : i32
    %c0_i32_1 = arith.constant 0 : i32
    %c0_i32_2 = arith.constant 0 : i32
    return %c0_i32, %c0_i32_0, %c0_i32_1 : i32, i32, i32
  }
  func.func @transform_13(%arg0: i32) -> (i32, i32, i32) {
    %c0_i32 = arith.constant 0 : i32
    %c0_i32_0 = arith.constant 0 : i32
    %c0_i32_1 = arith.constant 0 : i32
    %c0_i32_2 = arith.constant 0 : i32
    return %c0_i32, %c0_i32_0, %c0_i32_1 : i32, i32, i32
  }
  func.func @transform_14(%arg0: i32) -> (i32, i32) {
    %c0_i32 = arith.constant 0 : i32
    %c0_i32_0 = arith.constant 0 : i32
    %c0_i32_1 = arith.constant 0 : i32
    return %c0_i32, %c0_i32_0 : i32, i32
  }
  func.func @transform_15(%arg0: i32) -> (i32, i32) {
    %c0_i32 = arith.constant 0 : i32
    %c0_i32_0 = arith.constant 0 : i32
    %c0_i32_1 = arith.constant 0 : i32
    return %c0_i32, %c0_i32_0 : i32, i32
  }
  func.func @transform_16(%arg0: i32) -> (i32, i32) {
    %c0_i32 = arith.constant 0 : i32
    %c0_i32_0 = arith.constant 0 : i32
    %c0_i32_1 = arith.constant 0 : i32
    return %c0_i32, %c0_i32_0 : i32, i32
  }
  func.func @transform_17(%arg0: i32) -> (i32, i32, i32) {
    %c0_i32 = arith.constant 0 : i32
    %c0_i32_0 = arith.constant 0 : i32
    %c0_i32_1 = arith.constant 0 : i32
    %c0_i32_2 = arith.constant 0 : i32
    return %c0_i32, %c0_i32_0, %c0_i32_1 : i32, i32, i32
  }
  func.func @transform_18(%arg0: i32) -> (i32, i32, i32) {
    %c0_i32 = arith.constant 0 : i32
    %c0_i32_0 = arith.constant 0 : i32
    %c0_i32_1 = arith.constant 0 : i32
    %c0_i32_2 = arith.constant 0 : i32
    return %c0_i32, %c0_i32_0, %c0_i32_1 : i32, i32, i32
  }
  func.func @transform_19(%arg0: i32) -> (i32, i32, i32) {
    %c0_i32 = arith.constant 0 : i32
    %c0_i32_0 = arith.constant 0 : i32
    %c0_i32_1 = arith.constant 0 : i32
    %c0_i32_2 = arith.constant 0 : i32
    return %c0_i32, %c0_i32_0, %c0_i32_1 : i32, i32, i32
  }
  func.func @transform_20(%arg0: i32) -> (i32, i32, i32) {
    %c0_i32 = arith.constant 0 : i32
    %c0_i32_0 = arith.constant 0 : i32
    %c0_i32_1 = arith.constant 0 : i32
    %c0_i32_2 = arith.constant 0 : i32
    return %c0_i32, %c0_i32_0, %c0_i32_1 : i32, i32, i32
  }
  func.func @transform_21(%arg0: i32) -> (i32, i32, i32) {
    %c0_i32 = arith.constant 0 : i32
    %c0_i32_0 = arith.constant 0 : i32
    %c0_i32_1 = arith.constant 0 : i32
    %c0_i32_2 = arith.constant 0 : i32
    return %c0_i32, %c0_i32_0, %c0_i32_1 : i32, i32, i32
  }
  func.func @transform_22(%arg0: i32) -> (i32, i32, i32) {
    %c0_i32 = arith.constant 0 : i32
    %c0_i32_0 = arith.constant 0 : i32
    %c0_i32_1 = arith.constant 0 : i32
    %c0_i32_2 = arith.constant 0 : i32
    return %c0_i32, %c0_i32_0, %c0_i32_1 : i32, i32, i32
  }
  func.func @transform_23(%arg0: i32) -> (i32, i32, i32) {
    %c0_i32 = arith.constant 0 : i32
    %c0_i32_0 = arith.constant 0 : i32
    %c0_i32_1 = arith.constant 0 : i32
    %c0_i32_2 = arith.constant 0 : i32
    return %c0_i32, %c0_i32_0, %c0_i32_1 : i32, i32, i32
  }
  func.func @transform_24(%arg0: i32) -> (i32, i32) {
    %c0_i32 = arith.constant 0 : i32
    %c0_i32_0 = arith.constant 0 : i32
    %c0_i32_1 = arith.constant 0 : i32
    return %c0_i32, %c0_i32_0 : i32, i32
  }
  func.func @transform_25(%arg0: i32) -> (i32, i32) {
    %c0_i32 = arith.constant 0 : i32
    %c0_i32_0 = arith.constant 0 : i32
    %c0_i32_1 = arith.constant 0 : i32
    return %c0_i32, %c0_i32_0 : i32, i32
  }
  func.func @transform_26(%arg0: i32) -> (i32, i32) {
    %c0_i32 = arith.constant 0 : i32
    %c0_i32_0 = arith.constant 0 : i32
    %c0_i32_1 = arith.constant 0 : i32
    return %c0_i32, %c0_i32_0 : i32, i32
  }
  func.func @transform_27(%arg0: i32) -> (i32, i32) {
    %c0_i32 = arith.constant 0 : i32
    %c0_i32_0 = arith.constant 0 : i32
    %c0_i32_1 = arith.constant 0 : i32
    return %c0_i32, %c0_i32_0 : i32, i32
  }
  func.func @transform_28(%arg0: i32) -> (i32, i32) {
    %c0_i32 = arith.constant 0 : i32
    %c0_i32_0 = arith.constant 0 : i32
    %c0_i32_1 = arith.constant 0 : i32
    return %c0_i32, %c0_i32_0 : i32, i32
  }
  func.func @transform_29(%arg0: i32) -> (i32, i32) {
    %c0_i32 = arith.constant 0 : i32
    %c0_i32_0 = arith.constant 0 : i32
    %c0_i32_1 = arith.constant 0 : i32
    return %c0_i32, %c0_i32_0 : i32, i32
  }
  func.func @transform_30(%arg0: i32) -> (i32, i32) {
    %c0_i32 = arith.constant 0 : i32
    %c0_i32_0 = arith.constant 0 : i32
    %c0_i32_1 = arith.constant 0 : i32
    return %c0_i32, %c0_i32_0 : i32, i32
  }
  func.func @transform_31(%arg0: i32) -> (i32, i32) {
    %c0_i32 = arith.constant 0 : i32
    %c0_i32_0 = arith.constant 0 : i32
    %c0_i32_1 = arith.constant 0 : i32
    return %c0_i32, %c0_i32_0 : i32, i32
  }
  func.func @transform_32(%arg0: i32) -> (i32, i32) {
    %c0_i32 = arith.constant 0 : i32
    %c0_i32_0 = arith.constant 0 : i32
    %c0_i32_1 = arith.constant 0 : i32
    return %c0_i32, %c0_i32_0 : i32, i32
  }
  func.func @transform_33(%arg0: i32) -> (i32, i32) {
    %c0_i32 = arith.constant 0 : i32
    %c0_i32_0 = arith.constant 0 : i32
    %c0_i32_1 = arith.constant 0 : i32
    return %c0_i32, %c0_i32_0 : i32, i32
  }
  func.func @transform_34(%arg0: i32) -> (i32, i32) {
    %c0_i32 = arith.constant 0 : i32
    %c0_i32_0 = arith.constant 0 : i32
    %c0_i32_1 = arith.constant 0 : i32
    return %c0_i32, %c0_i32_0 : i32, i32
  }
  func.func @transform_35(%arg0: i32) -> (i32, i32, i32) {
    %c0_i32 = arith.constant 0 : i32
    %c0_i32_0 = arith.constant 0 : i32
    %c0_i32_1 = arith.constant 0 : i32
    return %arg0, %c0_i32, %c0_i32_0 : i32, i32, i32
  }
}

</mosaic_0001>

<bundles_post_ra>
// kernel: transformer_forward.2
= control target key start
LH: loop header
LB: loop body
LE: loop exit
PB: predicated region body
PF: predicated region fallthrough
CT: control target
= control target key end

     0   :  { %s8173_s0 = inlined_call_operand.vmem [shape: f32[2,8,32], index: 0, kind: input, shape index: {}]   ;;  %s8174_s1 = inlined_call_operand.vmem [shape: f32[1,150,32], index: 1, kind: input, shape index: {}]   ;;  %s8175_s2 = inlined_call_operand.vmem [shape: f32[1,32], index: 2, kind: input, shape index: {}]   ;;  %s8176_s3 = inlined_call_operand.vmem [shape: f32[1,32], index: 3, kind: input, shape index: {}]   ;;  %s8177_s4 = inlined_call_operand.vmem [shape: s32[2,1,8], index: 4, kind: input, shape index: {}]   ;;  %s8178_s5 = inlined_call_operand.vmem [shape: bf16[8,32,8], index: 5, kind: input, shape index: {}]   ;;  %s8179_s6 = inlined_call_operand.vmem [shape: f32[8,1,8], index: 6, kind: input, shape index: {}]   ;;  %s8180_s7 = inlined_call_operand.vmem [shape: bf16[8,32,8], index: 7, kind: input, shape index: {}]   ;;  %s8181_s8 = inlined_call_operand.vmem [shape: f32[8,1,8], index: 8, kind: input, shape index: {}]   ;;  %s8182_s9 = inlined_call_operand.vmem [shape: bf16[8,32,8], index: 9, kind: input, shape index: {}]   ;;  %s8183_s10 = inlined_call_operand.vmem [shape: f32[8,1,8], index: 10, kind: input, shape index: {}]   ;;  %s8184_s11 = inlined_call_operand.vmem [shape: bf16[8,8,32], index: 11, kind: input, shape index: {}]   ;;  %s8185_s12 = inlined_call_operand.vmem [shape: f32[1,32], index: 12, kind: input, shape index: {}]   ;;  %s8186_s13 = inlined_call_operand.vmem [shape: f32[1,32], index: 13, kind: input, shape index: {}]   ;;  %s8187_s14 = inlined_call_operand.vmem [shape: f32[1,32], index: 14, kind: input, shape index: {}]   ;;  %s8188_s15 = inlined_call_operand.vmem [shape: bf16[32,2048], index: 15, kind: input, shape index: {}]   ;;  %s8189_s16 = inlined_call_operand.vmem [shape: f32[1,2048], index: 16, kind: input, shape index: {}]   ;;  %s8190_s17 = inlined_call_operand.vmem [shape: bf16[2048,32], index: 17, kind: input, shape index: {}]   ;;  %s8191_s18 = inlined_call_operand.vmem [shape: f32[1,32], index: 18, kind: input, shape index: {}]   ;;  %s8192_s19 = inlined_call_operand.vmem [shape: f32[1,32], index: 19, kind: input, shape index: {}]   ;;  %s8193_s20 = inlined_call_operand.vmem [shape: f32[1,32], index: 20, kind: input, shape index: {}]   ;;  %s8194_s21 = inlined_call_operand.vmem [shape: f32[2,8,32], index: 21, kind: output, shape index: {}]  }
   0x1   :  { %8196 = sst [smem:[#allocation2_spill]] %s8173_s0 }
   0x2   :  { %8197 = sst [smem:[#allocation3_spill]] %s8174_s1 }
   0x3   :  { %8198 = sst [smem:[#allocation4_spill]] %s8175_s2  ;;  %s6896_s2 = smov 0  }
   0x4   :  { %8199 = sst [smem:[#allocation5_spill]] %s8176_s3 }
   0x5   :  { %8200 = sst [smem:[#allocation6_spill]] %s8177_s4 }
   0x6   :  { %8201 = sst [smem:[#allocation7_spill]] %s8178_s5 }
   0x7 LB: > { %s5613_s25 = sadd.s32 4294967295, %s6781_s2   ;;  %p5617_p0 = scmp.ge.s32.totalorder %s6781_s2, 1  ;;  %s6781_s2 = sphi %s6896_s2, %s31_s2  }
   0x8   : > { %p594_p1 = scmp.lt.s32.totalorder %s6781_s2, 3 }
   0xa   : > { %p595_p2 = pnand %p5617_p0, %p594_p1 }
   0xb   : > { %p655_p3 = scmp.lt.s32.totalorder (!%p595_p2), %s5613_s25, 1  ;;  %s8202_s28 = sld [smem:[#allocation2_spill]] (!%p595_p2) }
   0xc   : > { %598 = sbr.rel (%p595_p2) target bundleno = 2623 (0xa3f), region = 104  ;;  %s8203_s30 = sld [smem:[#allocation3_spill]] (!%p595_p2) }
   0xd   : > { %s8204_s23 = sld [smem:[#allocation7_spill]] (!%p595_p2) }
   0xe   : > { %s8206_s1 = sld [smem:[#allocation5_spill]] (!%p595_p2) }
   0xf   : > { %s8207_s0 = sld [smem:[#allocation6_spill]] (!%p595_p2) }
  0x11   : > { %s8211_s25 = smov (!%p655_p3, %s5613_s25), 1  ;;  %vm673_vm0 = vcmask 261120   ;;  %v6783_v12 = vmov 0.0   ;;  %vm6784_vm1 = vmmov 0   ;;  %v6577_v37 = vld [vmem:[%s8180_s7 + $0x8] sm:$0xff]   ;;  %v6578_v38 = vld [vmem:[%s8180_s7 + $0x18] sm:$0xff]  }
  0x12   : > { %s5618_s26 = sshll.u32 %s8211_s25, 3  ;;  %v668_v0 = vld [vmem:[%s8203_s30] sm:$0xff]  ;;  %6214 = vmatprep.subr.bf16.mxu0 %v6783_v12  ;;  %6222 = vmatprep.subr.bf16.mxu1 %v6783_v12  ;;  %s8205_s30 = sld [smem:[#allocation4_spill]]  ;;  %v6580_v40 = vld [vmem:[%s8180_s7 + $0x10] sm:$0xff]   ;;  %v6581_v41 = vld [vmem:[%s8180_s7 + $0x28] sm:$0xff]   ;;  %vm2247_vm2 = vcmask 64512  }
  0x13   : > { %s658_s29 = scalar_lea.vmem %s8202_s28, %s5618_s26  ;;  %v6561_v10 = vld [vmem:[%s8204_s23 + $0x8] sm:$0xff]   ;;  %v6562_v11 = vld [vmem:[%s8204_s23 + $0x18] sm:$0xff]   ;;  %v6563_v13 = vld [vmem:[%s8204_s23] sm:$0xff]   ;;  %6218 = vmatprep.mubr.msk.bf16.mxu0 %vm6784_vm1, %v6783_v12  ;;  %6226 = vmatprep.mubr.msk.bf16.mxu1 %vm6784_vm1, %v6783_v12  ;;  %vm2737_vm3 = vcmask 1043456  }
  0x14   : > { %v667_v1 = vld [vmem:[%s658_s29] sm:$0xff]  ;;  %6215 = vmatpush3.bf16.msra.mxu0 %v6561_v10  ;;  %6223 = vmatpush3.bf16.msra.mxu1 %v6562_v11  ;;  %v6564_v14 = vld [vmem:[%s8204_s23 + $0x10] sm:$0xff]   ;;  %v6565_v24 = vld [vmem:[%s8204_s23 + $0x28] sm:$0xff]  }
  0x15   : > { %v671_v2 = vmul.f32 5.656854, %v667_v1  ;;  %6216 = vmatprep.subr.bf16.mxu0 %v6783_v12  ;;  %6224 = vmatprep.subr.bf16.mxu1 %v6783_v12  ;;  %v5621_v21 = vld [vmem:[%s8206_s1] ss:$0 sm:$0xff]  ;;  %v6566_v25 = vld [vmem:[%s8204_s23 + $0x38] sm:$0xff]   ;;  %v6568_v28 = vld [vmem:[%s8204_s23 + $0x30] sm:$0xff]   ;;  %s661_s4 = scalar_lea.vmem %s8207_s0, %s8211_s25  ;;  %s665_s1 = scalar_lea.vmem %s8194_s21, %s5618_s26 }
  0x16   : > { %v6567_v27 = vld [vmem:[%s8204_s23 + $0x20] sm:$0xff]   ;;  %v6569_v29 = vld [vmem:[%s8204_s23 + $0x48] sm:$0xff]   ;;  %v6570_v30 = vld [vmem:[%s8204_s23 + $0x58] sm:$0xff]  }
  0x17   : > { %v672_v3 = vadd.f32 %v671_v2, %v668_v0  ;;  %v6571_v31 = vld [vmem:[%s8204_s23 + $0x40] sm:$0xff]   ;;  %v6572_v32 = vld [vmem:[%s8204_s23 + $0x50] sm:$0xff]   ;;  %v6573_v33 = vld [vmem:[%s8204_s23 + $0x68] sm:$0xff]  }
  0x18   : > { %6217 = vmatpush3.bf16.msra.mxu0 %v6563_v13  ;;  %6225 = vmatpush3.bf16.msra.mxu1 %v6564_v14  ;;  %v5620_v19 = vld [vmem:[%s8205_s30] ss:$0 sm:$0xff]  ;;  %v6574_v34 = vld [vmem:[%s8204_s23 + $0x78] sm:$0xff]   ;;  %v6576_v36 = vld [vmem:[%s8204_s23 + $0x70] sm:$0xff]  }
  0x19   : > { %v674_v4 = vsel %vm673_vm0, %v672_v3, 0.0  ;;  %6230 = vmatprep.subr.bf16.mxu0 %v6783_v12  ;;  %6238 = vmatprep.subr.bf16.mxu1 %v6783_v12  ;;  %v6575_v35 = vld [vmem:[%s8204_s23 + $0x60] sm:$0xff]   ;;  %v6582_v42 = vld [vmem:[%s8180_s7 + $0x38] sm:$0xff]   ;;  %v6584_v44 = vld [vmem:[%s8180_s7 + $0x30] sm:$0xff]  }
  0x1a   : > { %675 = vadd.xlane.f32.xlu0 %v674_v4  ;;  %v6579_v39 = vld [vmem:[%s8180_s7] sm:$0xff]   ;;  %v6585_v45 = vld [vmem:[%s8180_s7 + $0x48] sm:$0xff]   ;;  %v6586_v46 = vld [vmem:[%s8180_s7 + $0x58] sm:$0xff]  }
  0x1b   : > { %v6583_v43 = vld [vmem:[%s8180_s7 + $0x20] sm:$0xff]   ;;  %v6588_v48 = vld [vmem:[%s8180_s7 + $0x50] sm:$0xff]   ;;  %v6589_v49 = vld [vmem:[%s8180_s7 + $0x68] sm:$0xff]  }
  0x1c   : > { %v6587_v47 = vld [vmem:[%s8180_s7 + $0x40] sm:$0xff]   ;;  %v6590_v50 = vld [vmem:[%s8180_s7 + $0x78] sm:$0xff]   ;;  %v6592_v52 = vld [vmem:[%s8180_s7 + $0x70] sm:$0xff]  }
  0x1d   : > { %v6591_v51 = vld [vmem:[%s8180_s7 + $0x60] sm:$0xff]   ;;  %v6593_v53 = vld [vmem:[%s8182_s9 + $0x8] sm:$0xff]   ;;  %v6594_v54 = vld [vmem:[%s8182_s9 + $0x18] sm:$0xff]  }
  0x1e   : > { %v6595_v55 = vld [vmem:[%s8182_s9] sm:$0xff]   ;;  %v6596_v56 = vld [vmem:[%s8182_s9 + $0x10] sm:$0xff]   ;;  %v6597_v57 = vld [vmem:[%s8182_s9 + $0x28] sm:$0xff]  }
  0x1f   : > { %v6598_v58 = vld [vmem:[%s8182_s9 + $0x38] sm:$0xff]   ;;  %v6599_v59 = vld [vmem:[%s8182_s9 + $0x20] sm:$0xff]   ;;  %v6600_v60 = vld [vmem:[%s8182_s9 + $0x30] sm:$0xff]  }
  0x20   : > { %v6601_v61 = vld [vmem:[%s8182_s9 + $0x48] sm:$0xff]   ;;  %v6602_v62 = vld [vmem:[%s8182_s9 + $0x58] sm:$0xff]   ;;  %v6603_v63 = vld [vmem:[%s8182_s9 + $0x40] sm:$0xff]  }
  0x21   : > { %v6604_v0 = vld [vmem:[%s8182_s9 + $0x50] sm:$0xff]   ;;  %v6605_v1 = vld [vmem:[%s8182_s9 + $0x68] sm:$0xff]   ;;  %v6606_v2 = vld [vmem:[%s8182_s9 + $0x78] sm:$0xff]  }
  0x22   : > { %v6608_v4 = vld [vmem:[%s8182_s9 + $0x70] sm:$0xff]  }
  0xa3   : > { %v676_v5 = vpop.xlane.xlu0 %675 }
  0xa4   : > { %v678_v6 = vmul.f32 0.03125, %v676_v5 }
  0xa6   : > { %v679_v7 = vsub.f32 %v672_v3, %v678_v6  ;;  %v6607_v3 = vld [vmem:[%s8182_s9 + $0x60] sm:$0xff]  }
  0xa8   : > { %v680_v8 = vmul.f32 %v679_v7, %v679_v7 }
  0xaa   : > { %v681_v9 = vsel %vm673_vm0, %v680_v8, 0.0 }
  0xab   : > { %682 = vadd.xlane.f32.xlu0 %v681_v9 }
 0x134   : > { %v683_v15 = vpop.xlane.xlu0 %682 }
 0x135   : > { %v684_v16 = vmul.f32 0.03125, %v683_v15 }
 0x137   : > { %v685_v17 = vadd.f32 1e-05, %v684_v16 }
 0x139   : > { %6737 = vrsqrt.f32 %v685_v17 }
 0x146   : > { %v6738_v18 = vpop.eup %6737 }
 0x147   : > { %v687_v20 = vmul.f32 %v6738_v18, %v679_v7 }
 0x149   : > { %v694_v22 = vmul.f32 %v5620_v19, %v687_v20 }
 0x14b   : > { %v6945_v23 = vadd.f32 %v5621_v21, %v694_v22 }
 0x14d   : > { %v6955_v26 = vpack.c.bf16 %v6945_v23, %v6945_v23 }
 0x14f   : > { %6219 = vmatmul.mubr.msk.bf16.vlgmr.msra.gmra.mxu0 %vm673_vm0, %v6955_v26  ;;  %6227 = vmatmul.mubr.msk.bf16.vlgmr.msra.gmra.mxu1 %vm673_vm0, %v6955_v26 }
 0x150   : > { %6231 = vmatpush3.bf16.msra.mxu0 %v6565_v24  ;;  %6239 = vmatpush3.bf16.msra.mxu1 %v6566_v25 }
 0x151   : > { %6232 = vmatprep.subr.bf16.mxu0 %v6783_v12  ;;  %6240 = vmatprep.subr.bf16.mxu1 %v6783_v12 }
 0x152   : > { %6234 = vmatprep.mubr.msk.bf16.mxu0 %vm6784_vm1, %v6783_v12  ;;  %6242 = vmatprep.mubr.msk.bf16.mxu1 %vm6784_vm1, %v6783_v12 }
 0x154   : > { %6233 = vmatpush3.bf16.msra.mxu0 %v6567_v27  ;;  %6241 = vmatpush3.bf16.msra.mxu1 %v6568_v28 }
 0x155   : > { %6246 = vmatprep.subr.bf16.mxu0 %v6783_v12  ;;  %6254 = vmatprep.subr.bf16.mxu1 %v6783_v12 }
 0x157   : > { %6235 = vmatmul.mubr.msk.bf16.vlgmr.msra.gmra.mxu0 %vm673_vm0, %v6955_v26  ;;  %6243 = vmatmul.mubr.msk.bf16.vlgmr.msra.gmra.mxu1 %vm673_vm0, %v6955_v26 }
 0x158   : > { %6247 = vmatpush3.bf16.msra.mxu0 %v6569_v29  ;;  %6255 = vmatpush3.bf16.msra.mxu1 %v6570_v30 }
 0x159   : > { %6248 = vmatprep.subr.bf16.mxu0 %v6783_v12  ;;  %6256 = vmatprep.subr.bf16.mxu1 %v6783_v12 }
 0x15a   : > { %6250 = vmatprep.mubr.msk.bf16.mxu0 %vm6784_vm1, %v6783_v12  ;;  %6258 = vmatprep.mubr.msk.bf16.mxu1 %vm6784_vm1, %v6783_v12 }
 0x15c   : > { %6249 = vmatpush3.bf16.msra.mxu0 %v6571_v31  ;;  %6257 = vmatpush3.bf16.msra.mxu1 %v6572_v32 }
 0x15d   : > { %6262 = vmatprep.subr.bf16.mxu0 %v6783_v12  ;;  %6270 = vmatprep.subr.bf16.mxu1 %v6783_v12 }
 0x15f   : > { %6251 = vmatmul.mubr.msk.bf16.vlgmr.msra.gmra.mxu0 %vm673_vm0, %v6955_v26  ;;  %6259 = vmatmul.mubr.msk.bf16.vlgmr.msra.gmra.mxu1 %vm673_vm0, %v6955_v26 }
 0x160   : > { %6263 = vmatpush3.bf16.msra.mxu0 %v6573_v33  ;;  %6271 = vmatpush3.bf16.msra.mxu1 %v6574_v34 }
 0x161   : > { %6264 = vmatprep.subr.bf16.mxu0 %v6783_v12  ;;  %6272 = vmatprep.subr.bf16.mxu1 %v6783_v12 }
 0x162   : > { %6266 = vmatprep.mubr.msk.bf16.mxu0 %vm6784_vm1, %v6783_v12  ;;  %6274 = vmatprep.mubr.msk.bf16.mxu1 %vm6784_vm1, %v6783_v12 }
 0x164   : > { %6265 = vmatpush3.bf16.msra.mxu0 %v6575_v35  ;;  %6273 = vmatpush3.bf16.msra.mxu1 %v6576_v36 }
 0x165   : > { %6278 = vmatprep.subr.bf16.mxu0 %v6783_v12  ;;  %6286 = vmatprep.subr.bf16.mxu1 %v6783_v12 }
 0x167   : > { %6267 = vmatmul.mubr.msk.bf16.vlgmr.msra.gmra.mxu0 %vm673_vm0, %v6955_v26  ;;  %6275 = vmatmul.mubr.msk.bf16.vlgmr.msra.gmra.mxu1 %vm673_vm0, %v6955_v26 }
 0x168   : > { %6279 = vmatpush3.bf16.msra.mxu0 %v6577_v37  ;;  %6287 = vmatpush3.bf16.msra.mxu1 %v6578_v38 }
 0x169   : > { %6280 = vmatprep.subr.bf16.mxu0 %v6783_v12  ;;  %6288 = vmatprep.subr.bf16.mxu1 %v6783_v12 }
 0x16a   : > { %6282 = vmatprep.mubr.msk.bf16.mxu0 %vm6784_vm1, %v6783_v12  ;;  %6290 = vmatprep.mubr.msk.bf16.mxu1 %vm6784_vm1, %v6783_v12 }
 0x16c   : > { %6281 = vmatpush3.bf16.msra.mxu0 %v6579_v39  ;;  %6289 = vmatpush3.bf16.msra.mxu1 %v6580_v40  ;;  %v5654_v39 = vld [vmem:[%s8181_s8] ss:$0 sm:$0xff]  ;;  %v5655_v40 = vld [vmem:[%s8181_s8 + $0x1] ss:$0 sm:$0xff] }
 0x16d   : > { %6294 = vmatprep.subr.bf16.mxu0 %v6783_v12  ;;  %6302 = vmatprep.subr.bf16.mxu1 %v6783_v12 }
 0x16f   : > { %6283 = vmatmul.mubr.msk.bf16.vlgmr.msra.gmra.mxu0 %vm673_vm0, %v6955_v26  ;;  %6291 = vmatmul.mubr.msk.bf16.vlgmr.msra.gmra.mxu1 %vm673_vm0, %v6955_v26 }
 0x170   : > { %6295 = vmatpush3.bf16.msra.mxu0 %v6581_v41  ;;  %6303 = vmatpush3.bf16.msra.mxu1 %v6582_v42 }
 0x171   : > { %6296 = vmatprep.subr.bf16.mxu0 %v6783_v12  ;;  %6304 = vmatprep.subr.bf16.mxu1 %v6783_v12 }
 0x172   : > { %6298 = vmatprep.mubr.msk.bf16.mxu0 %vm6784_vm1, %v6783_v12  ;;  %6306 = vmatprep.mubr.msk.bf16.mxu1 %vm6784_vm1, %v6783_v12 }
 0x174   : > { %6297 = vmatpush3.bf16.msra.mxu0 %v6583_v43  ;;  %6305 = vmatpush3.bf16.msra.mxu1 %v6584_v44 }
 0x175   : > { %6310 = vmatprep.subr.bf16.mxu0 %v6783_v12  ;;  %6318 = vmatprep.subr.bf16.mxu1 %v6783_v12 }
 0x177   : > { %6299 = vmatmul.mubr.msk.bf16.vlgmr.msra.gmra.mxu0 %vm673_vm0, %v6955_v26  ;;  %6307 = vmatmul.mubr.msk.bf16.vlgmr.msra.gmra.mxu1 %vm673_vm0, %v6955_v26 }
 0x178   : > { %6311 = vmatpush3.bf16.msra.mxu0 %v6585_v45  ;;  %6319 = vmatpush3.bf16.msra.mxu1 %v6586_v46 }
 0x179   : > { %6312 = vmatprep.subr.bf16.mxu0 %v6783_v12  ;;  %6320 = vmatprep.subr.bf16.mxu1 %v6783_v12 }
 0x17a   : > { %6314 = vmatprep.mubr.msk.bf16.mxu0 %vm6784_vm1, %v6783_v12  ;;  %6322 = vmatprep.mubr.msk.bf16.mxu1 %vm6784_vm1, %v6783_v12 }
 0x17c   : > { %6313 = vmatpush3.bf16.msra.mxu0 %v6587_v47  ;;  %6321 = vmatpush3.bf16.msra.mxu1 %v6588_v48 }
 0x17d   : > { %6326 = vmatprep.subr.bf16.mxu0 %v6783_v12  ;;  %6334 = vmatprep.subr.bf16.mxu1 %v6783_v12 }
 0x17f   : > { %6315 = vmatmul.mubr.msk.bf16.vlgmr.msra.gmra.mxu0 %vm673_vm0, %v6955_v26  ;;  %6323 = vmatmul.mubr.msk.bf16.vlgmr.msra.gmra.mxu1 %vm673_vm0, %v6955_v26 }
 0x180   : > { %6327 = vmatpush3.bf16.msra.mxu0 %v6589_v49  ;;  %6335 = vmatpush3.bf16.msra.mxu1 %v6590_v50  ;;  %v5622_v49 = vld [vmem:[%s8179_s6] ss:$0 sm:$0xff]  ;;  %v5623_v50 = vld [vmem:[%s8179_s6 + $0x1] ss:$0 sm:$0xff] }
 0x181   : > { %6328 = vmatprep.subr.bf16.mxu0 %v6783_v12  ;;  %6336 = vmatprep.subr.bf16.mxu1 %v6783_v12 }
 0x182   : > { %6330 = vmatprep.mubr.msk.bf16.mxu0 %vm6784_vm1, %v6783_v12  ;;  %6338 = vmatprep.mubr.msk.bf16.mxu1 %vm6784_vm1, %v6783_v12 }
 0x184   : > { %6329 = vmatpush3.bf16.msra.mxu0 %v6591_v51  ;;  %6337 = vmatpush3.bf16.msra.mxu1 %v6592_v52 }
 0x185   : > { %6342 = vmatprep.subr.bf16.mxu0 %v6783_v12  ;;  %6350 = vmatprep.subr.bf16.mxu1 %v6783_v12 }
 0x187   : > { %6331 = vmatmul.mubr.msk.bf16.vlgmr.msra.gmra.mxu0 %vm673_vm0, %v6955_v26  ;;  %6339 = vmatmul.mubr.msk.bf16.vlgmr.msra.gmra.mxu1 %vm673_vm0, %v6955_v26 }
 0x188   : > { %6343 = vmatpush3.bf16.msra.mxu0 %v6593_v53  ;;  %6351 = vmatpush3.bf16.msra.mxu1 %v6594_v54 }
 0x189   : > { %6344 = vmatprep.subr.bf16.mxu0 %v6783_v12  ;;  %6352 = vmatprep.subr.bf16.mxu1 %v6783_v12 }
 0x18a   : > { %6346 = vmatprep.mubr.msk.bf16.mxu0 %vm6784_vm1, %v6783_v12  ;;  %6354 = vmatprep.mubr.msk.bf16.mxu1 %vm6784_vm1, %v6783_v12 }
 0x18c   : > { %6345 = vmatpush3.bf16.msra.mxu0 %v6595_v55  ;;  %6353 = vmatpush3.bf16.msra.mxu1 %v6596_v56 }
 0x18d   : > { %6358 = vmatprep.subr.bf16.mxu0 %v6783_v12  ;;  %6366 = vmatprep.subr.bf16.mxu1 %v6783_v12 }
 0x18f   : > { %6347 = vmatmul.mubr.msk.bf16.vlgmr.msra.gmra.mxu0 %vm673_vm0, %v6955_v26  ;;  %6355 = vmatmul.mubr.msk.bf16.vlgmr.msra.gmra.mxu1 %vm673_vm0, %v6955_v26 }
 0x190   : > { %6359 = vmatpush3.bf16.msra.mxu0 %v6597_v57  ;;  %6367 = vmatpush3.bf16.msra.mxu1 %v6598_v58  ;;  %v5656_v57 = vld [vmem:[%s8181_s8 + $0x2] ss:$0 sm:$0xff]  ;;  %v5657_v58 = vld [vmem:[%s8181_s8 + $0x3] ss:$0 sm:$0xff] }
 0x191   : > { %6360 = vmatprep.subr.bf16.mxu0 %v6783_v12  ;;  %6368 = vmatprep.subr.bf16.mxu1 %v6783_v12 }
 0x192   : > { %6362 = vmatprep.mubr.msk.bf16.mxu0 %vm6784_vm1, %v6783_v12  ;;  %6370 = vmatprep.mubr.msk.bf16.mxu1 %vm6784_vm1, %v6783_v12 }
 0x194   : > { %6361 = vmatpush3.bf16.msra.mxu0 %v6599_v59  ;;  %6369 = vmatpush3.bf16.msra.mxu1 %v6600_v60 }
 0x195   : > { %6374 = vmatprep.subr.bf16.mxu0 %v6783_v12  ;;  %6382 = vmatprep.subr.bf16.mxu1 %v6783_v12 }
 0x197   : > { %6363 = vmatmul.mubr.msk.bf16.vlgmr.msra.gmra.mxu0 %vm673_vm0, %v6955_v26  ;;  %6371 = vmatmul.mubr.msk.bf16.vlgmr.msra.gmra.mxu1 %vm673_vm0, %v6955_v26 }
 0x198   : > { %6375 = vmatpush3.bf16.msra.mxu0 %v6601_v61  ;;  %6383 = vmatpush3.bf16.msra.mxu1 %v6602_v62 }
 0x199   : > { %6376 = vmatprep.subr.bf16.mxu0 %v6783_v12  ;;  %6384 = vmatprep.subr.bf16.mxu1 %v6783_v12 }
 0x19a   : > { %6378 = vmatprep.mubr.msk.bf16.mxu0 %vm6784_vm1, %v6783_v12  ;;  %6386 = vmatprep.mubr.msk.bf16.mxu1 %vm6784_vm1, %v6783_v12 }
 0x19c   : > { %6377 = vmatpush3.bf16.msra.mxu0 %v6603_v63  ;;  %6385 = vmatpush3.bf16.msra.mxu1 %v6604_v0 }
 0x19d   : > { %6390 = vmatprep.subr.bf16.mxu0 %v6783_v12  ;;  %6398 = vmatprep.subr.bf16.mxu1 %v6783_v12 }
 0x19f   : > { %6379 = vmatmul.mubr.msk.bf16.vlgmr.msra.gmra.mxu0 %vm673_vm0, %v6955_v26  ;;  %6387 = vmatmul.mubr.msk.bf16.vlgmr.msra.gmra.mxu1 %vm673_vm0, %v6955_v26 }
 0x1a0   : > { %6391 = vmatpush3.bf16.msra.mxu0 %v6605_v1  ;;  %6399 = vmatpush3.bf16.msra.mxu1 %v6606_v2 }
 0x1a1   : > { %6392 = vmatprep.subr.bf16.mxu0 %v6783_v12  ;;  %6400 = vmatprep.subr.bf16.mxu1 %v6783_v12 }
 0x1a2   : > { %6394 = vmatprep.mubr.msk.bf16.mxu0 %vm6784_vm1, %v6783_v12  ;;  %6402 = vmatprep.mubr.msk.bf16.mxu1 %vm6784_vm1, %v6783_v12 }
 0x1a4   : > { %6393 = vmatpush3.bf16.msra.mxu0 %v6607_v3  ;;  %6401 = vmatpush3.bf16.msra.mxu1 %v6608_v4 }
 0x1a5   : > { %6406 = vmatprep.subr.bf16.mxu0 %v6783_v12  ;;  %6412 = vmatprep.subr.bf16.mxu1 %v6783_v12 }
 0x1a7   : > { %6395 = vmatmul.mubr.msk.bf16.vlgmr.msra.gmra.mxu0 %vm673_vm0, %v6955_v26  ;;  %6403 = vmatmul.mubr.msk.bf16.vlgmr.msra.gmra.mxu1 %vm673_vm0, %v6955_v26 }
 0x1a8   : > { %6408 = vmatprep.mubr.msk.bf16.mxu0 %vm6784_vm1, %v6783_v12  ;;  %6414 = vmatprep.mubr.msk.bf16.mxu1 %vm6784_vm1, %v6783_v12 }
 0x20f   : > { %v933_v5 = vpop.f32.mrf.mxu0  ;;  %v985_v6 = vpop.f32.mrf.mxu1 }
 0x210   : > { %v934_v59 = vadd.f32 %v5622_v49, %v933_v5  ;;  %v986_v60 = vadd.f32 %v5623_v50, %v985_v6  ;;  %v5625_v5 = vld [vmem:[%s8179_s6 + $0x3] ss:$0 sm:$0xff] }
 0x211   : > { %v6220_v7 = vpop.f32.mrf.mxu0  ;;  %v6228_v8 = vpop.f32.mrf.mxu1 }
 0x212   : > { %v2231_v3 = vpack.c.bf16 %v934_v59, %v934_v59  ;;  %v2232_v4 = vpack.c.bf16 %v986_v60, %v986_v60 }
 0x213   : > { %v936_v9 = vpop.f32.mrf.mxu0  ;;  %v988_v10 = vpop.f32.mrf.mxu1 }
 0x214   : > { %v5624_v9 = vld [vmem:[%s8179_s6 + $0x2] ss:$0 sm:$0xff] }
 0x215   : > { %v6221_v11 = vpop.f32.mrf.mxu0  ;;  %v6229_v13 = vpop.f32.mrf.mxu1 }
 0x217   : > { %v7223_v14 = vpop.f32.mrf.mxu0  ;;  %v7225_v15 = vpop.f32.mrf.mxu1 }
 0x219   : > { %v6236_v16 = vpop.f32.mrf.mxu0  ;;  %v6244_v17 = vpop.f32.mrf.mxu1 }
 0x21b   : > { %v1040_v18 = vpop.f32.mrf.mxu0  ;;  %v1092_v19 = vpop.f32.mrf.mxu1 }
 0x21c   : > { %v5658_v18 = vld [vmem:[%s8181_s8 + $0x4] ss:$0 sm:$0xff]  ;;  %v5659_v19 = vld [vmem:[%s8181_s8 + $0x5] ss:$0 sm:$0xff] }
 0x21d   : > { %v6237_v20 = vpop.f32.mrf.mxu0  ;;  %v6245_v21 = vpop.f32.mrf.mxu1 }
 0x21e   : > { %v1038_v20 = vadd.f32 %v5624_v9, %v7223_v14  ;;  %v1090_v21 = vadd.f32 %v5625_v5, %v7225_v15 }
 0x21f   : > { %v7227_v22 = vpop.f32.mrf.mxu0  ;;  %v7229_v24 = vpop.f32.mrf.mxu1 }
 0x220   : > { %v2234_v14 = vpack.c.bf16 %v1090_v21, %v1090_v21 }
 0x221   : > { %v6252_v25 = vpop.f32.mrf.mxu0  ;;  %v6260_v26 = vpop.f32.mrf.mxu1 }
 0x223   : > { %v1144_v27 = vpop.f32.mrf.mxu0  ;;  %v1196_v28 = vpop.f32.mrf.mxu1 }
 0x225   : > { %v6253_v29 = vpop.f32.mrf.mxu0  ;;  %v6261_v30 = vpop.f32.mrf.mxu1 }
 0x227   : > { %v7231_v31 = vpop.f32.mrf.mxu0  ;;  %v7233_v32 = vpop.f32.mrf.mxu1 }
 0x229   : > { %v6268_v33 = vpop.f32.mrf.mxu0  ;;  %v6276_v34 = vpop.f32.mrf.mxu1 }
 0x22a   : > { %v2233_v33 = vpack.c.bf16 %v1038_v20, %v1038_v20 }
 0x22b   : > { %v1248_v35 = vpop.f32.mrf.mxu0  ;;  %v1300_v36 = vpop.f32.mrf.mxu1 }
 0x22c   : > { %v5626_v35 = vld [vmem:[%s8179_s6 + $0x4] ss:$0 sm:$0xff]  ;;  %v5627_v36 = vld [vmem:[%s8179_s6 + $0x5] ss:$0 sm:$0xff] }
 0x22d   : > { %v6269_v37 = vpop.f32.mrf.mxu0  ;;  %v6277_v38 = vpop.f32.mrf.mxu1 }
 0x22f   : > { %v1397_v41 = vpop.f32.mrf.mxu0  ;;  %v1449_v42 = vpop.f32.mrf.mxu1 }
 0x230   : > { %v1398_v43 = vadd.f32 %v5654_v39, %v1397_v41  ;;  %v1450_v44 = vadd.f32 %v5655_v40, %v1449_v42 }
 0x231   : > { %v6284_v45 = vpop.f32.mrf.mxu0  ;;  %v6292_v46 = vpop.f32.mrf.mxu1 }
 0x232   : > { %v2239_v47 = vpack.c.bf16 %v1398_v43, %v1398_v43  ;;  %v2240_v48 = vpack.c.bf16 %v1450_v44, %v1450_v44  ;;  %v5660_v43 = vld [vmem:[%s8181_s8 + $0x6] ss:$0 sm:$0xff]  ;;  %v5661_v44 = vld [vmem:[%s8181_s8 + $0x7] ss:$0 sm:$0xff]  ;;  %v1142_v45 = vadd.f32 %v5626_v35, %v7227_v22  ;;  %v1194_v46 = vadd.f32 %v5627_v36, %v7229_v24 }
 0x233   : > { %v1400_v51 = vpop.f32.mrf.mxu0  ;;  %v1452_v52 = vpop.f32.mrf.mxu1 }
 0x234   : > { %v2252_v53 = vsel %vm2247_vm2, %v2239_v47, 0  ;;  %v2298_v54 = vsel %vm2247_vm2, %v2240_v48, 0  ;;  %v2236_v22 = vpack.c.bf16 %v1194_v46, %v1194_v46 }
 0x235   : > { %v6285_v55 = vpop.f32.mrf.mxu0  ;;  %v6293_v56 = vpop.f32.mrf.mxu1  ;;  %6407 = vmatpush3.bf16.xpose.msra.mxu0 %v2252_v53  ;;  %6413 = vmatpush3.bf16.xpose.msra.mxu1 %v2298_v54  ;;  %v2235_v53 = vpack.c.bf16 %v1142_v45, %v1142_v45 }
 0x236   : > { %6418 = vmatprep.subr.bf16.mxu0 %v6783_v12  ;;  %6424 = vmatprep.subr.bf16.mxu1 %v6783_v12  ;;  %v5628_v55 = vld [vmem:[%s8179_s6 + $0x6] ss:$0 sm:$0xff]  ;;  %v5629_v56 = vld [vmem:[%s8179_s6 + $0x7] ss:$0 sm:$0xff] }
 0x237   : > { %v1501_v61 = vpop.f32.mrf.mxu0  ;;  %v1553_v62 = vpop.f32.mrf.mxu1 }
 0x238   : > { %v1502_v63 = vadd.f32 %v5656_v57, %v1501_v61  ;;  %v1554_v0 = vadd.f32 %v5657_v58, %v1553_v62 }
 0x239   : > { %v6300_v1 = vpop.f32.mrf.mxu0  ;;  %v6308_v2 = vpop.f32.mrf.mxu1 }
 0x23a   : > { %v2241_v7 = vpack.c.bf16 %v1502_v63, %v1502_v63  ;;  %v2242_v8 = vpack.c.bf16 %v1554_v0, %v1554_v0  ;;  %v5686_v63 = vld [vmem:[%s8183_s10] ss:$0 sm:$0xff]  ;;  %v5687_v0 = vld [vmem:[%s8183_s10 + $0x1] ss:$0 sm:$0xff]  ;;  %v1246_v1 = vadd.f32 %v5628_v55, %v7231_v31  ;;  %v1298_v2 = vadd.f32 %v5629_v56, %v7233_v32 }
 0x23b   : > { %v1504_v6 = vpop.f32.mrf.mxu0  ;;  %v1556_v10 = vpop.f32.mrf.mxu1 }
 0x23c   : > { %v2344_v11 = vsel %vm2247_vm2, %v2241_v7, 0  ;;  %v2390_v13 = vsel %vm2247_vm2, %v2242_v8, 0  ;;  %6409 = vmatmul.mubr.msk.bf16.vlgmr.msra.gmra.mxu0 %vm2247_vm2, %v2231_v3  ;;  %6415 = vmatmul.mubr.msk.bf16.vlgmr.msra.gmra.mxu1 %vm2247_vm2, %v2232_v4  ;;  %v2237_v31 = vpack.c.bf16 %v1246_v1, %v1246_v1  ;;  %v2238_v6 = vpack.c.bf16 %v1298_v2, %v1298_v2 }
 0x23d   : > { %v6301_v16 = vpop.f32.mrf.mxu0  ;;  %v6309_v17 = vpop.f32.mrf.mxu1  ;;  %6419 = vmatpush3.bf16.xpose.msra.mxu0 %v2344_v11  ;;  %6425 = vmatpush3.bf16.xpose.msra.mxu1 %v2390_v13 }
 0x23e   : > { %6420 = vmatprep.mubr.msk.bf16.mxu0 %vm6784_vm1, %v6783_v12  ;;  %6426 = vmatprep.mubr.msk.bf16.mxu1 %vm6784_vm1, %v6783_v12 }
 0x23f   : > { %v1605_v25 = vpop.f32.mrf.mxu0  ;;  %v1657_v26 = vpop.f32.mrf.mxu1  ;;  %6430 = vmatprep.subr.bf16.mxu0 %v6783_v12  ;;  %6436 = vmatprep.subr.bf16.mxu1 %v6783_v12 }
 0x240   : > { %v1606_v27 = vadd.f32 %v5658_v18, %v1605_v25  ;;  %v1658_v28 = vadd.f32 %v5659_v19, %v1657_v26 }
 0x241   : > { %v6316_v29 = vpop.f32.mrf.mxu0  ;;  %v6324_v30 = vpop.f32.mrf.mxu1 }
 0x242   : > { %v2243_v34 = vpack.c.bf16 %v1606_v27, %v1606_v27  ;;  %v2244_v15 = vpack.c.bf16 %v1658_v28, %v1658_v28 }
 0x243   : > { %v1608_v37 = vpop.f32.mrf.mxu0  ;;  %v1660_v38 = vpop.f32.mrf.mxu1 }
 0x244   : > { %v2436_v39 = vsel %vm2247_vm2, %v2243_v34, 0  ;;  %v2482_v40 = vsel %vm2247_vm2, %v2244_v15, 0  ;;  %6421 = vmatmul.mubr.msk.bf16.vlgmr.msra.gmra.mxu0 %vm2247_vm2, %v2233_v33  ;;  %6427 = vmatmul.mubr.msk.bf16.vlgmr.msra.gmra.mxu1 %vm2247_vm2, %v2234_v14 }
 0x245   : > { %v6317_v41 = vpop.f32.mrf.mxu0  ;;  %v6325_v42 = vpop.f32.mrf.mxu1  ;;  %6431 = vmatpush3.bf16.xpose.msra.mxu0 %v2436_v39  ;;  %6437 = vmatpush3.bf16.xpose.msra.mxu1 %v2482_v40 }
 0x246   : > { %6432 = vmatprep.mubr.msk.bf16.mxu0 %vm6784_vm1, %v6783_v12  ;;  %6438 = vmatprep.mubr.msk.bf16.mxu1 %vm6784_vm1, %v6783_v12 }
 0x247   : > { %v1709_v47 = vpop.f32.mrf.mxu0  ;;  %v1761_v48 = vpop.f32.mrf.mxu1  ;;  %6442 = vmatprep.subr.bf16.mxu0 %v6783_v12  ;;  %6448 = vmatprep.subr.bf16.mxu1 %v6783_v12 }
 0x248   : > { %v1710_v49 = vadd.f32 %v5660_v43, %v1709_v47  ;;  %v1762_v50 = vadd.f32 %v5661_v44, %v1761_v48  ;;  %v2617_v47 = vlaneseq  ;;  %v702_v48 = vld [vmem:[%s661_s4] sm:$0x1] }
 0x249   : > { %v6332_v51 = vpop.f32.mrf.mxu0  ;;  %v6340_v52 = vpop.f32.mrf.mxu1  ;;  %vm703_vm4 = vcmp.ne.s32.totalorder %v702_v48, 0 }
 0x24a   : > { %v2245_v54 = vpack.c.bf16 %v1710_v49, %v1710_v49  ;;  %v2246_v24 = vpack.c.bf16 %v1762_v50, %v1762_v50  ;;  %v7355_v49 = vshrl.u32 %v2617_v47, 7  ;;  %v6785_v51 = vmov 0  }
 0x24b   : > { %v1712_v57 = vpop.f32.mrf.mxu0  ;;  %v1764_v58 = vpop.f32.mrf.mxu1  ;;  %v2616_v52 = vsel %vm703_vm4, 1, %v6785_v51 }
 0x24c   : > { %v2528_v59 = vsel %vm2247_vm2, %v2245_v54, 0  ;;  %v2574_v60 = vsel %vm2247_vm2, %v2246_v24, 0  ;;  %6433 = vmatmul.mubr.msk.bf16.vlgmr.msra.gmra.mxu0 %vm2247_vm2, %v2235_v53  ;;  %6439 = vmatmul.mubr.msk.bf16.vlgmr.msra.gmra.mxu1 %vm2247_vm2, %v2236_v22  ;;  %v7358_v50 = vsub.s32 0, %v7355_v49 }
 0x24d   : > { %v6333_v61 = vpop.f32.mrf.mxu0  ;;  %v6341_v62 = vpop.f32.mrf.mxu1  ;;  %6443 = vmatpush3.bf16.xpose.msra.mxu0 %v2528_v59  ;;  %6449 = vmatpush3.bf16.xpose.msra.mxu1 %v2574_v60 }
 0x24e   : > { %6444 = vmatprep.mubr.msk.bf16.mxu0 %vm6784_vm1, %v6783_v12  ;;  %6450 = vmatprep.mubr.msk.bf16.mxu1 %vm6784_vm1, %v6783_v12  ;;  %v2620_v53 = vrot.slane %v2616_v52, %v7358_v50 }
 0x24f   : > { %v1861_v3 = vpop.f32.mrf.mxu0  ;;  %v1913_v4 = vpop.f32.mrf.mxu1  ;;  %6454 = vmatprep.subr.bf16.mxu0 %v6783_v12  ;;  %6460 = vmatprep.subr.bf16.mxu1 %v6783_v12 }
 0x250   : > { %v1862_v7 = vadd.f32 %v5686_v63, %v1861_v3  ;;  %v1914_v8 = vadd.f32 %v5687_v0, %v1913_v4  ;;  %vm7362_vm5 = vcmp.eq.s32.totalorder %v2620_v53, 1 }
 0x251   : > { %v6348_v9 = vpop.f32.mrf.mxu0  ;;  %v6356_v5 = vpop.f32.mrf.mxu1 }
 0x252   : > { %v2726_v32 = vpack.c.bf16 %v1862_v7, %v1862_v7  ;;  %v2727_v10 = vpack.c.bf16 %v1914_v8, %v1914_v8 }
 0x253   : > { %v1864_v11 = vpop.f32.mrf.mxu0  ;;  %v1916_v13 = vpop.f32.mrf.mxu1 }
 0x254   : > { %v2739_v16 = vsel %vm2737_vm3, %v2726_v32, 0  ;;  %v2785_v17 = vsel %vm2737_vm3, %v2727_v10, 0  ;;  %6445 = vmatmul.mubr.msk.bf16.vlgmr.msra.gmra.mxu0 %vm2247_vm2, %v2237_v31  ;;  %6451 = vmatmul.mubr.msk.bf16.vlgmr.msra.gmra.mxu1 %vm2247_vm2, %v2238_v6 }
 0x255   : > { %v6349_v18 = vpop.f32.mrf.mxu0  ;;  %v6357_v19 = vpop.f32.mrf.mxu1  ;;  %6455 = vmatpush3.bf16.msra.mxu0 %v2739_v16  ;;  %6461 = vmatpush3.bf16.msra.mxu1 %v2785_v17 }
 0x256   : > { %6456 = vmatprep.mubr.msk.bf16.mxu0 %vm6784_vm1, %v6783_v12  ;;  %6466 = vmatprep.subr.bf16.mxu0 %v6783_v12 }
 0x257   : > { %v7336_v20 = vpop.f32.mrf.mxu0  ;;  %v7338_v21 = vpop.f32.mrf.mxu1  ;;  %6462 = vmatprep.mubr.msk.bf16.mxu1 %vm6784_vm1, %v6783_v12  ;;  %6472 = vmatprep.subr.bf16.mxu1 %v6783_v12 }
 0x259   : > { %v6364_v25 = vpop.f32.mrf.mxu0  ;;  %v6372_v26 = vpop.f32.mrf.mxu1 }
 0x25b   : > { %v1968_v27 = vpop.f32.mrf.mxu0  ;;  %v2020_v28 = vpop.f32.mrf.mxu1 }
 0x25d   : > { %v6365_v29 = vpop.f32.mrf.mxu0  ;;  %v6373_v30 = vpop.f32.mrf.mxu1 }
 0x25f   : > { %v7343_v33 = vpop.f32.mrf.mxu0  ;;  %v7345_v14 = vpop.f32.mrf.mxu1 }
 0x261   : > { %v6380_v34 = vpop.f32.mrf.mxu0  ;;  %v6388_v15 = vpop.f32.mrf.mxu1 }
 0x263   : > { %v2072_v35 = vpop.f32.mrf.mxu0  ;;  %v2124_v36 = vpop.f32.mrf.mxu1 }
 0x265   : > { %v6381_v37 = vpop.f32.mrf.mxu0  ;;  %v6389_v38 = vpop.f32.mrf.mxu1 }
 0x267   : > { %v7347_v39 = vpop.f32.mrf.mxu0  ;;  %v7349_v40 = vpop.f32.mrf.mxu1 }
 0x269   : > { %v6396_v41 = vpop.f32.mrf.mxu0  ;;  %v6404_v42 = vpop.f32.mrf.mxu1 }
 0x26b   : > { %v2176_v43 = vpop.f32.mrf.mxu0  ;;  %v2228_v44 = vpop.f32.mrf.mxu1 }
 0x26d   : > { %v6397_v45 = vpop.f32.mrf.mxu0  ;;  %v6405_v46 = vpop.f32.mrf.mxu1 }
 0x2fc   : > { %v2288_v54 = vpop.f32.mrf.mxu0  ;;  %v2334_v24 = vpop.f32.mrf.mxu1 }
 0x2fd   : > { %v2622_v55 = vsel %vm7362_vm5, %v2288_v54, -1e+30  ;;  %v2623_v59 = vsel %vm7362_vm5, %v2334_v24, -1e+30 }
 0x2fe   : > { %v6410_v56 = vpop.f32.mrf.mxu0  ;;  %v6416_v57 = vpop.f32.mrf.mxu1  ;;  %v2630_v58 = vsel %vm2247_vm2, %v2622_v55, -inf  ;;  %v2633_v0 = vsel %vm2247_vm2, %v2623_v59, -inf }
 0x2ff   : > { %2631 = vmax.xlane.f32.xlu1 %v2630_v58 }
 0x300   : > { %v2291_v60 = vpop.f32.mrf.mxu0  ;;  %v2337_v61 = vpop.f32.mrf.mxu1 }
 0x302   : > { %v6411_v62 = vpop.f32.mrf.mxu0  ;;  %v6417_v63 = vpop.f32.mrf.mxu1 }
 0x303   : > { %2634 = vmax.xlane.f32.xlu1 %v2633_v0 }
 0x304   : > { %v2380_v1 = vpop.f32.mrf.mxu0  ;;  %v2426_v2 = vpop.f32.mrf.mxu1 }
 0x305   : > { %v2624_v3 = vsel %vm7362_vm5, %v2380_v1, -1e+30  ;;  %v2625_v4 = vsel %vm7362_vm5, %v2426_v2, -1e+30 }
 0x306   : > { %v6422_v7 = vpop.f32.mrf.mxu0  ;;  %v6428_v8 = vpop.f32.mrf.mxu1  ;;  %v2639_v9 = vsel %vm2247_vm2, %v2625_v4, -inf  ;;  %v2636_v5 = vsel %vm2247_vm2, %v2624_v3, -inf }
 0x307   : > { %2640 = vmax.xlane.f32.xlu1 %v2639_v9  ;;  %2637 = vmax.xlane.f32.xlu0 %v2636_v5 }
 0x308   : > { %v2383_v31 = vpop.f32.mrf.mxu0  ;;  %v2429_v6 = vpop.f32.mrf.mxu1 }
 0x30a   : > { %v6423_v32 = vpop.f32.mrf.mxu0  ;;  %v6429_v10 = vpop.f32.mrf.mxu1 }
 0x30c   : > { %v2472_v11 = vpop.f32.mrf.mxu0  ;;  %v2518_v13 = vpop.f32.mrf.mxu1 }
 0x30d   : > { %v2626_v16 = vsel %vm7362_vm5, %v2472_v11, -1e+30  ;;  %v2627_v17 = vsel %vm7362_vm5, %v2518_v13, -1e+30 }
 0x30e   : > { %v6434_v18 = vpop.f32.mrf.mxu0  ;;  %v6440_v19 = vpop.f32.mrf.mxu1  ;;  %v2645_v25 = vsel %vm2247_vm2, %v2627_v17, -inf  ;;  %v2642_v26 = vsel %vm2247_vm2, %v2626_v16, -inf }
 0x30f   : > { %2646 = vmax.xlane.f32.xlu1 %v2645_v25  ;;  %2643 = vmax.xlane.f32.xlu0 %v2642_v26 }
 0x310   : > { %v2475_v27 = vpop.f32.mrf.mxu0  ;;  %v2521_v28 = vpop.f32.mrf.mxu1 }
 0x312   : > { %v6435_v29 = vpop.f32.mrf.mxu0  ;;  %v6441_v30 = vpop.f32.mrf.mxu1 }
 0x314   : > { %v2564_v34 = vpop.f32.mrf.mxu0  ;;  %v2610_v15 = vpop.f32.mrf.mxu1 }
 0x315   : > { %v2628_v35 = vsel %vm7362_vm5, %v2564_v34, -1e+30  ;;  %v2629_v36 = vsel %vm7362_vm5, %v2610_v15, -1e+30  ;;  %v5688_v15 = vld [vmem:[%s8183_s10 + $0x2] ss:$0 sm:$0xff] }
 0x316   : > { %v6446_v37 = vpop.f32.mrf.mxu0  ;;  %v6452_v38 = vpop.f32.mrf.mxu1  ;;  %v2651_v41 = vsel %vm2247_vm2, %v2629_v36, -inf  ;;  %v2648_v42 = vsel %vm2247_vm2, %v2628_v35, -inf }
 0x317   : > { %2652 = vmax.xlane.f32.xlu1 %v2651_v41  ;;  %2649 = vmax.xlane.f32.xlu0 %v2648_v42  ;;  %v1966_v37 = vadd.f32 %v5688_v15, %v7336_v20  ;;  %v5689_v38 = vld [vmem:[%s8183_s10 + $0x3] ss:$0 sm:$0xff] }
 0x318   : > { %v2567_v43 = vpop.f32.mrf.mxu0  ;;  %v2613_v44 = vpop.f32.mrf.mxu1 }
 0x319   : > { %v2728_v42 = vpack.c.bf16 %v1966_v37, %v1966_v37  ;;  %v2018_v43 = vadd.f32 %v5689_v38, %v7338_v21  ;;  %v5691_v21 = vld [vmem:[%s8183_s10 + $0x5] ss:$0 sm:$0xff]  ;;  %v827_v38 = vld [vmem:[%s8184_s11 + $0xc] sm:$0xf] }
 0x31a   : > { %v6447_v45 = vpop.f32.mrf.mxu0  ;;  %v6453_v46 = vpop.f32.mrf.mxu1 }
 0x31b   : > { %v5690_v46 = vld [vmem:[%s8183_s10 + $0x4] ss:$0 sm:$0xff]  ;;  %v2831_v20 = vsel %vm2737_vm3, %v2728_v42, 0 }
 0x388   : > { %v2632_v47 = vpop.xlane.xlu1 %2631 }
 0x389   : > { %v2654_v48 = vsub.f32 %v2622_v55, %v2632_v47 }
 0x38b   : > { %v2662_v52 = vmul.f32 1.442695, %v2654_v48 }
 0x38c   : > { %v2635_v53 = vpop.xlane.xlu1 %2634 }
 0x38d   : > { %6739 = vpow2.f32 %v2662_v52  ;;  %v2655_v54 = vsub.f32 %v2623_v59, %v2635_v53  ;;  %v2729_v53 = vpack.c.bf16 %v2018_v43, %v2018_v43 }
 0x38f   : > { %v2664_v22 = vmul.f32 1.442695, %v2655_v54 }
 0x390   : > { %v2641_v24 = vpop.xlane.xlu1 %2640  ;;  %v2638_v56 = vpop.xlane.xlu0 %2637 }
 0x391   : > { %6741 = vpow2.f32 %v2664_v22  ;;  %v2657_v57 = vsub.f32 %v2625_v4, %v2641_v24  ;;  %v2656_v58 = vsub.f32 %v2624_v3, %v2638_v56  ;;  %v2070_v22 = vadd.f32 %v5690_v46, %v7343_v33 }
 0x393   : > { %v2668_v60 = vmul.f32 1.442695, %v2657_v57  ;;  %v2666_v61 = vmul.f32 1.442695, %v2656_v58  ;;  %v2877_v58 = vsel %vm2737_vm3, %v2729_v53, 0  ;;  %v2730_v33 = vpack.c.bf16 %v2070_v22, %v2070_v22 }
 0x394   : > { %v829_v22 = vld [vmem:[%s8184_s11 + $0x14] sm:$0xf] }
 0x395   : > { %6743 = vpow2.f32 %v2668_v60  ;;  %v2122_v60 = vadd.f32 %v5691_v21, %v7345_v14 }
 0x396   : > { %6745 = vpow2.f32 %v2666_v61 }
 0x398   : > { %v2647_v62 = vpop.xlane.xlu1 %2646  ;;  %v2644_v63 = vpop.xlane.xlu0 %2643 }
 0x399   : > { %v2659_v0 = vsub.f32 %v2627_v17, %v2647_v62  ;;  %v2658_v1 = vsub.f32 %v2626_v16, %v2644_v63  ;;  %v5692_v63 = vld [vmem:[%s8183_s10 + $0x6] ss:$0 sm:$0xff] }
 0x39a   : > { %v6740_v2 = vpop.eup %6739 }
 0x39b   : > { %v2672_v55 = vmul.f32 1.442695, %v2659_v0  ;;  %v2670_v7 = vmul.f32 1.442695, %v2658_v1  ;;  %v2678_v8 = vsel %vm2247_vm2, %v6740_v2, 0.0 }
 0x39c   : > { %2679 = vadd.xlane.f32.xlu0 %v2678_v8  ;;  %v5693_v8 = vld [vmem:[%s8183_s10 + $0x7] ss:$0 sm:$0xff] }
 0x39d   : > { %6747 = vpow2.f32 %v2672_v55  ;;  %v2923_v55 = vsel %vm2737_vm3, %v2730_v33, 0 }
 0x39e   : > { %v6742_v59 = vpop.eup %6741  ;;  %6749 = vpow2.f32 %v2670_v7  ;;  %v2174_v7 = vadd.f32 %v5692_v63, %v7347_v39 }
 0x39f   : > { %v2681_v4 = vsel %vm2247_vm2, %v6742_v59, 0.0 }
 0x3a0   : > { %2682 = vadd.xlane.f32.xlu1 %v2681_v4  ;;  %v2653_v3 = vpop.xlane.xlu1 %2652  ;;  %v2650_v9 = vpop.xlane.xlu0 %2649  ;;  %v2732_v39 = vpack.c.bf16 %v2174_v7, %v2174_v7 }
 0x3a1   : > { %v2661_v5 = vsub.f32 %v2629_v36, %v2653_v3  ;;  %v2660_v31 = vsub.f32 %v2628_v35, %v2650_v9 }
 0x3a2   : > { %v7392_v6 = vpop.eup %6743 }
 0x3a3   : > { %v6746_v32 = vpop.eup %6745  ;;  %v2676_v10 = vmul.f32 1.442695, %v2661_v5  ;;  %v2674_v11 = vmul.f32 1.442695, %v2660_v31  ;;  %v2687_v13 = vsel %vm2247_vm2, %v7392_v6, 0.0  ;;  %v2226_v5 = vadd.f32 %v5693_v8, %v7349_v40 }
 0x3a4   : > { %2688 = vadd.xlane.f32.xlu1 %v2687_v13  ;;  %v2684_v16 = vsel %vm2247_vm2, %v6746_v32, 0.0 }
 0x3a5   : > { %6751 = vpow2.f32 %v2676_v10  ;;  %2685 = vadd.xlane.f32.xlu0 %v2684_v16  ;;  %v2733_v10 = vpack.c.bf16 %v2226_v5, %v2226_v5 }
 0x3a6   : > { %6753 = vpow2.f32 %v2674_v11  ;;  %v3015_v11 = vsel %vm2737_vm3, %v2732_v39, 0 }
 0x3aa   : > { %v7397_v17 = vpop.eup %6747 }
 0x3ab   : > { %v7399_v18 = vpop.eup %6749  ;;  %v2693_v19 = vsel %vm2247_vm2, %v7397_v17, 0.0 }
 0x3ac   : > { %2694 = vadd.xlane.f32.xlu1 %v2693_v19  ;;  %v2690_v25 = vsel %vm2247_vm2, %v7399_v18, 0.0 }
 0x3ad   : > { %2691 = vadd.xlane.f32.xlu0 %v2690_v25 }
 0x3b2   : > { %v7405_v26 = vpop.eup %6751 }
 0x3b3   : > { %v7407_v27 = vpop.eup %6753  ;;  %v2699_v28 = vsel %vm2247_vm2, %v7405_v26, 0.0 }
 0x3b4   : > { %2700 = vadd.xlane.f32.xlu1 %v2699_v28  ;;  %v2696_v29 = vsel %vm2247_vm2, %v7407_v27, 0.0 }
 0x3b5   : > { %2697 = vadd.xlane.f32.xlu0 %v2696_v29 }
 0x425   : > { %v2680_v30 = vpop.xlane.xlu0 %2679 }
 0x426   : > { %6755 = vrcp.f32 %v2680_v30 }
 0x429   : > { %v2683_v34 = vpop.xlane.xlu1 %2682 }
 0x42a   : > { %6757 = vrcp.f32 %v2683_v34  ;;  %v826_v34 = vld [vmem:[%s8184_s11 + $0x8] sm:$0xf] }
 0x42d   : > { %v2689_v35 = vpop.xlane.xlu1 %2688 }
 0x42e   : > { %6759 = vrcp.f32 %v2689_v35  ;;  %v2686_v36 = vpop.xlane.xlu0 %2685 }
 0x42f   : > { %6761 = vrcp.f32 %v2686_v36  ;;  %v3207_v36 = vsel %vm2737_vm3, %v826_v34, 0 }
 0x433   : > { %v6756_v41 = vpop.eup %6755 }
 0x434   : > { %v2710_v44 = vmul.f32 %v6756_v41, %v6740_v2  ;;  %v2731_v2 = vpack.c.bf16 %v2122_v60, %v2122_v60 }
 0x435   : > { %v2695_v45 = vpop.xlane.xlu1 %2694 }
 0x436   : > { %6763 = vrcp.f32 %v2695_v45  ;;  %v2692_v47 = vpop.xlane.xlu0 %2691  ;;  %v2718_v48 = vpack.c.bf16 %v2710_v44, %v2710_v44  ;;  %v2969_v9 = vsel %vm2737_vm3, %v2731_v2, 0  ;;  %v3253_v44 = vsel %vm2737_vm3, %v827_v38, 0  ;;  %v831_v2 = vld [vmem:[%s8184_s11 + $0x1c] sm:$0xf] }
 0x437   : > { %v6758_v52 = vpop.eup %6757  ;;  %6765 = vrcp.f32 %v2692_v47  ;;  %v828_v47 = vld [vmem:[%s8184_s11 + $0x10] sm:$0xf] }
 0x438   : > { %6457 = vmatmul.mubr.msk.bf16.vlgmr.msra.gmra.mxu0 %vm2247_vm2, %v2718_v48  ;;  %v2711_v54 = vmul.f32 %v6758_v52, %v6742_v59 }
 0x439   : > { %6467 = vmatpush3.bf16.msra.mxu0 %v2831_v20  ;;  %6468 = vmatprep.mubr.msk.bf16.mxu0 %vm6784_vm1, %v6783_v12 }
 0x43a   : > { %v2719_v24 = vpack.c.bf16 %v2711_v54, %v2711_v54  ;;  %6478 = vmatprep.subr.bf16.mxu0 %v6783_v12  ;;  %v3299_v54 = vsel %vm2737_vm3, %v828_v47, 0 }
 0x43b   : > { %v6760_v56 = vpop.eup %6759 }
 0x43c   : > { %v6762_v57 = vpop.eup %6761  ;;  %6463 = vmatmul.mubr.msk.bf16.vlgmr.msra.gmra.mxu1 %vm2247_vm2, %v2719_v24  ;;  %v2713_v1 = vmul.f32 %v6760_v56, %v7392_v6 }
 0x43d   : > { %6473 = vmatpush3.bf16.msra.mxu1 %v2877_v58  ;;  %v2701_v61 = vpop.xlane.xlu1 %2700  ;;  %v2712_v62 = vmul.f32 %v6762_v57, %v6746_v32  ;;  %6474 = vmatprep.mubr.msk.bf16.mxu1 %vm6784_vm1, %v6783_v12  ;;  %v3345_v58 = vsel %vm2737_vm3, %v829_v22, 0 }
 0x43e   : > { %6767 = vrcp.f32 %v2701_v61  ;;  %v2698_v0 = vpop.xlane.xlu0 %2697  ;;  %6484 = vmatprep.subr.bf16.mxu1 %v6783_v12  ;;  %v2721_v59 = vpack.c.bf16 %v2713_v1, %v2713_v1  ;;  %v830_v61 = vld [vmem:[%s8184_s11 + $0x18] sm:$0xf] }
 0x43f   : > { %6769 = vrcp.f32 %v2698_v0  ;;  %v2720_v14 = vpack.c.bf16 %v2712_v62, %v2712_v62 }
 0x441   : > { %6469 = vmatmul.mubr.msk.bf16.vlgmr.msra.gmra.mxu0 %vm2247_vm2, %v2720_v14  ;;  %v3391_v14 = vsel %vm2737_vm3, %v830_v61, 0 }
 0x442   : > { %6479 = vmatpush3.bf16.msra.mxu0 %v2923_v55  ;;  %6480 = vmatprep.mubr.msk.bf16.mxu0 %vm6784_vm1, %v6783_v12 }
 0x443   : > { %v6764_v4 = vpop.eup %6763  ;;  %6490 = vmatprep.subr.bf16.mxu0 %v6783_v12 }
 0x444   : > { %v6766_v3 = vpop.eup %6765  ;;  %6475 = vmatmul.mubr.msk.bf16.vlgmr.msra.gmra.mxu1 %vm2247_vm2, %v2721_v59  ;;  %v2715_v6 = vmul.f32 %v6764_v4, %v7397_v17  ;;  %v824_v17 = vld [vmem:[%s8184_s11] sm:$0xf]  ;;  %v3437_v4 = vsel %vm2737_vm3, %v831_v2, 0 }
 0x445   : > { %6485 = vmatpush3.bf16.msra.mxu1 %v2969_v9  ;;  %v2714_v31 = vmul.f32 %v6766_v3, %v7399_v18  ;;  %6486 = vmatprep.mubr.msk.bf16.mxu1 %vm6784_vm1, %v6783_v12  ;;  %v3061_v18 = vsel %vm2737_vm3, %v2733_v10, 0  ;;  %v3115_v29 = vsel %vm2737_vm3, %v824_v17, 0 }
 0x446   : > { %6496 = vmatprep.subr.bf16.mxu1 %v6783_v12  ;;  %v2723_v40 = vpack.c.bf16 %v2715_v6, %v2715_v6 }
 0x447   : > { %v2722_v32 = vpack.c.bf16 %v2714_v31, %v2714_v31 }
 0x449   : > { %6481 = vmatmul.mubr.msk.bf16.vlgmr.msra.gmra.mxu0 %vm2247_vm2, %v2722_v32 }
 0x44a   : > { %6491 = vmatpush3.bf16.msra.mxu0 %v3015_v11  ;;  %6492 = vmatprep.mubr.msk.bf16.mxu0 %vm6784_vm1, %v6783_v12 }
 0x44b   : > { %v6768_v13 = vpop.eup %6767  ;;  %6502 = vmatprep.subr.bf16.mxu0 %v6783_v12 }
 0x44c   : > { %v6770_v16 = vpop.eup %6769  ;;  %6487 = vmatmul.mubr.msk.bf16.vlgmr.msra.gmra.mxu1 %vm2247_vm2, %v2723_v40  ;;  %v2717_v25 = vmul.f32 %v6768_v13, %v7405_v26  ;;  %v825_v26 = vld [vmem:[%s8184_s11 + $0x4] sm:$0xf] }
 0x44d   : > { %6497 = vmatpush3.bf16.msra.mxu1 %v3061_v18  ;;  %v2716_v19 = vmul.f32 %v6770_v16, %v7407_v27  ;;  %6498 = vmatprep.mubr.msk.bf16.mxu1 %vm6784_vm1, %v6783_v12  ;;  %v3161_v27 = vsel %vm2737_vm3, %v825_v26, 0 }
 0x44e   : > { %6508 = vmatprep.subr.bf16.mxu1 %v6783_v12  ;;  %v2725_v30 = vpack.c.bf16 %v2717_v25, %v2717_v25 }
 0x44f   : > { %v2724_v28 = vpack.c.bf16 %v2716_v19, %v2716_v19 }
 0x451   : > { %6493 = vmatmul.mubr.msk.bf16.vlgmr.msra.gmra.mxu0 %vm2247_vm2, %v2724_v28 }
 0x452   : > { %6503 = vmatpush3.bf16.msra.mxu0 %v3115_v29  ;;  %6504 = vmatprep.mubr.msk.bf16.mxu0 %vm6784_vm1, %v6783_v12 }
 0x453   : > { %6514 = vmatprep.subr.bf16.mxu0 %v6783_v12 }
 0x454   : > { %6499 = vmatmul.mubr.msk.bf16.vlgmr.msra.gmra.mxu1 %vm2247_vm2, %v2725_v30 }
 0x455   : > { %6510 = vmatprep.mubr.msk.bf16.mxu1 %vm6784_vm1, %v6783_v12  ;;  %6509 = vmatpush3.bf16.msra.mxu1 %v3161_v27 }
 0x456   : > { %6520 = vmatprep.subr.bf16.mxu1 %v6783_v12 }
 0x4f8   : > { %v2775_v15 = vpop.f32.mrf.mxu0 }
 0x4f9   : > { %v3103_v35 = vpack.c.bf16 %v2775_v15, %v2775_v15 }
 0x4fa   : > { %v6458_v37 = vpop.f32.mrf.mxu0 }
 0x4fb   : > { %6505 = vmatmul.mubr.msk.bf16.vlgmr.msra.gmra.mxu0 %vm2247_vm2, %v3103_v35 }
 0x4fc   : > { %v2778_v41 = vpop.f32.mrf.mxu0  ;;  %v2821_v42 = vpop.f32.mrf.mxu1  ;;  %6515 = vmatpush3.bf16.msra.mxu0 %v3207_v36  ;;  %6516 = vmatprep.mubr.msk.bf16.mxu0 %vm6784_vm1, %v6783_v12 }
 0x4fd   : > { %v3104_v43 = vpack.c.bf16 %v2821_v42, %v2821_v42  ;;  %6526 = vmatprep.subr.bf16.mxu0 %v6783_v12 }
 0x4fe   : > { %v6459_v45 = vpop.f32.mrf.mxu0  ;;  %v6464_v46 = vpop.f32.mrf.mxu1 }
 0x4ff   : > { %6511 = vmatmul.mubr.msk.bf16.vlgmr.msra.gmra.mxu1 %vm2247_vm2, %v3104_v43 }
 0x500   : > { %v2824_v48 = vpop.f32.mrf.mxu1  ;;  %6521 = vmatpush3.bf16.msra.mxu1 %v3253_v44  ;;  %6522 = vmatprep.mubr.msk.bf16.mxu1 %vm6784_vm1, %v6783_v12 }
 0x501   : > { %v2867_v52 = vpop.f32.mrf.mxu0  ;;  %6532 = vmatprep.subr.bf16.mxu1 %v6783_v12 }
 0x502   : > { %v3105_v20 = vpack.c.bf16 %v2867_v52, %v2867_v52  ;;  %v6465_v53 = vpop.f32.mrf.mxu1 }
 0x503   : > { %v6470_v21 = vpop.f32.mrf.mxu0 }
 0x504   : > { %6517 = vmatmul.mubr.msk.bf16.vlgmr.msra.gmra.mxu0 %vm2247_vm2, %v3105_v20  ;;  %v2913_v24 = vpop.f32.mrf.mxu1 }
 0x505   : > { %v2870_v56 = vpop.f32.mrf.mxu0  ;;  %v3106_v57 = vpack.c.bf16 %v2913_v24, %v2913_v24  ;;  %6527 = vmatpush3.bf16.msra.mxu0 %v3299_v54  ;;  %6528 = vmatprep.mubr.msk.bf16.mxu0 %vm6784_vm1, %v6783_v12 }
 0x506   : > { %v6476_v60 = vpop.f32.mrf.mxu1  ;;  %6538 = vmatprep.subr.bf16.mxu0 %v6783_v12 }
 0x507   : > { %v6471_v33 = vpop.f32.mrf.mxu0  ;;  %6523 = vmatmul.mubr.msk.bf16.vlgmr.msra.gmra.mxu1 %vm2247_vm2, %v3106_v57 }
 0x508   : > { %v2916_v62 = vpop.f32.mrf.mxu1  ;;  %6533 = vmatpush3.bf16.msra.mxu1 %v3345_v58  ;;  %6534 = vmatprep.mubr.msk.bf16.mxu1 %vm6784_vm1, %v6783_v12 }
 0x509   : > { %v2959_v63 = vpop.f32.mrf.mxu0  ;;  %6544 = vmatprep.subr.bf16.mxu1 %v6783_v12 }
 0x50a   : > { %v3107_v0 = vpack.c.bf16 %v2959_v63, %v2959_v63  ;;  %v6477_v1 = vpop.f32.mrf.mxu1 }
 0x50b   : > { %v6482_v55 = vpop.f32.mrf.mxu0 }
 0x50c   : > { %6529 = vmatmul.mubr.msk.bf16.vlgmr.msra.gmra.mxu0 %vm2247_vm2, %v3107_v0  ;;  %v3005_v7 = vpop.f32.mrf.mxu1  ;;  %v5742_v55 = vld [vmem:[%s8185_s12] ss:$0 sm:$0xff] }
 0x50d   : > { %v2962_v8 = vpop.f32.mrf.mxu0  ;;  %v3108_v59 = vpack.c.bf16 %v3005_v7, %v3005_v7  ;;  %6539 = vmatpush3.bf16.msra.mxu0 %v3391_v14  ;;  %6540 = vmatprep.mubr.msk.bf16.mxu0 %vm6784_vm1, %v6783_v12 }
 0x50e   : > { %v6488_v3 = vpop.f32.mrf.mxu1 }
 0x50f   : > { %v6483_v9 = vpop.f32.mrf.mxu0  ;;  %6535 = vmatmul.mubr.msk.bf16.vlgmr.msra.gmra.mxu1 %vm2247_vm2, %v3108_v59 }
 0x510   : > { %v3008_v5 = vpop.f32.mrf.mxu1  ;;  %6545 = vmatpush3.bf16.msra.mxu1 %v3437_v4  ;;  %6546 = vmatprep.mubr.msk.bf16.mxu1 %vm6784_vm1, %v6783_v12 }
 0x511   : > { %v3051_v39 = vpop.f32.mrf.mxu0 }
 0x512   : > { %v3109_v31 = vpack.c.bf16 %v3051_v39, %v3051_v39  ;;  %v6489_v6 = vpop.f32.mrf.mxu1 }
 0x513   : > { %v6494_v32 = vpop.f32.mrf.mxu0 }
 0x514   : > { %6541 = vmatmul.mubr.msk.bf16.vlgmr.msra.gmra.mxu0 %vm2247_vm2, %v3109_v31  ;;  %v3097_v10 = vpop.f32.mrf.mxu1 }
 0x515   : > { %v3054_v11 = vpop.f32.mrf.mxu0  ;;  %v3110_v40 = vpack.c.bf16 %v3097_v10, %v3097_v10  ;;  %4100 = vmatprep.mubr.bf16.mxu0 %v6785_v51 }
 0x516   : > { %v6500_v13 = vpop.f32.mrf.mxu1 }
 0x517   : > { %v6495_v16 = vpop.f32.mrf.mxu0  ;;  %6547 = vmatmul.mubr.msk.bf16.vlgmr.msra.gmra.mxu1 %vm2247_vm2, %v3110_v40  ;;  %v3545_v13 = vld [vmem:[%s8188_s15 + $0x80] sm:$0xff] }
 0x518   : > { %v3100_v18 = vpop.f32.mrf.mxu1  ;;  %4141 = vmatprep.mubr.bf16.mxu1 %v6785_v51  ;;  %v3553_v16 = vld [vmem:[%s8188_s15 + $0xc0] sm:$0xff] }
 0x519   : > { %v5762_v18 = vcombine.high %v3545_v13, %v3553_v16 }
 0x51a   : > { %v6501_v17 = vpop.f32.mrf.mxu1 }
 0x51b   : > { %v3554_v17 = vld [vmem:[%s8188_s15 + $0xc8] sm:$0xff]  ;;  %4080 = vmatprep.subr.bf16.mxu0 %v5762_v18  ;;  %v3535_v18 = vld [vmem:[%s8188_s15 + $0x30] sm:$0xff] }
 0x5bb   : > { %v3151_v12 = vpop.f32.mrf.mxu0 }
 0x5bc   : > { %v3479_v43 = vsel %vm673_vm0, %v3151_v12, 0.0  ;;  %v5761_v12 = vcombine.low %v3545_v13, %v3553_v16 }
 0x5bd   : > { %v6506_v19 = vpop.f32.mrf.mxu0 }
 0x5be   : > { %4081 = vmatpush1.bf16.msra.mxu0 %v5761_v12  ;;  %v3536_v12 = vld [vmem:[%s8188_s15 + $0x38] sm:$0xff] }
 0x5bf   : > { %v3154_v25 = vpop.f32.mrf.mxu0  ;;  %v3197_v28 = vpop.f32.mrf.mxu1 }
 0x5c0   : > { %v3480_v38 = vsel %vm673_vm0, %v3197_v28, 0.0  ;;  %v3529_v28 = vld [vmem:[%s8188_s15] sm:$0xff] }
 0x5c1   : > { %v6507_v29 = vpop.f32.mrf.mxu0  ;;  %v6512_v30 = vpop.f32.mrf.mxu1  ;;  %v3481_v46 = vadd.f32 %v3480_v38, %v3479_v43  ;;  %v3548_v38 = vld [vmem:[%s8188_s15 + $0x98] sm:$0xff] }
 0x5c2   : > { %v3537_v29 = vld [vmem:[%s8188_s15 + $0x40] sm:$0xff]  ;;  %v3530_v30 = vld [vmem:[%s8188_s15 + $0x8] sm:$0xff]  ;;  %v3556_v43 = vld [vmem:[%s8188_s15 + $0xd8] sm:$0xff] }
 0x5c3   : > { %v3200_v26 = vpop.f32.mrf.mxu1 }
 0x5c4   : > { %v3243_v27 = vpop.f32.mrf.mxu0  ;;  %v5746_v26 = vcombine.high %v3529_v28, %v3537_v29 }
 0x5c5   : > { %v6513_v34 = vpop.f32.mrf.mxu1  ;;  %v3482_v44 = vsel %vm673_vm0, %v3243_v27, 0.0  ;;  %v3538_v27 = vld [vmem:[%s8188_s15 + $0x48] sm:$0xff] }
 0x5c6   : > { %v6518_v15 = vpop.f32.mrf.mxu0  ;;  %v3483_v20 = vadd.f32 %v3482_v44, %v3481_v46  ;;  %v5745_v34 = vcombine.low %v3529_v28, %v3537_v29  ;;  %4082 = vmatprep.subr.bf16.mxu0 %v5746_v26  ;;  %v5767_v44 = vcombine.low %v3548_v38, %v3556_v43 }
 0x5c7   : > { %v3289_v35 = vpop.f32.mrf.mxu1  ;;  %v5747_v15 = vcombine.low %v3530_v30, %v3538_v27 }
 0x5c8   : > { %v3246_v36 = vpop.f32.mrf.mxu0  ;;  %v3484_v48 = vsel %vm673_vm0, %v3289_v35, 0.0  ;;  %v5748_v35 = vcombine.high %v3530_v30, %v3538_v27  ;;  %4083 = vmatpush1.bf16.msra.mxu0 %v5745_v34  ;;  %v6609_v34 = vld [vmem:[%s8190_s17 + $0x78] sm:$0xff]  }
 0x5c9   : > { %v6524_v37 = vpop.f32.mrf.mxu1  ;;  %v3485_v21 = vadd.f32 %v3484_v48, %v3483_v20  ;;  %v3547_v36 = vld [vmem:[%s8188_s15 + $0x90] sm:$0xff]  ;;  %v5743_v20 = vld [vmem:[%s8186_s13] ss:$0 sm:$0xff] }
 0x5ca   : > { %v6519_v41 = vpop.f32.mrf.mxu0  ;;  %v3555_v37 = vld [vmem:[%s8188_s15 + $0xd0] sm:$0xff] }
 0x5cb   : > { %v3292_v42 = vpop.f32.mrf.mxu1  ;;  %v5765_v41 = vcombine.low %v3547_v36, %v3555_v37 }
 0x5cc   : > { %v3335_v45 = vpop.f32.mrf.mxu0  ;;  %v5766_v42 = vcombine.high %v3547_v36, %v3555_v37  ;;  %v6612_v36 = vld [vmem:[%s8190_s17 + $0xb8] sm:$0xff]   ;;  %v6613_v37 = vld [vmem:[%s8190_s17 + $0x70] sm:$0xff]  }
 0x5cd   : > { %v6525_v47 = vpop.f32.mrf.mxu1  ;;  %v3486_v54 = vsel %vm673_vm0, %v3335_v45, 0.0  ;;  %v5768_v45 = vcombine.high %v3548_v38, %v3556_v43  ;;  %v6615_v38 = vld [vmem:[%s8190_s17 + $0x30] sm:$0xff]   ;;  %v6618_v43 = vld [vmem:[%s8190_s17 + $0xe8] sm:$0xff]  }
 0x5ce   : > { %v6530_v52 = vpop.f32.mrf.mxu0  ;;  %v3487_v58 = vadd.f32 %v3486_v54, %v3485_v21  ;;  %4162 = vmatprep.subr.bf16.mxu0 %v5766_v42  ;;  %v5744_v54 = vld [vmem:[%s8187_s14] ss:$0 sm:$0xff]  ;;  %v3531_v21 = vld [vmem:[%s8188_s15 + $0x10] sm:$0xff]  ;;  %v6617_v42 = vld [vmem:[%s8190_s17 + $0x68] sm:$0xff]  }
 0x5cf   : > { %v3381_v53 = vpop.f32.mrf.mxu1 }
 0x5d0   : > { %v3338_v22 = vpop.f32.mrf.mxu0  ;;  %v3488_v56 = vsel %vm673_vm0, %v3381_v53, 0.0 }
 0x5d1   : > { %v6536_v24 = vpop.f32.mrf.mxu1  ;;  %v3489_v61 = vadd.f32 %v3488_v56, %v3487_v58  ;;  %v3532_v56 = vld [vmem:[%s8188_s15 + $0x18] sm:$0xff] }
 0x5d2   : > { %v6531_v57 = vpop.f32.mrf.mxu0  ;;  %v3539_v24 = vld [vmem:[%s8188_s15 + $0x50] sm:$0xff] }
 0x5d3   : > { %v3384_v60 = vpop.f32.mrf.mxu1  ;;  %v3540_v57 = vld [vmem:[%s8188_s15 + $0x58] sm:$0xff] }
 0x5d4   : > { %v3427_v33 = vpop.f32.mrf.mxu0 }
 0x5d5   : > { %v3490_v62 = vsel %vm673_vm0, %v3427_v33, 0.0  ;;  %v6537_v63 = vpop.f32.mrf.mxu1  ;;  %v5750_v33 = vcombine.high %v3531_v21, %v3539_v24 }
 0x5d6   : > { %v6542_v0 = vpop.f32.mrf.mxu0  ;;  %v3491_v1 = vadd.f32 %v3490_v62, %v3489_v61  ;;  %v5752_v61 = vcombine.high %v3532_v56, %v3540_v57  ;;  %v3549_v62 = vld [vmem:[%s8188_s15 + $0xa0] sm:$0xff] }
 0x5d7   : > { %v3473_v14 = vpop.f32.mrf.mxu1  ;;  %v3557_v63 = vld [vmem:[%s8188_s15 + $0xe0] sm:$0xff]  ;;  %v3550_v0 = vld [vmem:[%s8188_s15 + $0xa8] sm:$0xff] }
 0x5d8   : > { %v3430_v2 = vpop.f32.mrf.mxu0  ;;  %v3492_v7 = vsel %vm673_vm0, %v3473_v14, 0.0  ;;  %v5749_v14 = vcombine.low %v3531_v21, %v3539_v24  ;;  %v6629_v21 = vld [vmem:[%s8190_s17 + $0x50] sm:$0xff]  }
 0x5d9   : > { %v3493_v8 = vadd.f32 %v3492_v7, %v3491_v1  ;;  %v6548_v59 = vpop.f32.mrf.mxu1  ;;  %v3558_v1 = vld [vmem:[%s8188_s15 + $0xe8] sm:$0xff]  ;;  %v5751_v2 = vcombine.low %v3532_v56, %v3540_v57  ;;  %v6630_v24 = vld [vmem:[%s8190_s17 + $0xd0] sm:$0xff]  }
 0x5da   : > { %v6543_v4 = vpop.f32.mrf.mxu0  ;;  %v5772_v7 = vcombine.high %v3550_v0, %v3558_v1  ;;  %v3541_v59 = vld [vmem:[%s8188_s15 + $0x60] sm:$0xff]  ;;  %v6631_v56 = vld [vmem:[%s8190_s17 + $0x10] sm:$0xff]  }
 0x5db   : > { %v3500_v3 = vadd.f32 %v5742_v55, %v3493_v8  ;;  %v3476_v9 = vpop.f32.mrf.mxu1  ;;  %v5770_v55 = vcombine.high %v3549_v62, %v3557_v63  ;;  %v3533_v8 = vld [vmem:[%s8188_s15 + $0x20] sm:$0xff]  ;;  %v3534_v4 = vld [vmem:[%s8188_s15 + $0x28] sm:$0xff]  ;;  %v6632_v57 = vld [vmem:[%s8190_s17 + $0x90] sm:$0xff]  }
 0x5dc   : > { %v5769_v9 = vcombine.low %v3549_v62, %v3557_v63  ;;  %v6636_v62 = vld [vmem:[%s8190_s17 + $0x88] sm:$0xff]   ;;  %v6637_v63 = vld [vmem:[%s8190_s17 + $0x40] sm:$0xff]  }
 0x5dd   : > { %v6549_v5 = vpop.f32.mrf.mxu1  ;;  %v3501_v39 = vadd.f32 %v3500_v3, %v6945_v23  ;;  %v3546_v23 = vld [vmem:[%s8188_s15 + $0x88] sm:$0xff] }
 0x5de   : > { %v5763_v19 = vcombine.low %v3546_v23, %v3554_v17  ;;  %v5764_v25 = vcombine.high %v3546_v23, %v3554_v17  ;;  %v3542_v3 = vld [vmem:[%s8188_s15 + $0x68] sm:$0xff]  ;;  %v5771_v5 = vcombine.low %v3550_v0, %v3558_v1  ;;  %v3543_v17 = vld [vmem:[%s8188_s15 + $0x70] sm:$0xff]  ;;  %v6638_v0 = vld [vmem:[%s8190_s17 + $0xc0] sm:$0xff]  }
 0x5df   : > { %v3502_v31 = vsel %vm673_vm0, %v3501_v39, 0.0  ;;  %v5755_v13 = vcombine.low %v3534_v4, %v3542_v3  ;;  %v5758_v29 = vcombine.high %v3535_v18, %v3543_v17  ;;  %v5757_v26 = vcombine.low %v3535_v18, %v3543_v17  ;;  %v6639_v1 = vld [vmem:[%s8190_s17] sm:$0xff]  }
 0x5e0   : > { %3503 = vadd.xlane.f32.xlu0 %v3502_v31  ;;  %4121 = vmatprep.subr.bf16.mxu1 %v5764_v25  ;;  %v5756_v31 = vcombine.high %v3534_v4, %v3542_v3  ;;  %v3835_v4 = vsub.s32 2, %v7355_v49  ;;  %v7799_v3 = vld [vmem:[%s8189_s16] sm:$0xff] }
 0x5e1   : > { %4122 = vmatpush1.bf16.msra.mxu1 %v5763_v19  ;;  %v3544_v19 = vld [vmem:[%s8188_s15 + $0x78] sm:$0xff] }
 0x5e2   : > { %4123 = vmatprep.subr.bf16.mxu1 %v5748_v35  ;;  %v5760_v30 = vcombine.high %v3536_v12, %v3544_v19  ;;  %v5759_v27 = vcombine.low %v3536_v12, %v3544_v19  ;;  %v6611_v35 = vld [vmem:[%s8190_s17 + $0x38] sm:$0xff]   ;;  %v3847_v12 = vsub.s32 5, %v7355_v49  ;;  %v3855_v19 = vsub.s32 7, %v7355_v49 }
 0x5e5   : > { %4124 = vmatpush1.bf16.msra.mxu1 %v5747_v15  ;;  %v6610_v15 = vld [vmem:[%s8190_s17 + $0xf8] sm:$0xff]  }
 0x5e6   : > { %4203 = vmatprep.subr.bf16.mxu1 %v5768_v45  ;;  %v6620_v45 = vld [vmem:[%s8190_s17 + $0xa8] sm:$0xff]  }
 0x669   : > { %v3504_v6 = vpop.xlane.xlu0 %3503 }
 0x66a   : > { %v3505_v32 = vmul.f32 0.03125, %v3504_v6  ;;  %v3551_v6 = vld [vmem:[%s8188_s15 + $0xb0] sm:$0xff] }
 0x66c   : > { %v3506_v10 = vsub.f32 %v3501_v39, %v3505_v32  ;;  %v5754_v39 = vcombine.high %v3533_v8, %v3541_v59  ;;  %v3559_v32 = vld [vmem:[%s8188_s15 + $0xf0] sm:$0xff] }
 0x66d   : > { %v5774_v16 = vcombine.high %v3551_v6, %v3559_v32  ;;  %v5773_v25 = vcombine.low %v3551_v6, %v3559_v32 }
 0x66e   : > { %v3507_v11 = vmul.f32 %v3506_v10, %v3506_v10 }
 0x670   : > { %v3508_v40 = vsel %vm673_vm0, %v3507_v11, 0.0  ;;  %v3560_v11 = vld [vmem:[%s8188_s15 + $0xf8] sm:$0xff] }
 0x671   : > { %3509 = vadd.xlane.f32.xlu1 %v3508_v40  ;;  %v5753_v40 = vcombine.low %v3533_v8, %v3541_v59  ;;  %v7788_v8 = vld [vmem:[%s8189_s16 + $0x8] sm:$0xff] }
 0x6fa   : > { %v3510_v46 = vpop.xlane.xlu1 %3509 }
 0x6fb   : > { %v3511_v47 = vmul.f32 0.03125, %v3510_v46  ;;  %v6621_v46 = vld [vmem:[%s8190_s17 + $0x60] sm:$0xff]  }
 0x6fd   : > { %v3512_v48 = vadd.f32 1e-05, %v3511_v47  ;;  %v6622_v47 = vld [vmem:[%s8190_s17 + $0xe0] sm:$0xff]  }
 0x6ff   : > { %6771 = vrsqrt.f32 %v3512_v48  ;;  %v6623_v48 = vld [vmem:[%s8190_s17 + $0x20] sm:$0xff]  }
 0x70c   : > { %v6772_v52 = vpop.eup %6771 }
 0x70d   : > { %v3514_v53 = vmul.f32 %v6772_v52, %v3506_v10  ;;  %v3552_v10 = vld [vmem:[%s8188_s15 + $0xb8] sm:$0xff]  ;;  %v6624_v52 = vld [vmem:[%s8190_s17 + $0xa0] sm:$0xff]  }
 0x70e   : > { %v5776_v23 = vcombine.high %v3552_v10, %v3560_v11  ;;  %v5775_v28 = vcombine.low %v3552_v10, %v3560_v11 }
 0x70f   : > { %v3521_v22 = vmul.f32 %v5743_v20, %v3514_v53  ;;  %v6625_v20 = vld [vmem:[%s8190_s17 + $0x58] sm:$0xff]  }
 0x710   : > { %v6626_v53 = vld [vmem:[%s8190_s17 + $0xd8] sm:$0xff]  }
 0x711   : > { %v7606_v58 = vadd.f32 %v5744_v54, %v3521_v22  ;;  %v6627_v54 = vld [vmem:[%s8190_s17 + $0x18] sm:$0xff]  }
 0x712   : > { %v6628_v22 = vld [vmem:[%s8190_s17 + $0x98] sm:$0xff]  }
 0x713   : > { %v7610_v60 = vpack.c.bf16 %v7606_v58, %v7606_v58 }
 0x715   : > { %5777 = vmatmul.mubr.msk.bf16.vlgmr.msra.gmra.mxu0 %vm673_vm0, %v7610_v60  ;;  %5778 = vmatmul.mubr.msk.bf16.vlgmr.msra.gmra.mxu1 %vm673_vm0, %v7610_v60 }
 0x716   : > { %4163 = vmatpush1.bf16.msra.mxu0 %v5765_v41  ;;  %4204 = vmatpush1.bf16.msra.mxu1 %v5767_v44  ;;  %v6616_v41 = vld [vmem:[%s8190_s17 + $0xb0] sm:$0xff]   ;;  %v6619_v44 = vld [vmem:[%s8190_s17 + $0x28] sm:$0xff]  }
 0x717   : > { %4164 = vmatprep.subr.bf16.mxu0 %v5750_v33  ;;  %4205 = vmatprep.subr.bf16.mxu1 %v5752_v61  ;;  %v6634_v33 = vld [vmem:[%s8190_s17 + $0xc8] sm:$0xff]  }
 0x718   : > { %4182 = vmatprep.mubr.bf16.mxu0 %v6785_v51  ;;  %4223 = vmatprep.mubr.bf16.mxu1 %v6785_v51  ;;  %v6635_v61 = vld [vmem:[%s8190_s17 + $0x8] sm:$0xff]  }
 0x71a   : > { %4165 = vmatpush1.bf16.msra.mxu0 %v5749_v14  ;;  %4206 = vmatpush1.bf16.msra.mxu1 %v5751_v2  ;;  %v6640_v14 = vld [vmem:[%s8190_s17 + $0x80] sm:$0xff]   ;;  %v6641_v2 = vld [vmem:[%s8190_s17 + $0x178] sm:$0xff]  }
 0x71b   : > { %4244 = vmatprep.subr.bf16.mxu0 %v5770_v55  ;;  %4285 = vmatprep.subr.bf16.mxu1 %v5772_v7  ;;  %v6642_v55 = vld [vmem:[%s8190_s17 + $0x1f8] sm:$0xff]   ;;  %v3851_v7 = vsub.s32 6, %v7355_v49 }
 0x71d   : > { %5779 = vmatmul.mubr.msk.bf16.vlgmr.msra.gmra.mxu0 %vm673_vm0, %v7610_v60  ;;  %5780 = vmatmul.mubr.msk.bf16.vlgmr.msra.gmra.mxu1 %vm673_vm0, %v7610_v60  ;;  %v7793_v59 = vrot.slane %v7788_v8, %v3851_v7 }
 0x71e   : > { %4245 = vmatpush1.bf16.msra.mxu0 %v5769_v9  ;;  %4286 = vmatpush1.bf16.msra.mxu1 %v5771_v5  ;;  %v3831_v9 = vsub.s32 1, %v7355_v49  ;;  %v3839_v5 = vsub.s32 3, %v7355_v49 }
 0x71f   : > { %4246 = vmatprep.subr.bf16.mxu0 %v5754_v39  ;;  %4287 = vmatprep.subr.bf16.mxu1 %v5756_v31  ;;  %v3828_v39 = vrot.slane %v7799_v3, %v7358_v50  ;;  %v3836_v31 = vrot.slane %v7799_v3, %v3835_v4 }
 0x720   : > { %4264 = vmatprep.mubr.bf16.mxu0 %v6785_v51  ;;  %4305 = vmatprep.mubr.bf16.mxu1 %v6785_v51  ;;  %v3832_v6 = vrot.slane %v7799_v3, %v3831_v9  ;;  %v3840_v32 = vrot.slane %v7799_v3, %v3839_v5 }
 0x722   : > { %4247 = vmatpush1.bf16.msra.mxu0 %v5753_v40  ;;  %4288 = vmatpush1.bf16.msra.mxu1 %v5755_v13 }
 0x723   : > { %4326 = vmatprep.subr.bf16.mxu0 %v5774_v16  ;;  %4367 = vmatprep.subr.bf16.mxu1 %v5776_v23 }
 0x725   : > { %5781 = vmatmul.mubr.msk.bf16.vlgmr.msra.gmra.mxu0 %vm673_vm0, %v7610_v60  ;;  %5782 = vmatmul.mubr.msk.bf16.vlgmr.msra.gmra.mxu1 %vm673_vm0, %v7610_v60 }
 0x726   : > { %4327 = vmatpush1.bf16.msra.mxu0 %v5773_v25  ;;  %4368 = vmatpush1.bf16.msra.mxu1 %v5775_v28 }
 0x727   : > { %4328 = vmatprep.subr.bf16.mxu0 %v5758_v29  ;;  %4369 = vmatprep.subr.bf16.mxu1 %v5760_v30 }
 0x728   : > { %4346 = vmatprep.mubr.bf16.mxu0 %v6785_v51  ;;  %4387 = vmatprep.mubr.bf16.mxu1 %v6785_v51  ;;  %v6614_v51 = vld [vmem:[%s8190_s17 + $0xf0] sm:$0xff]  }
 0x72a   : > { %4329 = vmatpush1.bf16.msra.mxu0 %v5757_v26  ;;  %4370 = vmatpush1.bf16.msra.mxu1 %v5759_v27 }
 0x72b   : > { %6038 = vmatprep.subr.bf16.mxu0 %v6609_v34  ;;  %6060 = vmatprep.subr.bf16.mxu1 %v6610_v15 }
 0x72d   : > { %5783 = vmatmul.mubr.msk.bf16.vlgmr.msra.gmra.mxu0 %vm673_vm0, %v7610_v60  ;;  %5784 = vmatmul.mubr.msk.bf16.vlgmr.msra.gmra.mxu1 %vm673_vm0, %v7610_v60  ;;  %v6633_v60 = vld [vmem:[%s8190_s17 + $0x48] sm:$0xff]  }
 0x72e   : > { %6039 = vmatpush3.bf16.msra.mxu0 %v6611_v35  ;;  %6061 = vmatpush3.bf16.msra.mxu1 %v6612_v36 }
 0x72f   : > { %6040 = vmatprep.subr.bf16.mxu0 %v6613_v37  ;;  %6062 = vmatprep.subr.bf16.mxu1 %v6614_v51  ;;  %v3848_v37 = vrot.slane %v7799_v3, %v3847_v12  ;;  %v3856_v51 = vrot.slane %v7799_v3, %v3855_v19 }
 0x732   : > { %6041 = vmatpush3.bf16.msra.mxu0 %v6615_v38  ;;  %6063 = vmatpush3.bf16.msra.mxu1 %v6616_v41  ;;  %v6643_v38 = vld [vmem:[%s8190_s17 + $0x138] sm:$0xff]  }
 0x733   : > { %6042 = vmatprep.subr.bf16.mxu0 %v6617_v42  ;;  %6064 = vmatprep.subr.bf16.mxu1 %v6618_v43  ;;  %v6644_v41 = vld [vmem:[%s8190_s17 + $0x1b8] sm:$0xff]  }
 0x736   : > { %6043 = vmatpush3.bf16.msra.mxu0 %v6619_v44  ;;  %6065 = vmatpush3.bf16.msra.mxu1 %v6620_v45 }
 0x737   : > { %6044 = vmatprep.subr.bf16.mxu0 %v6621_v46  ;;  %6066 = vmatprep.subr.bf16.mxu1 %v6622_v47  ;;  %v6645_v46 = vld [vmem:[%s8190_s17 + $0x170] sm:$0xff]  }
 0x738   : > { %v6646_v47 = vld [vmem:[%s8190_s17 + $0x1f0] sm:$0xff]  }
 0x73a   : > { %6045 = vmatpush3.bf16.msra.mxu0 %v6623_v48  ;;  %6067 = vmatpush3.bf16.msra.mxu1 %v6624_v52 }
 0x73b   : > { %6046 = vmatprep.subr.bf16.mxu0 %v6625_v20  ;;  %6068 = vmatprep.subr.bf16.mxu1 %v6626_v53 }
 0x73e   : > { %6047 = vmatpush3.bf16.msra.mxu0 %v6627_v54  ;;  %6069 = vmatpush3.bf16.msra.mxu1 %v6628_v22  ;;  %v6647_v54 = vld [vmem:[%s8190_s17 + $0x130] sm:$0xff]  }
 0x73f   : > { %6048 = vmatprep.subr.bf16.mxu0 %v6629_v21  ;;  %6070 = vmatprep.subr.bf16.mxu1 %v6630_v24  ;;  %v6648_v22 = vld [vmem:[%s8190_s17 + $0x1b0] sm:$0xff]  }
 0x742   : > { %6049 = vmatpush3.bf16.msra.mxu0 %v6631_v56  ;;  %6071 = vmatpush3.bf16.msra.mxu1 %v6632_v57  ;;  %v6649_v56 = vld [vmem:[%s8190_s17 + $0x168] sm:$0xff]  }
 0x743   : > { %6050 = vmatprep.subr.bf16.mxu0 %v6633_v60  ;;  %6072 = vmatprep.subr.bf16.mxu1 %v6634_v33  ;;  %v6650_v57 = vld [vmem:[%s8190_s17 + $0x1e8] sm:$0xff]  }
 0x746   : > { %6051 = vmatpush3.bf16.msra.mxu0 %v6635_v61  ;;  %6073 = vmatpush3.bf16.msra.mxu1 %v6636_v62 }
 0x747   : > { %6052 = vmatprep.subr.bf16.mxu0 %v6637_v63  ;;  %6074 = vmatprep.subr.bf16.mxu1 %v6638_v0 }
 0x74a   : > { %6053 = vmatpush3.bf16.msra.mxu0 %v6639_v1  ;;  %6075 = vmatpush3.bf16.msra.mxu1 %v6640_v14  ;;  %v6651_v1 = vld [vmem:[%s8190_s17 + $0x128] sm:$0xff]  }
 0x74b   : > { %6082 = vmatprep.subr.bf16.mxu0 %v6641_v2  ;;  %6104 = vmatprep.subr.bf16.mxu1 %v6642_v55  ;;  %v6652_v14 = vld [vmem:[%s8190_s17 + $0x1a8] sm:$0xff]  }
 0x7d5   : > { %v4102_v10 = vpop.f32.mrf.mxu0  ;;  %v4143_v11 = vpop.f32.mrf.mxu1 }
 0x7d6   : > { %v4103_v40 = vadd.f32 %v4102_v10, %v3828_v39  ;;  %v4144_v13 = vadd.f32 %v4143_v11, %v3836_v31  ;;  %v6653_v39 = vld [vmem:[%s8190_s17 + $0x160] sm:$0xff]   ;;  %v3843_v10 = vsub.s32 4, %v7355_v49 }
 0x7d7   : > { %v4104_v16 = vpop.f32.mrf.mxu0  ;;  %v4145_v23 = vpop.f32.mrf.mxu1  ;;  %v6654_v31 = vld [vmem:[%s8190_s17 + $0x1e0] sm:$0xff]  }
 0x7d8   : > { %v4105_v18 = vadd.f32 %v4104_v16, %v3832_v6  ;;  %v4146_v17 = vadd.f32 %v4145_v23, %v3840_v32  ;;  %v4396_v25 = vmax.f32 %v4103_v40, 0.0  ;;  %v4398_v28 = vmax.f32 %v4144_v13, 0.0  ;;  %v6655_v11 = vld [vmem:[%s8190_s17 + $0x120] sm:$0xff]   ;;  %v6657_v23 = vld [vmem:[%s8190_s17 + $0x158] sm:$0xff]  }
 0x7d9   : > { %v4106_v29 = vpop.f32.mrf.mxu0  ;;  %v4147_v30 = vpop.f32.mrf.mxu1  ;;  %v6656_v40 = vld [vmem:[%s8190_s17 + $0x1a0] sm:$0xff]  }
 0x7da   : > { %v4397_v26 = vmax.f32 %v4105_v18, 0.0  ;;  %v4399_v27 = vmax.f32 %v4146_v17, 0.0  ;;  %v4412_v42 = vpack.c.bf16 %v4396_v25, %v4396_v25  ;;  %v4414_v43 = vpack.c.bf16 %v4398_v28, %v4398_v28  ;;  %v6658_v18 = vld [vmem:[%s8190_s17 + $0x1d8] sm:$0xff]  }
 0x7db   : > { %v4107_v34 = vpop.f32.mrf.mxu0  ;;  %v4148_v15 = vpop.f32.mrf.mxu1  ;;  %v3876_v17 = vrot.slane %v7788_v8, %v3843_v10  ;;  %v6659_v29 = vld [vmem:[%s8190_s17 + $0x118] sm:$0xff]  }
 0x7dc   : > { %v4413_v35 = vpack.c.bf16 %v4397_v26, %v4397_v26  ;;  %v4415_v36 = vpack.c.bf16 %v4399_v27, %v4399_v27  ;;  %v6660_v30 = vld [vmem:[%s8190_s17 + $0x198] sm:$0xff]   ;;  %v6661_v34 = vld [vmem:[%s8190_s17 + $0x150] sm:$0xff]  }
 0x7dd   : > { %v7828_v44 = vpop.f32.mrf.mxu0  ;;  %v7830_v45 = vpop.f32.mrf.mxu1  ;;  %v6662_v15 = vld [vmem:[%s8190_s17 + $0x1d0] sm:$0xff]  }
 0x7de   : > { %5234 = vmatprep.mubr.bf16.mxu0 %v4413_v35  ;;  %5274 = vmatprep.mubr.bf16.mxu1 %v4415_v36 }
 0x7df   : > { %v4186_v48 = vpop.f32.mrf.mxu0  ;;  %v4227_v52 = vpop.f32.mrf.mxu1  ;;  %5235 = vmatmul.mubr.bf16.vlgmr.msra.gmra.mxu0 %v4412_v42  ;;  %5275 = vmatmul.mubr.bf16.vlgmr.msra.gmra.mxu1 %v4414_v43  ;;  %v3844_v42 = vrot.slane %v7799_v3, %v3843_v10 }
 0x7e0   : > { %v4187_v20 = vadd.f32 %v4186_v48, %v3848_v37  ;;  %v4228_v53 = vadd.f32 %v4227_v52, %v3856_v51  ;;  %6083 = vmatpush3.bf16.msra.mxu0 %v6643_v38  ;;  %6105 = vmatpush3.bf16.msra.mxu1 %v6644_v41  ;;  %v6663_v38 = vld [vmem:[%s8190_s17 + $0x110] sm:$0xff]   ;;  %v6666_v48 = vld [vmem:[%s8190_s17 + $0x1c8] sm:$0xff]   ;;  %v3864_v52 = vrot.slane %v7788_v8, %v3831_v9 }
 0x7e1   : > { %v4188_v21 = vpop.f32.mrf.mxu0  ;;  %v4229_v24 = vpop.f32.mrf.mxu1  ;;  %6084 = vmatprep.subr.bf16.mxu0 %v6645_v46  ;;  %6106 = vmatprep.subr.bf16.mxu1 %v6646_v47  ;;  %v6664_v41 = vld [vmem:[%s8190_s17 + $0x190] sm:$0xff]   ;;  %v6665_v47 = vld [vmem:[%s8190_s17 + $0x148] sm:$0xff]  }
 0x7e2   : > { %v4401_v60 = vmax.f32 %v4187_v20, 0.0  ;;  %v4403_v33 = vmax.f32 %v4228_v53, 0.0  ;;  %v6667_v53 = vld [vmem:[%s8190_s17 + $0x108] sm:$0xff]   ;;  %v6670_v21 = vld [vmem:[%s8190_s17 + $0x1c0] sm:$0xff]  }
 0x7e3   : > { %v4189_v61 = vpop.f32.mrf.mxu0  ;;  %v4230_v62 = vpop.f32.mrf.mxu1 }
 0x7e4   : > { %v4417_v63 = vpack.c.bf16 %v4401_v60, %v4401_v60  ;;  %v4419_v0 = vpack.c.bf16 %v4403_v33, %v4403_v33  ;;  %6085 = vmatpush3.bf16.msra.mxu0 %v6647_v54  ;;  %6107 = vmatpush3.bf16.msra.mxu1 %v6648_v22  ;;  %v6668_v54 = vld [vmem:[%s8190_s17 + $0x188] sm:$0xff]   ;;  %v4185_v22 = vadd.f32 %v7828_v44, %v3844_v42  ;;  %v6671_v44 = vld [vmem:[%s8190_s17 + $0x100] sm:$0xff]   ;;  %v6673_v33 = vld [vmem:[%s8190_s17 + $0x278] sm:$0xff]  }
 0x7e5   : > { %v7856_v2 = vpop.f32.mrf.mxu0  ;;  %v7858_v55 = vpop.f32.mrf.mxu1  ;;  %6086 = vmatprep.subr.bf16.mxu0 %v6649_v56  ;;  %6108 = vmatprep.subr.bf16.mxu1 %v6650_v57  ;;  %v6674_v61 = vld [vmem:[%s8190_s17 + $0x2f8] sm:$0xff]   ;;  %v3860_v42 = vrot.slane %v7788_v8, %v7358_v50  ;;  %v3880_v50 = vrot.slane %v7788_v8, %v3847_v12  ;;  %v6701_v12 = vld [vmem:[%s8190_s17 + $0x240] sm:$0xff]  }
 0x7e6   : > { %5314 = vmatprep.mubr.bf16.mxu0 %v4417_v63  ;;  %5354 = vmatprep.mubr.bf16.mxu1 %v4419_v0  ;;  %v4400_v57 = vmax.f32 %v4185_v22, 0.0  ;;  %v6675_v0 = vld [vmem:[%s8190_s17 + $0x238] sm:$0xff]  }
 0x7e7   : > { %v4268_v6 = vpop.f32.mrf.mxu0  ;;  %v4309_v32 = vpop.f32.mrf.mxu1 }
 0x7e8   : > { %6087 = vmatpush3.bf16.msra.mxu0 %v6651_v1  ;;  %6109 = vmatpush3.bf16.msra.mxu1 %v6652_v14  ;;  %v4269_v24 = vadd.f32 %v4268_v6, %v3864_v52  ;;  %v4416_v1 = vpack.c.bf16 %v4400_v57, %v4400_v57  ;;  %v6677_v6 = vld [vmem:[%s8190_s17 + $0x270] sm:$0xff]   ;;  %v6699_v52 = vld [vmem:[%s8190_s17 + $0x208] sm:$0xff]  }
 0x7e9   : > { %v4270_v13 = vpop.f32.mrf.mxu0  ;;  %v4311_v16 = vpop.f32.mrf.mxu1  ;;  %6088 = vmatprep.subr.bf16.mxu0 %v6653_v39  ;;  %6110 = vmatprep.subr.bf16.mxu1 %v6654_v31  ;;  %v6676_v39 = vld [vmem:[%s8190_s17 + $0x2b8] sm:$0xff]  }
 0x7ea   : > { %v4405_v62 = vmax.f32 %v4269_v24, 0.0  ;;  %v6681_v13 = vld [vmem:[%s8190_s17 + $0x268] sm:$0xff]  }
 0x7eb   : > { %v4271_v25 = vpop.f32.mrf.mxu0  ;;  %v4312_v28 = vpop.f32.mrf.mxu1  ;;  %v6682_v16 = vld [vmem:[%s8190_s17 + $0x2e8] sm:$0xff]  }
 0x7ec   : > { %6089 = vmatpush3.bf16.msra.mxu0 %v6655_v11  ;;  %6111 = vmatpush3.bf16.msra.mxu1 %v6656_v40  ;;  %v4421_v31 = vpack.c.bf16 %v4405_v62, %v4405_v62  ;;  %v6679_v11 = vld [vmem:[%s8190_s17 + $0x230] sm:$0xff]   ;;  %v6686_v25 = vld [vmem:[%s8190_s17 + $0x2e0] sm:$0xff]   ;;  %v6714_v62 = vld [vmem:[%s8190_s17 + $0x3e8] sm:$0xff]  }
 0x7ed   : > { %v4348_v26 = vpop.f32.mrf.mxu0  ;;  %v4389_v27 = vpop.f32.mrf.mxu1  ;;  %6090 = vmatprep.subr.bf16.mxu0 %v6657_v23  ;;  %6112 = vmatprep.subr.bf16.mxu1 %v6658_v18  ;;  %v6680_v40 = vld [vmem:[%s8190_s17 + $0x2b0] sm:$0xff]   ;;  %v6683_v23 = vld [vmem:[%s8190_s17 + $0x228] sm:$0xff]   ;;  %v6687_v28 = vld [vmem:[%s8190_s17 + $0x220] sm:$0xff]  }
 0x7ee   : > { %v7892_v35 = vadd.f32 %v4348_v26, %v3876_v17  ;;  %v7895_v36 = vadd.f32 %v4389_v27, %v7793_v59  ;;  %v3852_v59 = vrot.slane %v7799_v3, %v3851_v7  ;;  %v3872_v7 = vrot.slane %v7788_v8, %v3839_v5  ;;  %v6669_v5 = vld [vmem:[%s8190_s17 + $0x140] sm:$0xff]   ;;  %v6684_v18 = vld [vmem:[%s8190_s17 + $0x2a8] sm:$0xff]   ;;  %v6690_v26 = vld [vmem:[%s8190_s17 + $0x2d8] sm:$0xff]  }
 0x7ef   : > { %v7897_v37 = vpop.f32.mrf.mxu0  ;;  %v7899_v51 = vpop.f32.mrf.mxu1  ;;  %v6685_v17 = vld [vmem:[%s8190_s17 + $0x260] sm:$0xff]   ;;  %v6691_v27 = vld [vmem:[%s8190_s17 + $0x218] sm:$0xff]  }
 0x7f0   : > { %6091 = vmatpush3.bf16.msra.mxu0 %v6659_v29  ;;  %6113 = vmatpush3.bf16.msra.mxu1 %v6660_v30  ;;  %v4226_v9 = vadd.f32 %v7830_v45, %v3852_v59  ;;  %v4310_v56 = vadd.f32 %v4309_v32, %v3872_v7  ;;  %v6672_v45 = vld [vmem:[%s8190_s17 + $0x180] sm:$0xff]   ;;  %v6678_v32 = vld [vmem:[%s8190_s17 + $0x2f0] sm:$0xff]   ;;  %v6689_v30 = vld [vmem:[%s8190_s17 + $0x258] sm:$0xff]  }
 0x7f1   : > { %v4352_v43 = vpop.f32.mrf.mxu0  ;;  %v4393_v46 = vpop.f32.mrf.mxu1  ;;  %6092 = vmatprep.subr.bf16.mxu0 %v6661_v34  ;;  %6114 = vmatprep.subr.bf16.mxu1 %v6662_v15  ;;  %v6688_v29 = vld [vmem:[%s8190_s17 + $0x2a0] sm:$0xff]   ;;  %v6692_v34 = vld [vmem:[%s8190_s17 + $0x298] sm:$0xff]   ;;  %v6693_v15 = vld [vmem:[%s8190_s17 + $0x250] sm:$0xff]  }
 0x7f2   : > { %v4402_v60 = vmax.f32 %v4226_v9, 0.0  ;;  %v4407_v63 = vmax.f32 %v4310_v56, 0.0  ;;  %v6696_v59 = vld [vmem:[%s8190_s17 + $0x290] sm:$0xff]   ;;  %v6697_v43 = vld [vmem:[%s8190_s17 + $0x248] sm:$0xff]   ;;  %v3868_v46 = vrot.slane %v7788_v8, %v3835_v4  ;;  %v4267_v4 = vadd.f32 %v7856_v2, %v3860_v42  ;;  %v6707_v9 = vld [vmem:[%s8190_s17 + $0x338] sm:$0xff]  }
 0x7f3   : > { %v4353_v3 = vpop.f32.mrf.mxu0  ;;  %v4394_v20 = vpop.f32.mrf.mxu1  ;;  %v6700_v7 = vld [vmem:[%s8190_s17 + $0x288] sm:$0xff]   ;;  %v6709_v56 = vld [vmem:[%s8190_s17 + $0x370] sm:$0xff]  }
 0x7f4   : > { %6093 = vmatpush3.bf16.msra.mxu0 %v6663_v38  ;;  %6115 = vmatpush3.bf16.msra.mxu1 %v6664_v41  ;;  %v4418_v14 = vpack.c.bf16 %v4402_v60, %v4402_v60  ;;  %v4423_v10 = vpack.c.bf16 %v4407_v63, %v4407_v63  ;;  %v6694_v38 = vld [vmem:[%s8190_s17 + $0x2d0] sm:$0xff]   ;;  %v4308_v49 = vadd.f32 %v7858_v55, %v3868_v46  ;;  %v6703_v3 = vld [vmem:[%s8190_s17 + $0x200] sm:$0xff]   ;;  %v4404_v20 = vmax.f32 %v4267_v4, 0.0  ;;  %v6715_v63 = vld [vmem:[%s8190_s17 + $0x328] sm:$0xff]  }
 0x7f5   : > { %6094 = vmatprep.subr.bf16.mxu0 %v6665_v47  ;;  %6116 = vmatprep.subr.bf16.mxu1 %v6666_v48  ;;  %v6695_v41 = vld [vmem:[%s8190_s17 + $0x210] sm:$0xff]   ;;  %v6698_v47 = vld [vmem:[%s8190_s17 + $0x2c8] sm:$0xff]   ;;  %v3888_v48 = vrot.slane %v7788_v8, %v3855_v19  ;;  %v6702_v8 = vld [vmem:[%s8190_s17 + $0x2c0] sm:$0xff]   ;;  %v4351_v19 = vadd.f32 %v7897_v37, %v3880_v50 }
 0x7f6   : > { %v6704_v55 = vld [vmem:[%s8190_s17 + $0x280] sm:$0xff]   ;;  %v6706_v37 = vld [vmem:[%s8190_s17 + $0x3f8] sm:$0xff]   ;;  %v6711_v60 = vld [vmem:[%s8190_s17 + $0x330] sm:$0xff]  }
 0x7f7   : > { %v4392_v2 = vadd.f32 %v7899_v51, %v3888_v48  ;;  %v4409_v51 = vmax.f32 %v4351_v19, 0.0 }
 0x7f8   : > { %6095 = vmatpush3.bf16.msra.mxu0 %v6667_v53  ;;  %6117 = vmatpush3.bf16.msra.mxu1 %v6668_v54  ;;  %v6705_v53 = vld [vmem:[%s8190_s17 + $0x378] sm:$0xff]   ;;  %v4406_v54 = vmax.f32 %v4308_v49, 0.0 }
 0x7f9   : > { %6096 = vmatprep.subr.bf16.mxu0 %v6669_v5  ;;  %6118 = vmatprep.subr.bf16.mxu1 %v6670_v21  ;;  %v4411_v22 = vmax.f32 %v4392_v2, 0.0  ;;  %v4420_v5 = vpack.c.bf16 %v4404_v20, %v4404_v20  ;;  %v6708_v21 = vld [vmem:[%s8190_s17 + $0x3b8] sm:$0xff]  }
 0x7fa   : > { %v4422_v24 = vpack.c.bf16 %v4406_v54, %v4406_v54 }
 0x7fb   : > { %v4427_v57 = vpack.c.bf16 %v4411_v22, %v4411_v22 }
 0x7fc   : > { %6097 = vmatpush3.bf16.msra.mxu0 %v6671_v44  ;;  %6119 = vmatpush3.bf16.msra.mxu1 %v6672_v45  ;;  %v4425_v44 = vpack.c.bf16 %v4409_v51, %v4409_v51  ;;  %v6710_v45 = vld [vmem:[%s8190_s17 + $0x3f0] sm:$0xff]  }
 0x7fd   : > { %6126 = vmatprep.subr.bf16.mxu0 %v6673_v33  ;;  %6148 = vmatprep.subr.bf16.mxu1 %v6674_v61  ;;  %v6712_v33 = vld [vmem:[%s8190_s17 + $0x3b0] sm:$0xff]   ;;  %v6713_v61 = vld [vmem:[%s8190_s17 + $0x368] sm:$0xff]  }
 0x7ff   : > { %5315 = vmatmul.mubr.bf16.vlgmr.msra.gmra.mxu0 %v4416_v1  ;;  %5355 = vmatmul.mubr.bf16.vlgmr.msra.gmra.mxu1 %v4418_v14  ;;  %v6717_v1 = vld [vmem:[%s8190_s17 + $0x360] sm:$0xff]  }
 0x800   : > { %6127 = vmatpush3.bf16.msra.mxu0 %v6675_v0  ;;  %5394 = vmatprep.mubr.bf16.mxu0 %v4421_v31  ;;  %v6716_v0 = vld [vmem:[%s8190_s17 + $0x3a8] sm:$0xff]   ;;  %v6718_v14 = vld [vmem:[%s8190_s17 + $0x3e0] sm:$0xff]  }
 0x801   : > { %6149 = vmatpush3.bf16.msra.mxu1 %v6676_v39  ;;  %5434 = vmatprep.mubr.bf16.mxu1 %v4423_v10  ;;  %v6719_v39 = vld [vmem:[%s8190_s17 + $0x320] sm:$0xff]   ;;  %v6723_v10 = vld [vmem:[%s8190_s17 + $0x318] sm:$0xff]  }
 0x802   : > { %6128 = vmatprep.subr.bf16.mxu0 %v6677_v6  ;;  %6150 = vmatprep.subr.bf16.mxu1 %v6678_v32  ;;  %v6720_v31 = vld [vmem:[%s8190_s17 + $0x3a0] sm:$0xff]   ;;  %v6721_v6 = vld [vmem:[%s8190_s17 + $0x358] sm:$0xff]  }
 0x803   : > { %v6722_v32 = vld [vmem:[%s8190_s17 + $0x3d8] sm:$0xff]  }
 0x804   : > { %6129 = vmatpush3.bf16.msra.mxu0 %v6679_v11  ;;  %v6724_v11 = vld [vmem:[%s8190_s17 + $0x398] sm:$0xff]  }
 0x805   : > { %6151 = vmatpush3.bf16.msra.mxu1 %v6680_v40  ;;  %6130 = vmatprep.subr.bf16.mxu0 %v6681_v13  ;;  %v6725_v40 = vld [vmem:[%s8190_s17 + $0x350] sm:$0xff]  }
 0x806   : > { %6152 = vmatprep.subr.bf16.mxu1 %v6682_v16  ;;  %v6726_v13 = vld [vmem:[%s8190_s17 + $0x3d0] sm:$0xff]  }
 0x807   : > { %v6727_v16 = vld [vmem:[%s8190_s17 + $0x310] sm:$0xff]  }
 0x808   : > { %6131 = vmatpush3.bf16.msra.mxu0 %v6683_v23  ;;  %v6728_v23 = vld [vmem:[%s8190_s17 + $0x390] sm:$0xff]  }
 0x809   : > { %6153 = vmatpush3.bf16.msra.mxu1 %v6684_v18  ;;  %6132 = vmatprep.subr.bf16.mxu0 %v6685_v17  ;;  %v6729_v18 = vld [vmem:[%s8190_s17 + $0x348] sm:$0xff]  }
 0x80a   : > { %6154 = vmatprep.subr.bf16.mxu1 %v6686_v25  ;;  %v6730_v17 = vld [vmem:[%s8190_s17 + $0x3c8] sm:$0xff]  }
 0x80b   : > { %v6731_v25 = vld [vmem:[%s8190_s17 + $0x308] sm:$0xff]  }
 0x80c   : > { %6133 = vmatpush3.bf16.msra.mxu0 %v6687_v28  ;;  %v6732_v28 = vld [vmem:[%s8190_s17 + $0x388] sm:$0xff]  }
 0x80d   : > { %6155 = vmatpush3.bf16.msra.mxu1 %v6688_v29  ;;  %6134 = vmatprep.subr.bf16.mxu0 %v6689_v30  ;;  %v6733_v29 = vld [vmem:[%s8190_s17 + $0x340] sm:$0xff]  }
 0x80e   : > { %6156 = vmatprep.subr.bf16.mxu1 %v6690_v26  ;;  %v6734_v30 = vld [vmem:[%s8190_s17 + $0x3c0] sm:$0xff]  }
 0x80f   : > { %v6735_v26 = vld [vmem:[%s8190_s17 + $0x300] sm:$0xff]  }
 0x810   : > { %6135 = vmatpush3.bf16.msra.mxu0 %v6691_v27  ;;  %v4408_v27 = vmax.f32 %v7892_v35, 0.0  ;;  %v5785_v35 = vld [vmem:[%s8191_s18] ss:$0 sm:$0xff] }
 0x811   : > { %6157 = vmatpush3.bf16.msra.mxu1 %v6692_v34  ;;  %6136 = vmatprep.subr.bf16.mxu0 %v6693_v15  ;;  %v6736_v34 = vld [vmem:[%s8190_s17 + $0x380] sm:$0xff]   ;;  %v4410_v15 = vmax.f32 %v7895_v36, 0.0 }
 0x812   : > { %6158 = vmatprep.subr.bf16.mxu1 %v6694_v38  ;;  %v4424_v38 = vpack.c.bf16 %v4408_v27, %v4408_v27 }
 0x814   : > { %6137 = vmatpush3.bf16.msra.mxu0 %v6695_v41  ;;  %v4426_v41 = vpack.c.bf16 %v4410_v15, %v4410_v15 }
 0x815   : > { %6159 = vmatpush3.bf16.msra.mxu1 %v6696_v59  ;;  %6138 = vmatprep.subr.bf16.mxu0 %v6697_v43 }
 0x816   : > { %6160 = vmatprep.subr.bf16.mxu1 %v6698_v47 }
 0x818   : > { %6139 = vmatpush3.bf16.msra.mxu0 %v6699_v52 }
 0x819   : > { %6161 = vmatpush3.bf16.msra.mxu1 %v6700_v7  ;;  %6140 = vmatprep.subr.bf16.mxu0 %v6701_v12 }
 0x81a   : > { %6162 = vmatprep.subr.bf16.mxu1 %v6702_v8 }
 0x81c   : > { %6141 = vmatpush3.bf16.msra.mxu0 %v6703_v3 }
 0x81d   : > { %6163 = vmatpush3.bf16.msra.mxu1 %v6704_v55  ;;  %6170 = vmatprep.subr.bf16.mxu0 %v6705_v53 }
 0x81e   : > { %6192 = vmatprep.subr.bf16.mxu1 %v6706_v37 }
 0x81f   : > { %5395 = vmatmul.mubr.bf16.vlgmr.msra.gmra.mxu0 %v4420_v5 }
 0x820   : > { %5435 = vmatmul.mubr.bf16.vlgmr.msra.gmra.mxu1 %v4422_v24  ;;  %6171 = vmatpush3.bf16.msra.mxu0 %v6707_v9 }
 0x821   : > { %5474 = vmatprep.mubr.bf16.mxu0 %v4425_v44  ;;  %6193 = vmatpush3.bf16.msra.mxu1 %v6708_v21 }
 0x822   : > { %5514 = vmatprep.mubr.bf16.mxu1 %v4427_v57  ;;  %6172 = vmatprep.subr.bf16.mxu0 %v6709_v56 }
 0x823   : > { %6194 = vmatprep.subr.bf16.mxu1 %v6710_v45 }
 0x824   : > { %6173 = vmatpush3.bf16.msra.mxu0 %v6711_v60 }
 0x825   : > { %6195 = vmatpush3.bf16.msra.mxu1 %v6712_v33  ;;  %6174 = vmatprep.subr.bf16.mxu0 %v6713_v61 }
 0x826   : > { %6196 = vmatprep.subr.bf16.mxu1 %v6714_v62 }
 0x828   : > { %6175 = vmatpush3.bf16.msra.mxu0 %v6715_v63 }
 0x829   : > { %6197 = vmatpush3.bf16.msra.mxu1 %v6716_v0  ;;  %6176 = vmatprep.subr.bf16.mxu0 %v6717_v1 }
 0x82a   : > { %6198 = vmatprep.subr.bf16.mxu1 %v6718_v14 }
 0x82c   : > { %6177 = vmatpush3.bf16.msra.mxu0 %v6719_v39 }
 0x82d   : > { %6199 = vmatpush3.bf16.msra.mxu1 %v6720_v31  ;;  %6178 = vmatprep.subr.bf16.mxu0 %v6721_v6 }
 0x82e   : > { %6200 = vmatprep.subr.bf16.mxu1 %v6722_v32 }
 0x830   : > { %6179 = vmatpush3.bf16.msra.mxu0 %v6723_v10 }
 0x831   : > { %6201 = vmatpush3.bf16.msra.mxu1 %v6724_v11  ;;  %6180 = vmatprep.subr.bf16.mxu0 %v6725_v40 }
 0x832   : > { %6202 = vmatprep.subr.bf16.mxu1 %v6726_v13 }
 0x834   : > { %6181 = vmatpush3.bf16.msra.mxu0 %v6727_v16 }
 0x835   : > { %6203 = vmatpush3.bf16.msra.mxu1 %v6728_v23  ;;  %6182 = vmatprep.subr.bf16.mxu0 %v6729_v18 }
 0x836   : > { %6204 = vmatprep.subr.bf16.mxu1 %v6730_v17 }
 0x838   : > { %6183 = vmatpush3.bf16.msra.mxu0 %v6731_v25 }
 0x839   : > { %6205 = vmatpush3.bf16.msra.mxu1 %v6732_v28  ;;  %6184 = vmatprep.subr.bf16.mxu0 %v6733_v29 }
 0x83a   : > { %6206 = vmatprep.subr.bf16.mxu1 %v6734_v30 }
 0x83c   : > { %6185 = vmatpush3.bf16.msra.mxu0 %v6735_v26 }
 0x83d   : > { %6207 = vmatpush3.bf16.msra.mxu1 %v6736_v34 }
 0x83f   : > { %5475 = vmatmul.mubr.bf16.vlgmr.msra.gmra.mxu0 %v4424_v38  ;;  %v5915_v38 = vld [vmem:[%s8193_s20] ss:$0 sm:$0xff] }
 0x840   : > { %5515 = vmatmul.mubr.bf16.vlgmr.msra.gmra.mxu1 %v4426_v41 }
 0x89f   : > { %v6054_v42 = vpop.f32.mrf.mxu0  ;;  %v6076_v59 = vpop.f32.mrf.mxu1 }
 0x8a1   : > { %v6055_v43 = vpop.f32.mrf.mxu0  ;;  %v6077_v46 = vpop.f32.mrf.mxu1 }
 0x8a2   : > { %v6056_v47 = vadd.f32 %v6055_v43, %v6054_v42  ;;  %v6078_v50 = vadd.f32 %v6077_v46, %v6076_v59 }
 0x8a3   : > { %v6057_v48 = vpop.f32.mrf.mxu0  ;;  %v6079_v52 = vpop.f32.mrf.mxu1 }
 0x8a4   : > { %v5237_v36 = vadd.f32 %v6056_v47, %v5785_v35 }
 0x8a5   : > { %v6058_v4 = vpop.f32.mrf.mxu0  ;;  %v6080_v7 = vpop.f32.mrf.mxu1 }
 0x8a6   : > { %v5277_v12 = vadd.f32 %v6078_v50, %v5237_v36 }
 0x8bf   : > { %v6098_v49 = vpop.f32.mrf.mxu0  ;;  %v6120_v8 = vpop.f32.mrf.mxu1 }
 0x8c1   : > { %v6099_v19 = vpop.f32.mrf.mxu0  ;;  %v6121_v2 = vpop.f32.mrf.mxu1 }
 0x8c2   : > { %v6100_v56 = vadd.f32 %v6099_v19, %v6098_v49  ;;  %v6122_v45 = vadd.f32 %v6121_v2, %v6120_v8 }
 0x8c3   : > { %v6101_v3 = vpop.f32.mrf.mxu0  ;;  %v6123_v20 = vpop.f32.mrf.mxu1 }
 0x8c4   : > { %v5317_v44 = vadd.f32 %v6100_v56, %v5277_v12 }
 0x8c5   : > { %v6102_v55 = vpop.f32.mrf.mxu0  ;;  %v6124_v53 = vpop.f32.mrf.mxu1 }
 0x8c6   : > { %v5357_v60 = vadd.f32 %v6122_v45, %v5317_v44 }
 0x8df   : > { %v6142_v54 = vpop.f32.mrf.mxu0 }
 0x8e0   : > { %v6164_v37 = vpop.f32.mrf.mxu1 }
 0x8e1   : > { %v6143_v51 = vpop.f32.mrf.mxu0 }
 0x8e2   : > { %v6165_v22 = vpop.f32.mrf.mxu1  ;;  %v6144_v57 = vadd.f32 %v6143_v51, %v6142_v54 }
 0x8e3   : > { %v6145_v9 = vpop.f32.mrf.mxu0  ;;  %v6166_v62 = vadd.f32 %v6165_v22, %v6164_v37 }
 0x8e4   : > { %v6167_v5 = vpop.f32.mrf.mxu1  ;;  %v5397_v33 = vadd.f32 %v6144_v57, %v5357_v60 }
 0x8e5   : > { %v6146_v21 = vpop.f32.mrf.mxu0 }
 0x8e6   : > { %v6168_v24 = vpop.f32.mrf.mxu1  ;;  %v5437_v1 = vadd.f32 %v6166_v62, %v5397_v33 }
 0x8ff   : > { %v6186_v61 = vpop.f32.mrf.mxu0 }
 0x900   : > { %v6208_v63 = vpop.f32.mrf.mxu1 }
 0x901   : > { %v6187_v0 = vpop.f32.mrf.mxu0 }
 0x902   : > { %v6188_v14 = vadd.f32 %v6187_v0, %v6186_v61  ;;  %v6209_v39 = vpop.f32.mrf.mxu1 }
 0x903   : > { %v6189_v31 = vpop.f32.mrf.mxu0  ;;  %v6210_v32 = vadd.f32 %v6209_v39, %v6208_v63 }
 0x904   : > { %v5477_v6 = vadd.f32 %v6188_v14, %v5437_v1  ;;  %v6211_v10 = vpop.f32.mrf.mxu1 }
 0x905   : > { %v6190_v11 = vpop.f32.mrf.mxu0 }
 0x906   : > { %v5517_v40 = vadd.f32 %v6210_v32, %v5477_v6  ;;  %v6212_v13 = vpop.f32.mrf.mxu1 }
 0x908   : > { %v5522_v16 = vadd.f32 %v5517_v40, %v7606_v58  ;;  %v5914_v58 = vld [vmem:[%s8192_s19] ss:$0 sm:$0xff] }
 0x90a   : > { %v5523_v23 = vsel %vm673_vm0, %v5522_v16, 0.0 }
 0x90b   : > { %5524 = vadd.xlane.f32.xlu0 %v5523_v23 }
 0x994   : > { %v5525_v18 = vpop.xlane.xlu0 %5524 }
 0x995   : > { %v5526_v17 = vmul.f32 0.03125, %v5525_v18 }
 0x997   : > { %v5527_v25 = vsub.f32 %v5522_v16, %v5526_v17 }
 0x999   : > { %v5528_v28 = vmul.f32 %v5527_v25, %v5527_v25 }
 0x99b   : > { %v5529_v29 = vsel %vm673_vm0, %v5528_v28, 0.0 }
 0x99c   : > { %5530 = vadd.xlane.f32.xlu1 %v5529_v29 }
 0xa25   : > { %v5531_v30 = vpop.xlane.xlu1 %5530 }
 0xa26   : > { %v5532_v26 = vmul.f32 0.03125, %v5531_v30 }
 0xa28   : > { %v5533_v27 = vadd.f32 1e-05, %v5532_v26 }
 0xa2a   : > { %6773 = vrsqrt.f32 %v5533_v27 }
 0xa37   : > { %v6774_v34 = vpop.eup %6773 }
 0xa38   : > { %v5535_v15 = vmul.f32 %v6774_v34, %v5527_v25 }
 0xa3a   : > { %v5542_v41 = vmul.f32 %v5914_v58, %v5535_v15 }
 0xa3c   : > { %v5549_v42 = vadd.f32 %v5915_v38, %v5542_v41 }
 0xa3e   : > { %5550 = vst.msk [vmem:[%s665_s1] sm:$0xff] %vm673_vm0, %v5549_v42 }
 0xa3f PF: > { %s31_s2 = sadd.s32 1, %s6781_s2  }
 0xa40   : > { %p28_p4 = scmp.ge.s32.totalorder %s31_s2, 4  }
 0xa42   :  { %30 = sbr.rel (!%p28_p4) target bundleno = 7 (0x7), region = 137 }

// kernel: transformer_forward.3
= control target key start
LH: loop header
LB: loop body
LE: loop exit
PB: predicated region body
PF: predicated region fallthrough
CT: control target
= control target key end

     0   :  { %s11010_s6 = smov 1   ;;  %s11011_s10 = smov 2   ;;  %s12542_s0 = inlined_call_operand.smem [shape: u32[36], index: -1, kind: input, shape index: {}] }
   0x1   :  { %s11057_s5 = sld [smem:[%s12542_s0]]   ;;  %s11012_s14 = smov 3  }
   0x2   :  { %s11062_s9 = sld [smem:[%s12542_s0 + %s11010_s6]]   ;;  %s11013_s18 = smov 4  }
   0x3   :  { %s11067_s13 = sld [smem:[%s12542_s0 + %s11011_s10]]   ;;  %s11014_s22 = smov 5  }
   0x4   :  { %s11072_s17 = sld [smem:[%s12542_s0 + %s11012_s14]]   ;;  %s11015_s26 = smov 6  }
   0x5   :  { %s11077_s21 = sld [smem:[%s12542_s0 + %s11013_s18]]   ;;  %s11016_s30 = smov 7  }
   0x6   :  { %s11082_s25 = sld [smem:[%s12542_s0 + %s11014_s22]]   ;;  %s11017_s4 = smov 8  }
   0x7   :  { %12564 = sst [smem:[#allocation5_spill]] %s11057_s5  ;;  %s11018_s10 = smov 9  }
   0x8   :  { %12565 = sst [smem:[#allocation6_spill]] %s11062_s9  ;;  %s11019_s15 = smov 10  }
   0x9   :  { %s11087_s29 = sld [smem:[%s12542_s0 + %s11015_s26]]   ;;  %s11020_s20 = smov 11  }
   0xa   :  { %s11092_s3 = sld [smem:[%s12542_s0 + %s11016_s30]]   ;;  %s11021_s26 = smov 12  }
   0xb   :  { %12566 = sst [smem:[#allocation7_spill]] %s11077_s21  ;;  %s11022_s1 = smov 13  }
   0xc   :  { %s11097_s8 = sld [smem:[%s12542_s0 + %s11017_s4]]   ;;  %s11023_s7 = smov 14  }
   0xd   :  { %s11102_s14 = sld [smem:[%s12542_s0 + %s11018_s10]]   ;;  %s11025_s22 = smov 16  }
   0xe   :  { %s11107_s19 = sld [smem:[%s12542_s0 + %s11019_s15]]   ;;  %s11024_s15 = smov 15  }
   0xf   :  { %12567 = sst [smem:[#allocation8_spill]] %s11087_s29  ;;  %s11026_s28 = smov 17  }
  0x10   :  { %12568 = sst [smem:[#allocation9_spill]] %s11092_s3 }
  0x11   :  { %s11112_s24 = sld [smem:[%s12542_s0 + %s11020_s20]]  }
  0x12   :  { %12569 = sst [smem:[#allocation10_spill]] %s11097_s8 }
  0x13   :  { %s11117_s30 = sld [smem:[%s12542_s0 + %s11021_s26]]  }
  0x14   :  { %s11122_s6 = sld [smem:[%s12542_s0 + %s11022_s1]]  }
  0x15   :  { %s11127_s12 = sld [smem:[%s12542_s0 + %s11023_s7]]   ;;  %s11027_s7 = smov 18  }
  0x16   :  { %s11132_s20 = sld [smem:[%s12542_s0 + %s11024_s15]]   ;;  %s11028_s15 = smov 19  }
  0x17   :  { %s11137_s27 = sld [smem:[%s12542_s0 + %s11025_s22]]   ;;  %s11029_s22 = smov 20  }
  0x18   :  { %s11142_s4 = sld [smem:[%s12542_s0 + %s11026_s28]]   ;;  %s11030_s28 = smov 21  }
  0x19   :  { %s11147_s29 = sld [smem:[%s12542_s0 + %s11027_s7]]   ;;  %s11031_s7 = smov 22  }
  0x1a   :  { %12570 = sst [smem:[#allocation11_spill]] %s11122_s6 }
  0x1b   :  { %s11152_s21 = sld [smem:[%s12542_s0 + %s11028_s15]]   ;;  %s11032_s15 = smov 23  }
  0x1c   :  { %12571 = sst [smem:[#allocation12_spill]] %s11132_s20 }
  0x1d   :  { %12572 = sst [smem:[#allocation13_spill]] %s11137_s27 }
  0x1e   :  { %12573 = sst [smem:[#allocation14_spill]] %s11142_s4 }
  0x1f   :  { %12574 = sst [smem:[#allocation15_spill]] %s11147_s29 }
  0x20   :  { %s11157_s27 = sld [smem:[%s12542_s0 + %s11029_s22]]   ;;  %s11033_s22 = smov 24  }
  0x21   :  { %12575 = sst [smem:[#allocation16_spill]] %s11152_s21 }
  0x22   :  { %s11162_s20 = sld [smem:[%s12542_s0 + %s11030_s28]]   ;;  %s11034_s28 = smov 25  }
  0x23   :  { %s11167_s29 = sld [smem:[%s12542_s0 + %s11031_s7]]   ;;  %s11035_s7 = smov 26  }
  0x24   :  { %s11172_s21 = sld [smem:[%s12542_s0 + %s11032_s15]]   ;;  %s11036_s15 = smov 27  }
  0x26   :  { %12576 = sst [smem:[#allocation17_spill]] %s11157_s27 }
  0x27   :  { %s11177_s27 = sld [smem:[%s12542_s0 + %s11033_s22]]   ;;  %s11037_s22 = smov 28  }
  0x28   :  { %12577 = sst [smem:[#allocation18_spill]] %s11162_s20 }
  0x29   :  { %12578 = sst [smem:[#allocation19_spill]] %s11167_s29 }
  0x2a   :  { %12579 = sst [smem:[#allocation20_spill]] %s11172_s21 }
  0x2b   :  { %s11182_s20 = sld [smem:[%s12542_s0 + %s11034_s28]]   ;;  %s11038_s28 = smov 29  }
  0x2c   :  { %s11187_s29 = sld [smem:[%s12542_s0 + %s11035_s7]]   ;;  %s11039_s7 = smov 30  }
  0x2d   :  { %12580 = sst [smem:[#allocation21_spill]] %s11177_s27 }
  0x2e   :  { %s11192_s21 = sld [smem:[%s12542_s0 + %s11036_s15]]   ;;  %s11040_s15 = smov 31  }
  0x2f   :  { %s11197_s27 = sld [smem:[%s12542_s0 + %s11037_s22]]   ;;  %s11041_s22 = smov 32  }
  0x31   :  { %12581 = sst [smem:[#allocation22_spill]] %s11182_s20 }
  0x32   :  { %12582 = sst [smem:[#allocation23_spill]] %s11187_s29 }
  0x33   :  { %s11202_s20 = sld [smem:[%s12542_s0 + %s11038_s28]]   ;;  %s11042_s28 = smov 33  }
  0x34   :  { %12583 = sst [smem:[#allocation24_spill]] %s11192_s21 }
  0x35   :  { %12584 = sst [smem:[#allocation25_spill]] %s11197_s27 }
  0x36   :  { %s11207_s29 = sld [smem:[%s12542_s0 + %s11039_s7]]   ;;  %s11043_s7 = smov 34  }
  0x37   :  { %s11212_s21 = sld [smem:[%s12542_s0 + %s11040_s15]]   ;;  %s11044_s15 = smov 35  }
  0x38   :  { %s11217_s27 = sld [smem:[%s12542_s0 + %s11041_s22]]  }
  0x39   :  { %12585 = sst [smem:[#allocation26_spill]] %s11202_s20 }
  0x3a   :  { %s11222_s20 = sld [smem:[%s12542_s0 + %s11042_s28]]  }
  0x3c   :  { %12586 = sst [smem:[#allocation27_spill]] %s11207_s29 }
  0x3d   :  { %12587 = sst [smem:[#allocation28_spill]] %s11212_s21 }
  0x3e   :  { %s11227_s29 = sld [smem:[%s12542_s0 + %s11043_s7]]  }
  0x3f   :  { %s11232_s21 = sld [smem:[%s12542_s0 + %s11044_s15]]  }
  0x40   :  { %76 = vsyncpa [#allocation3], 0 }
  0x41   :  { %78 = vsyncpa [#allocation3 + $0x1], 0  ;;  %s11234_s22 = smov 0   ;;  %s11236_s23 = smov 0  }
  0x42   :  { %s11238_s26 = smov 0   ;;  %s11240_s28 = smov 0  }
  0x43 LB: > { %s12588_s8 = sld [smem:[#allocation10_spill]]  ;;  %s11255_s0 = sadd.s32 4294967295, %s11008_s28   ;;  %s11008_s28 = sphi %s11240_s28, %s12621_s28   ;;  %s11004_s26 = sphi %s11238_s26, %s12620_s26   ;;  %s11000_s23 = sphi %s11236_s23, %s12619_s23   ;;  %s10996_s22 = sphi %s11234_s22, %s12618_s22  }
  0x44   : > { %s12589_s6 = sld [smem:[#allocation11_spill]]  ;;  %s9040_s1 = sadd.s32 4294967294, %s11008_s28  }
  0x45   : > { %s12590_s4 = sld [smem:[#allocation14_spill]]  ;;  %s11259_s2 = sadd.s32 1, %s11008_s28  }
  0x46   : > { %s12591_s3 = sld [smem:[#allocation9_spill]]  ;;  %s846_s7 = sadd.s32 1, %s11004_s26 }
  0x47   : > { %s843_s10 = ssub.s32 %s11008_s28, %s11259_s2  ;;  %p856_p0 = scmp.ne.s32.totalorder %s11004_s26, %s11000_s23 }
  0x48   : > { %p844_p1 = scmp.eq.s32.totalorder %s843_s10, 0  ;;  %p857_p2 = scmp.eq.s32.totalorder %s11255_s0, 1 }
  0x49   : > { %p862_p3 = scmp.ne.s32.totalorder %s11000_s23, %s10996_s22  ;;  %p863_p4 = scmp.eq.s32.totalorder %s9040_s1, 1 }
  0x4a   : > { %s11270_s11 = scalar_select %p844_p1, %s11004_s26, %s846_s7  }
  0x4b   : > { %p11272_p5 = por %p857_p2, %p856_p0  ;;  %p11276_p6 = por %p863_p4, %p862_p3 }
  0x4c   : > { %p9043_p7 = scmp.ge.s32.totalorder %s11008_s28, 1  ;;  %p1000_p8 = scmp.lt.s32.totalorder %s11008_s28, 3 }
  0x4e   : > { %p1001_p9 = pnand %p9043_p7, %p1000_p8 }
  0x4f   : > { %s12594_s5 = sld [smem:[#allocation5_spill]] (!%p1001_p9)  ;;  %p1097_p10 = scmp.lt.s32.totalorder (!%p1001_p9), %s11255_s0, 1 }
  0x50   : > { %1004 = sbr.rel (%p1001_p9) target bundleno = 4379 (0x111b), region = 160  ;;  %s12595_s9 = sld [smem:[#allocation6_spill]] (!%p1001_p9) }
  0x55   : > { %s11284_s18 = scalar_select %p1097_p10, %s11255_s0, 1  ;;  %vm1118_vm0 = vcmask 261120   ;;  %v10650_v10 = vld [vmem:[%s12591_s3 + $0x8] sm:$0xff]   ;;  %v10651_v11 = vld [vmem:[%s12591_s3 + $0x18] sm:$0xff]   ;;  %v11045_v12 = vmov 0.0   ;;  %v10652_v13 = vld [vmem:[%s12591_s3] sm:$0xff]  }
  0x56   : > { %v1113_v1 = vld [vmem:[%s12595_s9] sm:$0xff]  ;;  %9893 = vmatprep.subr.bf16.mxu0 %v11045_v12  ;;  %9901 = vmatprep.subr.bf16.mxu1 %v11045_v12  ;;  %v10653_v14 = vld [vmem:[%s12591_s3 + $0x10] sm:$0xff]   ;;  %vm11046_vm1 = vmmov 0   ;;  %v10654_v24 = vld [vmem:[%s12591_s3 + $0x28] sm:$0xff]   ;;  %vm2705_vm2 = vcmask 64512   ;;  %vm3191_vm3 = vcmask 1043456  }
  0x57   : > { %s9045_s1 = sshll.u32 %s11284_s18, 3  ;;  %9894 = vmatpush3.bf16.msra.mxu0 %v10650_v10  ;;  %9902 = vmatpush3.bf16.msra.mxu1 %v10651_v11  ;;  %v9047_v19 = vld [vmem:[%s11067_s13] ss:$0 sm:$0xff]  ;;  %v10655_v25 = vld [vmem:[%s12591_s3 + $0x38] sm:$0xff]   ;;  %v10657_v28 = vld [vmem:[%s12591_s3 + $0x30] sm:$0xff]   ;;  %s1107_s10 = scalar_lea.vmem %s11082_s25, %s11284_s18  ;;  %vm8900_vm10 = vcmask 130048  }
  0x58   : > { %s1100_s7 = scalar_lea.vmem %s12594_s5, %s9045_s1  ;;  %9895 = vmatprep.subr.bf16.mxu0 %v11045_v12  ;;  %9903 = vmatprep.subr.bf16.mxu1 %v11045_v12  ;;  %v9048_v21 = vld [vmem:[%s11072_s17] ss:$0 sm:$0xff]  ;;  %v10658_v29 = vld [vmem:[%s12591_s3 + $0x48] sm:$0xff]   ;;  %v10659_v30 = vld [vmem:[%s12591_s3 + $0x58] sm:$0xff]   ;;  %s9471_s5 = sshll.u32 %s11255_s0, 7 }
  0x59   : > { %v1112_v0 = vld [vmem:[%s1100_s7] sm:$0xff]  ;;  %9897 = vmatprep.mubr.msk.bf16.mxu0 %vm11046_vm1, %v11045_v12  ;;  %9905 = vmatprep.mubr.msk.bf16.mxu1 %vm11046_vm1, %v11045_v12  ;;  %v10661_v32 = vld [vmem:[%s12591_s3 + $0x50] sm:$0xff]   ;;  %v10662_v33 = vld [vmem:[%s12591_s3 + $0x68] sm:$0xff]   ;;  %s12598_s7 = sld [smem:[#allocation12_spill]]  ;;  %s11048_s0 = smov [#allocation2]  }
  0x5a   : > { %v1116_v2 = vmul.f32 5.656854, %v1112_v0  ;;  %v10656_v27 = vld [vmem:[%s12591_s3 + $0x20] sm:$0xff]   ;;  %v10663_v34 = vld [vmem:[%s12591_s3 + $0x78] sm:$0xff]   ;;  %v10665_v36 = vld [vmem:[%s12591_s3 + $0x70] sm:$0xff]  }
  0x5b   : > { %9896 = vmatpush3.bf16.msra.mxu0 %v10652_v13  ;;  %9904 = vmatpush3.bf16.msra.mxu1 %v10653_v14  ;;  %v10660_v31 = vld [vmem:[%s12591_s3 + $0x40] sm:$0xff]   ;;  %v10666_v37 = vld [vmem:[%s11102_s14 + $0x8] sm:$0xff]   ;;  %v10667_v38 = vld [vmem:[%s11102_s14 + $0x18] sm:$0xff]  }
  0x5c   : > { %v1117_v3 = vadd.f32 %v1116_v2, %v1113_v1  ;;  %9909 = vmatprep.subr.bf16.mxu0 %v11045_v12  ;;  %9917 = vmatprep.subr.bf16.mxu1 %v11045_v12  ;;  %v10664_v35 = vld [vmem:[%s12591_s3 + $0x60] sm:$0xff]   ;;  %v10669_v40 = vld [vmem:[%s11102_s14 + $0x10] sm:$0xff]   ;;  %v10670_v41 = vld [vmem:[%s11102_s14 + $0x28] sm:$0xff]  }
  0x5d   : > { %v10668_v39 = vld [vmem:[%s11102_s14] sm:$0xff]   ;;  %v10671_v42 = vld [vmem:[%s11102_s14 + $0x38] sm:$0xff]   ;;  %v10673_v44 = vld [vmem:[%s11102_s14 + $0x30] sm:$0xff]  }
  0x5e   : > { %v1119_v4 = vsel %vm1118_vm0, %v1117_v3, 0.0  ;;  %v10672_v43 = vld [vmem:[%s11102_s14 + $0x20] sm:$0xff]   ;;  %v10674_v45 = vld [vmem:[%s11102_s14 + $0x48] sm:$0xff]   ;;  %v10675_v46 = vld [vmem:[%s11102_s14 + $0x58] sm:$0xff]  }
  0x5f   : > { %1120 = vadd.xlane.f32.xlu0 %v1119_v4  ;;  %v10676_v47 = vld [vmem:[%s11102_s14 + $0x40] sm:$0xff]   ;;  %v10677_v48 = vld [vmem:[%s11102_s14 + $0x50] sm:$0xff]   ;;  %v10678_v49 = vld [vmem:[%s11102_s14 + $0x68] sm:$0xff]  }
  0x60   : > { %v10679_v50 = vld [vmem:[%s11102_s14 + $0x78] sm:$0xff]   ;;  %v10680_v51 = vld [vmem:[%s11102_s14 + $0x60] sm:$0xff]   ;;  %v10681_v52 = vld [vmem:[%s11102_s14 + $0x70] sm:$0xff]  }
  0x61   : > { %v10682_v53 = vld [vmem:[%s11112_s24 + $0x8] sm:$0xff]   ;;  %v10683_v54 = vld [vmem:[%s11112_s24 + $0x18] sm:$0xff]   ;;  %v10684_v55 = vld [vmem:[%s11112_s24] sm:$0xff]  }
  0x62   : > { %v10685_v56 = vld [vmem:[%s11112_s24 + $0x10] sm:$0xff]   ;;  %v10686_v57 = vld [vmem:[%s11112_s24 + $0x28] sm:$0xff]   ;;  %v10687_v58 = vld [vmem:[%s11112_s24 + $0x38] sm:$0xff]  }
  0x63   : > { %v10688_v59 = vld [vmem:[%s11112_s24 + $0x20] sm:$0xff]   ;;  %v10689_v60 = vld [vmem:[%s11112_s24 + $0x30] sm:$0xff]   ;;  %v10690_v61 = vld [vmem:[%s11112_s24 + $0x48] sm:$0xff]  }
  0x64   : > { %v10691_v62 = vld [vmem:[%s11112_s24 + $0x58] sm:$0xff]   ;;  %v10692_v63 = vld [vmem:[%s11112_s24 + $0x40] sm:$0xff]   ;;  %v10693_v0 = vld [vmem:[%s11112_s24 + $0x50] sm:$0xff]  }
  0x65   : > { %v10694_v1 = vld [vmem:[%s11112_s24 + $0x68] sm:$0xff]   ;;  %v10695_v2 = vld [vmem:[%s11112_s24 + $0x78] sm:$0xff]   ;;  %v10697_v4 = vld [vmem:[%s11112_s24 + $0x70] sm:$0xff]  }
  0xe8   : > { %v1121_v5 = vpop.xlane.xlu0 %1120 }
  0xe9   : > { %v1123_v6 = vmul.f32 0.03125, %v1121_v5 }
  0xeb   : > { %v1124_v7 = vsub.f32 %v1117_v3, %v1123_v6  ;;  %v10696_v3 = vld [vmem:[%s11112_s24 + $0x60] sm:$0xff]  }
  0xed   : > { %v1125_v8 = vmul.f32 %v1124_v7, %v1124_v7 }
  0xef   : > { %v1126_v9 = vsel %vm1118_vm0, %v1125_v8, 0.0 }
  0xf0   : > { %1127 = vadd.xlane.f32.xlu0 %v1126_v9 }
 0x179   : > { %v1128_v15 = vpop.xlane.xlu0 %1127 }
 0x17a   : > { %v1129_v16 = vmul.f32 0.03125, %v1128_v15 }
 0x17c   : > { %v1130_v17 = vadd.f32 1e-05, %v1129_v16 }
 0x17e   : > { %10876 = vrsqrt.f32 %v1130_v17 }
 0x18b   : > { %v10877_v18 = vpop.eup %10876 }
 0x18c   : > { %v1132_v20 = vmul.f32 %v10877_v18, %v1124_v7 }
 0x18e   : > { %v1139_v22 = vmul.f32 %v9047_v19, %v1132_v20 }
 0x190   : > { %v11309_v23 = vadd.f32 %v9048_v21, %v1139_v22 }
 0x192   : > { %v11315_v26 = vpack.c.bf16 %v11309_v23, %v11309_v23 }
 0x194   : > { %9898 = vmatmul.mubr.msk.bf16.vlgmr.msra.gmra.mxu0 %vm1118_vm0, %v11315_v26  ;;  %9906 = vmatmul.mubr.msk.bf16.vlgmr.msra.gmra.mxu1 %vm1118_vm0, %v11315_v26 }
 0x195   : > { %9910 = vmatpush3.bf16.msra.mxu0 %v10654_v24  ;;  %9918 = vmatpush3.bf16.msra.mxu1 %v10655_v25 }
 0x196   : > { %9911 = vmatprep.subr.bf16.mxu0 %v11045_v12  ;;  %9919 = vmatprep.subr.bf16.mxu1 %v11045_v12 }
 0x197   : > { %9913 = vmatprep.mubr.msk.bf16.mxu0 %vm11046_vm1, %v11045_v12  ;;  %9921 = vmatprep.mubr.msk.bf16.mxu1 %vm11046_vm1, %v11045_v12 }
 0x199   : > { %9912 = vmatpush3.bf16.msra.mxu0 %v10656_v27  ;;  %9920 = vmatpush3.bf16.msra.mxu1 %v10657_v28 }
 0x19a   : > { %9925 = vmatprep.subr.bf16.mxu0 %v11045_v12  ;;  %9933 = vmatprep.subr.bf16.mxu1 %v11045_v12 }
 0x19c   : > { %9914 = vmatmul.mubr.msk.bf16.vlgmr.msra.gmra.mxu0 %vm1118_vm0, %v11315_v26  ;;  %9922 = vmatmul.mubr.msk.bf16.vlgmr.msra.gmra.mxu1 %vm1118_vm0, %v11315_v26 }
 0x19d   : > { %9926 = vmatpush3.bf16.msra.mxu0 %v10658_v29  ;;  %9934 = vmatpush3.bf16.msra.mxu1 %v10659_v30 }
 0x19e   : > { %9927 = vmatprep.subr.bf16.mxu0 %v11045_v12  ;;  %9935 = vmatprep.subr.bf16.mxu1 %v11045_v12 }
 0x19f   : > { %9929 = vmatprep.mubr.msk.bf16.mxu0 %vm11046_vm1, %v11045_v12  ;;  %9937 = vmatprep.mubr.msk.bf16.mxu1 %vm11046_vm1, %v11045_v12 }
 0x1a1   : > { %9928 = vmatpush3.bf16.msra.mxu0 %v10660_v31  ;;  %9936 = vmatpush3.bf16.msra.mxu1 %v10661_v32 }
 0x1a2   : > { %9941 = vmatprep.subr.bf16.mxu0 %v11045_v12  ;;  %9949 = vmatprep.subr.bf16.mxu1 %v11045_v12 }
 0x1a4   : > { %9930 = vmatmul.mubr.msk.bf16.vlgmr.msra.gmra.mxu0 %vm1118_vm0, %v11315_v26  ;;  %9938 = vmatmul.mubr.msk.bf16.vlgmr.msra.gmra.mxu1 %vm1118_vm0, %v11315_v26 }
 0x1a5   : > { %9942 = vmatpush3.bf16.msra.mxu0 %v10662_v33  ;;  %9950 = vmatpush3.bf16.msra.mxu1 %v10663_v34 }
 0x1a6   : > { %9943 = vmatprep.subr.bf16.mxu0 %v11045_v12  ;;  %9951 = vmatprep.subr.bf16.mxu1 %v11045_v12 }
 0x1a7   : > { %9945 = vmatprep.mubr.msk.bf16.mxu0 %vm11046_vm1, %v11045_v12  ;;  %9953 = vmatprep.mubr.msk.bf16.mxu1 %vm11046_vm1, %v11045_v12 }
 0x1a9   : > { %9944 = vmatpush3.bf16.msra.mxu0 %v10664_v35  ;;  %9952 = vmatpush3.bf16.msra.mxu1 %v10665_v36 }
 0x1aa   : > { %9957 = vmatprep.subr.bf16.mxu0 %v11045_v12  ;;  %9965 = vmatprep.subr.bf16.mxu1 %v11045_v12 }
 0x1ac   : > { %9946 = vmatmul.mubr.msk.bf16.vlgmr.msra.gmra.mxu0 %vm1118_vm0, %v11315_v26  ;;  %9954 = vmatmul.mubr.msk.bf16.vlgmr.msra.gmra.mxu1 %vm1118_vm0, %v11315_v26 }
 0x1ad   : > { %9958 = vmatpush3.bf16.msra.mxu0 %v10666_v37  ;;  %9966 = vmatpush3.bf16.msra.mxu1 %v10667_v38 }
 0x1ae   : > { %9959 = vmatprep.subr.bf16.mxu0 %v11045_v12  ;;  %9967 = vmatprep.subr.bf16.mxu1 %v11045_v12 }
 0x1af   : > { %9961 = vmatprep.mubr.msk.bf16.mxu0 %vm11046_vm1, %v11045_v12  ;;  %9969 = vmatprep.mubr.msk.bf16.mxu1 %vm11046_vm1, %v11045_v12 }
 0x1b1   : > { %9960 = vmatpush3.bf16.msra.mxu0 %v10668_v39  ;;  %9968 = vmatpush3.bf16.msra.mxu1 %v10669_v40  ;;  %v9081_v39 = vld [vmem:[%s11107_s19] ss:$0 sm:$0xff]  ;;  %v9082_v40 = vld [vmem:[%s11107_s19 + $0x1] ss:$0 sm:$0xff] }
 0x1b2   : > { %9973 = vmatprep.subr.bf16.mxu0 %v11045_v12  ;;  %9981 = vmatprep.subr.bf16.mxu1 %v11045_v12 }
 0x1b4   : > { %9962 = vmatmul.mubr.msk.bf16.vlgmr.msra.gmra.mxu0 %vm1118_vm0, %v11315_v26  ;;  %9970 = vmatmul.mubr.msk.bf16.vlgmr.msra.gmra.mxu1 %vm1118_vm0, %v11315_v26 }
 0x1b5   : > { %9974 = vmatpush3.bf16.msra.mxu0 %v10670_v41  ;;  %9982 = vmatpush3.bf16.msra.mxu1 %v10671_v42 }
 0x1b6   : > { %9975 = vmatprep.subr.bf16.mxu0 %v11045_v12  ;;  %9983 = vmatprep.subr.bf16.mxu1 %v11045_v12 }
 0x1b7   : > { %9977 = vmatprep.mubr.msk.bf16.mxu0 %vm11046_vm1, %v11045_v12  ;;  %9985 = vmatprep.mubr.msk.bf16.mxu1 %vm11046_vm1, %v11045_v12 }
 0x1b9   : > { %9976 = vmatpush3.bf16.msra.mxu0 %v10672_v43  ;;  %9984 = vmatpush3.bf16.msra.mxu1 %v10673_v44 }
 0x1ba   : > { %9989 = vmatprep.subr.bf16.mxu0 %v11045_v12  ;;  %9997 = vmatprep.subr.bf16.mxu1 %v11045_v12 }
 0x1bc   : > { %9978 = vmatmul.mubr.msk.bf16.vlgmr.msra.gmra.mxu0 %vm1118_vm0, %v11315_v26  ;;  %9986 = vmatmul.mubr.msk.bf16.vlgmr.msra.gmra.mxu1 %vm1118_vm0, %v11315_v26 }
 0x1bd   : > { %9990 = vmatpush3.bf16.msra.mxu0 %v10674_v45  ;;  %9998 = vmatpush3.bf16.msra.mxu1 %v10675_v46 }
 0x1be   : > { %9991 = vmatprep.subr.bf16.mxu0 %v11045_v12  ;;  %9999 = vmatprep.subr.bf16.mxu1 %v11045_v12 }
 0x1bf   : > { %9993 = vmatprep.mubr.msk.bf16.mxu0 %vm11046_vm1, %v11045_v12  ;;  %10001 = vmatprep.mubr.msk.bf16.mxu1 %vm11046_vm1, %v11045_v12 }
 0x1c1   : > { %9992 = vmatpush3.bf16.msra.mxu0 %v10676_v47  ;;  %10000 = vmatpush3.bf16.msra.mxu1 %v10677_v48 }
 0x1c2   : > { %10005 = vmatprep.subr.bf16.mxu0 %v11045_v12  ;;  %10013 = vmatprep.subr.bf16.mxu1 %v11045_v12 }
 0x1c4   : > { %9994 = vmatmul.mubr.msk.bf16.vlgmr.msra.gmra.mxu0 %vm1118_vm0, %v11315_v26  ;;  %10002 = vmatmul.mubr.msk.bf16.vlgmr.msra.gmra.mxu1 %vm1118_vm0, %v11315_v26 }
 0x1c5   : > { %10006 = vmatpush3.bf16.msra.mxu0 %v10678_v49  ;;  %10014 = vmatpush3.bf16.msra.mxu1 %v10679_v50  ;;  %v9049_v49 = vld [vmem:[%s12588_s8] ss:$0 sm:$0xff]  ;;  %v9050_v50 = vld [vmem:[%s12588_s8 + $0x1] ss:$0 sm:$0xff] }
 0x1c6   : > { %10007 = vmatprep.subr.bf16.mxu0 %v11045_v12  ;;  %10015 = vmatprep.subr.bf16.mxu1 %v11045_v12 }
 0x1c7   : > { %10009 = vmatprep.mubr.msk.bf16.mxu0 %vm11046_vm1, %v11045_v12  ;;  %10017 = vmatprep.mubr.msk.bf16.mxu1 %vm11046_vm1, %v11045_v12 }
 0x1c9   : > { %10008 = vmatpush3.bf16.msra.mxu0 %v10680_v51  ;;  %10016 = vmatpush3.bf16.msra.mxu1 %v10681_v52 }
 0x1ca   : > { %10021 = vmatprep.subr.bf16.mxu0 %v11045_v12  ;;  %10029 = vmatprep.subr.bf16.mxu1 %v11045_v12 }
 0x1cc   : > { %10010 = vmatmul.mubr.msk.bf16.vlgmr.msra.gmra.mxu0 %vm1118_vm0, %v11315_v26  ;;  %10018 = vmatmul.mubr.msk.bf16.vlgmr.msra.gmra.mxu1 %vm1118_vm0, %v11315_v26 }
 0x1cd   : > { %10022 = vmatpush3.bf16.msra.mxu0 %v10682_v53  ;;  %10030 = vmatpush3.bf16.msra.mxu1 %v10683_v54 }
 0x1ce   : > { %10023 = vmatprep.subr.bf16.mxu0 %v11045_v12  ;;  %10031 = vmatprep.subr.bf16.mxu1 %v11045_v12 }
 0x1cf   : > { %10025 = vmatprep.mubr.msk.bf16.mxu0 %vm11046_vm1, %v11045_v12  ;;  %10033 = vmatprep.mubr.msk.bf16.mxu1 %vm11046_vm1, %v11045_v12 }
 0x1d1   : > { %10024 = vmatpush3.bf16.msra.mxu0 %v10684_v55  ;;  %10032 = vmatpush3.bf16.msra.mxu1 %v10685_v56 }
 0x1d2   : > { %10037 = vmatprep.subr.bf16.mxu0 %v11045_v12  ;;  %10045 = vmatprep.subr.bf16.mxu1 %v11045_v12 }
 0x1d4   : > { %10026 = vmatmul.mubr.msk.bf16.vlgmr.msra.gmra.mxu0 %vm1118_vm0, %v11315_v26  ;;  %10034 = vmatmul.mubr.msk.bf16.vlgmr.msra.gmra.mxu1 %vm1118_vm0, %v11315_v26 }
 0x1d5   : > { %10038 = vmatpush3.bf16.msra.mxu0 %v10686_v57  ;;  %10046 = vmatpush3.bf16.msra.mxu1 %v10687_v58  ;;  %v9083_v57 = vld [vmem:[%s11107_s19 + $0x2] ss:$0 sm:$0xff]  ;;  %v9084_v58 = vld [vmem:[%s11107_s19 + $0x3] ss:$0 sm:$0xff] }
 0x1d6   : > { %10039 = vmatprep.subr.bf16.mxu0 %v11045_v12  ;;  %10047 = vmatprep.subr.bf16.mxu1 %v11045_v12 }
 0x1d7   : > { %10041 = vmatprep.mubr.msk.bf16.mxu0 %vm11046_vm1, %v11045_v12  ;;  %10049 = vmatprep.mubr.msk.bf16.mxu1 %vm11046_vm1, %v11045_v12 }
 0x1d9   : > { %10040 = vmatpush3.bf16.msra.mxu0 %v10688_v59  ;;  %10048 = vmatpush3.bf16.msra.mxu1 %v10689_v60 }
 0x1da   : > { %10053 = vmatprep.subr.bf16.mxu0 %v11045_v12  ;;  %10061 = vmatprep.subr.bf16.mxu1 %v11045_v12 }
 0x1dc   : > { %10042 = vmatmul.mubr.msk.bf16.vlgmr.msra.gmra.mxu0 %vm1118_vm0, %v11315_v26  ;;  %10050 = vmatmul.mubr.msk.bf16.vlgmr.msra.gmra.mxu1 %vm1118_vm0, %v11315_v26 }
 0x1dd   : > { %10054 = vmatpush3.bf16.msra.mxu0 %v10690_v61  ;;  %10062 = vmatpush3.bf16.msra.mxu1 %v10691_v62 }
 0x1de   : > { %10055 = vmatprep.subr.bf16.mxu0 %v11045_v12  ;;  %10063 = vmatprep.subr.bf16.mxu1 %v11045_v12 }
 0x1df   : > { %10057 = vmatprep.mubr.msk.bf16.mxu0 %vm11046_vm1, %v11045_v12  ;;  %10065 = vmatprep.mubr.msk.bf16.mxu1 %vm11046_vm1, %v11045_v12 }
 0x1e1   : > { %10056 = vmatpush3.bf16.msra.mxu0 %v10692_v63  ;;  %10064 = vmatpush3.bf16.msra.mxu1 %v10693_v0 }
 0x1e2   : > { %10069 = vmatprep.subr.bf16.mxu0 %v11045_v12  ;;  %10077 = vmatprep.subr.bf16.mxu1 %v11045_v12 }
 0x1e4   : > { %10058 = vmatmul.mubr.msk.bf16.vlgmr.msra.gmra.mxu0 %vm1118_vm0, %v11315_v26  ;;  %10066 = vmatmul.mubr.msk.bf16.vlgmr.msra.gmra.mxu1 %vm1118_vm0, %v11315_v26 }
 0x1e5   : > { %10070 = vmatpush3.bf16.msra.mxu0 %v10694_v1  ;;  %10078 = vmatpush3.bf16.msra.mxu1 %v10695_v2 }
 0x1e6   : > { %10071 = vmatprep.subr.bf16.mxu0 %v11045_v12  ;;  %10079 = vmatprep.subr.bf16.mxu1 %v11045_v12 }
 0x1e7   : > { %10073 = vmatprep.mubr.msk.bf16.mxu0 %vm11046_vm1, %v11045_v12  ;;  %10081 = vmatprep.mubr.msk.bf16.mxu1 %vm11046_vm1, %v11045_v12 }
 0x1e9   : > { %10072 = vmatpush3.bf16.msra.mxu0 %v10696_v3  ;;  %10080 = vmatpush3.bf16.msra.mxu1 %v10697_v4 }
 0x1ea   : > { %10085 = vmatprep.subr.bf16.mxu0 %v11045_v12  ;;  %10091 = vmatprep.subr.bf16.mxu1 %v11045_v12 }
 0x1ec   : > { %10074 = vmatmul.mubr.msk.bf16.vlgmr.msra.gmra.mxu0 %vm1118_vm0, %v11315_v26  ;;  %10082 = vmatmul.mubr.msk.bf16.vlgmr.msra.gmra.mxu1 %vm1118_vm0, %v11315_v26 }
 0x1ed   : > { %10087 = vmatprep.mubr.msk.bf16.mxu0 %vm11046_vm1, %v11045_v12  ;;  %10093 = vmatprep.mubr.msk.bf16.mxu1 %vm11046_vm1, %v11045_v12 }
 0x254   : > { %v1391_v5 = vpop.f32.mrf.mxu0  ;;  %v1443_v6 = vpop.f32.mrf.mxu1 }
 0x255   : > { %v1392_v59 = vadd.f32 %v9049_v49, %v1391_v5  ;;  %v1444_v60 = vadd.f32 %v9050_v50, %v1443_v6 }
 0x256   : > { %v9899_v7 = vpop.f32.mrf.mxu0  ;;  %v9907_v8 = vpop.f32.mrf.mxu1 }
 0x257   : > { %v2689_v3 = vpack.c.bf16 %v1392_v59, %v1392_v59  ;;  %v2690_v4 = vpack.c.bf16 %v1444_v60, %v1444_v60 }
 0x258   : > { %v1394_v9 = vpop.f32.mrf.mxu0  ;;  %v1446_v10 = vpop.f32.mrf.mxu1 }
 0x259   : > { %v9051_v9 = vld [vmem:[%s12588_s8 + $0x2] ss:$0 sm:$0xff]  ;;  %v9052_v10 = vld [vmem:[%s12588_s8 + $0x3] ss:$0 sm:$0xff] }
 0x25a   : > { %v9900_v11 = vpop.f32.mrf.mxu0  ;;  %v9908_v13 = vpop.f32.mrf.mxu1 }
 0x25c   : > { %v11499_v14 = vpop.f32.mrf.mxu0  ;;  %v11501_v15 = vpop.f32.mrf.mxu1 }
 0x25e   : > { %v9915_v16 = vpop.f32.mrf.mxu0  ;;  %v9923_v17 = vpop.f32.mrf.mxu1 }
 0x260   : > { %v1498_v18 = vpop.f32.mrf.mxu0  ;;  %v1550_v19 = vpop.f32.mrf.mxu1 }
 0x261   : > { %v9085_v18 = vld [vmem:[%s11107_s19 + $0x4] ss:$0 sm:$0xff]  ;;  %v9086_v19 = vld [vmem:[%s11107_s19 + $0x5] ss:$0 sm:$0xff] }
 0x262   : > { %v9916_v20 = vpop.f32.mrf.mxu0  ;;  %v9924_v21 = vpop.f32.mrf.mxu1 }
 0x263   : > { %v1496_v20 = vadd.f32 %v9051_v9, %v11499_v14  ;;  %v1548_v21 = vadd.f32 %v9052_v10, %v11501_v15 }
 0x264   : > { %v11503_v22 = vpop.f32.mrf.mxu0  ;;  %v11505_v24 = vpop.f32.mrf.mxu1 }
 0x265   : > { %v2692_v15 = vpack.c.bf16 %v1548_v21, %v1548_v21 }
 0x266   : > { %v9931_v25 = vpop.f32.mrf.mxu0  ;;  %v9939_v26 = vpop.f32.mrf.mxu1 }
 0x268   : > { %v1602_v27 = vpop.f32.mrf.mxu0  ;;  %v1654_v28 = vpop.f32.mrf.mxu1 }
 0x26a   : > { %v9932_v29 = vpop.f32.mrf.mxu0  ;;  %v9940_v30 = vpop.f32.mrf.mxu1 }
 0x26b   : > { %v2691_v30 = vpack.c.bf16 %v1496_v20, %v1496_v20 }
 0x26c   : > { %v11507_v31 = vpop.f32.mrf.mxu0  ;;  %v11509_v32 = vpop.f32.mrf.mxu1 }
 0x26e   : > { %v9947_v33 = vpop.f32.mrf.mxu0  ;;  %v9955_v34 = vpop.f32.mrf.mxu1 }
 0x270   : > { %v1706_v35 = vpop.f32.mrf.mxu0  ;;  %v1758_v36 = vpop.f32.mrf.mxu1 }
 0x271   : > { %v9053_v35 = vld [vmem:[%s12588_s8 + $0x4] ss:$0 sm:$0xff]  ;;  %v9054_v36 = vld [vmem:[%s12588_s8 + $0x5] ss:$0 sm:$0xff] }
 0x272   : > { %v9948_v37 = vpop.f32.mrf.mxu0  ;;  %v9956_v38 = vpop.f32.mrf.mxu1 }
 0x274   : > { %v1855_v41 = vpop.f32.mrf.mxu0  ;;  %v1907_v42 = vpop.f32.mrf.mxu1 }
 0x275   : > { %v1856_v43 = vadd.f32 %v9081_v39, %v1855_v41  ;;  %v1908_v44 = vadd.f32 %v9082_v40, %v1907_v42 }
 0x276   : > { %v9963_v45 = vpop.f32.mrf.mxu0  ;;  %v9971_v46 = vpop.f32.mrf.mxu1 }
 0x277   : > { %v2697_v47 = vpack.c.bf16 %v1856_v43, %v1856_v43  ;;  %v2698_v48 = vpack.c.bf16 %v1908_v44, %v1908_v44  ;;  %v9087_v43 = vld [vmem:[%s11107_s19 + $0x6] ss:$0 sm:$0xff]  ;;  %v9088_v44 = vld [vmem:[%s11107_s19 + $0x7] ss:$0 sm:$0xff]  ;;  %v1600_v45 = vadd.f32 %v9053_v35, %v11503_v22  ;;  %v1652_v46 = vadd.f32 %v9054_v36, %v11505_v24 }
 0x278   : > { %v1858_v51 = vpop.f32.mrf.mxu0  ;;  %v1910_v52 = vpop.f32.mrf.mxu1 }
 0x279   : > { %v2710_v53 = vsel %vm2705_vm2, %v2697_v47, 0  ;;  %v2756_v54 = vsel %vm2705_vm2, %v2698_v48, 0  ;;  %v2693_v52 = vpack.c.bf16 %v1600_v45, %v1600_v45  ;;  %v2694_v24 = vpack.c.bf16 %v1652_v46, %v1652_v46 }
 0x27a   : > { %v9964_v55 = vpop.f32.mrf.mxu0  ;;  %v9972_v56 = vpop.f32.mrf.mxu1  ;;  %10086 = vmatpush3.bf16.xpose.msra.mxu0 %v2710_v53  ;;  %10092 = vmatpush3.bf16.xpose.msra.mxu1 %v2756_v54 }
 0x27b   : > { %10097 = vmatprep.subr.bf16.mxu0 %v11045_v12  ;;  %10103 = vmatprep.subr.bf16.mxu1 %v11045_v12  ;;  %v9055_v55 = vld [vmem:[%s12588_s8 + $0x6] ss:$0 sm:$0xff]  ;;  %v9056_v56 = vld [vmem:[%s12588_s8 + $0x7] ss:$0 sm:$0xff]  ;;  %s12505_s8 = scalar_lea.hbm %s11232_s21, %s9471_s5 }
 0x27c   : > { %v1959_v61 = vpop.f32.mrf.mxu0  ;;  %v2011_v62 = vpop.f32.mrf.mxu1 }
 0x27d   : > { %v1960_v63 = vadd.f32 %v9083_v57, %v1959_v61  ;;  %v2012_v0 = vadd.f32 %v9084_v58, %v2011_v62 }
 0x27e   : > { %v9979_v1 = vpop.f32.mrf.mxu0  ;;  %v9987_v2 = vpop.f32.mrf.mxu1 }
 0x27f   : > { %v2699_v7 = vpack.c.bf16 %v1960_v63, %v1960_v63  ;;  %v2700_v8 = vpack.c.bf16 %v2012_v0, %v2012_v0  ;;  %v9113_v63 = vld [vmem:[%s11117_s30] ss:$0 sm:$0xff]  ;;  %v9114_v0 = vld [vmem:[%s11117_s30 + $0x1] ss:$0 sm:$0xff]  ;;  %v1704_v1 = vadd.f32 %v9055_v55, %v11507_v31  ;;  %v1756_v2 = vadd.f32 %v9056_v56, %v11509_v32 }
 0x280   : > { %v1962_v5 = vpop.f32.mrf.mxu0  ;;  %v2014_v6 = vpop.f32.mrf.mxu1 }
 0x281   : > { %v2802_v11 = vsel %vm2705_vm2, %v2699_v7, 0  ;;  %v2848_v13 = vsel %vm2705_vm2, %v2700_v8, 0  ;;  %10088 = vmatmul.mubr.msk.bf16.vlgmr.msra.gmra.mxu0 %vm2705_vm2, %v2689_v3  ;;  %10094 = vmatmul.mubr.msk.bf16.vlgmr.msra.gmra.mxu1 %vm2705_vm2, %v2690_v4  ;;  %v2695_v31 = vpack.c.bf16 %v1704_v1, %v1704_v1  ;;  %v2696_v5 = vpack.c.bf16 %v1756_v2, %v1756_v2 }
 0x282   : > { %v9980_v16 = vpop.f32.mrf.mxu0  ;;  %v9988_v17 = vpop.f32.mrf.mxu1  ;;  %10098 = vmatpush3.bf16.xpose.msra.mxu0 %v2802_v11  ;;  %10104 = vmatpush3.bf16.xpose.msra.mxu1 %v2848_v13 }
 0x283   : > { %10099 = vmatprep.mubr.msk.bf16.mxu0 %vm11046_vm1, %v11045_v12  ;;  %10105 = vmatprep.mubr.msk.bf16.mxu1 %vm11046_vm1, %v11045_v12 }
 0x284   : > { %v2063_v25 = vpop.f32.mrf.mxu0  ;;  %v2115_v26 = vpop.f32.mrf.mxu1  ;;  %10109 = vmatprep.subr.bf16.mxu0 %v11045_v12  ;;  %10115 = vmatprep.subr.bf16.mxu1 %v11045_v12 }
 0x285   : > { %v2064_v27 = vadd.f32 %v9085_v18, %v2063_v25  ;;  %v2116_v28 = vadd.f32 %v9086_v19, %v2115_v26 }
 0x286   : > { %v9995_v29 = vpop.f32.mrf.mxu0  ;;  %v10003_v14 = vpop.f32.mrf.mxu1 }
 0x287   : > { %v2701_v33 = vpack.c.bf16 %v2064_v27, %v2064_v27  ;;  %v2702_v34 = vpack.c.bf16 %v2116_v28, %v2116_v28 }
 0x288   : > { %v2066_v37 = vpop.f32.mrf.mxu0  ;;  %v2118_v38 = vpop.f32.mrf.mxu1 }
 0x289   : > { %v2894_v39 = vsel %vm2705_vm2, %v2701_v33, 0  ;;  %v2940_v40 = vsel %vm2705_vm2, %v2702_v34, 0  ;;  %10100 = vmatmul.mubr.msk.bf16.vlgmr.msra.gmra.mxu0 %vm2705_vm2, %v2691_v30  ;;  %10106 = vmatmul.mubr.msk.bf16.vlgmr.msra.gmra.mxu1 %vm2705_vm2, %v2692_v15 }
 0x28a   : > { %v9996_v41 = vpop.f32.mrf.mxu0  ;;  %v10004_v42 = vpop.f32.mrf.mxu1  ;;  %10110 = vmatpush3.bf16.xpose.msra.mxu0 %v2894_v39  ;;  %10116 = vmatpush3.bf16.xpose.msra.mxu1 %v2940_v40 }
 0x28b   : > { %10111 = vmatprep.mubr.msk.bf16.mxu0 %vm11046_vm1, %v11045_v12  ;;  %10117 = vmatprep.mubr.msk.bf16.mxu1 %vm11046_vm1, %v11045_v12 }
 0x28c   : > { %v2167_v47 = vpop.f32.mrf.mxu0  ;;  %v2219_v48 = vpop.f32.mrf.mxu1  ;;  %10121 = vmatprep.subr.bf16.mxu0 %v11045_v12  ;;  %10127 = vmatprep.subr.bf16.mxu1 %v11045_v12 }
 0x28d   : > { %v2168_v49 = vadd.f32 %v9087_v43, %v2167_v47  ;;  %v2220_v50 = vadd.f32 %v9088_v44, %v2219_v48  ;;  %v1151_v47 = vlaneseq  ;;  %v1148_v48 = vld [vmem:[%s1107_s10] sm:$0x1]  ;;  %s12599_s10 = sld [smem:[#allocation13_spill]] }
 0x28e   : > { %v10011_v51 = vpop.f32.mrf.mxu0  ;;  %v10019_v22 = vpop.f32.mrf.mxu1  ;;  %vm1149_vm4 = vcmp.ne.s32.totalorder %v1148_v48, 0 }
 0x28f   : > { %v2703_v53 = vpack.c.bf16 %v2168_v49, %v2168_v49  ;;  %v2704_v54 = vpack.c.bf16 %v2220_v50, %v2220_v50  ;;  %v11593_v49 = vshrl.u32 %v1151_v47, 7  ;;  %v11047_v51 = vmov 0  }
 0x290   : > { %v2170_v57 = vpop.f32.mrf.mxu0  ;;  %v2222_v58 = vpop.f32.mrf.mxu1  ;;  %v1150_v22 = vsel %vm1149_vm4, 1, %v11047_v51 }
 0x291   : > { %v2986_v59 = vsel %vm2705_vm2, %v2703_v53, 0  ;;  %v3032_v60 = vsel %vm2705_vm2, %v2704_v54, 0  ;;  %10112 = vmatmul.mubr.msk.bf16.vlgmr.msra.gmra.mxu0 %vm2705_vm2, %v2693_v52  ;;  %10118 = vmatmul.mubr.msk.bf16.vlgmr.msra.gmra.mxu1 %vm2705_vm2, %v2694_v24  ;;  %v11596_v50 = vsub.s32 0, %v11593_v49  ;;  %v1159_v24 = vand.u32 127, %v1151_v47 }
 0x292   : > { %v10012_v61 = vpop.f32.mrf.mxu0  ;;  %v10020_v62 = vpop.f32.mrf.mxu1  ;;  %10122 = vmatpush3.bf16.xpose.msra.mxu0 %v2986_v59  ;;  %10128 = vmatpush3.bf16.xpose.msra.mxu1 %v3032_v60 }
 0x293   : > { %10123 = vmatprep.mubr.msk.bf16.mxu0 %vm11046_vm1, %v11045_v12  ;;  %10129 = vmatprep.mubr.msk.bf16.mxu1 %vm11046_vm1, %v11045_v12  ;;  %v1154_v52 = vrot.slane %v1150_v22, %v11596_v50  ;;  %vm1160_vm6 = vcmp.ge.s32.totalorder %v11593_v49, %v1159_v24 }
 0x294   : > { %v2319_v3 = vpop.f32.mrf.mxu0  ;;  %v2371_v4 = vpop.f32.mrf.mxu1  ;;  %10133 = vmatprep.subr.bf16.mxu0 %v11045_v12  ;;  %10139 = vmatprep.subr.bf16.mxu1 %v11045_v12 }
 0x295   : > { %v2320_v7 = vadd.f32 %v9113_v63, %v2319_v3  ;;  %v2372_v8 = vadd.f32 %v9114_v0, %v2371_v4  ;;  %vm1155_vm5 = vcmp.eq.s32.totalorder %v1154_v52, 1 }
 0x296   : > { %v10027_v9 = vpop.f32.mrf.mxu0  ;;  %v10035_v10 = vpop.f32.mrf.mxu1  ;;  %vm11601_vm7 = vmand %vm1155_vm5, %vm1160_vm6 }
 0x297   : > { %v3180_v32 = vpack.c.bf16 %v2320_v7, %v2320_v7  ;;  %v3181_v6 = vpack.c.bf16 %v2372_v8, %v2372_v8 }
 0x298   : > { %v2322_v11 = vpop.f32.mrf.mxu0  ;;  %v2374_v13 = vpop.f32.mrf.mxu1 }
 0x299   : > { %v3193_v16 = vsel %vm3191_vm3, %v3180_v32, 0  ;;  %v3239_v17 = vsel %vm3191_vm3, %v3181_v6, 0  ;;  %10124 = vmatmul.mubr.msk.bf16.vlgmr.msra.gmra.mxu0 %vm2705_vm2, %v2695_v31  ;;  %10130 = vmatmul.mubr.msk.bf16.vlgmr.msra.gmra.mxu1 %vm2705_vm2, %v2696_v5 }
 0x29a   : > { %v10028_v18 = vpop.f32.mrf.mxu0  ;;  %v10036_v19 = vpop.f32.mrf.mxu1  ;;  %10134 = vmatpush3.bf16.msra.mxu0 %v3193_v16  ;;  %10140 = vmatpush3.bf16.msra.mxu1 %v3239_v17 }
 0x29b   : > { %10135 = vmatprep.mubr.msk.bf16.mxu0 %vm11046_vm1, %v11045_v12  ;;  %10145 = vmatprep.subr.bf16.mxu0 %v11045_v12 }
 0x29c   : > { %v11576_v20 = vpop.f32.mrf.mxu0  ;;  %v11578_v21 = vpop.f32.mrf.mxu1  ;;  %10141 = vmatprep.mubr.msk.bf16.mxu1 %vm11046_vm1, %v11045_v12  ;;  %10151 = vmatprep.subr.bf16.mxu1 %v11045_v12 }
 0x29e   : > { %v10043_v25 = vpop.f32.mrf.mxu0  ;;  %v10051_v26 = vpop.f32.mrf.mxu1 }
 0x2a0   : > { %v2426_v27 = vpop.f32.mrf.mxu0  ;;  %v2478_v28 = vpop.f32.mrf.mxu1 }
 0x2a2   : > { %v10044_v29 = vpop.f32.mrf.mxu0  ;;  %v10052_v14 = vpop.f32.mrf.mxu1 }
 0x2a4   : > { %v11583_v30 = vpop.f32.mrf.mxu0  ;;  %v11585_v15 = vpop.f32.mrf.mxu1 }
 0x2a6   : > { %v10059_v33 = vpop.f32.mrf.mxu0  ;;  %v10067_v34 = vpop.f32.mrf.mxu1 }
 0x2a8   : > { %v2530_v35 = vpop.f32.mrf.mxu0  ;;  %v2582_v36 = vpop.f32.mrf.mxu1 }
 0x2aa   : > { %v10060_v37 = vpop.f32.mrf.mxu0  ;;  %v10068_v38 = vpop.f32.mrf.mxu1 }
 0x2ac   : > { %v11587_v39 = vpop.f32.mrf.mxu0  ;;  %v11589_v40 = vpop.f32.mrf.mxu1 }
 0x2ae   : > { %v10075_v41 = vpop.f32.mrf.mxu0  ;;  %v10083_v42 = vpop.f32.mrf.mxu1 }
 0x2b0   : > { %v2634_v43 = vpop.f32.mrf.mxu0  ;;  %v2686_v44 = vpop.f32.mrf.mxu1 }
 0x2b2   : > { %v10076_v45 = vpop.f32.mrf.mxu0  ;;  %v10084_v46 = vpop.f32.mrf.mxu1 }
 0x341   : > { %v2746_v54 = vpop.f32.mrf.mxu0  ;;  %v2792_v55 = vpop.f32.mrf.mxu1 }
 0x342   : > { %v3076_v56 = vsel %vm11601_vm7, %v2746_v54, -1e+30  ;;  %v3077_v60 = vsel %vm11601_vm7, %v2792_v55, -1e+30 }
 0x343   : > { %v10089_v57 = vpop.f32.mrf.mxu0  ;;  %v10095_v58 = vpop.f32.mrf.mxu1  ;;  %v3084_v59 = vsel %vm2705_vm2, %v3076_v56, -inf  ;;  %v3087_v1 = vsel %vm2705_vm2, %v3077_v60, -inf }
 0x344   : > { %3085 = vmax.xlane.f32.xlu1 %v3084_v59 }
 0x345   : > { %v2749_v61 = vpop.f32.mrf.mxu0  ;;  %v2795_v62 = vpop.f32.mrf.mxu1 }
 0x347   : > { %v10090_v63 = vpop.f32.mrf.mxu0  ;;  %v10096_v0 = vpop.f32.mrf.mxu1 }
 0x348   : > { %3088 = vmax.xlane.f32.xlu1 %v3087_v1 }
 0x349   : > { %v2838_v2 = vpop.f32.mrf.mxu0  ;;  %v2884_v3 = vpop.f32.mrf.mxu1 }
 0x34a   : > { %v3078_v4 = vsel %vm11601_vm7, %v2838_v2, -1e+30  ;;  %v3079_v7 = vsel %vm11601_vm7, %v2884_v3, -1e+30 }
 0x34b   : > { %v10101_v8 = vpop.f32.mrf.mxu0  ;;  %v10107_v9 = vpop.f32.mrf.mxu1  ;;  %v3093_v10 = vsel %vm2705_vm2, %v3079_v7, -inf  ;;  %v3090_v31 = vsel %vm2705_vm2, %v3078_v4, -inf }
 0x34c   : > { %3094 = vmax.xlane.f32.xlu1 %v3093_v10  ;;  %3091 = vmax.xlane.f32.xlu0 %v3090_v31 }
 0x34d   : > { %v2841_v5 = vpop.f32.mrf.mxu0  ;;  %v2887_v32 = vpop.f32.mrf.mxu1 }
 0x34f   : > { %v10102_v6 = vpop.f32.mrf.mxu0  ;;  %v10108_v11 = vpop.f32.mrf.mxu1 }
 0x351   : > { %v2930_v13 = vpop.f32.mrf.mxu0  ;;  %v2976_v16 = vpop.f32.mrf.mxu1 }
 0x352   : > { %v3080_v17 = vsel %vm11601_vm7, %v2930_v13, -1e+30  ;;  %v3081_v18 = vsel %vm11601_vm7, %v2976_v16, -1e+30 }
 0x353   : > { %v10113_v19 = vpop.f32.mrf.mxu0  ;;  %v10119_v25 = vpop.f32.mrf.mxu1  ;;  %v3099_v26 = vsel %vm2705_vm2, %v3081_v18, -inf  ;;  %v3096_v27 = vsel %vm2705_vm2, %v3080_v17, -inf }
 0x354   : > { %3100 = vmax.xlane.f32.xlu1 %v3099_v26  ;;  %3097 = vmax.xlane.f32.xlu0 %v3096_v27 }
 0x355   : > { %v2933_v28 = vpop.f32.mrf.mxu0  ;;  %v2979_v29 = vpop.f32.mrf.mxu1 }
 0x357   : > { %v10114_v14 = vpop.f32.mrf.mxu0  ;;  %v10120_v33 = vpop.f32.mrf.mxu1 }
 0x359   : > { %v3022_v34 = vpop.f32.mrf.mxu0  ;;  %v3068_v35 = vpop.f32.mrf.mxu1 }
 0x35a   : > { %v3082_v36 = vsel %vm11601_vm7, %v3022_v34, -1e+30  ;;  %v3083_v37 = vsel %vm11601_vm7, %v3068_v35, -1e+30  ;;  %v9115_v35 = vld [vmem:[%s11117_s30 + $0x2] ss:$0 sm:$0xff] }
 0x35b   : > { %v10125_v38 = vpop.f32.mrf.mxu0  ;;  %v10131_v41 = vpop.f32.mrf.mxu1  ;;  %v3105_v42 = vsel %vm2705_vm2, %v3083_v37, -inf  ;;  %v3102_v43 = vsel %vm2705_vm2, %v3082_v36, -inf }
 0x35c   : > { %3106 = vmax.xlane.f32.xlu1 %v3105_v42  ;;  %3103 = vmax.xlane.f32.xlu0 %v3102_v43  ;;  %v2424_v38 = vadd.f32 %v9115_v35, %v11576_v20  ;;  %v9116_v41 = vld [vmem:[%s11117_s30 + $0x3] ss:$0 sm:$0xff] }
 0x35d   : > { %v3025_v44 = vpop.f32.mrf.mxu0  ;;  %v3071_v45 = vpop.f32.mrf.mxu1 }
 0x35e   : > { %v3182_v43 = vpack.c.bf16 %v2424_v38, %v2424_v38  ;;  %v2476_v44 = vadd.f32 %v9116_v41, %v11578_v21  ;;  %v1285_v41 = vld [vmem:[%s12589_s6 + $0xc] sm:$0xf] }
 0x35f   : > { %v10126_v46 = vpop.f32.mrf.mxu0  ;;  %v10132_v47 = vpop.f32.mrf.mxu1 }
 0x360   : > { %v9117_v47 = vld [vmem:[%s11117_s30 + $0x4] ss:$0 sm:$0xff] }
 0x3cd   : > { %v3086_v48 = vpop.xlane.xlu1 %3085 }
 0x3ce   : > { %v3108_v22 = vsub.f32 %v3076_v56, %v3086_v48 }
 0x3d0   : > { %v3116_v52 = vmul.f32 1.442695, %v3108_v22 }
 0x3d1   : > { %v3089_v24 = vpop.xlane.xlu1 %3088 }
 0x3d2   : > { %10878 = vpow2.f32 %v3116_v52  ;;  %v3109_v54 = vsub.f32 %v3077_v60, %v3089_v24  ;;  %v3285_v24 = vsel %vm3191_vm3, %v3182_v43, 0 }
 0x3d4   : > { %v3118_v53 = vmul.f32 1.442695, %v3109_v54  ;;  %v3183_v54 = vpack.c.bf16 %v2476_v44, %v2476_v44 }
 0x3d5   : > { %v3095_v55 = vpop.xlane.xlu1 %3094  ;;  %v3092_v57 = vpop.xlane.xlu0 %3091 }
 0x3d6   : > { %10880 = vpow2.f32 %v3118_v53  ;;  %v3111_v58 = vsub.f32 %v3079_v7, %v3095_v55  ;;  %v3110_v59 = vsub.f32 %v3078_v4, %v3092_v57  ;;  %v2528_v53 = vadd.f32 %v9117_v47, %v11583_v30  ;;  %v9118_v55 = vld [vmem:[%s11117_s30 + $0x5] ss:$0 sm:$0xff] }
 0x3d8   : > { %v3122_v61 = vmul.f32 1.442695, %v3111_v58  ;;  %v3120_v62 = vmul.f32 1.442695, %v3110_v59  ;;  %v3331_v59 = vsel %vm3191_vm3, %v3183_v54, 0 }
 0x3da   : > { %10882 = vpow2.f32 %v3122_v61  ;;  %v2580_v61 = vadd.f32 %v9118_v55, %v11585_v15 }
 0x3db   : > { %10884 = vpow2.f32 %v3120_v62  ;;  %v3184_v62 = vpack.c.bf16 %v2528_v53, %v2528_v53  ;;  %v1287_v53 = vld [vmem:[%s12589_s6 + $0x14] sm:$0xf] }
 0x3dc   : > { %v3185_v15 = vpack.c.bf16 %v2580_v61, %v2580_v61 }
 0x3dd   : > { %v3101_v63 = vpop.xlane.xlu1 %3100  ;;  %v3098_v0 = vpop.xlane.xlu0 %3097 }
 0x3de   : > { %v3113_v1 = vsub.f32 %v3081_v18, %v3101_v63  ;;  %v3112_v2 = vsub.f32 %v3080_v17, %v3098_v0  ;;  %v9119_v0 = vld [vmem:[%s11117_s30 + $0x6] ss:$0 sm:$0xff] }
 0x3df   : > { %v10879_v3 = vpop.eup %10878 }
 0x3e0   : > { %v3126_v56 = vmul.f32 1.442695, %v3113_v1  ;;  %v3124_v8 = vmul.f32 1.442695, %v3112_v2  ;;  %v3132_v9 = vsel %vm2705_vm2, %v10879_v3, 0.0 }
 0x3e1   : > { %3133 = vadd.xlane.f32.xlu0 %v3132_v9  ;;  %v9120_v9 = vld [vmem:[%s11117_s30 + $0x7] ss:$0 sm:$0xff] }
 0x3e2   : > { %10886 = vpow2.f32 %v3126_v56  ;;  %v3377_v56 = vsel %vm3191_vm3, %v3184_v62, 0 }
 0x3e3   : > { %v10881_v60 = vpop.eup %10880  ;;  %10888 = vpow2.f32 %v3124_v8  ;;  %v2632_v8 = vadd.f32 %v9119_v0, %v11587_v39 }
 0x3e4   : > { %v3135_v7 = vsel %vm2705_vm2, %v10881_v60, 0.0 }
 0x3e5   : > { %3136 = vadd.xlane.f32.xlu1 %v3135_v7  ;;  %v3107_v4 = vpop.xlane.xlu1 %3106  ;;  %v3104_v10 = vpop.xlane.xlu0 %3103 }
 0x3e6   : > { %v3115_v31 = vsub.f32 %v3083_v37, %v3107_v4  ;;  %v3114_v5 = vsub.f32 %v3082_v36, %v3104_v10  ;;  %v3423_v10 = vsel %vm3191_vm3, %v3185_v15, 0  ;;  %v1289_v15 = vld [vmem:[%s12589_s6 + $0x1c] sm:$0xf] }
 0x3e7   : > { %v11631_v32 = vpop.eup %10882 }
 0x3e8   : > { %v10885_v6 = vpop.eup %10884  ;;  %v3130_v11 = vmul.f32 1.442695, %v3115_v31  ;;  %v3128_v13 = vmul.f32 1.442695, %v3114_v5  ;;  %v3141_v16 = vsel %vm2705_vm2, %v11631_v32, 0.0  ;;  %v2684_v31 = vadd.f32 %v9120_v9, %v11589_v40 }
 0x3e9   : > { %3142 = vadd.xlane.f32.xlu1 %v3141_v16  ;;  %v3138_v17 = vsel %vm2705_vm2, %v10885_v6, 0.0  ;;  %v3186_v5 = vpack.c.bf16 %v2632_v8, %v2632_v8 }
 0x3ea   : > { %10890 = vpow2.f32 %v3130_v11  ;;  %3139 = vadd.xlane.f32.xlu0 %v3138_v17  ;;  %v3187_v11 = vpack.c.bf16 %v2684_v31, %v2684_v31 }
 0x3eb   : > { %10892 = vpow2.f32 %v3128_v13  ;;  %v3469_v13 = vsel %vm3191_vm3, %v3186_v5, 0 }
 0x3ef   : > { %v11636_v18 = vpop.eup %10886 }
 0x3f0   : > { %v11638_v19 = vpop.eup %10888  ;;  %v3147_v25 = vsel %vm2705_vm2, %v11636_v18, 0.0 }
 0x3f1   : > { %3148 = vadd.xlane.f32.xlu1 %v3147_v25  ;;  %v3144_v26 = vsel %vm2705_vm2, %v11638_v19, 0.0 }
 0x3f2   : > { %3145 = vadd.xlane.f32.xlu0 %v3144_v26 }
 0x3f7   : > { %v11644_v27 = vpop.eup %10890 }
 0x3f8   : > { %v11646_v28 = vpop.eup %10892  ;;  %v3153_v29 = vsel %vm2705_vm2, %v11644_v27, 0.0 }
 0x3f9   : > { %3154 = vadd.xlane.f32.xlu1 %v3153_v29  ;;  %v3150_v14 = vsel %vm2705_vm2, %v11646_v28, 0.0 }
 0x3fa   : > { %3151 = vadd.xlane.f32.xlu0 %v3150_v14 }
 0x46a   : > { %v3134_v33 = vpop.xlane.xlu0 %3133 }
 0x46b   : > { %10894 = vrcp.f32 %v3134_v33 }
 0x46e   : > { %v3137_v34 = vpop.xlane.xlu1 %3136 }
 0x46f   : > { %10896 = vrcp.f32 %v3137_v34  ;;  %v1284_v34 = vld [vmem:[%s12589_s6 + $0x8] sm:$0xf] }
 0x472   : > { %v3143_v36 = vpop.xlane.xlu1 %3142 }
 0x473   : > { %10898 = vrcp.f32 %v3143_v36  ;;  %v3140_v37 = vpop.xlane.xlu0 %3139 }
 0x474   : > { %10900 = vrcp.f32 %v3140_v37  ;;  %v3661_v37 = vsel %vm3191_vm3, %v1284_v34, 0 }
 0x478   : > { %v10895_v42 = vpop.eup %10894 }
 0x479   : > { %v3164_v45 = vmul.f32 %v10895_v42, %v10879_v3 }
 0x47a   : > { %v3149_v46 = vpop.xlane.xlu1 %3148 }
 0x47b   : > { %10902 = vrcp.f32 %v3149_v46  ;;  %v3146_v48 = vpop.xlane.xlu0 %3145  ;;  %v3172_v22 = vpack.c.bf16 %v3164_v45, %v3164_v45  ;;  %v3707_v45 = vsel %vm3191_vm3, %v1285_v41, 0 }
 0x47c   : > { %v10897_v52 = vpop.eup %10896  ;;  %10904 = vrcp.f32 %v3146_v48  ;;  %v1286_v48 = vld [vmem:[%s12589_s6 + $0x10] sm:$0xf] }
 0x47d   : > { %10136 = vmatmul.mubr.msk.bf16.vlgmr.msra.gmra.mxu0 %vm2705_vm2, %v3172_v22  ;;  %v3165_v20 = vmul.f32 %v10897_v52, %v10881_v60 }
 0x47e   : > { %10146 = vmatpush3.bf16.msra.mxu0 %v3285_v24  ;;  %10147 = vmatprep.mubr.msk.bf16.mxu0 %vm11046_vm1, %v11045_v12 }
 0x47f   : > { %v3173_v21 = vpack.c.bf16 %v3165_v20, %v3165_v20  ;;  %10157 = vmatprep.subr.bf16.mxu0 %v11045_v12  ;;  %v3753_v20 = vsel %vm3191_vm3, %v1286_v48, 0 }
 0x480   : > { %v10899_v57 = vpop.eup %10898 }
 0x481   : > { %v10901_v58 = vpop.eup %10900  ;;  %10142 = vmatmul.mubr.msk.bf16.vlgmr.msra.gmra.mxu1 %vm2705_vm2, %v3173_v21  ;;  %v3167_v2 = vmul.f32 %v10899_v57, %v11631_v32 }
 0x482   : > { %10152 = vmatpush3.bf16.msra.mxu1 %v3331_v59  ;;  %v3155_v30 = vpop.xlane.xlu1 %3154  ;;  %v3166_v63 = vmul.f32 %v10901_v58, %v10885_v6  ;;  %10153 = vmatprep.mubr.msk.bf16.mxu1 %vm11046_vm1, %v11045_v12  ;;  %v3799_v59 = vsel %vm3191_vm3, %v1287_v53, 0 }
 0x483   : > { %10906 = vrcp.f32 %v3155_v30  ;;  %v3152_v1 = vpop.xlane.xlu0 %3151  ;;  %10163 = vmatprep.subr.bf16.mxu1 %v11045_v12  ;;  %v3175_v60 = vpack.c.bf16 %v3167_v2, %v3167_v2  ;;  %v1288_v30 = vld [vmem:[%s12589_s6 + $0x18] sm:$0xf] }
 0x484   : > { %10908 = vrcp.f32 %v3152_v1  ;;  %v3174_v3 = vpack.c.bf16 %v3166_v63, %v3166_v63 }
 0x486   : > { %10148 = vmatmul.mubr.msk.bf16.vlgmr.msra.gmra.mxu0 %vm2705_vm2, %v3174_v3  ;;  %v3845_v3 = vsel %vm3191_vm3, %v1288_v30, 0 }
 0x487   : > { %10158 = vmatpush3.bf16.msra.mxu0 %v3377_v56  ;;  %10159 = vmatprep.mubr.msk.bf16.mxu0 %vm11046_vm1, %v11045_v12 }
 0x488   : > { %v10903_v7 = vpop.eup %10902  ;;  %10169 = vmatprep.subr.bf16.mxu0 %v11045_v12 }
 0x489   : > { %v10905_v4 = vpop.eup %10904  ;;  %10154 = vmatmul.mubr.msk.bf16.vlgmr.msra.gmra.mxu1 %vm2705_vm2, %v3175_v60  ;;  %v3169_v32 = vmul.f32 %v10903_v7, %v11636_v18  ;;  %v1282_v18 = vld [vmem:[%s12589_s6] sm:$0xf]  ;;  %v3891_v7 = vsel %vm3191_vm3, %v1289_v15, 0 }
 0x48a   : > { %10164 = vmatpush3.bf16.msra.mxu1 %v3423_v10  ;;  %v3168_v39 = vmul.f32 %v10905_v4, %v11638_v19  ;;  %10165 = vmatprep.mubr.msk.bf16.mxu1 %vm11046_vm1, %v11045_v12  ;;  %v3515_v19 = vsel %vm3191_vm3, %v3187_v11, 0  ;;  %v3569_v14 = vsel %vm3191_vm3, %v1282_v18, 0 }
 0x48b   : > { %10175 = vmatprep.subr.bf16.mxu1 %v11045_v12  ;;  %v3177_v40 = vpack.c.bf16 %v3169_v32, %v3169_v32 }
 0x48c   : > { %v3176_v6 = vpack.c.bf16 %v3168_v39, %v3168_v39 }
 0x48e   : > { %10160 = vmatmul.mubr.msk.bf16.vlgmr.msra.gmra.mxu0 %vm2705_vm2, %v3176_v6 }
 0x48f   : > { %10170 = vmatpush3.bf16.msra.mxu0 %v3469_v13  ;;  %10171 = vmatprep.mubr.msk.bf16.mxu0 %vm11046_vm1, %v11045_v12 }
 0x490   : > { %v10907_v16 = vpop.eup %10906  ;;  %10181 = vmatprep.subr.bf16.mxu0 %v11045_v12 }
 0x491   : > { %v10909_v17 = vpop.eup %10908  ;;  %10166 = vmatmul.mubr.msk.bf16.vlgmr.msra.gmra.mxu1 %vm2705_vm2, %v3177_v40  ;;  %v3171_v26 = vmul.f32 %v10907_v16, %v11644_v27  ;;  %v1283_v27 = vld [vmem:[%s12589_s6 + $0x4] sm:$0xf] }
 0x492   : > { %10176 = vmatpush3.bf16.msra.mxu1 %v3515_v19  ;;  %v3170_v25 = vmul.f32 %v10909_v17, %v11646_v28  ;;  %10177 = vmatprep.mubr.msk.bf16.mxu1 %vm11046_vm1, %v11045_v12  ;;  %v3615_v28 = vsel %vm3191_vm3, %v1283_v27, 0 }
 0x493   : > { %10187 = vmatprep.subr.bf16.mxu1 %v11045_v12  ;;  %v3179_v33 = vpack.c.bf16 %v3171_v26, %v3171_v26 }
 0x494   : > { %v3178_v29 = vpack.c.bf16 %v3170_v25, %v3170_v25 }
 0x496   : > { %10172 = vmatmul.mubr.msk.bf16.vlgmr.msra.gmra.mxu0 %vm2705_vm2, %v3178_v29 }
 0x497   : > { %10182 = vmatpush3.bf16.msra.mxu0 %v3569_v14  ;;  %10183 = vmatprep.mubr.msk.bf16.mxu0 %vm11046_vm1, %v11045_v12 }
 0x498   : > { %10193 = vmatprep.subr.bf16.mxu0 %v11045_v12 }
 0x499   : > { %10178 = vmatmul.mubr.msk.bf16.vlgmr.msra.gmra.mxu1 %vm2705_vm2, %v3179_v33 }
 0x49a   : > { %10189 = vmatprep.mubr.msk.bf16.mxu1 %vm11046_vm1, %v11045_v12  ;;  %10188 = vmatpush3.bf16.msra.mxu1 %v3615_v28 }
 0x49b   : > { %10199 = vmatprep.subr.bf16.mxu1 %v11045_v12 }
 0x53d   : > { %v3229_v35 = vpop.f32.mrf.mxu0 }
 0x53e   : > { %v3557_v36 = vpack.c.bf16 %v3229_v35, %v3229_v35 }
 0x53f   : > { %v10137_v38 = vpop.f32.mrf.mxu0 }
 0x540   : > { %10184 = vmatmul.mubr.msk.bf16.vlgmr.msra.gmra.mxu0 %vm2705_vm2, %v3557_v36 }
 0x541   : > { %v3232_v42 = vpop.f32.mrf.mxu0  ;;  %v3275_v43 = vpop.f32.mrf.mxu1  ;;  %10194 = vmatpush3.bf16.msra.mxu0 %v3661_v37  ;;  %10195 = vmatprep.mubr.msk.bf16.mxu0 %vm11046_vm1, %v11045_v12 }
 0x542   : > { %v3558_v44 = vpack.c.bf16 %v3275_v43, %v3275_v43  ;;  %10205 = vmatprep.subr.bf16.mxu0 %v11045_v12 }
 0x543   : > { %v10138_v46 = vpop.f32.mrf.mxu0  ;;  %v10143_v47 = vpop.f32.mrf.mxu1 }
 0x544   : > { %10190 = vmatmul.mubr.msk.bf16.vlgmr.msra.gmra.mxu1 %vm2705_vm2, %v3558_v44 }
 0x545   : > { %v3278_v22 = vpop.f32.mrf.mxu1  ;;  %10200 = vmatpush3.bf16.msra.mxu1 %v3707_v45  ;;  %10201 = vmatprep.mubr.msk.bf16.mxu1 %vm11046_vm1, %v11045_v12 }
 0x546   : > { %v3321_v52 = vpop.f32.mrf.mxu0  ;;  %10211 = vmatprep.subr.bf16.mxu1 %v11045_v12 }
 0x547   : > { %v3559_v24 = vpack.c.bf16 %v3321_v52, %v3321_v52  ;;  %v10144_v54 = vpop.f32.mrf.mxu1 }
 0x548   : > { %v10149_v55 = vpop.f32.mrf.mxu0 }
 0x549   : > { %10196 = vmatmul.mubr.msk.bf16.vlgmr.msra.gmra.mxu0 %vm2705_vm2, %v3559_v24  ;;  %v3367_v21 = vpop.f32.mrf.mxu1 }
 0x54a   : > { %v3324_v57 = vpop.f32.mrf.mxu0  ;;  %v3560_v58 = vpack.c.bf16 %v3367_v21, %v3367_v21  ;;  %10206 = vmatpush3.bf16.msra.mxu0 %v3753_v20  ;;  %10207 = vmatprep.mubr.msk.bf16.mxu0 %vm11046_vm1, %v11045_v12 }
 0x54b   : > { %v10155_v61 = vpop.f32.mrf.mxu1  ;;  %10217 = vmatprep.subr.bf16.mxu0 %v11045_v12 }
 0x54c   : > { %v10150_v62 = vpop.f32.mrf.mxu0  ;;  %10202 = vmatmul.mubr.msk.bf16.vlgmr.msra.gmra.mxu1 %vm2705_vm2, %v3560_v58 }
 0x54d   : > { %v3370_v63 = vpop.f32.mrf.mxu1  ;;  %10212 = vmatpush3.bf16.msra.mxu1 %v3799_v59  ;;  %10213 = vmatprep.mubr.msk.bf16.mxu1 %vm11046_vm1, %v11045_v12 }
 0x54e   : > { %v3413_v0 = vpop.f32.mrf.mxu0  ;;  %10223 = vmatprep.subr.bf16.mxu1 %v11045_v12 }
 0x54f   : > { %v3561_v1 = vpack.c.bf16 %v3413_v0, %v3413_v0  ;;  %v10156_v2 = vpop.f32.mrf.mxu1 }
 0x550   : > { %v10161_v56 = vpop.f32.mrf.mxu0 }
 0x551   : > { %10208 = vmatmul.mubr.msk.bf16.vlgmr.msra.gmra.mxu0 %vm2705_vm2, %v3561_v1  ;;  %v3459_v8 = vpop.f32.mrf.mxu1 }
 0x552   : > { %v3416_v9 = vpop.f32.mrf.mxu0  ;;  %v3562_v60 = vpack.c.bf16 %v3459_v8, %v3459_v8  ;;  %10218 = vmatpush3.bf16.msra.mxu0 %v3845_v3  ;;  %10219 = vmatprep.mubr.msk.bf16.mxu0 %vm11046_vm1, %v11045_v12  ;;  %v9169_v8 = vld [vmem:[%s11127_s12] ss:$0 sm:$0xff] }
 0x553   : > { %v10167_v4 = vpop.f32.mrf.mxu1  ;;  %10229 = vmatprep.subr.bf16.mxu0 %v11045_v12 }
 0x554   : > { %v10162_v10 = vpop.f32.mrf.mxu0  ;;  %10214 = vmatmul.mubr.msk.bf16.vlgmr.msra.gmra.mxu1 %vm2705_vm2, %v3562_v60 }
 0x555   : > { %v3462_v31 = vpop.f32.mrf.mxu1  ;;  %10224 = vmatpush3.bf16.msra.mxu1 %v3891_v7  ;;  %10225 = vmatprep.mubr.msk.bf16.mxu1 %vm11046_vm1, %v11045_v12 }
 0x556   : > { %v3505_v5 = vpop.f32.mrf.mxu0  ;;  %10237 = vmatprep.subr.bf16.mxu1 %v11045_v12 }
 0x557   : > { %v3563_v39 = vpack.c.bf16 %v3505_v5, %v3505_v5  ;;  %v10168_v32 = vpop.f32.mrf.mxu1 }
 0x558   : > { %v10173_v6 = vpop.f32.mrf.mxu0 }
 0x559   : > { %10220 = vmatmul.mubr.msk.bf16.vlgmr.msra.gmra.mxu0 %vm2705_vm2, %v3563_v39  ;;  %v3551_v11 = vpop.f32.mrf.mxu1 }
 0x55a   : > { %v3508_v13 = vpop.f32.mrf.mxu0  ;;  %v3564_v40 = vpack.c.bf16 %v3551_v11, %v3551_v11  ;;  %10233 = vmatprep.mubr.msk.bf16.mxu0 %vm11046_vm1, %v11045_v12 }
 0x55b   : > { %v10179_v16 = vpop.f32.mrf.mxu1 }
 0x55c   : > { %v10174_v17 = vpop.f32.mrf.mxu0  ;;  %10226 = vmatmul.mubr.msk.bf16.vlgmr.msra.gmra.mxu1 %vm2705_vm2, %v3564_v40 }
 0x55d   : > { %v3554_v19 = vpop.f32.mrf.mxu1  ;;  %10241 = vmatprep.mubr.msk.bf16.mxu1 %vm11046_vm1, %v11045_v12  ;;  %v10698_v17 = vld [vmem:[%s12590_s4 + $0x8] sm:$0xff]  }
 0x55e   : > { %v10699_v19 = vld [vmem:[%s12590_s4 + $0x18] sm:$0xff]   ;;  %10230 = vmatpush3.bf16.msra.mxu0 %v10698_v17 }
 0x55f   : > { %v10180_v18 = vpop.f32.mrf.mxu1  ;;  %10238 = vmatpush3.bf16.msra.mxu1 %v10699_v19  ;;  %10231 = vmatprep.subr.bf16.mxu0 %v11045_v12 }
 0x560   : > { %10239 = vmatprep.subr.bf16.mxu1 %v11045_v12  ;;  %v10701_v18 = vld [vmem:[%s12590_s4 + $0x10] sm:$0xff]  }
 0x563   : > { %10240 = vmatpush3.bf16.msra.mxu1 %v10701_v18 }
 0x564   : > { %10253 = vmatprep.subr.bf16.mxu1 %v11045_v12 }
 0x600   : > { %v3605_v25 = vpop.f32.mrf.mxu0 }
 0x601   : > { %v3933_v45 = vsel %vm1118_vm0, %v3605_v25, 0.0 }
 0x602   : > { %v10185_v26 = vpop.f32.mrf.mxu0 }
 0x604   : > { %v3608_v29 = vpop.f32.mrf.mxu0  ;;  %v3651_v14 = vpop.f32.mrf.mxu1 }
 0x605   : > { %v3934_v42 = vsel %vm1118_vm0, %v3651_v14, 0.0 }
 0x606   : > { %v10186_v33 = vpop.f32.mrf.mxu0  ;;  %v10191_v27 = vpop.f32.mrf.mxu1  ;;  %v3935_v48 = vadd.f32 %v3934_v42, %v3933_v45  ;;  %v10705_v42 = vld [vmem:[%s12590_s4 + $0x30] sm:$0xff]   ;;  %v10708_v45 = vld [vmem:[%s12590_s4 + $0x40] sm:$0xff]  }
 0x607   : > { %v9170_v33 = vld [vmem:[%s12598_s7] ss:$0 sm:$0xff]  ;;  %s12600_s7 = sld [smem:[#allocation16_spill]] }
 0x608   : > { %v3654_v28 = vpop.f32.mrf.mxu1 }
 0x609   : > { %v3697_v34 = vpop.f32.mrf.mxu0  ;;  %v9171_v28 = vld [vmem:[%s12599_s10] ss:$0 sm:$0xff]  ;;  %s12601_s10 = sld [smem:[#allocation7_spill]] }
 0x60a   : > { %v10192_v35 = vpop.f32.mrf.mxu1  ;;  %v3936_v46 = vsel %vm1118_vm0, %v3697_v34, 0.0 }
 0x60b   : > { %v10197_v36 = vpop.f32.mrf.mxu0  ;;  %v3937_v54 = vadd.f32 %v3936_v46, %v3935_v48  ;;  %v10709_v46 = vld [vmem:[%s12590_s4 + $0x50] sm:$0xff]   ;;  %v10711_v48 = vld [vmem:[%s12590_s4 + $0x78] sm:$0xff]  }
 0x60c   : > { %v3743_v37 = vpop.f32.mrf.mxu1  ;;  %v10702_v36 = vld [vmem:[%s12590_s4 + $0x28] sm:$0xff]  }
 0x60d   : > { %v3700_v38 = vpop.f32.mrf.mxu0  ;;  %v3938_v52 = vsel %vm1118_vm0, %v3743_v37, 0.0  ;;  %v10703_v37 = vld [vmem:[%s12590_s4 + $0x38] sm:$0xff]  }
 0x60e   : > { %v10203_v41 = vpop.f32.mrf.mxu1  ;;  %v3939_v21 = vadd.f32 %v3938_v52, %v3937_v54  ;;  %v10713_v52 = vld [vmem:[%s12590_s4 + $0x70] sm:$0xff]   ;;  %v10715_v54 = vld [vmem:[%s12600_s7 + $0x18] sm:$0xff]  }
 0x60f   : > { %v10198_v43 = vpop.f32.mrf.mxu0  ;;  %v10704_v41 = vld [vmem:[%s12590_s4 + $0x20] sm:$0xff]   ;;  %s1104_s3 = scalar_lea.vmem %s12601_s10, %s9045_s1  ;;  %s12603_s1 = sld [smem:[#allocation17_spill]] }
 0x610   : > { %v3746_v44 = vpop.f32.mrf.mxu1  ;;  %v10706_v43 = vld [vmem:[%s12590_s4 + $0x48] sm:$0xff]   ;;  %s12604_s10 = sld [smem:[#allocation15_spill]] }
 0x611   : > { %v3789_v47 = vpop.f32.mrf.mxu0  ;;  %v10707_v44 = vld [vmem:[%s12590_s4 + $0x58] sm:$0xff]  }
 0x612   : > { %v10204_v22 = vpop.f32.mrf.mxu1  ;;  %v3940_v53 = vsel %vm1118_vm0, %v3789_v47, 0.0  ;;  %v10710_v47 = vld [vmem:[%s12590_s4 + $0x68] sm:$0xff]  }
 0x613   : > { %v10209_v24 = vpop.f32.mrf.mxu0  ;;  %v3941_v61 = vadd.f32 %v3940_v53, %v3939_v21  ;;  %v10712_v22 = vld [vmem:[%s12590_s4 + $0x60] sm:$0xff]  }
 0x614   : > { %v3835_v20 = vpop.f32.mrf.mxu1  ;;  %v10714_v24 = vld [vmem:[%s12600_s7 + $0x8] sm:$0xff]   ;;  %v10716_v53 = vld [vmem:[%s12600_s7] sm:$0xff]  }
 0x615   : > { %v3792_v55 = vpop.f32.mrf.mxu0  ;;  %v3942_v58 = vsel %vm1118_vm0, %v3835_v20, 0.0  ;;  %v1147_v20 = vld [vmem:[%s1104_s3] sm:$0xff]  ;;  %s12602_s3 = sld [smem:[#allocation18_spill]] }
 0x616   : > { %v10215_v57 = vpop.f32.mrf.mxu1  ;;  %v3943_v63 = vadd.f32 %v3942_v58, %v3941_v61  ;;  %v10717_v55 = vld [vmem:[%s12600_s7 + $0x10] sm:$0xff]   ;;  %v11836_v21 = vpack.c.bf16 %v1147_v20, %v1147_v20  ;;  %v10719_v58 = vld [vmem:[%s12600_s7 + $0x38] sm:$0xff]  }
 0x617   : > { %v10210_v59 = vpop.f32.mrf.mxu0  ;;  %v10718_v57 = vld [vmem:[%s12600_s7 + $0x28] sm:$0xff]   ;;  %v10721_v61 = vld [vmem:[%s12600_s7 + $0x30] sm:$0xff]  }
 0x618   : > { %v3838_v62 = vpop.f32.mrf.mxu1  ;;  %v10720_v59 = vld [vmem:[%s12600_s7 + $0x20] sm:$0xff]  }
 0x619   : > { %v3881_v30 = vpop.f32.mrf.mxu0  ;;  %v10722_v62 = vld [vmem:[%s12600_s7 + $0x48] sm:$0xff]  }
 0x61a   : > { %v3944_v0 = vsel %vm1118_vm0, %v3881_v30, 0.0  ;;  %v10216_v1 = vpop.f32.mrf.mxu1  ;;  %v10723_v30 = vld [vmem:[%s12600_s7 + $0x58] sm:$0xff]  }
 0x61b   : > { %v10221_v2 = vpop.f32.mrf.mxu0  ;;  %v3945_v3 = vadd.f32 %v3944_v0, %v3943_v63  ;;  %v10724_v63 = vld [vmem:[%s12600_s7 + $0x40] sm:$0xff]   ;;  %v10725_v0 = vld [vmem:[%s12600_s7 + $0x50] sm:$0xff]   ;;  %v10726_v1 = vld [vmem:[%s12600_s7 + $0x68] sm:$0xff]  }
 0x61c   : > { %v3927_v15 = vpop.f32.mrf.mxu1  ;;  %v10727_v2 = vld [vmem:[%s12600_s7 + $0x78] sm:$0xff]  }
 0x61d   : > { %v3884_v56 = vpop.f32.mrf.mxu0  ;;  %v3946_v9 = vsel %vm1118_vm0, %v3927_v15, 0.0  ;;  %v10729_v15 = vld [vmem:[%s12600_s7 + $0x70] sm:$0xff]  }
 0x61e   : > { %v3947_v60 = vadd.f32 %v3946_v9, %v3945_v3  ;;  %v10227_v7 = vpop.f32.mrf.mxu1  ;;  %v10728_v3 = vld [vmem:[%s12600_s7 + $0x60] sm:$0xff]   ;;  %v10730_v56 = vld [vmem:[%s12602_s3 + $0x8] sm:$0xff]  }
 0x61f   : > { %v10222_v4 = vpop.f32.mrf.mxu0  ;;  %v10732_v9 = vld [vmem:[%s12602_s3] sm:$0xff]   ;;  %v10734_v7 = vld [vmem:[%s12602_s3 + $0x28] sm:$0xff]  }
 0x620   : > { %v3954_v10 = vadd.f32 %v9169_v8, %v3947_v60  ;;  %v3930_v31 = vpop.f32.mrf.mxu1  ;;  %v10731_v8 = vld [vmem:[%s12602_s3 + $0x18] sm:$0xff]   ;;  %v10733_v60 = vld [vmem:[%s12602_s3 + $0x10] sm:$0xff]  }
 0x621   : > { %v10735_v4 = vld [vmem:[%s12602_s3 + $0x38] sm:$0xff]   ;;  %v10737_v31 = vld [vmem:[%s12602_s3 + $0x30] sm:$0xff]  }
 0x622   : > { %v10228_v5 = vpop.f32.mrf.mxu1  ;;  %v3955_v39 = vadd.f32 %v3954_v10, %v11309_v23  ;;  %v10700_v23 = vld [vmem:[%s12590_s4] sm:$0xff]  }
 0x623   : > { %10232 = vmatpush3.bf16.msra.mxu0 %v10700_v23  ;;  %v10736_v10 = vld [vmem:[%s12602_s3 + $0x20] sm:$0xff]   ;;  %v10738_v5 = vld [vmem:[%s12602_s3 + $0x48] sm:$0xff]  }
 0x624   : > { %v3956_v32 = vsel %vm1118_vm0, %v3955_v39, 0.0  ;;  %10245 = vmatprep.subr.bf16.mxu0 %v11045_v12 }
 0x625   : > { %3957 = vadd.xlane.f32.xlu0 %v3956_v32  ;;  %v10740_v32 = vld [vmem:[%s12602_s3 + $0x40] sm:$0xff]  }
 0x6ae   : > { %v3958_v6 = vpop.xlane.xlu0 %3957 }
 0x6af   : > { %v3959_v11 = vmul.f32 0.03125, %v3958_v6  ;;  %v10741_v6 = vld [vmem:[%s12602_s3 + $0x50] sm:$0xff]  }
 0x6b1   : > { %v3960_v13 = vsub.f32 %v3955_v39, %v3959_v11  ;;  %v10739_v39 = vld [vmem:[%s12602_s3 + $0x58] sm:$0xff]   ;;  %v10742_v11 = vld [vmem:[%s12602_s3 + $0x68] sm:$0xff]  }
 0x6b3   : > { %v3961_v40 = vmul.f32 %v3960_v13, %v3960_v13 }
 0x6b5   : > { %v3962_v16 = vsel %vm1118_vm0, %v3961_v40, 0.0  ;;  %v10744_v40 = vld [vmem:[%s12602_s3 + $0x60] sm:$0xff]  }
 0x6b6   : > { %3963 = vadd.xlane.f32.xlu1 %v3962_v16  ;;  %v10745_v16 = vld [vmem:[%s12602_s3 + $0x70] sm:$0xff]  }
 0x73f   : > { %v3964_v25 = vpop.xlane.xlu1 %3963 }
 0x740   : > { %v3965_v26 = vmul.f32 0.03125, %v3964_v25 }
 0x742   : > { %v3966_v29 = vadd.f32 1e-05, %v3965_v26 }
 0x744   : > { %10910 = vrsqrt.f32 %v3966_v29 }
 0x751   : > { %v10911_v14 = vpop.eup %10910 }
 0x752   : > { %v3968_v27 = vmul.f32 %v10911_v14, %v3960_v13  ;;  %v10743_v13 = vld [vmem:[%s12602_s3 + $0x78] sm:$0xff]   ;;  %s12606_s3 = sld [smem:[#allocation8_spill]] }
 0x754   : > { %v3975_v34 = vmul.f32 %v9170_v33, %v3968_v27 }
 0x756   : > { %v11775_v35 = vadd.f32 %v9171_v28, %v3975_v34 }
 0x758   : > { %v4116_v38 = vpack.c.bf16 %v11775_v35, %v11775_v35  ;;  %s1110_s4 = scalar_lea.vmem %s12606_s3, %s11284_s18  ;;  %s12610_s18 = sld [smem:[#allocation21_spill]] }
 0x759   : > { %s12611_s3 = sld [smem:[#allocation24_spill]] }
 0x75a   : > { %10234 = vmatmul.mubr.msk.bf16.vlgmr.msra.gmra.mxu0 %vm1118_vm0, %v4116_v38  ;;  %10242 = vmatmul.mubr.msk.bf16.vlgmr.msra.gmra.mxu1 %vm1118_vm0, %v4116_v38 }
 0x75b   : > { %10246 = vmatpush3.bf16.msra.mxu0 %v10702_v36  ;;  %10254 = vmatpush3.bf16.msra.mxu1 %v10703_v37 }
 0x75c   : > { %10247 = vmatprep.subr.bf16.mxu0 %v11045_v12  ;;  %10255 = vmatprep.subr.bf16.mxu1 %v11045_v12 }
 0x75d   : > { %10249 = vmatprep.mubr.msk.bf16.mxu0 %vm11046_vm1, %v11045_v12  ;;  %10257 = vmatprep.mubr.msk.bf16.mxu1 %vm11046_vm1, %v11045_v12 }
 0x75f   : > { %10248 = vmatpush3.bf16.msra.mxu0 %v10704_v41  ;;  %10256 = vmatpush3.bf16.msra.mxu1 %v10705_v42 }
 0x760   : > { %10261 = vmatprep.subr.bf16.mxu0 %v11045_v12  ;;  %10269 = vmatprep.subr.bf16.mxu1 %v11045_v12 }
 0x762   : > { %10250 = vmatmul.mubr.msk.bf16.vlgmr.msra.gmra.mxu0 %vm1118_vm0, %v4116_v38  ;;  %10258 = vmatmul.mubr.msk.bf16.vlgmr.msra.gmra.mxu1 %vm1118_vm0, %v4116_v38 }
 0x763   : > { %10262 = vmatpush3.bf16.msra.mxu0 %v10706_v43  ;;  %10270 = vmatpush3.bf16.msra.mxu1 %v10707_v44 }
 0x764   : > { %10263 = vmatprep.subr.bf16.mxu0 %v11045_v12  ;;  %10271 = vmatprep.subr.bf16.mxu1 %v11045_v12 }
 0x765   : > { %10265 = vmatprep.mubr.msk.bf16.mxu0 %vm11046_vm1, %v11045_v12  ;;  %10273 = vmatprep.mubr.msk.bf16.mxu1 %vm11046_vm1, %v11045_v12 }
 0x767   : > { %10264 = vmatpush3.bf16.msra.mxu0 %v10708_v45  ;;  %10272 = vmatpush3.bf16.msra.mxu1 %v10709_v46 }
 0x768   : > { %10277 = vmatprep.subr.bf16.mxu0 %v11045_v12  ;;  %10285 = vmatprep.subr.bf16.mxu1 %v11045_v12 }
 0x76a   : > { %10266 = vmatmul.mubr.msk.bf16.vlgmr.msra.gmra.mxu0 %vm1118_vm0, %v4116_v38  ;;  %10274 = vmatmul.mubr.msk.bf16.vlgmr.msra.gmra.mxu1 %vm1118_vm0, %v4116_v38 }
 0x76b   : > { %10278 = vmatpush3.bf16.msra.mxu0 %v10710_v47  ;;  %10286 = vmatpush3.bf16.msra.mxu1 %v10711_v48 }
 0x76c   : > { %10279 = vmatprep.subr.bf16.mxu0 %v11045_v12  ;;  %10287 = vmatprep.subr.bf16.mxu1 %v11045_v12 }
 0x76d   : > { %10281 = vmatprep.mubr.msk.bf16.mxu0 %vm11046_vm1, %v11045_v12  ;;  %10289 = vmatprep.mubr.msk.bf16.mxu1 %vm11046_vm1, %v11045_v12 }
 0x76f   : > { %10280 = vmatpush3.bf16.msra.mxu0 %v10712_v22  ;;  %10288 = vmatpush3.bf16.msra.mxu1 %v10713_v52 }
 0x770   : > { %10293 = vmatprep.subr.bf16.mxu0 %v11045_v12  ;;  %10301 = vmatprep.subr.bf16.mxu1 %v11045_v12 }
 0x772   : > { %10282 = vmatmul.mubr.msk.bf16.vlgmr.msra.gmra.mxu0 %vm1118_vm0, %v4116_v38  ;;  %10290 = vmatmul.mubr.msk.bf16.vlgmr.msra.gmra.mxu1 %vm1118_vm0, %v4116_v38 }
 0x773   : > { %10294 = vmatpush3.bf16.msra.mxu0 %v10714_v24  ;;  %10302 = vmatpush3.bf16.msra.mxu1 %v10715_v54 }
 0x774   : > { %10295 = vmatprep.subr.bf16.mxu0 %v11045_v12  ;;  %10303 = vmatprep.subr.bf16.mxu1 %v11045_v12 }
 0x775   : > { %10297 = vmatprep.mubr.msk.bf16.mxu0 %vm11046_vm1, %v11045_v12  ;;  %10305 = vmatprep.mubr.msk.bf16.mxu1 %vm11046_vm1, %v11045_v12 }
 0x777   : > { %10296 = vmatpush3.bf16.msra.mxu0 %v10716_v53  ;;  %10304 = vmatpush3.bf16.msra.mxu1 %v10717_v55 }
 0x778   : > { %10309 = vmatprep.subr.bf16.mxu0 %v11045_v12  ;;  %10317 = vmatprep.subr.bf16.mxu1 %v11045_v12 }
 0x77a   : > { %10298 = vmatmul.mubr.msk.bf16.vlgmr.msra.gmra.mxu0 %vm1118_vm0, %v11836_v21  ;;  %10306 = vmatmul.mubr.msk.bf16.vlgmr.msra.gmra.mxu1 %vm1118_vm0, %v11836_v21 }
 0x77b   : > { %10310 = vmatpush3.bf16.msra.mxu0 %v10718_v57  ;;  %10318 = vmatpush3.bf16.msra.mxu1 %v10719_v58  ;;  %v9204_v58 = vld [vmem:[%s12603_s1] ss:$0 sm:$0xff] }
 0x77c   : > { %10311 = vmatprep.subr.bf16.mxu0 %v11045_v12  ;;  %10319 = vmatprep.subr.bf16.mxu1 %v11045_v12 }
 0x77d   : > { %10313 = vmatprep.mubr.msk.bf16.mxu0 %vm11046_vm1, %v11045_v12  ;;  %10321 = vmatprep.mubr.msk.bf16.mxu1 %vm11046_vm1, %v11045_v12 }
 0x77f   : > { %10312 = vmatpush3.bf16.msra.mxu0 %v10720_v59  ;;  %10320 = vmatpush3.bf16.msra.mxu1 %v10721_v61  ;;  %v9205_v59 = vld [vmem:[%s12603_s1 + $0x1] ss:$0 sm:$0xff] }
 0x780   : > { %10325 = vmatprep.subr.bf16.mxu0 %v11045_v12  ;;  %10333 = vmatprep.subr.bf16.mxu1 %v11045_v12 }
 0x782   : > { %10314 = vmatmul.mubr.msk.bf16.vlgmr.msra.gmra.mxu0 %vm1118_vm0, %v11836_v21  ;;  %10322 = vmatmul.mubr.msk.bf16.vlgmr.msra.gmra.mxu1 %vm1118_vm0, %v11836_v21 }
 0x783   : > { %10326 = vmatpush3.bf16.msra.mxu0 %v10722_v62  ;;  %10334 = vmatpush3.bf16.msra.mxu1 %v10723_v30 }
 0x784   : > { %10327 = vmatprep.subr.bf16.mxu0 %v11045_v12  ;;  %10335 = vmatprep.subr.bf16.mxu1 %v11045_v12 }
 0x785   : > { %10329 = vmatprep.mubr.msk.bf16.mxu0 %vm11046_vm1, %v11045_v12  ;;  %10337 = vmatprep.mubr.msk.bf16.mxu1 %vm11046_vm1, %v11045_v12 }
 0x787   : > { %10328 = vmatpush3.bf16.msra.mxu0 %v10724_v63  ;;  %10336 = vmatpush3.bf16.msra.mxu1 %v10725_v0 }
 0x788   : > { %10341 = vmatprep.subr.bf16.mxu0 %v11045_v12  ;;  %10349 = vmatprep.subr.bf16.mxu1 %v11045_v12 }
 0x78a   : > { %10330 = vmatmul.mubr.msk.bf16.vlgmr.msra.gmra.mxu0 %vm1118_vm0, %v11836_v21  ;;  %10338 = vmatmul.mubr.msk.bf16.vlgmr.msra.gmra.mxu1 %vm1118_vm0, %v11836_v21 }
 0x78b   : > { %10342 = vmatpush3.bf16.msra.mxu0 %v10726_v1  ;;  %10350 = vmatpush3.bf16.msra.mxu1 %v10727_v2 }
 0x78c   : > { %10343 = vmatprep.subr.bf16.mxu0 %v11045_v12  ;;  %10351 = vmatprep.subr.bf16.mxu1 %v11045_v12 }
 0x78d   : > { %10345 = vmatprep.mubr.msk.bf16.mxu0 %vm11046_vm1, %v11045_v12  ;;  %10353 = vmatprep.mubr.msk.bf16.mxu1 %vm11046_vm1, %v11045_v12 }
 0x78f   : > { %10344 = vmatpush3.bf16.msra.mxu0 %v10728_v3  ;;  %10352 = vmatpush3.bf16.msra.mxu1 %v10729_v15  ;;  %v9172_v15 = vld [vmem:[%s12604_s10] ss:$0 sm:$0xff] }
 0x790   : > { %10357 = vmatprep.subr.bf16.mxu0 %v11045_v12  ;;  %10365 = vmatprep.subr.bf16.mxu1 %v11045_v12 }
 0x792   : > { %10346 = vmatmul.mubr.msk.bf16.vlgmr.msra.gmra.mxu0 %vm1118_vm0, %v11836_v21  ;;  %10354 = vmatmul.mubr.msk.bf16.vlgmr.msra.gmra.mxu1 %vm1118_vm0, %v11836_v21 }
 0x793   : > { %10361 = vmatprep.mubr.msk.bf16.mxu0 %vm11046_vm1, %v11045_v12  ;;  %10369 = vmatprep.mubr.msk.bf16.mxu1 %vm11046_vm1, %v11045_v12 }
 0x794   : > { %10358 = vmatpush3.bf16.msra.mxu0 %v10730_v56  ;;  %10366 = vmatpush3.bf16.msra.mxu1 %v10731_v8  ;;  %v9173_v56 = vld [vmem:[%s12604_s10 + $0x1] ss:$0 sm:$0xff] }
 0x795   : > { %10359 = vmatprep.subr.bf16.mxu0 %v11045_v12  ;;  %10367 = vmatprep.subr.bf16.mxu1 %v11045_v12 }
 0x798   : > { %10360 = vmatpush3.bf16.msra.mxu0 %v10732_v9  ;;  %10368 = vmatpush3.bf16.msra.mxu1 %v10733_v60 }
 0x799   : > { %10373 = vmatprep.subr.bf16.mxu0 %v11045_v12  ;;  %10381 = vmatprep.subr.bf16.mxu1 %v11045_v12 }
 0x79b   : > { %10362 = vmatmul.mubr.msk.bf16.vlgmr.msra.gmra.mxu0 %vm1118_vm0, %v11836_v21  ;;  %10370 = vmatmul.mubr.msk.bf16.vlgmr.msra.gmra.mxu1 %vm1118_vm0, %v11836_v21 }
 0x79c   : > { %10374 = vmatpush3.bf16.msra.mxu0 %v10734_v7  ;;  %10377 = vmatprep.mubr.msk.bf16.mxu0 %vm11046_vm1, %v11045_v12 }
 0x79d   : > { %10375 = vmatprep.subr.bf16.mxu0 %v11045_v12  ;;  %10382 = vmatpush3.bf16.msra.mxu1 %v10735_v4 }
 0x79e   : > { %10385 = vmatprep.mubr.msk.bf16.mxu1 %vm11046_vm1, %v11045_v12  ;;  %10383 = vmatprep.subr.bf16.mxu1 %v11045_v12 }
 0x7a0   : > { %10376 = vmatpush3.bf16.msra.mxu0 %v10736_v10 }
 0x7a1   : > { %10389 = vmatprep.subr.bf16.mxu0 %v11045_v12  ;;  %10384 = vmatpush3.bf16.msra.mxu1 %v10737_v31  ;;  %v9206_v31 = vld [vmem:[%s12603_s1 + $0x2] ss:$0 sm:$0xff] }
 0x7a2   : > { %10397 = vmatprep.subr.bf16.mxu1 %v11045_v12 }
 0x7a3   : > { %10378 = vmatmul.mubr.msk.bf16.vlgmr.msra.gmra.mxu0 %vm1118_vm0, %v11836_v21 }
 0x7a4   : > { %10390 = vmatpush3.bf16.msra.mxu0 %v10738_v5  ;;  %10393 = vmatprep.mubr.msk.bf16.mxu0 %vm11046_vm1, %v11045_v12  ;;  %v9207_v5 = vld [vmem:[%s12603_s1 + $0x3] ss:$0 sm:$0xff] }
 0x7a5   : > { %10386 = vmatmul.mubr.msk.bf16.vlgmr.msra.gmra.mxu1 %vm1118_vm0, %v11836_v21  ;;  %10391 = vmatprep.subr.bf16.mxu0 %v11045_v12 }
 0x7a6   : > { %10398 = vmatpush3.bf16.msra.mxu1 %v10739_v39  ;;  %10401 = vmatprep.mubr.msk.bf16.mxu1 %vm11046_vm1, %v11045_v12 }
 0x7a7   : > { %10399 = vmatprep.subr.bf16.mxu1 %v11045_v12 }
 0x7a8   : > { %10392 = vmatpush3.bf16.msra.mxu0 %v10740_v32 }
 0x7a9   : > { %10405 = vmatprep.subr.bf16.mxu0 %v11045_v12 }
 0x7aa   : > { %10400 = vmatpush3.bf16.msra.mxu1 %v10741_v6 }
 0x7ab   : > { %10394 = vmatmul.mubr.msk.bf16.vlgmr.msra.gmra.mxu0 %vm1118_vm0, %v11836_v21  ;;  %10413 = vmatprep.subr.bf16.mxu1 %v11045_v12 }
 0x7ac   : > { %10406 = vmatpush3.bf16.msra.mxu0 %v10742_v11  ;;  %10409 = vmatprep.mubr.msk.bf16.mxu0 %vm11046_vm1, %v11045_v12 }
 0x7ad   : > { %10402 = vmatmul.mubr.msk.bf16.vlgmr.msra.gmra.mxu1 %vm1118_vm0, %v11836_v21  ;;  %10407 = vmatprep.subr.bf16.mxu0 %v11045_v12 }
 0x7ae   : > { %10414 = vmatpush3.bf16.msra.mxu1 %v10743_v13  ;;  %10417 = vmatprep.mubr.msk.bf16.mxu1 %vm11046_vm1, %v11045_v12 }
 0x7af   : > { %10415 = vmatprep.subr.bf16.mxu1 %v11045_v12 }
 0x7b0   : > { %10408 = vmatpush3.bf16.msra.mxu0 %v10744_v40 }
 0x7b1   : > { %10421 = vmatprep.subr.bf16.mxu0 %v11045_v12 }
 0x7b2   : > { %10416 = vmatpush3.bf16.msra.mxu1 %v10745_v16 }
 0x7b3   : > { %10410 = vmatmul.mubr.msk.bf16.vlgmr.msra.gmra.mxu0 %vm1118_vm0, %v11836_v21  ;;  %10427 = vmatprep.subr.bf16.mxu1 %v11045_v12 }
 0x7b4   : > { %10423 = vmatprep.mubr.msk.bf16.mxu0 %vm11046_vm1, %v11045_v12 }
 0x7b5   : > { %10418 = vmatmul.mubr.msk.bf16.vlgmr.msra.gmra.mxu1 %vm1118_vm0, %v11836_v21 }
 0x7b6   : > { %10429 = vmatprep.mubr.msk.bf16.mxu1 %vm11046_vm1, %v11045_v12 }
 0x81a   : > { %v4215_v17 = vpop.f32.mrf.mxu0  ;;  %v4267_v19 = vpop.f32.mrf.mxu1 }
 0x81b   : > { %v4216_v39 = vadd.f32 %v9172_v15, %v4215_v17  ;;  %v4268_v32 = vadd.f32 %v9173_v56, %v4267_v19 }
 0x81c   : > { %v10235_v23 = vpop.f32.mrf.mxu0  ;;  %v10243_v18 = vpop.f32.mrf.mxu1 }
 0x81d   : > { %v5516_v18 = vpack.c.bf16 %v4216_v39, %v4216_v39  ;;  %v9179_v39 = vld [vmem:[%s12604_s10 + $0x7] ss:$0 sm:$0xff] }
 0x81e   : > { %v4218_v25 = vpop.f32.mrf.mxu0  ;;  %v4270_v26 = vpop.f32.mrf.mxu1 }
 0x81f   : > { %v5517_v25 = vpack.c.bf16 %v4268_v32, %v4268_v32 }
 0x820   : > { %v10236_v29 = vpop.f32.mrf.mxu0  ;;  %v10244_v14 = vpop.f32.mrf.mxu1 }
 0x821   : > { %v9174_v14 = vld [vmem:[%s12604_s10 + $0x2] ss:$0 sm:$0xff] }
 0x822   : > { %v11960_v33 = vpop.f32.mrf.mxu0  ;;  %v11962_v27 = vpop.f32.mrf.mxu1 }
 0x824   : > { %v10251_v28 = vpop.f32.mrf.mxu0  ;;  %v10259_v34 = vpop.f32.mrf.mxu1 }
 0x825   : > { %v9175_v28 = vld [vmem:[%s12604_s10 + $0x3] ss:$0 sm:$0xff] }
 0x826   : > { %v4322_v36 = vpop.f32.mrf.mxu0  ;;  %v4374_v37 = vpop.f32.mrf.mxu1 }
 0x828   : > { %v10252_v38 = vpop.f32.mrf.mxu0  ;;  %v10260_v41 = vpop.f32.mrf.mxu1 }
 0x829   : > { %v9208_v41 = vld [vmem:[%s12603_s1 + $0x4] ss:$0 sm:$0xff] }
 0x82a   : > { %v11964_v42 = vpop.f32.mrf.mxu0  ;;  %v11966_v43 = vpop.f32.mrf.mxu1 }
 0x82c   : > { %v10267_v44 = vpop.f32.mrf.mxu0  ;;  %v10275_v45 = vpop.f32.mrf.mxu1 }
 0x82d   : > { %v9209_v44 = vld [vmem:[%s12603_s1 + $0x5] ss:$0 sm:$0xff]  ;;  %v4320_v45 = vadd.f32 %v9174_v14, %v11960_v33 }
 0x82e   : > { %v4426_v46 = vpop.f32.mrf.mxu0  ;;  %v4478_v47 = vpop.f32.mrf.mxu1 }
 0x82f   : > { %v4372_v46 = vadd.f32 %v9175_v28, %v11962_v27 }
 0x830   : > { %v10268_v48 = vpop.f32.mrf.mxu0  ;;  %v10276_v22 = vpop.f32.mrf.mxu1 }
 0x831   : > { %v5519_v27 = vpack.c.bf16 %v4372_v46, %v4372_v46 }
 0x832   : > { %v11968_v52 = vpop.f32.mrf.mxu0  ;;  %v11970_v24 = vpop.f32.mrf.mxu1 }
 0x834   : > { %v10283_v54 = vpop.f32.mrf.mxu0  ;;  %v10291_v20 = vpop.f32.mrf.mxu1 }
 0x836   : > { %v4530_v53 = vpop.f32.mrf.mxu0  ;;  %v4582_v55 = vpop.f32.mrf.mxu1 }
 0x837   : > { %v5518_v53 = vpack.c.bf16 %v4320_v45, %v4320_v45 }
 0x838   : > { %v10284_v21 = vpop.f32.mrf.mxu0  ;;  %v10292_v57 = vpop.f32.mrf.mxu1 }
 0x839   : > { %v9176_v57 = vld [vmem:[%s12604_s10 + $0x4] ss:$0 sm:$0xff] }
 0x83a   : > { %v4682_v61 = vpop.f32.mrf.mxu0  ;;  %v4734_v62 = vpop.f32.mrf.mxu1 }
 0x83b   : > { %v4683_v30 = vadd.f32 %v9204_v58, %v4682_v61  ;;  %v4735_v63 = vadd.f32 %v9205_v59, %v4734_v62  ;;  %v9177_v58 = vld [vmem:[%s12604_s10 + $0x5] ss:$0 sm:$0xff] }
 0x83c   : > { %v10299_v0 = vpop.f32.mrf.mxu0  ;;  %v10307_v1 = vpop.f32.mrf.mxu1  ;;  %v4476_v15 = vadd.f32 %v9177_v58, %v11966_v43 }
 0x83d   : > { %v5524_v2 = vpack.c.bf16 %v4683_v30, %v4683_v30  ;;  %v5525_v3 = vpack.c.bf16 %v4735_v63, %v4735_v63  ;;  %v9210_v1 = vld [vmem:[%s12603_s1 + $0x6] ss:$0 sm:$0xff] }
 0x83e   : > { %v4685_v8 = vpop.f32.mrf.mxu0  ;;  %v4737_v9 = vpop.f32.mrf.mxu1 }
 0x83f   : > { %v5536_v60 = vsel %vm2705_vm2, %v5524_v2, 0  ;;  %v5582_v7 = vsel %vm2705_vm2, %v5525_v3, 0  ;;  %v9211_v2 = vld [vmem:[%s12603_s1 + $0x7] ss:$0 sm:$0xff]  ;;  %v4424_v3 = vadd.f32 %v9176_v57, %v11964_v42  ;;  %s12605_s1 = sld [smem:[#allocation19_spill]] }
 0x840   : > { %v10300_v4 = vpop.f32.mrf.mxu0  ;;  %v10308_v10 = vpop.f32.mrf.mxu1  ;;  %10422 = vmatpush3.bf16.xpose.msra.mxu0 %v5536_v60  ;;  %10428 = vmatpush3.bf16.xpose.msra.mxu1 %v5582_v7 }
 0x841   : > { %10433 = vmatprep.subr.bf16.mxu0 %v11045_v12  ;;  %10439 = vmatprep.subr.bf16.mxu1 %v11045_v12  ;;  %v5520_v4 = vpack.c.bf16 %v4424_v3, %v4424_v3  ;;  %v5521_v10 = vpack.c.bf16 %v4476_v15, %v4476_v15 }
 0x842   : > { %v4786_v6 = vpop.f32.mrf.mxu0  ;;  %v4838_v11 = vpop.f32.mrf.mxu1 }
 0x843   : > { %v4787_v13 = vadd.f32 %v9206_v31, %v4786_v6  ;;  %v4839_v40 = vadd.f32 %v9207_v5, %v4838_v11  ;;  %v9178_v5 = vld [vmem:[%s12604_s10 + $0x6] ss:$0 sm:$0xff] }
 0x844   : > { %v10315_v16 = vpop.f32.mrf.mxu0  ;;  %v10323_v23 = vpop.f32.mrf.mxu1 }
 0x845   : > { %v5526_v26 = vpack.c.bf16 %v4787_v13, %v4787_v13  ;;  %v5527_v29 = vpack.c.bf16 %v4839_v40, %v4839_v40  ;;  %v4528_v23 = vadd.f32 %v9178_v5, %v11968_v52  ;;  %v9236_v52 = vld [vmem:[%s12605_s1] ss:$0 sm:$0xff] }
 0x846   : > { %v4789_v17 = vpop.f32.mrf.mxu0  ;;  %v4841_v19 = vpop.f32.mrf.mxu1 }
 0x847   : > { %v5628_v34 = vsel %vm2705_vm2, %v5526_v26, 0  ;;  %v5674_v36 = vsel %vm2705_vm2, %v5527_v29, 0  ;;  %10424 = vmatmul.mubr.msk.bf16.vlgmr.msra.gmra.mxu0 %vm2705_vm2, %v5516_v18  ;;  %10430 = vmatmul.mubr.msk.bf16.vlgmr.msra.gmra.mxu1 %vm2705_vm2, %v5517_v25  ;;  %v4580_v18 = vadd.f32 %v9179_v39, %v11970_v24  ;;  %v5522_v25 = vpack.c.bf16 %v4528_v23, %v4528_v23  ;;  %v9237_v29 = vld [vmem:[%s12605_s1 + $0x1] ss:$0 sm:$0xff] }
 0x848   : > { %v10316_v37 = vpop.f32.mrf.mxu0  ;;  %v10324_v38 = vpop.f32.mrf.mxu1  ;;  %10434 = vmatpush3.bf16.xpose.msra.mxu0 %v5628_v34  ;;  %10440 = vmatpush3.bf16.xpose.msra.mxu1 %v5674_v36 }
 0x849   : > { %10435 = vmatprep.mubr.msk.bf16.mxu0 %vm11046_vm1, %v11045_v12  ;;  %10441 = vmatprep.mubr.msk.bf16.mxu1 %vm11046_vm1, %v11045_v12  ;;  %v5523_v26 = vpack.c.bf16 %v4580_v18, %v4580_v18 }
 0x84a   : > { %v4890_v47 = vpop.f32.mrf.mxu0  ;;  %v4942_v48 = vpop.f32.mrf.mxu1  ;;  %10445 = vmatprep.subr.bf16.mxu0 %v11045_v12  ;;  %10451 = vmatprep.subr.bf16.mxu1 %v11045_v12 }
 0x84b   : > { %v4891_v22 = vadd.f32 %v9208_v41, %v4890_v47  ;;  %v4943_v54 = vadd.f32 %v9209_v44, %v4942_v48 }
 0x84c   : > { %v10331_v20 = vpop.f32.mrf.mxu0  ;;  %v10339_v33 = vpop.f32.mrf.mxu1 }
 0x84d   : > { %v5528_v55 = vpack.c.bf16 %v4891_v22, %v4891_v22  ;;  %v5529_v21 = vpack.c.bf16 %v4943_v54, %v4943_v54 }
 0x84e   : > { %v4893_v59 = vpop.f32.mrf.mxu0  ;;  %v4945_v61 = vpop.f32.mrf.mxu1 }
 0x84f   : > { %v5720_v62 = vsel %vm2705_vm2, %v5528_v55, 0  ;;  %v5766_v30 = vsel %vm2705_vm2, %v5529_v21, 0  ;;  %10436 = vmatmul.mubr.msk.bf16.vlgmr.msra.gmra.mxu0 %vm2705_vm2, %v5518_v53  ;;  %10442 = vmatmul.mubr.msk.bf16.vlgmr.msra.gmra.mxu1 %vm2705_vm2, %v5519_v27 }
 0x850   : > { %v10332_v63 = vpop.f32.mrf.mxu0  ;;  %v10340_v0 = vpop.f32.mrf.mxu1  ;;  %10446 = vmatpush3.bf16.xpose.msra.mxu0 %v5720_v62  ;;  %10452 = vmatpush3.bf16.xpose.msra.mxu1 %v5766_v30 }
 0x851   : > { %10447 = vmatprep.mubr.msk.bf16.mxu0 %vm11046_vm1, %v11045_v12  ;;  %10453 = vmatprep.mubr.msk.bf16.mxu1 %vm11046_vm1, %v11045_v12 }
 0x852   : > { %v4994_v56 = vpop.f32.mrf.mxu0  ;;  %v5046_v8 = vpop.f32.mrf.mxu1  ;;  %10457 = vmatprep.subr.bf16.mxu0 %v11045_v12  ;;  %10463 = vmatprep.subr.bf16.mxu1 %v11045_v12 }
 0x853   : > { %v4995_v9 = vadd.f32 %v9210_v1, %v4994_v56  ;;  %v5047_v60 = vadd.f32 %v9211_v2, %v5046_v8 }
 0x854   : > { %v10347_v7 = vpop.f32.mrf.mxu0  ;;  %v10355_v42 = vpop.f32.mrf.mxu1 }
 0x855   : > { %v5530_v43 = vpack.c.bf16 %v4995_v9, %v4995_v9  ;;  %v5531_v31 = vpack.c.bf16 %v5047_v60, %v5047_v60  ;;  %v3983_v60 = vld [vmem:[%s1110_s4] sm:$0x1]  ;;  %s12609_s4 = sld [smem:[#allocation20_spill]] }
 0x856   : > { %v4997_v32 = vpop.f32.mrf.mxu0  ;;  %v5049_v6 = vpop.f32.mrf.mxu1  ;;  %vm3984_vm8 = vcmp.ne.s32.totalorder %v3983_v60, 0 }
 0x857   : > { %v5812_v11 = vsel %vm2705_vm2, %v5530_v43, 0  ;;  %v5858_v13 = vsel %vm2705_vm2, %v5531_v31, 0  ;;  %10448 = vmatmul.mubr.msk.bf16.vlgmr.msra.gmra.mxu0 %vm2705_vm2, %v5520_v4  ;;  %10454 = vmatmul.mubr.msk.bf16.vlgmr.msra.gmra.mxu1 %vm2705_vm2, %v5521_v10  ;;  %v5900_v7 = vsel %vm3984_vm8, 1, %v11047_v51 }
 0x858   : > { %v10348_v40 = vpop.f32.mrf.mxu0  ;;  %v10356_v16 = vpop.f32.mrf.mxu1  ;;  %10458 = vmatpush3.bf16.xpose.msra.mxu0 %v5812_v11  ;;  %10464 = vmatpush3.bf16.xpose.msra.mxu1 %v5858_v13  ;;  %v5904_v42 = vrot.slane %v5900_v7, %v11596_v50 }
 0x859   : > { %10459 = vmatprep.mubr.msk.bf16.mxu0 %vm11046_vm1, %v11045_v12  ;;  %10465 = vmatprep.mubr.msk.bf16.mxu1 %vm11046_vm1, %v11045_v12 }
 0x85a   : > { %10469 = vmatprep.subr.bf16.mxu0 %v11045_v12  ;;  %10475 = vmatprep.subr.bf16.mxu1 %v11045_v12  ;;  %vm12056_vm9 = vcmp.eq.s32.totalorder %v5904_v42, 1 }
 0x85b   : > { %v5146_v24 = vpop.f32.mrf.mxu0  ;;  %v5198_v17 = vpop.f32.mrf.mxu1 }
 0x85c   : > { %v5147_v14 = vadd.f32 %v9236_v52, %v5146_v24  ;;  %v5199_v34 = vadd.f32 %v9237_v29, %v5198_v17 }
 0x85d   : > { %v10363_v28 = vpop.f32.mrf.mxu0  ;;  %v10371_v37 = vpop.f32.mrf.mxu1 }
 0x85e   : > { %v6010_v19 = vpack.c.bf16 %v5147_v14, %v5147_v14  ;;  %v6011_v41 = vpack.c.bf16 %v5199_v34, %v5199_v34 }
 0x85f   : > { %10460 = vmatmul.mubr.msk.bf16.vlgmr.msra.gmra.mxu0 %vm2705_vm2, %v5522_v25  ;;  %10466 = vmatmul.mubr.msk.bf16.vlgmr.msra.gmra.mxu1 %vm2705_vm2, %v5523_v26  ;;  %v5149_v36 = vpop.f32.mrf.mxu0  ;;  %v5201_v45 = vpop.f32.mrf.mxu1 }
 0x860   : > { %10471 = vmatprep.mubr.msk.bf16.mxu0 %vm11046_vm1, %v11045_v12  ;;  %10477 = vmatprep.mubr.msk.bf16.mxu1 %vm11046_vm1, %v11045_v12  ;;  %v6022_v38 = vsel %vm3191_vm3, %v6010_v19, 0  ;;  %v6068_v46 = vsel %vm3191_vm3, %v6011_v41, 0 }
 0x861   : > { %v10364_v44 = vpop.f32.mrf.mxu0  ;;  %10470 = vmatpush3.bf16.msra.mxu0 %v6022_v38  ;;  %v10372_v47 = vpop.f32.mrf.mxu1  ;;  %10476 = vmatpush3.bf16.msra.mxu1 %v6068_v46 }
 0x862   : > { %10481 = vmatprep.subr.bf16.mxu0 %v11045_v12  ;;  %10487 = vmatprep.subr.bf16.mxu1 %v11045_v12 }
 0x863   : > { %v12039_v48 = vpop.f32.mrf.mxu0 }
 0x865   : > { %v10379_v22 = vpop.f32.mrf.mxu0  ;;  %v12042_v54 = vpop.f32.mrf.mxu1 }
 0x867   : > { %v5253_v20 = vpop.f32.mrf.mxu0  ;;  %v10387_v33 = vpop.f32.mrf.mxu1 }
 0x869   : > { %v10380_v53 = vpop.f32.mrf.mxu0  ;;  %v5305_v27 = vpop.f32.mrf.mxu1 }
 0x86b   : > { %v10388_v55 = vpop.f32.mrf.mxu1  ;;  %v12044_v21 = vpop.f32.mrf.mxu0 }
 0x86d   : > { %v10395_v57 = vpop.f32.mrf.mxu0  ;;  %v12046_v58 = vpop.f32.mrf.mxu1 }
 0x86f   : > { %v5357_v59 = vpop.f32.mrf.mxu0  ;;  %v10403_v61 = vpop.f32.mrf.mxu1 }
 0x871   : > { %v10396_v62 = vpop.f32.mrf.mxu0  ;;  %v5409_v30 = vpop.f32.mrf.mxu1 }
 0x873   : > { %v10404_v63 = vpop.f32.mrf.mxu1  ;;  %v12048_v0 = vpop.f32.mrf.mxu0 }
 0x875   : > { %v10411_v1 = vpop.f32.mrf.mxu0  ;;  %v12050_v2 = vpop.f32.mrf.mxu1 }
 0x877   : > { %v5461_v3 = vpop.f32.mrf.mxu0  ;;  %v10419_v15 = vpop.f32.mrf.mxu1 }
 0x879   : > { %v10412_v56 = vpop.f32.mrf.mxu0  ;;  %v5513_v8 = vpop.f32.mrf.mxu1 }
 0x87b   : > { %v10420_v9 = vpop.f32.mrf.mxu1 }
 0x907   : > { %v5572_v10 = vpop.f32.mrf.mxu0  ;;  %v5618_v43 = vpop.f32.mrf.mxu1 }
 0x908   : > { %v5906_v31 = vsel %vm12056_vm9, %v5572_v10, -1e+30  ;;  %v5907_v5 = vsel %vm12056_vm9, %v5618_v43, -1e+30 }
 0x909   : > { %v10425_v39 = vpop.f32.mrf.mxu0  ;;  %v10431_v32 = vpop.f32.mrf.mxu1  ;;  %v5917_v6 = vsel %vm2705_vm2, %v5907_v5, -inf  ;;  %v5914_v11 = vsel %vm2705_vm2, %v5906_v31, -inf }
 0x90a   : > { %5918 = vmax.xlane.f32.xlu1 %v5917_v6  ;;  %5915 = vmax.xlane.f32.xlu0 %v5914_v11 }
 0x90b   : > { %v5575_v13 = vpop.f32.mrf.mxu0  ;;  %v5621_v40 = vpop.f32.mrf.mxu1 }
 0x90d   : > { %v10426_v16 = vpop.f32.mrf.mxu0  ;;  %v10432_v23 = vpop.f32.mrf.mxu1 }
 0x90f   : > { %v5664_v18 = vpop.f32.mrf.mxu0  ;;  %v5710_v25 = vpop.f32.mrf.mxu1 }
 0x910   : > { %v5908_v26 = vsel %vm12056_vm9, %v5664_v18, -1e+30  ;;  %v5909_v52 = vsel %vm12056_vm9, %v5710_v25, -1e+30 }
 0x911   : > { %v10437_v24 = vpop.f32.mrf.mxu0  ;;  %v10443_v29 = vpop.f32.mrf.mxu1  ;;  %v5923_v14 = vsel %vm2705_vm2, %v5909_v52, -inf  ;;  %v5920_v28 = vsel %vm2705_vm2, %v5908_v26, -inf }
 0x912   : > { %5924 = vmax.xlane.f32.xlu1 %v5923_v14  ;;  %5921 = vmax.xlane.f32.xlu0 %v5920_v28 }
 0x913   : > { %v5667_v17 = vpop.f32.mrf.mxu0  ;;  %v5713_v19 = vpop.f32.mrf.mxu1 }
 0x915   : > { %v10438_v34 = vpop.f32.mrf.mxu0  ;;  %v10444_v36 = vpop.f32.mrf.mxu1 }
 0x917   : > { %v5756_v37 = vpop.f32.mrf.mxu0  ;;  %v5802_v38 = vpop.f32.mrf.mxu1 }
 0x918   : > { %v5910_v41 = vsel %vm12056_vm9, %v5756_v37, -1e+30  ;;  %v5911_v44 = vsel %vm12056_vm9, %v5802_v38, -1e+30 }
 0x919   : > { %v10449_v45 = vpop.f32.mrf.mxu0  ;;  %v10455_v46 = vpop.f32.mrf.mxu1  ;;  %v5929_v47 = vsel %vm2705_vm2, %v5911_v44, -inf  ;;  %v5926_v22 = vsel %vm2705_vm2, %v5910_v41, -inf }
 0x91a   : > { %5930 = vmax.xlane.f32.xlu1 %v5929_v47  ;;  %5927 = vmax.xlane.f32.xlu0 %v5926_v22 }
 0x91b   : > { %v5759_v20 = vpop.f32.mrf.mxu0  ;;  %v5805_v33 = vpop.f32.mrf.mxu1 }
 0x91d   : > { %v10450_v53 = vpop.f32.mrf.mxu0  ;;  %v10456_v27 = vpop.f32.mrf.mxu1 }
 0x91f   : > { %v5848_v55 = vpop.f32.mrf.mxu0  ;;  %v5894_v57 = vpop.f32.mrf.mxu1 }
 0x920   : > { %v5912_v59 = vsel %vm12056_vm9, %v5848_v55, -1e+30  ;;  %v5913_v61 = vsel %vm12056_vm9, %v5894_v57, -1e+30  ;;  %v9239_v57 = vld [vmem:[%s12605_s1 + $0x3] ss:$0 sm:$0xff] }
 0x921   : > { %v10461_v62 = vpop.f32.mrf.mxu0  ;;  %v10467_v30 = vpop.f32.mrf.mxu1  ;;  %v5935_v63 = vsel %vm2705_vm2, %v5913_v61, -inf  ;;  %v5932_v1 = vsel %vm2705_vm2, %v5912_v59, -inf }
 0x922   : > { %5936 = vmax.xlane.f32.xlu1 %v5935_v63  ;;  %5933 = vmax.xlane.f32.xlu0 %v5932_v1  ;;  %v5303_v30 = vadd.f32 %v9239_v57, %v12042_v54 }
 0x923   : > { %v5851_v3 = vpop.f32.mrf.mxu0  ;;  %v5897_v15 = vpop.f32.mrf.mxu1 }
 0x924   : > { %v6013_v15 = vpack.c.bf16 %v5303_v30, %v5303_v30 }
 0x925   : > { %v10462_v56 = vpop.f32.mrf.mxu0  ;;  %v10468_v8 = vpop.f32.mrf.mxu1 }
 0x993   : > { %v5919_v9 = vpop.xlane.xlu1 %5918  ;;  %v5916_v60 = vpop.xlane.xlu0 %5915 }
 0x994   : > { %v5939_v7 = vsub.f32 %v5907_v5, %v5919_v9  ;;  %v5938_v42 = vsub.f32 %v5906_v31, %v5916_v60  ;;  %v9241_v9 = vld [vmem:[%s12605_s1 + $0x5] ss:$0 sm:$0xff] }
 0x995   : > { %v5407_v54 = vadd.f32 %v9241_v9, %v12046_v58 }
 0x996   : > { %v5948_v10 = vmul.f32 1.442695, %v5939_v7  ;;  %v5946_v43 = vmul.f32 1.442695, %v5938_v42  ;;  %v9240_v42 = vld [vmem:[%s12605_s1 + $0x4] ss:$0 sm:$0xff] }
 0x998   : > { %10912 = vpow2.f32 %v5948_v10 }
 0x999   : > { %10914 = vpow2.f32 %v5946_v43 }
 0x99b   : > { %v5925_v4 = vpop.xlane.xlu1 %5924  ;;  %v5922_v39 = vpop.xlane.xlu0 %5921 }
 0x99c   : > { %v5941_v32 = vsub.f32 %v5909_v52, %v5925_v4  ;;  %v5940_v6 = vsub.f32 %v5908_v26, %v5922_v39  ;;  %v6160_v39 = vsel %vm3191_vm3, %v6013_v15, 0 }
 0x99e   : > { %v5952_v11 = vmul.f32 1.442695, %v5941_v32  ;;  %v5950_v13 = vmul.f32 1.442695, %v5940_v6  ;;  %v5355_v32 = vadd.f32 %v9240_v42, %v12044_v21  ;;  %v4109_v42 = vld [vmem:[%s12609_s4 + $0x10] sm:$0xf] }
 0x9a0   : > { %10916 = vpow2.f32 %v5952_v11  ;;  %v6015_v11 = vpack.c.bf16 %v5407_v54, %v5407_v54  ;;  %v6014_v21 = vpack.c.bf16 %v5355_v32, %v5355_v32  ;;  %v6582_v32 = vsel %vm3191_vm3, %v4109_v42, 0 }
 0x9a1   : > { %10918 = vpow2.f32 %v5950_v13 }
 0x9a3   : > { %v5931_v40 = vpop.xlane.xlu1 %5930  ;;  %v5928_v16 = vpop.xlane.xlu0 %5927 }
 0x9a4   : > { %v5943_v23 = vsub.f32 %v5911_v44, %v5931_v40  ;;  %v5942_v18 = vsub.f32 %v5910_v41, %v5928_v16  ;;  %v9243_v40 = vld [vmem:[%s12605_s1 + $0x7] ss:$0 sm:$0xff] }
 0x9a5   : > { %v10913_v25 = vpop.eup %10912 }
 0x9a6   : > { %v10915_v24 = vpop.eup %10914  ;;  %v5956_v5 = vmul.f32 1.442695, %v5943_v23  ;;  %v5954_v31 = vmul.f32 1.442695, %v5942_v18  ;;  %v5965_v29 = vsel %vm2705_vm2, %v10913_v25, 0.0 }
 0x9a7   : > { %5966 = vadd.xlane.f32.xlu1 %v5965_v29  ;;  %v5962_v14 = vsel %vm2705_vm2, %v10915_v24, 0.0  ;;  %v9242_v18 = vld [vmem:[%s12605_s1 + $0x6] ss:$0 sm:$0xff]  ;;  %v5511_v29 = vadd.f32 %v9243_v40, %v12050_v2 }
 0x9a8   : > { %10920 = vpow2.f32 %v5956_v5  ;;  %5963 = vadd.xlane.f32.xlu0 %v5962_v14  ;;  %v6206_v14 = vsel %vm3191_vm3, %v6014_v21, 0  ;;  %v4112_v21 = vld [vmem:[%s12609_s4 + $0x1c] sm:$0xf] }
 0x9a9   : > { %10922 = vpow2.f32 %v5954_v31  ;;  %v6252_v31 = vsel %vm3191_vm3, %v6015_v11, 0 }
 0x9ab   : > { %v5937_v26 = vpop.xlane.xlu1 %5936  ;;  %v5934_v52 = vpop.xlane.xlu0 %5933 }
 0x9ac   : > { %v5945_v28 = vsub.f32 %v5913_v61, %v5937_v26  ;;  %v5944_v17 = vsub.f32 %v5912_v59, %v5934_v52  ;;  %v9238_v61 = vld [vmem:[%s12605_s1 + $0x2] ss:$0 sm:$0xff]  ;;  %v5459_v26 = vadd.f32 %v9242_v18, %v12048_v0  ;;  %s12613_s1 = sld [smem:[#allocation23_spill]] }
 0x9ad   : > { %v10917_v19 = vpop.eup %10916  ;;  %v5251_v63 = vadd.f32 %v9238_v61, %v12039_v48 }
 0x9ae   : > { %v12086_v34 = vpop.eup %10918  ;;  %v5960_v36 = vmul.f32 1.442695, %v5945_v28  ;;  %v5958_v37 = vmul.f32 1.442695, %v5944_v17  ;;  %v5971_v38 = vsel %vm2705_vm2, %v10917_v19, 0.0  ;;  %v6017_v28 = vpack.c.bf16 %v5511_v29, %v5511_v29 }
 0x9af   : > { %5972 = vadd.xlane.f32.xlu1 %v5971_v38  ;;  %v5968_v41 = vsel %vm2705_vm2, %v12086_v34, 0.0  ;;  %v6012_v8 = vpack.c.bf16 %v5251_v63, %v5251_v63  ;;  %v6016_v0 = vpack.c.bf16 %v5459_v26, %v5459_v26 }
 0x9b0   : > { %10924 = vpow2.f32 %v5960_v36  ;;  %5969 = vadd.xlane.f32.xlu0 %v5968_v41 }
 0x9b1   : > { %10926 = vpow2.f32 %v5958_v37  ;;  %v6114_v48 = vsel %vm3191_vm3, %v6012_v8, 0  ;;  %v6344_v37 = vsel %vm3191_vm3, %v6017_v28, 0  ;;  %v6298_v38 = vsel %vm3191_vm3, %v6016_v0, 0 }
 0x9b5   : > { %v12091_v44 = vpop.eup %10920 }
 0x9b6   : > { %v12093_v45 = vpop.eup %10922  ;;  %v5977_v46 = vsel %vm2705_vm2, %v12091_v44, 0.0 }
 0x9b7   : > { %5978 = vadd.xlane.f32.xlu1 %v5977_v46  ;;  %v5974_v47 = vsel %vm2705_vm2, %v12093_v45, 0.0 }
 0x9b8   : > { %5975 = vadd.xlane.f32.xlu0 %v5974_v47  ;;  %v4105_v47 = vld [vmem:[%s12609_s4] sm:$0xf] }
 0x9b9   : > { %v6398_v57 = vsel %vm3191_vm3, %v4105_v47, 0 }
 0x9bd   : > { %v12099_v22 = vpop.eup %10924 }
 0x9be   : > { %v12101_v20 = vpop.eup %10926  ;;  %v5983_v33 = vsel %vm2705_vm2, %v12099_v22, 0.0 }
 0x9bf   : > { %5984 = vadd.xlane.f32.xlu1 %v5983_v33  ;;  %v5980_v53 = vsel %vm2705_vm2, %v12101_v20, 0.0 }
 0x9c0   : > { %5981 = vadd.xlane.f32.xlu0 %v5980_v53 }
 0xa30   : > { %v5967_v27 = vpop.xlane.xlu1 %5966 }
 0xa31   : > { %10928 = vrcp.f32 %v5967_v27  ;;  %v5964_v55 = vpop.xlane.xlu0 %5963 }
 0xa32   : > { %10930 = vrcp.f32 %v5964_v55 }
 0xa38   : > { %v5973_v59 = vpop.xlane.xlu1 %5972 }
 0xa39   : > { %10932 = vrcp.f32 %v5973_v59  ;;  %v5970_v62 = vpop.xlane.xlu0 %5969 }
 0xa3a   : > { %10934 = vrcp.f32 %v5970_v62 }
 0xa3e   : > { %v10929_v1 = vpop.eup %10928 }
 0xa3f   : > { %v10931_v3 = vpop.eup %10930  ;;  %v5995_v56 = vmul.f32 %v10929_v1, %v10913_v25 }
 0xa40   : > { %v5994_v60 = vmul.f32 %v10931_v3, %v10915_v24  ;;  %v5979_v7 = vpop.xlane.xlu1 %5978 }
 0xa41   : > { %v6003_v10 = vpack.c.bf16 %v5995_v56, %v5995_v56  ;;  %10936 = vrcp.f32 %v5979_v7  ;;  %v5976_v43 = vpop.xlane.xlu0 %5975 }
 0xa42   : > { %v6002_v4 = vpack.c.bf16 %v5994_v60, %v5994_v60  ;;  %10938 = vrcp.f32 %v5976_v43  ;;  %v4110_v60 = vld [vmem:[%s12609_s4 + $0x14] sm:$0xf] }
 0xa43   : > { %10478 = vmatmul.mubr.msk.bf16.vlgmr.msra.gmra.mxu1 %vm2705_vm2, %v6003_v10 }
 0xa44   : > { %10472 = vmatmul.mubr.msk.bf16.vlgmr.msra.gmra.mxu0 %vm2705_vm2, %v6002_v4  ;;  %10488 = vmatpush3.bf16.msra.mxu1 %v6160_v39  ;;  %v6628_v39 = vsel %vm3191_vm3, %v4110_v60, 0 }
 0xa45   : > { %10482 = vmatpush3.bf16.msra.mxu0 %v6114_v48  ;;  %10483 = vmatprep.mubr.msk.bf16.mxu0 %vm11046_vm1, %v11045_v12 }
 0xa46   : > { %v10933_v6 = vpop.eup %10932  ;;  %10489 = vmatprep.mubr.msk.bf16.mxu1 %vm11046_vm1, %v11045_v12  ;;  %10493 = vmatprep.subr.bf16.mxu0 %v11045_v12 }
 0xa47   : > { %v10935_v58 = vpop.eup %10934  ;;  %v5997_v13 = vmul.f32 %v10933_v6, %v10917_v19  ;;  %10499 = vmatprep.subr.bf16.mxu1 %v11045_v12 }
 0xa48   : > { %v5996_v16 = vmul.f32 %v10935_v58, %v12086_v34  ;;  %v5985_v23 = vpop.xlane.xlu1 %5984 }
 0xa49   : > { %v6005_v25 = vpack.c.bf16 %v5997_v13, %v5997_v13  ;;  %10940 = vrcp.f32 %v5985_v23  ;;  %v5982_v24 = vpop.xlane.xlu0 %5981 }
 0xa4a   : > { %v6004_v5 = vpack.c.bf16 %v5996_v16, %v5996_v16  ;;  %10942 = vrcp.f32 %v5982_v24  ;;  %v4111_v16 = vld [vmem:[%s12609_s4 + $0x18] sm:$0xf]  ;;  %v6720_v24 = vsel %vm3191_vm3, %v4112_v21, 0 }
 0xa4b   : > { %10490 = vmatmul.mubr.msk.bf16.vlgmr.msra.gmra.mxu1 %vm2705_vm2, %v6005_v25  ;;  %v6674_v29 = vsel %vm3191_vm3, %v4111_v16, 0 }
 0xa4c   : > { %10484 = vmatmul.mubr.msk.bf16.vlgmr.msra.gmra.mxu0 %vm2705_vm2, %v6004_v5  ;;  %10500 = vmatpush3.bf16.msra.mxu1 %v6252_v31 }
 0xa4d   : > { %10494 = vmatpush3.bf16.msra.mxu0 %v6206_v14  ;;  %10495 = vmatprep.mubr.msk.bf16.mxu0 %vm11046_vm1, %v11045_v12 }
 0xa4e   : > { %v10937_v52 = vpop.eup %10936  ;;  %10501 = vmatprep.mubr.msk.bf16.mxu1 %vm11046_vm1, %v11045_v12  ;;  %10505 = vmatprep.subr.bf16.mxu0 %v11045_v12 }
 0xa4f   : > { %v10939_v2 = vpop.eup %10938  ;;  %v5999_v17 = vmul.f32 %v10937_v52, %v12091_v44  ;;  %10511 = vmatprep.subr.bf16.mxu1 %v11045_v12  ;;  %v4106_v44 = vld [vmem:[%s12609_s4 + $0x4] sm:$0xf] }
 0xa50   : > { %v5998_v19 = vmul.f32 %v10939_v2, %v12093_v45  ;;  %v6444_v27 = vsel %vm3191_vm3, %v4106_v44, 0 }
 0xa51   : > { %v6007_v34 = vpack.c.bf16 %v5999_v17, %v5999_v17 }
 0xa52   : > { %v6006_v36 = vpack.c.bf16 %v5998_v19, %v5998_v19 }
 0xa53   : > { %10502 = vmatmul.mubr.msk.bf16.vlgmr.msra.gmra.mxu1 %vm2705_vm2, %v6007_v34 }
 0xa54   : > { %10496 = vmatmul.mubr.msk.bf16.vlgmr.msra.gmra.mxu0 %vm2705_vm2, %v6006_v36  ;;  %10512 = vmatpush3.bf16.msra.mxu1 %v6344_v37 }
 0xa55   : > { %10506 = vmatpush3.bf16.msra.mxu0 %v6298_v38  ;;  %10507 = vmatprep.mubr.msk.bf16.mxu0 %vm11046_vm1, %v11045_v12 }
 0xa56   : > { %v10941_v41 = vpop.eup %10940  ;;  %10513 = vmatprep.mubr.msk.bf16.mxu1 %vm11046_vm1, %v11045_v12  ;;  %10517 = vmatprep.subr.bf16.mxu0 %v11045_v12 }
 0xa57   : > { %v10943_v45 = vpop.eup %10942  ;;  %v6001_v46 = vmul.f32 %v10941_v41, %v12099_v22  ;;  %10523 = vmatprep.subr.bf16.mxu1 %v11045_v12  ;;  %v4108_v22 = vld [vmem:[%s12609_s4 + $0xc] sm:$0xf] }
 0xa58   : > { %v6000_v33 = vmul.f32 %v10943_v45, %v12101_v20  ;;  %v4107_v20 = vld [vmem:[%s12609_s4 + $0x8] sm:$0xf]  ;;  %v6536_v30 = vsel %vm3191_vm3, %v4108_v22, 0 }
 0xa59   : > { %v6009_v53 = vpack.c.bf16 %v6001_v46, %v6001_v46  ;;  %v6490_v3 = vsel %vm3191_vm3, %v4107_v20, 0 }
 0xa5a   : > { %v6008_v55 = vpack.c.bf16 %v6000_v33, %v6000_v33 }
 0xa5b   : > { %10514 = vmatmul.mubr.msk.bf16.vlgmr.msra.gmra.mxu1 %vm2705_vm2, %v6009_v53 }
 0xa5c   : > { %10508 = vmatmul.mubr.msk.bf16.vlgmr.msra.gmra.mxu0 %vm2705_vm2, %v6008_v55  ;;  %10524 = vmatpush3.bf16.msra.mxu1 %v6444_v27 }
 0xa5d   : > { %10518 = vmatpush3.bf16.msra.mxu0 %v6398_v57  ;;  %10519 = vmatprep.mubr.msk.bf16.mxu0 %vm11046_vm1, %v11045_v12 }
 0xa5e   : > { %10525 = vmatprep.mubr.msk.bf16.mxu1 %vm11046_vm1, %v11045_v12  ;;  %10529 = vmatprep.subr.bf16.mxu0 %v11045_v12 }
 0xa5f   : > { %10535 = vmatprep.subr.bf16.mxu1 %v11045_v12 }
 0xb03   : > { %v6104_v59 = vpop.f32.mrf.mxu1 }
 0xb04   : > { %v6058_v61 = vpop.f32.mrf.mxu0  ;;  %v6387_v62 = vpack.c.bf16 %v6104_v59, %v6104_v59 }
 0xb05   : > { %v6386_v63 = vpack.c.bf16 %v6058_v61, %v6058_v61  ;;  %v10479_v1 = vpop.f32.mrf.mxu1 }
 0xb06   : > { %v10473_v15 = vpop.f32.mrf.mxu0  ;;  %10526 = vmatmul.mubr.msk.bf16.vlgmr.msra.gmra.mxu1 %vm2705_vm2, %v6387_v62 }
 0xb07   : > { %10520 = vmatmul.mubr.msk.bf16.vlgmr.msra.gmra.mxu0 %vm2705_vm2, %v6386_v63  ;;  %v6107_v56 = vpop.f32.mrf.mxu1  ;;  %10536 = vmatpush3.bf16.msra.mxu1 %v6536_v30 }
 0xb08   : > { %v6061_v8 = vpop.f32.mrf.mxu0  ;;  %10530 = vmatpush3.bf16.msra.mxu0 %v6490_v3  ;;  %10531 = vmatprep.mubr.msk.bf16.mxu0 %vm11046_vm1, %v11045_v12 }
 0xb09   : > { %v10480_v9 = vpop.f32.mrf.mxu1  ;;  %10537 = vmatprep.mubr.msk.bf16.mxu1 %vm11046_vm1, %v11045_v12  ;;  %10541 = vmatprep.subr.bf16.mxu0 %v11045_v12 }
 0xb0a   : > { %v10474_v7 = vpop.f32.mrf.mxu0  ;;  %10547 = vmatprep.subr.bf16.mxu1 %v11045_v12 }
 0xb0b   : > { %v6196_v10 = vpop.f32.mrf.mxu1 }
 0xb0c   : > { %v6150_v43 = vpop.f32.mrf.mxu0  ;;  %v6389_v4 = vpack.c.bf16 %v6196_v10, %v6196_v10 }
 0xb0d   : > { %v6388_v54 = vpack.c.bf16 %v6150_v43, %v6150_v43  ;;  %v10491_v48 = vpop.f32.mrf.mxu1 }
 0xb0e   : > { %v10485_v6 = vpop.f32.mrf.mxu0  ;;  %10538 = vmatmul.mubr.msk.bf16.vlgmr.msra.gmra.mxu1 %vm2705_vm2, %v6389_v4 }
 0xb0f   : > { %10532 = vmatmul.mubr.msk.bf16.vlgmr.msra.gmra.mxu0 %vm2705_vm2, %v6388_v54  ;;  %v6199_v58 = vpop.f32.mrf.mxu1  ;;  %10548 = vmatpush3.bf16.msra.mxu1 %v6628_v39 }
 0xb10   : > { %v6153_v11 = vpop.f32.mrf.mxu0  ;;  %10542 = vmatpush3.bf16.msra.mxu0 %v6582_v32  ;;  %10543 = vmatprep.mubr.msk.bf16.mxu0 %vm11046_vm1, %v11045_v12 }
 0xb11   : > { %v10492_v13 = vpop.f32.mrf.mxu1  ;;  %10549 = vmatprep.mubr.msk.bf16.mxu1 %vm11046_vm1, %v11045_v12  ;;  %10553 = vmatprep.subr.bf16.mxu0 %v11045_v12 }
 0xb12   : > { %v10486_v40 = vpop.f32.mrf.mxu0  ;;  %10559 = vmatprep.subr.bf16.mxu1 %v11045_v12 }
 0xb13   : > { %v6288_v23 = vpop.f32.mrf.mxu1 }
 0xb14   : > { %v6242_v18 = vpop.f32.mrf.mxu0  ;;  %v6391_v25 = vpack.c.bf16 %v6288_v23, %v6288_v23 }
 0xb15   : > { %v6390_v5 = vpack.c.bf16 %v6242_v18, %v6242_v18  ;;  %v10503_v31 = vpop.f32.mrf.mxu1 }
 0xb16   : > { %v10497_v14 = vpop.f32.mrf.mxu0  ;;  %10550 = vmatmul.mubr.msk.bf16.vlgmr.msra.gmra.mxu1 %vm2705_vm2, %v6391_v25 }
 0xb17   : > { %10544 = vmatmul.mubr.msk.bf16.vlgmr.msra.gmra.mxu0 %vm2705_vm2, %v6390_v5  ;;  %v6291_v26 = vpop.f32.mrf.mxu1  ;;  %10560 = vmatpush3.bf16.msra.mxu1 %v6720_v24  ;;  %v9292_v5 = vld [vmem:[%s12610_s18] ss:$0 sm:$0xff]  ;;  %s12612_s18 = sld [smem:[#allocation22_spill]] }
 0xb18   : > { %v6245_v52 = vpop.f32.mrf.mxu0  ;;  %10554 = vmatpush3.bf16.msra.mxu0 %v6674_v29  ;;  %10555 = vmatprep.mubr.msk.bf16.mxu0 %vm11046_vm1, %v11045_v12 }
 0xb19   : > { %v10504_v2 = vpop.f32.mrf.mxu1  ;;  %10561 = vmatprep.mubr.msk.bf16.mxu1 %vm11046_vm1, %v11045_v12 }
 0xb1a   : > { %v10498_v28 = vpop.f32.mrf.mxu0 }
 0xb1b   : > { %v6380_v17 = vpop.f32.mrf.mxu1 }
 0xb1c   : > { %v6334_v0 = vpop.f32.mrf.mxu0  ;;  %v6393_v19 = vpack.c.bf16 %v6380_v17, %v6380_v17 }
 0xb1d   : > { %v6392_v34 = vpack.c.bf16 %v6334_v0, %v6334_v0  ;;  %v10515_v36 = vpop.f32.mrf.mxu1 }
 0xb1e   : > { %v10509_v37 = vpop.f32.mrf.mxu0  ;;  %10562 = vmatmul.mubr.msk.bf16.vlgmr.msra.gmra.mxu1 %vm2705_vm2, %v6393_v19 }
 0xb1f   : > { %10556 = vmatmul.mubr.msk.bf16.vlgmr.msra.gmra.mxu0 %vm2705_vm2, %v6392_v34  ;;  %v6383_v38 = vpop.f32.mrf.mxu1  ;;  %7424 = vmatprep.mubr.bf16.mxu1 %v11047_v51 }
 0xb20   : > { %v6337_v41 = vpop.f32.mrf.mxu0  ;;  %7383 = vmatprep.mubr.bf16.mxu0 %v11047_v51 }
 0xb21   : > { %v10516_v44 = vpop.f32.mrf.mxu1  ;;  %v6828_v41 = vld [vmem:[%s12611_s3 + $0x80] sm:$0xff] }
 0xb22   : > { %v10510_v45 = vpop.f32.mrf.mxu0  ;;  %v6836_v44 = vld [vmem:[%s12611_s3 + $0xc0] sm:$0xff] }
 0xb23   : > { %v6829_v45 = vld [vmem:[%s12611_s3 + $0x88] sm:$0xff] }
 0xbc6   : > { %v6480_v46 = vpop.f32.mrf.mxu1 }
 0xbc7   : > { %v6434_v47 = vpop.f32.mrf.mxu0  ;;  %v6763_v62 = vsel %vm1118_vm0, %v6480_v46, 0.0  ;;  %v9312_v46 = vcombine.high %v6828_v41, %v6836_v44 }
 0xbc8   : > { %v10527_v33 = vpop.f32.mrf.mxu1  ;;  %v6762_v61 = vsel %vm1118_vm0, %v6434_v47, 0.0  ;;  %v6837_v47 = vld [vmem:[%s12611_s3 + $0xc8] sm:$0xff] }
 0xbc9   : > { %v10521_v53 = vpop.f32.mrf.mxu0  ;;  %v6764_v15 = vadd.f32 %v6763_v62, %v6762_v61  ;;  %v9313_v33 = vcombine.low %v6829_v45, %v6837_v47  ;;  %7363 = vmatprep.subr.bf16.mxu0 %v9312_v46 }
 0xbca   : > { %v6483_v27 = vpop.f32.mrf.mxu1  ;;  %v9314_v53 = vcombine.high %v6829_v45, %v6837_v47  ;;  %v6818_v47 = vld [vmem:[%s12611_s3 + $0x30] sm:$0xff] }
 0xbcb   : > { %v6437_v55 = vpop.f32.mrf.mxu0  ;;  %v6812_v27 = vld [vmem:[%s12611_s3] sm:$0xff] }
 0xbcc   : > { %v10528_v57 = vpop.f32.mrf.mxu1  ;;  %7404 = vmatprep.subr.bf16.mxu1 %v9314_v53  ;;  %v6820_v55 = vld [vmem:[%s12611_s3 + $0x40] sm:$0xff]  ;;  %v6827_v53 = vld [vmem:[%s12611_s3 + $0x78] sm:$0xff] }
 0xbcd   : > { %v10522_v22 = vpop.f32.mrf.mxu0  ;;  %v6813_v57 = vld [vmem:[%s12611_s3 + $0x8] sm:$0xff]  ;;  %7405 = vmatpush1.bf16.msra.mxu1 %v9313_v33  ;;  %v6819_v33 = vld [vmem:[%s12611_s3 + $0x38] sm:$0xff] }
 0xbce   : > { %v6572_v20 = vpop.f32.mrf.mxu1  ;;  %v9296_v22 = vcombine.high %v6812_v27, %v6820_v55 }
 0xbcf   : > { %v6526_v59 = vpop.f32.mrf.mxu0  ;;  %v6767_v10 = vsel %vm1118_vm0, %v6572_v20, 0.0  ;;  %v6821_v20 = vld [vmem:[%s12611_s3 + $0x48] sm:$0xff] }
 0xbd0   : > { %v10539_v30 = vpop.f32.mrf.mxu1  ;;  %v6765_v1 = vsel %vm1118_vm0, %v6526_v59, 0.0  ;;  %v9295_v59 = vcombine.low %v6812_v27, %v6820_v55  ;;  %v9297_v61 = vcombine.low %v6813_v57, %v6821_v20  ;;  %v9298_v62 = vcombine.high %v6813_v57, %v6821_v20 }
 0xbd1   : > { %v10533_v63 = vpop.f32.mrf.mxu0  ;;  %v6766_v9 = vadd.f32 %v6765_v1, %v6764_v15  ;;  %v6830_v30 = vld [vmem:[%s12611_s3 + $0x90] sm:$0xff]  ;;  %v6831_v1 = vld [vmem:[%s12611_s3 + $0x98] sm:$0xff] }
 0xbd2   : > { %v6575_v3 = vpop.f32.mrf.mxu1  ;;  %7406 = vmatprep.subr.bf16.mxu1 %v9298_v62  ;;  %v6838_v63 = vld [vmem:[%s12611_s3 + $0xd0] sm:$0xff]  ;;  %v6839_v15 = vld [vmem:[%s12611_s3 + $0xd8] sm:$0xff] }
 0xbd3   : > { %v6529_v56 = vpop.f32.mrf.mxu0  ;;  %v6768_v39 = vadd.f32 %v6767_v10, %v6766_v9  ;;  %7407 = vmatpush1.bf16.msra.mxu1 %v9297_v61  ;;  %v9316_v3 = vcombine.high %v6830_v30, %v6838_v63  ;;  %v9318_v9 = vcombine.high %v6831_v1, %v6839_v15 }
 0xbd4   : > { %v10540_v8 = vpop.f32.mrf.mxu1  ;;  %v9315_v56 = vcombine.low %v6830_v30, %v6838_v63 }
 0xbd5   : > { %v10534_v60 = vpop.f32.mrf.mxu0  ;;  %v9317_v8 = vcombine.low %v6831_v1, %v6839_v15  ;;  %7486 = vmatprep.subr.bf16.mxu1 %v9318_v9 }
 0xbd6   : > { %v6664_v7 = vpop.f32.mrf.mxu1 }
 0xbd7   : > { %v6618_v42 = vpop.f32.mrf.mxu0  ;;  %v6771_v13 = vsel %vm1118_vm0, %v6664_v7, 0.0 }
 0xbd8   : > { %v6769_v43 = vsel %vm1118_vm0, %v6618_v42, 0.0  ;;  %v10551_v4 = vpop.f32.mrf.mxu1 }
 0xbd9   : > { %v10545_v54 = vpop.f32.mrf.mxu0  ;;  %v6770_v32 = vadd.f32 %v6769_v43, %v6768_v39  ;;  %v9293_v43 = vld [vmem:[%s12612_s18] ss:$0 sm:$0xff]  ;;  %s12615_s18 = sld [smem:[#allocation25_spill]] }
 0xbda   : > { %v6667_v48 = vpop.f32.mrf.mxu1  ;;  %v9294_v39 = vld [vmem:[%s12613_s1] ss:$0 sm:$0xff]  ;;  %s12614_s1 = sld [smem:[#allocation26_spill]] }
 0xbdb   : > { %v6621_v6 = vpop.f32.mrf.mxu0  ;;  %v6772_v40 = vadd.f32 %v6771_v13, %v6770_v32  ;;  %v6814_v48 = vld [vmem:[%s12611_s3 + $0x10] sm:$0xff] }
 0xbdc   : > { %v10552_v58 = vpop.f32.mrf.mxu1  ;;  %v6822_v32 = vld [vmem:[%s12611_s3 + $0x50] sm:$0xff]  ;;  %v6815_v6 = vld [vmem:[%s12611_s3 + $0x18] sm:$0xff] }
 0xbdd   : > { %v10546_v11 = vpop.f32.mrf.mxu0  ;;  %v6823_v58 = vld [vmem:[%s12611_s3 + $0x58] sm:$0xff] }
 0xbde   : > { %v6756_v21 = vpop.f32.mrf.mxu1 }
 0xbdf   : > { %v6710_v16 = vpop.f32.mrf.mxu0  ;;  %v6775_v31 = vsel %vm1118_vm0, %v6756_v21, 0.0  ;;  %v9300_v21 = vcombine.high %v6814_v48, %v6822_v32 }
 0xbe0   : > { %v6773_v23 = vsel %vm1118_vm0, %v6710_v16, 0.0  ;;  %v10563_v18 = vpop.f32.mrf.mxu1  ;;  %v6832_v16 = vld [vmem:[%s12611_s3 + $0xa0] sm:$0xff]  ;;  %v10746_v61 = vld [vmem:[%s12614_s1 + $0x78] sm:$0xff]   ;;  %v10750_v1 = vld [vmem:[%s12614_s1 + $0x70] sm:$0xff]  }
 0xbe1   : > { %v6774_v25 = vadd.f32 %v6773_v23, %v6772_v40  ;;  %v10557_v24 = vpop.f32.mrf.mxu0  ;;  %v9302_v40 = vcombine.high %v6815_v6, %v6823_v58  ;;  %v6840_v23 = vld [vmem:[%s12611_s3 + $0xe0] sm:$0xff]  ;;  %v6833_v18 = vld [vmem:[%s12611_s3 + $0xa8] sm:$0xff]  ;;  %v10747_v62 = vld [vmem:[%s12614_s1 + $0xf8] sm:$0xff]  }
 0xbe2   : > { %v6759_v29 = vpop.f32.mrf.mxu1  ;;  %v9299_v24 = vcombine.low %v6814_v48, %v6822_v32  ;;  %v10748_v30 = vld [vmem:[%s12614_s1 + $0x38] sm:$0xff]   ;;  %v10753_v15 = vld [vmem:[%s12614_s1 + $0xb0] sm:$0xff]   ;;  %v10756_v9 = vld [vmem:[%s12614_s1 + $0x28] sm:$0xff]  }
 0xbe3   : > { %v6776_v14 = vadd.f32 %v6775_v31, %v6774_v25  ;;  %v6713_v26 = vpop.f32.mrf.mxu0  ;;  %v6841_v25 = vld [vmem:[%s12611_s3 + $0xe8] sm:$0xff]  ;;  %v9320_v31 = vcombine.high %v6832_v16, %v6840_v23  ;;  %v10749_v63 = vld [vmem:[%s12614_s1 + $0xb8] sm:$0xff]   ;;  %v10766_v32 = vld [vmem:[%s12614_s1 + $0x50] sm:$0xff]  }
 0xbe4   : > { %v10564_v52 = vpop.f32.mrf.mxu1  ;;  %v9322_v29 = vcombine.high %v6833_v18, %v6841_v25  ;;  %v6824_v26 = vld [vmem:[%s12611_s3 + $0x60] sm:$0xff]  ;;  %v10765_v48 = vld [vmem:[%s12614_s1 + $0x98] sm:$0xff]  }
 0xbe5   : > { %v6783_v2 = vadd.f32 %v9292_v5, %v6776_v14  ;;  %v10558_v28 = vpop.f32.mrf.mxu0  ;;  %v9301_v5 = vcombine.low %v6815_v6, %v6823_v58  ;;  %v6816_v14 = vld [vmem:[%s12611_s3 + $0x20] sm:$0xff]  ;;  %v6817_v52 = vld [vmem:[%s12611_s3 + $0x28] sm:$0xff]  ;;  %v10767_v6 = vld [vmem:[%s12614_s1 + $0xd0] sm:$0xff]  }
 0xbe6   : > { %v9319_v28 = vcombine.low %v6832_v16, %v6840_v23  ;;  %v10768_v58 = vld [vmem:[%s12614_s1 + $0x10] sm:$0xff]   ;;  %v10772_v16 = vld [vmem:[%s12614_s1 + $0x8] sm:$0xff]  }
 0xbe7   : > { %v6784_v17 = vadd.f32 %v6783_v2, %v11775_v35  ;;  %v9311_v35 = vcombine.low %v6828_v41, %v6836_v44  ;;  %v6825_v2 = vld [vmem:[%s12611_s3 + $0x68] sm:$0xff]  ;;  %v9303_v41 = vcombine.low %v6816_v14, %v6824_v26 }
 0xbe8   : > { %v9305_v44 = vcombine.low %v6817_v52, %v6825_v2  ;;  %v10773_v23 = vld [vmem:[%s12614_s1 + $0x88] sm:$0xff]  }
 0xbe9   : > { %v6785_v0 = vsel %vm1118_vm0, %v6784_v17, 0.0  ;;  %7364 = vmatpush1.bf16.msra.mxu0 %v9311_v35  ;;  %v6826_v35 = vld [vmem:[%s12611_s3 + $0x70] sm:$0xff] }
 0xbea   : > { %6786 = vadd.xlane.f32.xlu0 %v6785_v0  ;;  %7365 = vmatprep.subr.bf16.mxu0 %v9296_v22  ;;  %v9304_v0 = vcombine.high %v6816_v14, %v6824_v26  ;;  %v9308_v57 = vcombine.high %v6818_v47, %v6826_v35  ;;  %v9310_v22 = vcombine.high %v6819_v33, %v6827_v53  ;;  %v7134_v14 = vsub.s32 6, %v11593_v49  ;;  %v12314_v26 = vld [vmem:[%s12615_s18 + $0x8] sm:$0xff] }
 0xbeb   : > { %v9307_v20 = vcombine.low %v6818_v47, %v6826_v35 }
 0xbed   : > { %7366 = vmatpush1.bf16.msra.mxu0 %v9295_v59  ;;  %v9309_v59 = vcombine.low %v6819_v33, %v6827_v53  ;;  %v7130_v53 = vsub.s32 5, %v11593_v49 }
 0xbee   : > { %7445 = vmatprep.subr.bf16.mxu0 %v9316_v3  ;;  %v10751_v3 = vld [vmem:[%s12614_s1 + $0xf0] sm:$0xff]  }
 0xc73   : > { %v6787_v19 = vpop.xlane.xlu0 %6786 }
 0xc74   : > { %v6788_v34 = vmul.f32 0.03125, %v6787_v19  ;;  %v9306_v19 = vcombine.high %v6817_v52, %v6825_v2  ;;  %v12319_v52 = vrot.slane %v12314_v26, %v7134_v14  ;;  %v7118_v2 = vsub.s32 2, %v11593_v49 }
 0xc76   : > { %v6789_v36 = vsub.f32 %v6784_v17, %v6788_v34  ;;  %v9321_v17 = vcombine.low %v6833_v18, %v6841_v25  ;;  %v6834_v34 = vld [vmem:[%s12611_s3 + $0xb0] sm:$0xff]  ;;  %v10774_v18 = vld [vmem:[%s12614_s1 + $0x40] sm:$0xff]  }
 0xc77   : > { %v10775_v25 = vld [vmem:[%s12614_s1 + $0xc0] sm:$0xff]  }
 0xc78   : > { %v6790_v37 = vmul.f32 %v6789_v36, %v6789_v36 }
 0xc7a   : > { %v6791_v38 = vsel %vm1118_vm0, %v6790_v37, 0.0  ;;  %v6835_v37 = vld [vmem:[%s12611_s3 + $0xb8] sm:$0xff] }
 0xc7b   : > { %6792 = vadd.xlane.f32.xlu1 %v6791_v38  ;;  %v6843_v38 = vld [vmem:[%s12611_s3 + $0xf8] sm:$0xff] }
 0xc7c   : > { %v9326_v46 = vcombine.high %v6835_v37, %v6843_v38  ;;  %v9325_v55 = vcombine.low %v6835_v37, %v6843_v38 }
 0xd04   : > { %v6793_v60 = vpop.xlane.xlu1 %6792 }
 0xd05   : > { %v6794_v7 = vmul.f32 0.03125, %v6793_v60  ;;  %v10757_v60 = vld [vmem:[%s12614_s1 + $0xa8] sm:$0xff]  }
 0xd07   : > { %v6795_v42 = vadd.f32 1e-05, %v6794_v7  ;;  %v10758_v7 = vld [vmem:[%s12614_s1 + $0x60] sm:$0xff]  }
 0xd09   : > { %10944 = vrsqrt.f32 %v6795_v42  ;;  %v10759_v42 = vld [vmem:[%s12614_s1 + $0xe0] sm:$0xff]  }
 0xd16   : > { %v10945_v10 = vpop.eup %10944 }
 0xd17   : > { %v6797_v4 = vmul.f32 %v10945_v10, %v6789_v36  ;;  %v6842_v36 = vld [vmem:[%s12611_s3 + $0xf0] sm:$0xff]  ;;  %v10760_v10 = vld [vmem:[%s12614_s1 + $0x20] sm:$0xff]   ;;  %s12616_s3 = sld [smem:[#allocation27_spill]] }
 0xd18   : > { %v9324_v45 = vcombine.high %v6834_v34, %v6842_v36  ;;  %v9323_v27 = vcombine.low %v6834_v34, %v6842_v36 }
 0xd19   : > { %v6804_v54 = vmul.f32 %v9293_v43, %v6797_v4  ;;  %v10761_v43 = vld [vmem:[%s12614_s1 + $0xa0] sm:$0xff]   ;;  %v10762_v4 = vld [vmem:[%s12614_s1 + $0x58] sm:$0xff]  }
 0xd1b   : > { %v12234_v11 = vadd.f32 %v9294_v39, %v6804_v54  ;;  %v10763_v39 = vld [vmem:[%s12614_s1 + $0xd8] sm:$0xff]  }
 0xd1c   : > { %v10764_v54 = vld [vmem:[%s12614_s1 + $0x18] sm:$0xff]  }
 0xd1d   : > { %v12238_v13 = vpack.c.bf16 %v12234_v11, %v12234_v11 }
 0xd1f   : > { %9327 = vmatmul.mubr.msk.bf16.vlgmr.msra.gmra.mxu0 %vm1118_vm0, %v12238_v13  ;;  %9328 = vmatmul.mubr.msk.bf16.vlgmr.msra.gmra.mxu1 %vm1118_vm0, %v12238_v13 }
 0xd20   : > { %7446 = vmatpush1.bf16.msra.mxu0 %v9315_v56  ;;  %7487 = vmatpush1.bf16.msra.mxu1 %v9317_v8  ;;  %v10754_v56 = vld [vmem:[%s12614_s1 + $0x68] sm:$0xff]  }
 0xd21   : > { %7447 = vmatprep.subr.bf16.mxu0 %v9300_v21  ;;  %7488 = vmatprep.subr.bf16.mxu1 %v9302_v40  ;;  %v10755_v8 = vld [vmem:[%s12614_s1 + $0xe8] sm:$0xff]  }
 0xd22   : > { %7465 = vmatprep.mubr.bf16.mxu0 %v11047_v51  ;;  %7506 = vmatprep.mubr.bf16.mxu1 %v11047_v51  ;;  %v10770_v21 = vld [vmem:[%s12614_s1 + $0x48] sm:$0xff]  }
 0xd23   : > { %v10771_v40 = vld [vmem:[%s12614_s1 + $0xc8] sm:$0xff]  }
 0xd24   : > { %7448 = vmatpush1.bf16.msra.mxu0 %v9299_v24  ;;  %7489 = vmatpush1.bf16.msra.mxu1 %v9301_v5  ;;  %v10776_v24 = vld [vmem:[%s12614_s1] sm:$0xff]  }
 0xd25   : > { %7527 = vmatprep.subr.bf16.mxu0 %v9320_v31  ;;  %7568 = vmatprep.subr.bf16.mxu1 %v9322_v29  ;;  %v10777_v5 = vld [vmem:[%s12614_s1 + $0x80] sm:$0xff]   ;;  %v10778_v31 = vld [vmem:[%s12614_s1 + $0x178] sm:$0xff]  }
 0xd26   : > { %v10779_v29 = vld [vmem:[%s12614_s1 + $0x1f8] sm:$0xff]  }
 0xd27   : > { %9329 = vmatmul.mubr.msk.bf16.vlgmr.msra.gmra.mxu0 %vm1118_vm0, %v12238_v13  ;;  %9330 = vmatmul.mubr.msk.bf16.vlgmr.msra.gmra.mxu1 %vm1118_vm0, %v12238_v13 }
 0xd28   : > { %7528 = vmatpush1.bf16.msra.mxu0 %v9319_v28  ;;  %7569 = vmatpush1.bf16.msra.mxu1 %v9321_v17  ;;  %v12323_v28 = vld [vmem:[%s12615_s18] sm:$0xff]  ;;  %v7114_v17 = vsub.s32 1, %v11593_v49 }
 0xd29   : > { %7529 = vmatprep.subr.bf16.mxu0 %v9304_v0  ;;  %7570 = vmatprep.subr.bf16.mxu1 %v9306_v19  ;;  %v7122_v0 = vsub.s32 3, %v11593_v49  ;;  %v7111_v19 = vrot.slane %v12323_v28, %v11596_v50  ;;  %v7119_v34 = vrot.slane %v12323_v28, %v7118_v2 }
 0xd2a   : > { %7547 = vmatprep.mubr.bf16.mxu0 %v11047_v51  ;;  %7588 = vmatprep.mubr.bf16.mxu1 %v11047_v51  ;;  %v7115_v36 = vrot.slane %v12323_v28, %v7114_v17 }
 0xd2b   : > { %v7123_v37 = vrot.slane %v12323_v28, %v7122_v0 }
 0xd2c   : > { %7530 = vmatpush1.bf16.msra.mxu0 %v9303_v41  ;;  %7571 = vmatpush1.bf16.msra.mxu1 %v9305_v44 }
 0xd2d   : > { %7609 = vmatprep.subr.bf16.mxu0 %v9324_v45  ;;  %7650 = vmatprep.subr.bf16.mxu1 %v9326_v46 }
 0xd2f   : > { %9331 = vmatmul.mubr.msk.bf16.vlgmr.msra.gmra.mxu0 %vm1118_vm0, %v12238_v13  ;;  %9332 = vmatmul.mubr.msk.bf16.vlgmr.msra.gmra.mxu1 %vm1118_vm0, %v12238_v13 }
 0xd30   : > { %7610 = vmatpush1.bf16.msra.mxu0 %v9323_v27  ;;  %7651 = vmatpush1.bf16.msra.mxu1 %v9325_v55  ;;  %v7138_v27 = vsub.s32 7, %v11593_v49 }
 0xd31   : > { %7611 = vmatprep.subr.bf16.mxu0 %v9308_v57  ;;  %7652 = vmatprep.subr.bf16.mxu1 %v9310_v22 }
 0xd32   : > { %7629 = vmatprep.mubr.bf16.mxu0 %v11047_v51  ;;  %7670 = vmatprep.mubr.bf16.mxu1 %v11047_v51  ;;  %v10752_v51 = vld [vmem:[%s12614_s1 + $0x30] sm:$0xff]  }
 0xd34   : > { %7612 = vmatpush1.bf16.msra.mxu0 %v9307_v20  ;;  %7653 = vmatpush1.bf16.msra.mxu1 %v9309_v59 }
 0xd35   : > { %9714 = vmatprep.subr.bf16.mxu0 %v10746_v61  ;;  %9736 = vmatprep.subr.bf16.mxu1 %v10747_v62 }
 0xd37   : > { %9333 = vmatmul.mubr.msk.bf16.vlgmr.msra.gmra.mxu0 %vm1118_vm0, %v12238_v13  ;;  %9334 = vmatmul.mubr.msk.bf16.vlgmr.msra.gmra.mxu1 %vm1118_vm0, %v12238_v13  ;;  %v10769_v13 = vld [vmem:[%s12614_s1 + $0x90] sm:$0xff]  }
 0xd38   : > { %9715 = vmatpush3.bf16.msra.mxu0 %v10748_v30  ;;  %9737 = vmatpush3.bf16.msra.mxu1 %v10749_v63 }
 0xd39   : > { %9716 = vmatprep.subr.bf16.mxu0 %v10750_v1  ;;  %9738 = vmatprep.subr.bf16.mxu1 %v10751_v3  ;;  %v7131_v3 = vrot.slane %v12323_v28, %v7130_v53 }
 0xd3c   : > { %9717 = vmatpush3.bf16.msra.mxu0 %v10752_v51  ;;  %9739 = vmatpush3.bf16.msra.mxu1 %v10753_v15  ;;  %v7139_v51 = vrot.slane %v12323_v28, %v7138_v27  ;;  %v10780_v15 = vld [vmem:[%s12614_s1 + $0x138] sm:$0xff]  }
 0xd3d   : > { %9718 = vmatprep.subr.bf16.mxu0 %v10754_v56  ;;  %9740 = vmatprep.subr.bf16.mxu1 %v10755_v8  ;;  %v10781_v56 = vld [vmem:[%s12614_s1 + $0x1b8] sm:$0xff]  }
 0xd40   : > { %9719 = vmatpush3.bf16.msra.mxu0 %v10756_v9  ;;  %9741 = vmatpush3.bf16.msra.mxu1 %v10757_v60 }
 0xd41   : > { %9720 = vmatprep.subr.bf16.mxu0 %v10758_v7  ;;  %9742 = vmatprep.subr.bf16.mxu1 %v10759_v42  ;;  %v10782_v42 = vld [vmem:[%s12614_s1 + $0x170] sm:$0xff]  }
 0xd44   : > { %9721 = vmatpush3.bf16.msra.mxu0 %v10760_v10  ;;  %9743 = vmatpush3.bf16.msra.mxu1 %v10761_v43  ;;  %v10783_v10 = vld [vmem:[%s12614_s1 + $0x1f0] sm:$0xff]  }
 0xd45   : > { %9722 = vmatprep.subr.bf16.mxu0 %v10762_v4  ;;  %9744 = vmatprep.subr.bf16.mxu1 %v10763_v39 }
 0xd48   : > { %9723 = vmatpush3.bf16.msra.mxu0 %v10764_v54  ;;  %9745 = vmatpush3.bf16.msra.mxu1 %v10765_v48  ;;  %v10784_v48 = vld [vmem:[%s12614_s1 + $0x130] sm:$0xff]  }
 0xd49   : > { %9724 = vmatprep.subr.bf16.mxu0 %v10766_v32  ;;  %9746 = vmatprep.subr.bf16.mxu1 %v10767_v6  ;;  %v10785_v32 = vld [vmem:[%s12614_s1 + $0x1b0] sm:$0xff]  }
 0xd4c   : > { %9725 = vmatpush3.bf16.msra.mxu0 %v10768_v58  ;;  %9747 = vmatpush3.bf16.msra.mxu1 %v10769_v13  ;;  %v10786_v13 = vld [vmem:[%s12614_s1 + $0x168] sm:$0xff]  }
 0xd4d   : > { %9726 = vmatprep.subr.bf16.mxu0 %v10770_v21  ;;  %9748 = vmatprep.subr.bf16.mxu1 %v10771_v40  ;;  %v10787_v21 = vld [vmem:[%s12614_s1 + $0x1e8] sm:$0xff]  }
 0xd50   : > { %9727 = vmatpush3.bf16.msra.mxu0 %v10772_v16  ;;  %9749 = vmatpush3.bf16.msra.mxu1 %v10773_v23 }
 0xd51   : > { %9728 = vmatprep.subr.bf16.mxu0 %v10774_v18  ;;  %9750 = vmatprep.subr.bf16.mxu1 %v10775_v25 }
 0xd54   : > { %9729 = vmatpush3.bf16.msra.mxu0 %v10776_v24  ;;  %9751 = vmatpush3.bf16.msra.mxu1 %v10777_v5  ;;  %v10788_v5 = vld [vmem:[%s12614_s1 + $0x128] sm:$0xff]  }
 0xd55   : > { %9758 = vmatprep.subr.bf16.mxu0 %v10778_v31  ;;  %9780 = vmatprep.subr.bf16.mxu1 %v10779_v29  ;;  %v10789_v31 = vld [vmem:[%s12614_s1 + $0x1a8] sm:$0xff]  }
 0xddf   : > { %v7385_v38 = vpop.f32.mrf.mxu0  ;;  %v7426_v41 = vpop.f32.mrf.mxu1 }
 0xde0   : > { %v7386_v44 = vadd.f32 %v7385_v38, %v7111_v19  ;;  %v7427_v45 = vadd.f32 %v7426_v41, %v7119_v34  ;;  %v10790_v34 = vld [vmem:[%s12614_s1 + $0x160] sm:$0xff]   ;;  %v7126_v41 = vsub.s32 4, %v11593_v49 }
 0xde1   : > { %v7387_v46 = vpop.f32.mrf.mxu0  ;;  %v7428_v47 = vpop.f32.mrf.mxu1 }
 0xde2   : > { %v7388_v35 = vadd.f32 %v7387_v46, %v7115_v36  ;;  %v7429_v33 = vadd.f32 %v7428_v47, %v7123_v37  ;;  %v7679_v55 = vmax.f32 %v7386_v44, 0.0  ;;  %v7681_v57 = vmax.f32 %v7427_v45, 0.0  ;;  %v10791_v36 = vld [vmem:[%s12614_s1 + $0x1e0] sm:$0xff]  }
 0xde3   : > { %v7389_v22 = vpop.f32.mrf.mxu0  ;;  %v7430_v20 = vpop.f32.mrf.mxu1  ;;  %v10792_v44 = vld [vmem:[%s12614_s1 + $0x120] sm:$0xff]  }
 0xde4   : > { %v7680_v59 = vmax.f32 %v7388_v35, 0.0  ;;  %v7682_v61 = vmax.f32 %v7429_v33, 0.0  ;;  %v7695_v8 = vpack.c.bf16 %v7679_v55, %v7679_v55  ;;  %v7697_v9 = vpack.c.bf16 %v7681_v57, %v7681_v57  ;;  %v10793_v45 = vld [vmem:[%s12614_s1 + $0x1a0] sm:$0xff]   ;;  %v10794_v35 = vld [vmem:[%s12614_s1 + $0x158] sm:$0xff]  }
 0xde5   : > { %v7390_v62 = vpop.f32.mrf.mxu0  ;;  %v7431_v30 = vpop.f32.mrf.mxu1  ;;  %v10795_v33 = vld [vmem:[%s12614_s1 + $0x1d8] sm:$0xff]   ;;  %v7159_v55 = vrot.slane %v12314_v26, %v7126_v41 }
 0xde6   : > { %v7696_v63 = vpack.c.bf16 %v7680_v59, %v7680_v59  ;;  %v7698_v1 = vpack.c.bf16 %v7682_v61, %v7682_v61  ;;  %v10796_v20 = vld [vmem:[%s12614_s1 + $0x118] sm:$0xff]   ;;  %v10798_v30 = vld [vmem:[%s12614_s1 + $0x150] sm:$0xff]  }
 0xde7   : > { %v12348_v60 = vpop.f32.mrf.mxu0  ;;  %v12350_v7 = vpop.f32.mrf.mxu1  ;;  %v10797_v59 = vld [vmem:[%s12614_s1 + $0x198] sm:$0xff]  }
 0xde8   : > { %8517 = vmatprep.mubr.bf16.mxu0 %v7696_v63  ;;  %8557 = vmatprep.mubr.bf16.mxu1 %v7698_v1  ;;  %v10799_v63 = vld [vmem:[%s12614_s1 + $0x1d0] sm:$0xff]  }
 0xde9   : > { %v7469_v43 = vpop.f32.mrf.mxu0  ;;  %v7510_v4 = vpop.f32.mrf.mxu1  ;;  %8518 = vmatmul.mubr.bf16.vlgmr.msra.gmra.mxu0 %v7695_v8  ;;  %8558 = vmatmul.mubr.bf16.vlgmr.msra.gmra.mxu1 %v7697_v9  ;;  %v10801_v8 = vld [vmem:[%s12614_s1 + $0x190] sm:$0xff]   ;;  %v7127_v9 = vrot.slane %v12323_v28, %v7126_v41 }
 0xdea   : > { %v7470_v39 = vadd.f32 %v7469_v43, %v7131_v3  ;;  %v7511_v54 = vadd.f32 %v7510_v4, %v7139_v51  ;;  %9759 = vmatpush3.bf16.msra.mxu0 %v10780_v15  ;;  %9781 = vmatpush3.bf16.msra.mxu1 %v10781_v56  ;;  %v10800_v56 = vld [vmem:[%s12614_s1 + $0x110] sm:$0xff]   ;;  %v10803_v4 = vld [vmem:[%s12614_s1 + $0x1c8] sm:$0xff]  }
 0xdeb   : > { %v7471_v6 = vpop.f32.mrf.mxu0  ;;  %v7512_v58 = vpop.f32.mrf.mxu1  ;;  %9760 = vmatprep.subr.bf16.mxu0 %v10782_v42  ;;  %9782 = vmatprep.subr.bf16.mxu1 %v10783_v10  ;;  %v7135_v42 = vrot.slane %v12323_v28, %v7134_v14  ;;  %v10804_v14 = vld [vmem:[%s12614_s1 + $0x108] sm:$0xff]   ;;  %v10815_v41 = vld [vmem:[%s12614_s1 + $0x2f0] sm:$0xff]  }
 0xdec   : > { %v7684_v40 = vmax.f32 %v7470_v39, 0.0  ;;  %v7686_v16 = vmax.f32 %v7511_v54, 0.0  ;;  %v7147_v39 = vrot.slane %v12314_v26, %v7114_v17  ;;  %v7155_v54 = vrot.slane %v12314_v26, %v7122_v0  ;;  %v10805_v28 = vld [vmem:[%s12614_s1 + $0x188] sm:$0xff]   ;;  %v10806_v17 = vld [vmem:[%s12614_s1 + $0x140] sm:$0xff]  }
 0xded   : > { %v7472_v23 = vpop.f32.mrf.mxu0  ;;  %v7513_v18 = vpop.f32.mrf.mxu1  ;;  %v7468_v6 = vadd.f32 %v12348_v60, %v7127_v9  ;;  %v7509_v58 = vadd.f32 %v12350_v7, %v7135_v42  ;;  %v10810_v60 = vld [vmem:[%s12614_s1 + $0x278] sm:$0xff]   ;;  %v10832_v9 = vld [vmem:[%s12614_s1 + $0x210] sm:$0xff]   ;;  %v7143_v42 = vrot.slane %v12314_v26, %v11596_v50  ;;  %v7171_v50 = vrot.slane %v12314_v26, %v7138_v27 }
 0xdee   : > { %v7700_v25 = vpack.c.bf16 %v7684_v40, %v7684_v40  ;;  %v7702_v24 = vpack.c.bf16 %v7686_v16, %v7686_v16  ;;  %9761 = vmatpush3.bf16.msra.mxu0 %v10784_v48  ;;  %9783 = vmatpush3.bf16.msra.mxu1 %v10785_v32  ;;  %v10808_v40 = vld [vmem:[%s12614_s1 + $0x100] sm:$0xff]   ;;  %v10811_v7 = vld [vmem:[%s12614_s1 + $0x2f8] sm:$0xff]  }
 0xdef   : > { %v12360_v29 = vpop.f32.mrf.mxu0  ;;  %v12362_v19 = vpop.f32.mrf.mxu1  ;;  %9762 = vmatprep.subr.bf16.mxu0 %v10786_v13  ;;  %9784 = vmatprep.subr.bf16.mxu1 %v10787_v21  ;;  %v10807_v13 = vld [vmem:[%s12614_s1 + $0x1c0] sm:$0xff]   ;;  %v7683_v23 = vmax.f32 %v7468_v6, 0.0  ;;  %v7685_v18 = vmax.f32 %v7509_v58, 0.0  ;;  %v10842_v6 = vld [vmem:[%s12614_s1 + $0x378] sm:$0xff]  }
 0xdf0   : > { %8597 = vmatprep.mubr.bf16.mxu0 %v7700_v25  ;;  %8637 = vmatprep.mubr.bf16.mxu1 %v7702_v24  ;;  %v10809_v16 = vld [vmem:[%s12614_s1 + $0x180] sm:$0xff]  }
 0xdf1   : > { %v7551_v37 = vpop.f32.mrf.mxu0  ;;  %v7592_v38 = vpop.f32.mrf.mxu1 }
 0xdf2   : > { %9763 = vmatpush3.bf16.msra.mxu0 %v10788_v5  ;;  %9785 = vmatpush3.bf16.msra.mxu1 %v10789_v31  ;;  %v7552_v21 = vadd.f32 %v7551_v37, %v7147_v39  ;;  %v7593_v0 = vadd.f32 %v7592_v38, %v7155_v54  ;;  %v10812_v5 = vld [vmem:[%s12614_s1 + $0x238] sm:$0xff]   ;;  %v7699_v31 = vpack.c.bf16 %v7683_v23, %v7683_v23  ;;  %v10814_v38 = vld [vmem:[%s12614_s1 + $0x270] sm:$0xff]   ;;  %v10836_v54 = vld [vmem:[%s12614_s1 + $0x208] sm:$0xff]  }
 0xdf3   : > { %v7553_v46 = vpop.f32.mrf.mxu0  ;;  %v7594_v47 = vpop.f32.mrf.mxu1  ;;  %9764 = vmatprep.subr.bf16.mxu0 %v10790_v34  ;;  %9786 = vmatprep.subr.bf16.mxu1 %v10791_v36  ;;  %v7701_v34 = vpack.c.bf16 %v7685_v18, %v7685_v18  ;;  %v10813_v36 = vld [vmem:[%s12614_s1 + $0x2b8] sm:$0xff]   ;;  %v7163_v39 = vrot.slane %v12314_v26, %v7130_v53  ;;  %v10840_v53 = vld [vmem:[%s12614_s1 + $0x200] sm:$0xff]   ;;  %v10847_v23 = vld [vmem:[%s12614_s1 + $0x3f0] sm:$0xff]  }
 0xdf4   : > { %v7688_v25 = vmax.f32 %v7552_v21, 0.0  ;;  %v7690_v24 = vmax.f32 %v7593_v0, 0.0  ;;  %v10817_v46 = vld [vmem:[%s12614_s1 + $0x2b0] sm:$0xff]   ;;  %v10818_v47 = vld [vmem:[%s12614_s1 + $0x268] sm:$0xff]  }
 0xdf5   : > { %v7554_v57 = vpop.f32.mrf.mxu0  ;;  %v7595_v22 = vpop.f32.mrf.mxu1 }
 0xdf6   : > { %9765 = vmatpush3.bf16.msra.mxu0 %v10792_v44  ;;  %9787 = vmatpush3.bf16.msra.mxu1 %v10793_v45  ;;  %v7704_v37 = vpack.c.bf16 %v7688_v25, %v7688_v25  ;;  %v7706_v44 = vpack.c.bf16 %v7690_v24, %v7690_v24  ;;  %v10816_v45 = vld [vmem:[%s12614_s1 + $0x230] sm:$0xff]   ;;  %v10822_v57 = vld [vmem:[%s12614_s1 + $0x260] sm:$0xff]   ;;  %v10850_v25 = vld [vmem:[%s12614_s1 + $0x368] sm:$0xff]  }
 0xdf7   : > { %v7631_v61 = vpop.f32.mrf.mxu0  ;;  %v7672_v62 = vpop.f32.mrf.mxu1  ;;  %9766 = vmatprep.subr.bf16.mxu0 %v10794_v35  ;;  %9788 = vmatprep.subr.bf16.mxu1 %v10795_v33  ;;  %v10819_v35 = vld [vmem:[%s12614_s1 + $0x2e8] sm:$0xff]   ;;  %v10823_v22 = vld [vmem:[%s12614_s1 + $0x2e0] sm:$0xff]  }
 0xdf8   : > { %v12376_v1 = vadd.f32 %v7631_v61, %v7159_v55  ;;  %v12379_v3 = vadd.f32 %v7672_v62, %v12319_v52  ;;  %v10802_v52 = vld [vmem:[%s12614_s1 + $0x148] sm:$0xff]   ;;  %v10826_v61 = vld [vmem:[%s12614_s1 + $0x258] sm:$0xff]  }
 0xdf9   : > { %v12381_v51 = vpop.f32.mrf.mxu0  ;;  %v12383_v15 = vpop.f32.mrf.mxu1  ;;  %v10820_v33 = vld [vmem:[%s12614_s1 + $0x228] sm:$0xff]   ;;  %v10827_v62 = vld [vmem:[%s12614_s1 + $0x2d8] sm:$0xff]  }
 0xdfa   : > { %9767 = vmatpush3.bf16.msra.mxu0 %v10796_v20  ;;  %9789 = vmatpush3.bf16.msra.mxu1 %v10797_v59  ;;  %v10821_v55 = vld [vmem:[%s12614_s1 + $0x2a8] sm:$0xff]   ;;  %v10824_v20 = vld [vmem:[%s12614_s1 + $0x220] sm:$0xff]   ;;  %v7634_v49 = vadd.f32 %v12381_v51, %v7163_v39  ;;  %v10844_v51 = vld [vmem:[%s12614_s1 + $0x338] sm:$0xff]  }
 0xdfb   : > { %v7635_v10 = vpop.f32.mrf.mxu0  ;;  %v7676_v43 = vpop.f32.mrf.mxu1  ;;  %9768 = vmatprep.subr.bf16.mxu0 %v10798_v30  ;;  %9790 = vmatprep.subr.bf16.mxu1 %v10799_v63  ;;  %v10825_v59 = vld [vmem:[%s12614_s1 + $0x2a0] sm:$0xff]   ;;  %v10828_v30 = vld [vmem:[%s12614_s1 + $0x218] sm:$0xff]   ;;  %v10851_v24 = vld [vmem:[%s12614_s1 + $0x3e8] sm:$0xff]  }
 0xdfc   : > { %v10829_v63 = vld [vmem:[%s12614_s1 + $0x298] sm:$0xff]   ;;  %v10833_v10 = vld [vmem:[%s12614_s1 + $0x290] sm:$0xff]   ;;  %v10834_v43 = vld [vmem:[%s12614_s1 + $0x248] sm:$0xff]  }
 0xdfd   : > { %v7636_v48 = vpop.f32.mrf.mxu0  ;;  %v7677_v32 = vpop.f32.mrf.mxu1 }
 0xdfe   : > { %9769 = vmatpush3.bf16.msra.mxu0 %v10800_v56  ;;  %9791 = vmatpush3.bf16.msra.mxu1 %v10801_v8  ;;  %v10830_v56 = vld [vmem:[%s12614_s1 + $0x250] sm:$0xff]   ;;  %v7550_v48 = vadd.f32 %v12360_v29, %v7143_v42  ;;  %v10838_v32 = vld [vmem:[%s12614_s1 + $0x240] sm:$0xff]  }
 0xdff   : > { %9770 = vmatprep.subr.bf16.mxu0 %v10802_v52  ;;  %9792 = vmatprep.subr.bf16.mxu1 %v10803_v4  ;;  %v10831_v8 = vld [vmem:[%s12614_s1 + $0x2d0] sm:$0xff]   ;;  %v7151_v52 = vrot.slane %v12314_v26, %v7118_v2  ;;  %v10835_v4 = vld [vmem:[%s12614_s1 + $0x2c8] sm:$0xff]   ;;  %v7675_v26 = vadd.f32 %v12383_v15, %v7171_v50  ;;  %v10841_v29 = vld [vmem:[%s12614_s1 + $0x280] sm:$0xff]  }
 0xe00   : > { %v10837_v2 = vld [vmem:[%s12614_s1 + $0x288] sm:$0xff]   ;;  %v7687_v27 = vmax.f32 %v7550_v48, 0.0  ;;  %v10845_v15 = vld [vmem:[%s12614_s1 + $0x3b8] sm:$0xff]  }
 0xe02   : > { %9771 = vmatpush3.bf16.msra.mxu0 %v10804_v14  ;;  %9793 = vmatpush3.bf16.msra.mxu1 %v10805_v28  ;;  %v7591_v14 = vadd.f32 %v12362_v19, %v7151_v52  ;;  %v10839_v28 = vld [vmem:[%s12614_s1 + $0x2c0] sm:$0xff]   ;;  %v10843_v19 = vld [vmem:[%s12614_s1 + $0x3f8] sm:$0xff]   ;;  %v7703_v21 = vpack.c.bf16 %v7687_v27, %v7687_v27 }
 0xe03   : > { %9772 = vmatprep.subr.bf16.mxu0 %v10806_v17  ;;  %9794 = vmatprep.subr.bf16.mxu1 %v10807_v13  ;;  %v7692_v17 = vmax.f32 %v7634_v49, 0.0  ;;  %v7694_v13 = vmax.f32 %v7675_v26, 0.0 }
 0xe04   : > { %v7689_v58 = vmax.f32 %v7591_v14, 0.0 }
 0xe05   : > { %v7710_v18 = vpack.c.bf16 %v7694_v13, %v7694_v13 }
 0xe06   : > { %9773 = vmatpush3.bf16.msra.mxu0 %v10808_v40  ;;  %9795 = vmatpush3.bf16.msra.mxu1 %v10809_v16  ;;  %v7705_v0 = vpack.c.bf16 %v7689_v58, %v7689_v58  ;;  %v10846_v40 = vld [vmem:[%s12614_s1 + $0x370] sm:$0xff]   ;;  %v7708_v16 = vpack.c.bf16 %v7692_v17, %v7692_v17 }
 0xe07   : > { %9802 = vmatprep.subr.bf16.mxu0 %v10810_v60  ;;  %9824 = vmatprep.subr.bf16.mxu1 %v10811_v7  ;;  %v10848_v60 = vld [vmem:[%s12614_s1 + $0x330] sm:$0xff]  }
 0xe08   : > { %v10849_v7 = vld [vmem:[%s12614_s1 + $0x3b0] sm:$0xff]  }
 0xe09   : > { %8598 = vmatmul.mubr.bf16.vlgmr.msra.gmra.mxu0 %v7699_v31  ;;  %8638 = vmatmul.mubr.bf16.vlgmr.msra.gmra.mxu1 %v7701_v34  ;;  %v10853_v31 = vld [vmem:[%s12614_s1 + $0x3a8] sm:$0xff]   ;;  %v10854_v34 = vld [vmem:[%s12614_s1 + $0x360] sm:$0xff]  }
 0xe0a   : > { %9803 = vmatpush3.bf16.msra.mxu0 %v10812_v5  ;;  %8677 = vmatprep.mubr.bf16.mxu0 %v7704_v37  ;;  %v10852_v5 = vld [vmem:[%s12614_s1 + $0x328] sm:$0xff]   ;;  %v10856_v37 = vld [vmem:[%s12614_s1 + $0x320] sm:$0xff]  }
 0xe0b   : > { %9825 = vmatpush3.bf16.msra.mxu1 %v10813_v36  ;;  %8717 = vmatprep.mubr.bf16.mxu1 %v7706_v44  ;;  %v10855_v36 = vld [vmem:[%s12614_s1 + $0x3e0] sm:$0xff]   ;;  %v10859_v44 = vld [vmem:[%s12614_s1 + $0x3d8] sm:$0xff]  }
 0xe0c   : > { %9804 = vmatprep.subr.bf16.mxu0 %v10814_v38  ;;  %9826 = vmatprep.subr.bf16.mxu1 %v10815_v41  ;;  %v10857_v38 = vld [vmem:[%s12614_s1 + $0x3a0] sm:$0xff]   ;;  %v10858_v41 = vld [vmem:[%s12614_s1 + $0x358] sm:$0xff]  }
 0xe0e   : > { %9805 = vmatpush3.bf16.msra.mxu0 %v10816_v45  ;;  %v10860_v45 = vld [vmem:[%s12614_s1 + $0x318] sm:$0xff]  }
 0xe0f   : > { %9827 = vmatpush3.bf16.msra.mxu1 %v10817_v46  ;;  %9806 = vmatprep.subr.bf16.mxu0 %v10818_v47  ;;  %v10861_v46 = vld [vmem:[%s12614_s1 + $0x398] sm:$0xff]   ;;  %v10862_v47 = vld [vmem:[%s12614_s1 + $0x350] sm:$0xff]  }
 0xe10   : > { %9828 = vmatprep.subr.bf16.mxu1 %v10819_v35  ;;  %v10863_v35 = vld [vmem:[%s12614_s1 + $0x3d0] sm:$0xff]  }
 0xe12   : > { %9807 = vmatpush3.bf16.msra.mxu0 %v10820_v33  ;;  %v10864_v33 = vld [vmem:[%s12614_s1 + $0x310] sm:$0xff]  }
 0xe13   : > { %9829 = vmatpush3.bf16.msra.mxu1 %v10821_v55  ;;  %9808 = vmatprep.subr.bf16.mxu0 %v10822_v57  ;;  %v10865_v55 = vld [vmem:[%s12614_s1 + $0x390] sm:$0xff]   ;;  %v10866_v57 = vld [vmem:[%s12614_s1 + $0x348] sm:$0xff]  }
 0xe14   : > { %9830 = vmatprep.subr.bf16.mxu1 %v10823_v22  ;;  %v10867_v22 = vld [vmem:[%s12614_s1 + $0x3c8] sm:$0xff]  }
 0xe16   : > { %9809 = vmatpush3.bf16.msra.mxu0 %v10824_v20  ;;  %v10868_v20 = vld [vmem:[%s12614_s1 + $0x308] sm:$0xff]  }
 0xe17   : > { %9831 = vmatpush3.bf16.msra.mxu1 %v10825_v59  ;;  %9810 = vmatprep.subr.bf16.mxu0 %v10826_v61  ;;  %v10869_v59 = vld [vmem:[%s12614_s1 + $0x388] sm:$0xff]   ;;  %v10870_v61 = vld [vmem:[%s12614_s1 + $0x340] sm:$0xff]  }
 0xe18   : > { %9832 = vmatprep.subr.bf16.mxu1 %v10827_v62  ;;  %v10871_v62 = vld [vmem:[%s12614_s1 + $0x3c0] sm:$0xff]  }
 0xe1a   : > { %9811 = vmatpush3.bf16.msra.mxu0 %v10828_v30  ;;  %v10872_v30 = vld [vmem:[%s12614_s1 + $0x300] sm:$0xff]  }
 0xe1b   : > { %9833 = vmatpush3.bf16.msra.mxu1 %v10829_v63  ;;  %9812 = vmatprep.subr.bf16.mxu0 %v10830_v56  ;;  %v7691_v63 = vmax.f32 %v12376_v1, 0.0  ;;  %v10873_v56 = vld [vmem:[%s12614_s1 + $0x380] sm:$0xff]   ;;  %s1094_s1 = sand.u32 1, %s11000_s23  }
 0xe1c   : > { %9834 = vmatprep.subr.bf16.mxu1 %v10831_v8  ;;  %v7693_v8 = vmax.f32 %v12379_v3, 0.0  ;;  %s9044_s4 = sshll.u32 %s1094_s1, 3 }
 0xe1d   : > { %s1096_s6 = scalar_lea.vmem [#allocation2], %s9044_s4  ;;  %s10952_s4 = sshll.u32 %s11048_s0, 4  ;;  %s10953_s4 = int_to_ptr.vmem [resolvable:$false] %s10952_s4 }
 0xe1e   : > { %9813 = vmatpush3.bf16.msra.mxu0 %v10832_v9  ;;  %v7707_v9 = vpack.c.bf16 %v7691_v63, %v7691_v63  ;;  %v7709_v42 = vpack.c.bf16 %v7693_v8, %v7693_v8  ;;  %v10875_v63 = vld [vmem:[%s11222_s20] sm:$0xff]   ;;  %s8916_s7 = sshll.u32 %s1096_s6, 4  ;;  %s10954_s10 = scalar_lea.vmem %s10953_s4, 256  ;;  %s12507_s7 = int_to_ptr.vmem [resolvable:$true] %s8916_s7 }
 0xe1f   : > { %9835 = vmatpush3.bf16.msra.mxu1 %v10833_v10  ;;  %9814 = vmatprep.subr.bf16.mxu0 %v10834_v43  ;;  %v9335_v43 = vld [vmem:[%s12616_s3] ss:$0 sm:$0xff]  ;;  %s12617_s3 = sld [smem:[#allocation28_spill]]  ;;  %s10948_s9 = scalar_lea.vmem %s12507_s7, 128 }
 0xe20   : > { %9836 = vmatprep.subr.bf16.mxu1 %v10835_v4  ;;  %p10949_p11 = scmp.ne.s32.totalorder %s12507_s7, %s10948_s9  ;;  %p10955_p0 = scmp.lt.s32.totalorder %s12507_s7, %s10953_s4 }
 0xe21   : > { %p10956_p1 = scmp.lt.s32.totalorder %s10954_s10, %s10948_s9 }
 0xe22   : > { %9815 = vmatpush3.bf16.msra.mxu0 %v10836_v54  ;;  %p10950_p12 = pnand %p10949_p11, %p11272_p5 }
 0xe23   : > { %9837 = vmatpush3.bf16.msra.mxu1 %v10837_v2  ;;  %9816 = vmatprep.subr.bf16.mxu0 %v10838_v32  ;;  %p10957_p2 = por %p10956_p1, %p10955_p0 }
 0xe24   : > { %9838 = vmatprep.subr.bf16.mxu1 %v10839_v28  ;;  %p10951_p13 = pneg %p10950_p12 }
 0xe26   : > { %9817 = vmatpush3.bf16.msra.mxu0 %v10840_v53  ;;  %p10958_p3 = pnand %p10957_p2, %p10951_p13 }
 0xe27   : > { %9839 = vmatpush3.bf16.msra.mxu1 %v10841_v29  ;;  %9846 = vmatprep.subr.bf16.mxu0 %v10842_v6 }
 0xe28   : > { %9868 = vmatprep.subr.bf16.mxu1 %v10843_v19 }
 0xe29   : > { %8678 = vmatmul.mubr.bf16.vlgmr.msra.gmra.mxu0 %v7703_v21 }
 0xe2a   : > { %8718 = vmatmul.mubr.bf16.vlgmr.msra.gmra.mxu1 %v7705_v0  ;;  %9847 = vmatpush3.bf16.msra.mxu0 %v10844_v51 }
 0xe2b   : > { %8757 = vmatprep.mubr.bf16.mxu0 %v7708_v16  ;;  %9869 = vmatpush3.bf16.msra.mxu1 %v10845_v15 }
 0xe2c   : > { %8797 = vmatprep.mubr.bf16.mxu1 %v7710_v18  ;;  %9848 = vmatprep.subr.bf16.mxu0 %v10846_v40 }
 0xe2d   : > { %9870 = vmatprep.subr.bf16.mxu1 %v10847_v23 }
 0xe2e   : > { %9849 = vmatpush3.bf16.msra.mxu0 %v10848_v60 }
 0xe2f   : > { %9871 = vmatpush3.bf16.msra.mxu1 %v10849_v7  ;;  %9850 = vmatprep.subr.bf16.mxu0 %v10850_v25 }
 0xe30   : > { %9872 = vmatprep.subr.bf16.mxu1 %v10851_v24 }
 0xe32   : > { %9851 = vmatpush3.bf16.msra.mxu0 %v10852_v5 }
 0xe33   : > { %9873 = vmatpush3.bf16.msra.mxu1 %v10853_v31  ;;  %9852 = vmatprep.subr.bf16.mxu0 %v10854_v34 }
 0xe34   : > { %9874 = vmatprep.subr.bf16.mxu1 %v10855_v36 }
 0xe36   : > { %9853 = vmatpush3.bf16.msra.mxu0 %v10856_v37 }
 0xe37   : > { %9875 = vmatpush3.bf16.msra.mxu1 %v10857_v38  ;;  %9854 = vmatprep.subr.bf16.mxu0 %v10858_v41 }
 0xe38   : > { %9876 = vmatprep.subr.bf16.mxu1 %v10859_v44 }
 0xe3a   : > { %9855 = vmatpush3.bf16.msra.mxu0 %v10860_v45 }
 0xe3b   : > { %9877 = vmatpush3.bf16.msra.mxu1 %v10861_v46  ;;  %9856 = vmatprep.subr.bf16.mxu0 %v10862_v47 }
 0xe3c   : > { %9878 = vmatprep.subr.bf16.mxu1 %v10863_v35 }
 0xe3e   : > { %9857 = vmatpush3.bf16.msra.mxu0 %v10864_v33 }
 0xe3f   : > { %9879 = vmatpush3.bf16.msra.mxu1 %v10865_v55  ;;  %9858 = vmatprep.subr.bf16.mxu0 %v10866_v57 }
 0xe40   : > { %9880 = vmatprep.subr.bf16.mxu1 %v10867_v22 }
 0xe42   : > { %9859 = vmatpush3.bf16.msra.mxu0 %v10868_v20 }
 0xe43   : > { %9881 = vmatpush3.bf16.msra.mxu1 %v10869_v59  ;;  %9860 = vmatprep.subr.bf16.mxu0 %v10870_v61 }
 0xe44   : > { %9882 = vmatprep.subr.bf16.mxu1 %v10871_v62 }
 0xe46   : > { %9861 = vmatpush3.bf16.msra.mxu0 %v10872_v30  ;;  %v10874_v30 = vld [vmem:[%s11222_s20 + $0x8] sm:$0xff]  }
 0xe47   : > { %9883 = vmatpush3.bf16.msra.mxu1 %v10873_v56  ;;  %10565 = vmatprep.subr.bf16.mxu0 %v11045_v12 }
 0xe49   : > { %8758 = vmatmul.mubr.bf16.vlgmr.msra.gmra.mxu0 %v7707_v9 }
 0xe4a   : > { %8798 = vmatmul.mubr.bf16.vlgmr.msra.gmra.mxu1 %v7709_v42  ;;  %10569 = vmatprep.mubr.msk.bf16.mxu0 %vm11046_vm1, %v11045_v12  ;;  %v9464_v42 = vld [vmem:[%s12617_s3] ss:$0 sm:$0xff]  ;;  %s8903_s3 = scalar_lea.sflag [#allocation3], %s1094_s1 }
 0xe4b   : > { %10566 = vmatpush3.bf16.msra.mxu0 %v10874_v30 }
 0xe4c   : > { %10567 = vmatprep.subr.bf16.mxu0 %v11045_v12  ;;  %v9466_v12 = vld [vmem:[%s11227_s29] ss:$0 sm:$0xff] }
 0xe4f   : > { %10568 = vmatpush3.bf16.msra.mxu0 %v10875_v63 }
 0xea9   : > { %v9730_v10 = vpop.f32.mrf.mxu0  ;;  %v9752_v1 = vpop.f32.mrf.mxu1 }
 0xeab   : > { %v9731_v52 = vpop.f32.mrf.mxu0  ;;  %v9753_v4 = vpop.f32.mrf.mxu1 }
 0xeac   : > { %v9732_v39 = vadd.f32 %v9731_v52, %v9730_v10  ;;  %v9754_v50 = vadd.f32 %v9753_v4, %v9752_v1  ;;  %v9465_v1 = vld [vmem:[%s11217_s27] ss:$0 sm:$0xff] }
 0xead   : > { %v9733_v3 = vpop.f32.mrf.mxu0  ;;  %v9755_v54 = vpop.f32.mrf.mxu1 }
 0xeae   : > { %v8520_v48 = vadd.f32 %v9732_v39, %v9335_v43 }
 0xeaf   : > { %v9734_v2 = vpop.f32.mrf.mxu0  ;;  %v9756_v32 = vpop.f32.mrf.mxu1 }
 0xeb0   : > { %v8560_v14 = vadd.f32 %v9754_v50, %v8520_v48 }
 0xec9   : > { %v9774_v28 = vpop.f32.mrf.mxu0  ;;  %v9796_v49 = vpop.f32.mrf.mxu1 }
 0xecb   : > { %v9775_v26 = vpop.f32.mrf.mxu0  ;;  %v9797_v53 = vpop.f32.mrf.mxu1 }
 0xecc   : > { %v9776_v16 = vadd.f32 %v9775_v26, %v9774_v28  ;;  %v9798_v18 = vadd.f32 %v9797_v53, %v9796_v49 }
 0xecd   : > { %v9777_v27 = vpop.f32.mrf.mxu0  ;;  %v9799_v29 = vpop.f32.mrf.mxu1 }
 0xece   : > { %v8600_v23 = vadd.f32 %v9776_v16, %v8560_v14 }
 0xecf   : > { %v9778_v6 = vpop.f32.mrf.mxu0  ;;  %v9800_v58 = vpop.f32.mrf.mxu1 }
 0xed0   : > { %v8640_v7 = vadd.f32 %v9798_v18, %v8600_v23 }
 0xee9   : > { %v9818_v19 = vpop.f32.mrf.mxu0 }
 0xeea   : > { %v9840_v17 = vpop.f32.mrf.mxu1 }
 0xeeb   : > { %v9819_v13 = vpop.f32.mrf.mxu0 }
 0xeec   : > { %v9841_v51 = vpop.f32.mrf.mxu1  ;;  %v9820_v60 = vadd.f32 %v9819_v13, %v9818_v19 }
 0xeed   : > { %v9821_v21 = vpop.f32.mrf.mxu0  ;;  %v9842_v5 = vadd.f32 %v9841_v51, %v9840_v17 }
 0xeee   : > { %v9843_v15 = vpop.f32.mrf.mxu1  ;;  %v8680_v25 = vadd.f32 %v9820_v60, %v8640_v7 }
 0xeef   : > { %v9822_v0 = vpop.f32.mrf.mxu0 }
 0xef0   : > { %v9844_v40 = vpop.f32.mrf.mxu1  ;;  %v8720_v36 = vadd.f32 %v9842_v5, %v8680_v25 }
 0xf09   : > { %v9862_v24 = vpop.f32.mrf.mxu0 }
 0xf0a   : > { %v9884_v31 = vpop.f32.mrf.mxu1 }
 0xf0b   : > { %v9863_v34 = vpop.f32.mrf.mxu0 }
 0xf0c   : > { %v9864_v37 = vadd.f32 %v9863_v34, %v9862_v24  ;;  %v9885_v38 = vpop.f32.mrf.mxu1 }
 0xf0d   : > { %v9865_v41 = vpop.f32.mrf.mxu0  ;;  %v9886_v45 = vadd.f32 %v9885_v38, %v9884_v31 }
 0xf0e   : > { %v8760_v44 = vadd.f32 %v9864_v37, %v8720_v36  ;;  %v9887_v46 = vpop.f32.mrf.mxu1 }
 0xf0f   : > { %v9866_v47 = vpop.f32.mrf.mxu0 }
 0xf10   : > { %v8800_v35 = vadd.f32 %v9886_v45, %v8760_v44  ;;  %v9888_v33 = vpop.f32.mrf.mxu1 }
 0xf12   : > { %v8805_v55 = vadd.f32 %v8800_v35, %v12234_v11 }
 0xf14   : > { %v8806_v57 = vsel %vm1118_vm0, %v8805_v55, 0.0 }
 0xf15   : > { %8807 = vadd.xlane.f32.xlu0 %v8806_v57 }
 0xf9e   : > { %v8808_v22 = vpop.xlane.xlu0 %8807 }
 0xf9f   : > { %v8809_v20 = vmul.f32 0.03125, %v8808_v22 }
 0xfa1   : > { %v8810_v59 = vsub.f32 %v8805_v55, %v8809_v20 }
 0xfa3   : > { %v8811_v61 = vmul.f32 %v8810_v59, %v8810_v59 }
 0xfa5   : > { %v8812_v62 = vsel %vm1118_vm0, %v8811_v61, 0.0 }
 0xfa6   : > { %8813 = vadd.xlane.f32.xlu1 %v8812_v62 }
0x102f   : > { %v8814_v11 = vpop.xlane.xlu1 %8813 }
0x1030   : > { %v8815_v56 = vmul.f32 0.03125, %v8814_v11 }
0x1032   : > { %v8816_v8 = vadd.f32 1e-05, %v8815_v56 }
0x1034   : > { %10946 = vrsqrt.f32 %v8816_v8 }
0x1041   : > { %v10947_v9 = vpop.eup %10946 }
0x1042   : > { %v8818_v10 = vmul.f32 %v10947_v9, %v8810_v59 }
0x1044   : > { %v8825_v43 = vmul.f32 %v9464_v42, %v8818_v10 }
0x1046   : > { %v8832_v52 = vadd.f32 %v9465_v1, %v8825_v43 }
0x1048   : > { %v8833_v4 = vpack.c.bf16 %v8832_v52, %v8832_v52 }
0x104a   : > { %10570 = vmatmul.mubr.msk.bf16.vlgmr.msra.gmra.mxu0 %vm1118_vm0, %v8833_v4 }
0x110a   : > { %v8894_v39 = vpop.f32.mrf.mxu0 }
0x110b   : > { %v8895_v50 = vadd.f32 %v9466_v12, %v8894_v39 }
0x110c   : > { %v10571_v3 = vpop.f32.mrf.mxu0 }
0x110d   : > { %8901 = vst.msk [vmem:[%s1096_s6] sm:$0xff] %vm8900_vm10, %v8895_v50 }
0x110e   : > { %v8897_v54 = vpop.f32.mrf.mxu0 }
0x110f   : > { %10961 = shalt.err (!%p10958_p3)
}
0x1110   : > { %s10962_s5 = scalar_lea.hbm %s12505_s8, 128  ;;  %s10966_s6 = scalar_lea.hbm %s11232_s21, 256 }
0x1111   : > { %p10963_p4 = scmp.ne.s32.totalorder %s12505_s8, %s10962_s5  ;;  %p10967_p9 = scmp.lt.s32.totalorder %s12505_s8, %s11232_s21 }
0x1112   : > { %p10968_p10 = scmp.lt.s32.totalorder %s10966_s6, %s10962_s5 }
0x1113   : > { %p10964_p7 = pnand %p10963_p4, %p11272_p5 }
0x1114   : > { %p10969_p11 = por %p10968_p10, %p10967_p9 }
0x1115   : > { %p10965_p8 = pneg %p10964_p7 }
0x1117   : > { %p10970_p12 = pnand %p10969_p11, %p10965_p8 }
0x1119   : > { %10973 = shalt.err (!%p10970_p12)
}
0x111a   : > { %10573 = dma.vmem_to_hbm [thread:$0]  (%p11272_p5), %s12507_s7, 128, %s12505_s8, %s8903_s3   ;;  %v10572_v48 = vpop.f32.mrf.mxu0 }
0x111b PF: > { %p10579_p13 = scmp.ge.s32.totalorder %s11008_s28, 2  ;;  %s8928_s9 = sand.u32 1, %s10996_s22  }
0x111c   : > { %s8929_s10 = scalar_lea.sflag [#allocation3], %s8928_s9 }
0x111d   : > { %p10576_p0 = pnand %p10579_p13, %p11276_p6 }
0x111f   : > { %p10577_p1 = pneg %p10576_p0 }
0x1121   : > { %10991 = dma.done.wait (%p10577_p1), %s8929_s10, 128  }
0x1122   : > { %10993 = vsyncadd (%p10577_p1), %s8929_s10, 4294967168  ;;  %p81_p2 = scmp.ge.s32.totalorder %s11259_s2, 4   ;;  %s12618_s22 = smov %s11000_s23 }
0x1123   : > { %s12619_s23 = smov %s11004_s26  ;;  %s12620_s26 = smov %s11270_s11 }
0x1124   : > { %s12621_s28 = smov %s11259_s2  ;;  %83 = sbr.rel (!%p81_p2) target bundleno = 67 (0x43), region = 239 }
0x1129   :  { %8934 = vsyncpa [#allocation3], 1 }
0x112a   :  { %8936 = vsyncpa [#allocation3 + $0x1], 1 }

</bundles_post_ra>
